<compile_context>
chip_gen: v6e
topology: v6e:2x2x1
jax: 0.10.0
libtpu: 0.0.40
codegen_flags: <defaults>
</compile_context>

<pallas_src>
import functools

import jax
import jax.numpy as jnp
from jax.experimental import pallas as pl
from jax.experimental.pallas import tpu as pltpu

LANE = 128  # TPU lane width; output-channel axes are padded to this once at init.


# ----------------------------------------------------------------------------
# Pallas kernel: (tm, K) x (K, tn) full-K matmul + bias + optional ReLU
# ----------------------------------------------------------------------------
def _matmul_bias_act_kernel(a_ref, b_ref, bias_ref, o_ref, *, apply_relu):
    acc = jnp.dot(a_ref[...], b_ref[...], preferred_element_type=jnp.float32)
    r = acc + bias_ref[...]
    if apply_relu:
        r = jnp.maximum(r, 0.0)
    o_ref[...] = r.astype(o_ref.dtype)


def _choose_tm(m, cap=512):
    """Smallest 8-aligned tile covering m, or an 8-aligned divisor <= cap."""
    mp = ((m + 7) // 8) * 8
    if mp <= cap:
        return mp
    for t in range(cap, 7, -8):
        if mp % t == 0:
            return t
    return cap


def matmul_bias_act(a, b, bias, *, relu, tn, n_out, tm=None):
    """out = a @ b + bias (optional ReLU).

    a:    (M, K)  activations (cast to bf16 here; M padded to a tm multiple).
    b:    (K, Np) bf16 weight — pre-permuted / transposed / padded at init.
    bias: (1, Np) f32 — pre-padded at init.
    Returns f32 (M, n_out).
    """
    M, K = a.shape
    Kb, Np = b.shape
    assert K == Kb and Np % tn == 0
    if tm is None:
        tm = _choose_tm(M)

    Mp = ((M + tm - 1) // tm) * tm
    a = a.astype(jnp.bfloat16)
    if Mp != M:
        a = jnp.pad(a, ((0, Mp - M), (0, 0)))

    out = pl.pallas_call(
        functools.partial(_matmul_bias_act_kernel, apply_relu=relu),
        out_shape=jax.ShapeDtypeStruct((Mp, Np), jnp.float32),
        grid_spec=pltpu.PrefetchScalarGridSpec(
            num_scalar_prefetch=0,
            grid=(Mp // tm, Np // tn),
            in_specs=[
                pl.BlockSpec((tm, K), lambda i, j: (i, 0)),   # full-K A tile
                pl.BlockSpec((K, tn), lambda i, j: (0, j)),   # full-K B tile
                pl.BlockSpec((1, tn), lambda i, j: (0, j)),   # bias row
            ],
            out_specs=pl.BlockSpec((tm, tn), lambda i, j: (i, j)),
        ),
        compiler_params=pltpu.CompilerParams(
            dimension_semantics=("parallel", "parallel"),
        ),
    )(a, b, bias)
    return out[:M, :n_out]


# ----------------------------------------------------------------------------
# Conv-as-im2col glue (plain JAX slicing, channels-last so no relayouts)
# ----------------------------------------------------------------------------
def im2col_nhwc(x, kh, kw, stride):
    """x: (N, H, W, C) -> patches (N*OH*OW, kh*kw*C), feature order (kh, kw, C)."""
    N, H, W, C = x.shape
    OH = (H - kh) // stride + 1
    OW = (W - kw) // stride + 1
    cols = []
    for i in range(kh):
        for j in range(kw):
            cols.append(
                x[:, i : i + stride * OH : stride, j : j + stride * OW : stride, :]
            )
    patches = jnp.concatenate(cols, axis=-1)            # (N, OH, OW, kh*kw*C)
    return patches.reshape(N * OH * OW, kh * kw * C), OH, OW


def conv2d_relu(x, w2d, bias, *, cout, kh, kw, stride):
    """NHWC conv + ReLU via the Pallas matmul kernel; returns NHWC."""
    N = x.shape[0]
    patches, OH, OW = im2col_nhwc(x, kh, kw, stride)
    out = matmul_bias_act(patches, w2d, bias, relu=True, tn=LANE, n_out=cout)
    return out.reshape(N, OH, OW, cout)


# ----------------------------------------------------------------------------
# Parameters: raw (PyTorch layout) + one-time kernel-friendly preprocessing
# ----------------------------------------------------------------------------
def init_params(key, channels_in, num_actions):
    """Raw parameters, same layout the PyTorch module would hold."""
    ks = jax.random.split(key, 10)
    return {
        "w1": 0.05 * jax.random.normal(ks[0], (32, channels_in, 8, 8), jnp.float32),
        "b1": 0.05 * jax.random.normal(ks[1], (32,), jnp.float32),
        "w2": 0.05 * jax.random.normal(ks[2], (64, 32, 4, 4), jnp.float32),
        "b2": 0.05 * jax.random.normal(ks[3], (64,), jnp.float32),
        "w3": 0.05 * jax.random.normal(ks[4], (64, 64, 3, 3), jnp.float32),
        "b3": 0.05 * jax.random.normal(ks[5], (64,), jnp.float32),
        "w4": 0.02 * jax.random.normal(ks[6], (512, 64 * 7 * 17), jnp.float32),
        "b4": 0.02 * jax.random.normal(ks[7], (512,), jnp.float32),
        "w5": 0.05 * jax.random.normal(ks[8], (num_actions, 512), jnp.float32),
        "b5": 0.05 * jax.random.normal(ks[9], (num_actions,), jnp.float32),
    }


def _prep_conv(w, b):
    """(Cout,Cin,kh,kw) -> ((kh*kw*Cin, 128) bf16 weight, (1,128) f32 bias)."""
    cout, cin, kh, kw = w.shape
    w2d = jnp.transpose(w, (2, 3, 1, 0)).reshape(kh * kw * cin, cout)  # (kh,kw,C) order
    w2d = jnp.pad(w2d, ((0, 0), (0, LANE - cout))).astype(jnp.bfloat16)
    bias = jnp.pad(b, (0, LANE - cout)).reshape(1, LANE).astype(jnp.float32)
    return w2d, bias


def prepare_params(raw, num_actions):
    """One-time weight preprocessing: permute, transpose, pad, cast to bf16."""
    assert num_actions <= LANE
    p = {}
    p["w1"], p["b1"] = _prep_conv(raw["w1"], raw["b1"])
    p["w2"], p["b2"] = _prep_conv(raw["w2"], raw["b2"])
    p["w3"], p["b3"] = _prep_conv(raw["w3"], raw["b3"])

    # fc4: PyTorch flattens conv3 output in (C,H,W) order; our activations are
    # channels-last, i.e. (H,W,C) order -> permute fc4's columns once here.
    w4 = raw["w4"].reshape(512, 64, 7, 17).transpose(0, 2, 3, 1).reshape(512, 7616)
    p["w4"] = w4.T.astype(jnp.bfloat16)                        # (7616, 512)
    p["b4"] = raw["b4"].reshape(1, 512).astype(jnp.float32)

    pad_a = LANE - num_actions
    p["w5"] = jnp.pad(raw["w5"].T, ((0, 0), (0, pad_a))).astype(jnp.bfloat16)
    p["b5"] = jnp.pad(raw["b5"], (0, pad_a)).reshape(1, LANE).astype(jnp.float32)
    return p


# ----------------------------------------------------------------------------
# DQN forward
# ----------------------------------------------------------------------------
def dqn_forward(params, x_nchw, *, num_actions):
    """x_nchw: (N, C, H, W) float32 — same input convention as the PyTorch module."""
    N = x_nchw.shape[0]
    x = jnp.transpose(x_nchw, (0, 2, 3, 1))                    # NCHW -> NHWC once

    x = conv2d_relu(x, params["w1"], params["b1"], cout=32, kh=8, kw=8, stride=4)
    x = conv2d_relu(x, params["w2"], params["b2"], cout=64, kh=4, kw=4, stride=2)
    x = conv2d_relu(x, params["w3"], params["b3"], cout=64, kh=3, kw=3, stride=1)

    x = x.reshape(N, -1)   # (N, 7*17*64) in (H,W,C) order; w4 columns match this
    x = matmul_bias_act(x, params["w4"], params["b4"], relu=True,
                        tm=8, tn=256, n_out=512)
    # TODO(synk): fc5 could be fused into the fc4 epilogue (w5 is ~128 KB of VMEM).
    x = matmul_bias_act(x, params["w5"], params["b5"], relu=False,
                        tm=8, tn=LANE, n_out=num_actions)
    return x


# ----------------------------------------------------------------------------
# Pure-jnp reference (original NCHW / PyTorch layout, raw params, same bf16
# operand quantization as the kernels) for correctness check.
# ----------------------------------------------------------------------------
def _q(x):  # bf16-quantize matmul operands, matching the kernel precision policy
    return x.astype(jnp.bfloat16).astype(jnp.float32)


def _ref_im2col_nchw(x, kh, kw, stride):
    N, C, H, W = x.shape
    OH = (H - kh) // stride + 1
    OW = (W - kw) // stride + 1
    cols = []
    for i in range(kh):
        for j in range(kw):
            cols.append(
                x[:, :, i : i + stride * OH : stride, j : j + stride * OW : stride]
            )
    cols = jnp.stack(cols, axis=2).reshape(N, C * kh * kw, OH, OW)
    return cols.transpose(0, 2, 3, 1).reshape(N * OH * OW, C * kh * kw), OH, OW


def _ref_conv_relu(x, w, b, stride):
    N = x.shape[0]
    cout, cin, kh, kw = w.shape
    patches, OH, OW = _ref_im2col_nchw(x, kh, kw, stride)
    out = _q(patches) @ _q(w.reshape(cout, cin * kh * kw).T) + b
    out = jnp.maximum(out, 0.0)
    return out.reshape(N, OH, OW, cout).transpose(0, 3, 1, 2)


def dqn_forward_ref(raw, x):
    N = x.shape[0]
    x = _ref_conv_relu(x, raw["w1"], raw["b1"], 4)
    x = _ref_conv_relu(x, raw["w2"], raw["b2"], 2)
    x = _ref_conv_relu(x, raw["w3"], raw["b3"], 1)
    x = x.reshape(N, -1)                                       # PyTorch (C,H,W) order
    x = jnp.maximum(_q(x) @ _q(raw["w4"].T) + raw["b4"], 0.0)
    x = _q(x) @ _q(raw["w5"].T) + raw["b5"]
    return x


if __name__ == "__main__":
    key = jax.random.PRNGKey(0)
    k_in, k_par = jax.random.split(key)

    batch, channels_in, num_actions = 2, 4, 6
    H, W = 84, 164  # required by fc4's in_features = 64*7*17

    x = jax.random.normal(k_in, (batch, channels_in, H, W), jnp.float32)
    raw = init_params(k_par, channels_in, num_actions)
    params = prepare_params(raw, num_actions)   # one-time weight preprocessing

    fwd = jax.jit(lambda p, xx: dqn_forward(p, xx, num_actions=num_actions))
    out = jax.block_until_ready(fwd(params, x))
    assert out.shape == (batch, num_actions), out.shape

    ref = jax.block_until_ready(dqn_forward_ref(raw, x))
    max_err = float(jnp.max(jnp.abs(out - ref)))
    assert jnp.allclose(out, ref, atol=2e-2, rtol=2e-2), (
        "mismatch vs reference, max abs err = %e" % max_err
    )

    print("KERNEL_OK")
</pallas_src>

<mosaic_0001>
module attributes {stable_mosaic.version = 11 : i64} {
  func.func @_matmul_bias_act_kernel(%arg0: i32, %arg1: i32, %arg2: memref<400x256xbf16, #tpu.memory_space<vmem>>, %arg3: memref<256x128xbf16, #tpu.memory_space<vmem>>, %arg4: memref<1x128xf32, #tpu.memory_space<vmem>>, %arg5: memref<400x128xf32, #tpu.memory_space<vmem>>) attributes {dimension_semantics = [#tpu.dimension_semantics<parallel>, #tpu.dimension_semantics<parallel>], iteration_bounds = array<i64: 4, 1>, scalar_prefetch = 0 : i64, scratch_operands = 0 : i64, tpu.core_type = #tpu.core_type<tc>, window_params = [{transform_indices = @transform_0, window_bounds = array<i64: 400, 256>}, {transform_indices = @transform_1, window_bounds = array<i64: 256, 128>}, {transform_indices = @transform_2, window_bounds = array<i64: 1, 128>}, {transform_indices = @transform_3, window_bounds = array<i64: 400, 128>}]} {
    %c0 = arith.constant 0 : index
    %c0_0 = arith.constant 0 : index
    %0 = vector.load %arg2[%c0, %c0_0] : memref<400x256xbf16, #tpu.memory_space<vmem>>, vector<400x256xbf16>
    %c0_1 = arith.constant 0 : index
    %c0_2 = arith.constant 0 : index
    %1 = vector.load %arg3[%c0_1, %c0_2] : memref<256x128xbf16, #tpu.memory_space<vmem>>, vector<256x128xbf16>
    %cst = arith.constant dense<0.000000e+00> : vector<400x128xf32>
    %2 = tpu.matmul %0, %1, %cst {dimension_numbers = #tpu.dot_dimension_numbers<[1], [0], [0], [1], [0, 0, 1, 1], [], []>} : vector<400x256xbf16>, vector<256x128xbf16>, vector<400x128xf32> -> vector<400x128xf32>
    %c0_3 = arith.constant 0 : index
    %c0_4 = arith.constant 0 : index
    %3 = vector.load %arg4[%c0_3, %c0_4] : memref<1x128xf32, #tpu.memory_space<vmem>>, vector<1x128xf32>
    %4 = vector.broadcast %3 : vector<1x128xf32> to vector<400x128xf32>
    %5 = arith.addf %2, %4 : vector<400x128xf32>
    %cst_5 = arith.constant 0.000000e+00 : f32
    %6 = vector.broadcast %cst_5 : f32 to vector<400x128xf32>
    %7 = arith.maximumf %5, %6 : vector<400x128xf32>
    %c0_6 = arith.constant 0 : index
    %c0_7 = arith.constant 0 : index
    %8 = vector.load %arg5[%c0_6, %c0_7] : memref<400x128xf32, #tpu.memory_space<vmem>>, vector<400x128xf32>
    tpu.vector_store %arg5[%c0_6, %c0_7], %7 {strides = array<i32>} : memref<400x128xf32, #tpu.memory_space<vmem>>, vector<400x128xf32>,
    return
  }
  func.func @transform_0(%arg0: i32, %arg1: i32) -> (i32, i32) {
    %c0_i32 = arith.constant 0 : i32
    %c0_i32_0 = arith.constant 0 : i32
    return %arg0, %c0_i32 : i32, i32
  }
  func.func @transform_1(%arg0: i32, %arg1: i32) -> (i32, i32) {
    %c0_i32 = arith.constant 0 : i32
    %c0_i32_0 = arith.constant 0 : i32
    return %c0_i32, %arg1 : i32, i32
  }
  func.func @transform_2(%arg0: i32, %arg1: i32) -> (i32, i32) {
    %c0_i32 = arith.constant 0 : i32
    %c0_i32_0 = arith.constant 0 : i32
    return %c0_i32, %arg1 : i32, i32
  }
  func.func @transform_3(%arg0: i32, %arg1: i32) -> (i32, i32) {
    %c0_i32 = arith.constant 0 : i32
    return %arg0, %arg1 : i32, i32
  }
}

module attributes {stable_mosaic.version = 11 : i64} {
  func.func @_matmul_bias_act_kernel(%arg0: i32, %arg1: i32, %arg2: memref<344x512xbf16, #tpu.memory_space<vmem>>, %arg3: memref<512x128xbf16, #tpu.memory_space<vmem>>, %arg4: memref<1x128xf32, #tpu.memory_space<vmem>>, %arg5: memref<344x128xf32, #tpu.memory_space<vmem>>) attributes {dimension_semantics = [#tpu.dimension_semantics<parallel>, #tpu.dimension_semantics<parallel>], iteration_bounds = array<i64: 1, 1>, scalar_prefetch = 0 : i64, scratch_operands = 0 : i64, tpu.core_type = #tpu.core_type<tc>, window_params = [{transform_indices = @transform_0, window_bounds = array<i64: 344, 512>}, {transform_indices = @transform_1, window_bounds = array<i64: 512, 128>}, {transform_indices = @transform_2, window_bounds = array<i64: 1, 128>}, {transform_indices = @transform_3, window_bounds = array<i64: 344, 128>}]} {
    %c0 = arith.constant 0 : index
    %c0_0 = arith.constant 0 : index
    %0 = vector.load %arg2[%c0, %c0_0] : memref<344x512xbf16, #tpu.memory_space<vmem>>, vector<344x512xbf16>
    %c0_1 = arith.constant 0 : index
    %c0_2 = arith.constant 0 : index
    %1 = vector.load %arg3[%c0_1, %c0_2] : memref<512x128xbf16, #tpu.memory_space<vmem>>, vector<512x128xbf16>
    %cst = arith.constant dense<0.000000e+00> : vector<344x128xf32>
    %2 = tpu.matmul %0, %1, %cst {dimension_numbers = #tpu.dot_dimension_numbers<[1], [0], [0], [1], [0, 0, 1, 1], [], []>} : vector<344x512xbf16>, vector<512x128xbf16>, vector<344x128xf32> -> vector<344x128xf32>
    %c0_3 = arith.constant 0 : index
    %c0_4 = arith.constant 0 : index
    %3 = vector.load %arg4[%c0_3, %c0_4] : memref<1x128xf32, #tpu.memory_space<vmem>>, vector<1x128xf32>
    %4 = vector.broadcast %3 : vector<1x128xf32> to vector<344x128xf32>
    %5 = arith.addf %2, %4 : vector<344x128xf32>
    %cst_5 = arith.constant 0.000000e+00 : f32
    %6 = vector.broadcast %cst_5 : f32 to vector<344x128xf32>
    %7 = arith.maximumf %5, %6 : vector<344x128xf32>
    %c0_6 = arith.constant 0 : index
    %c0_7 = arith.constant 0 : index
    %8 = vector.load %arg5[%c0_6, %c0_7] : memref<344x128xf32, #tpu.memory_space<vmem>>, vector<344x128xf32>
    tpu.vector_store %arg5[%c0_6, %c0_7], %7 {strides = array<i32>} : memref<344x128xf32, #tpu.memory_space<vmem>>, vector<344x128xf32>,
    return
  }
  func.func @transform_0(%arg0: i32, %arg1: i32) -> (i32, i32) {
    %c0_i32 = arith.constant 0 : i32
    %c0_i32_0 = arith.constant 0 : i32
    return %arg0, %c0_i32 : i32, i32
  }
  func.func @transform_1(%arg0: i32, %arg1: i32) -> (i32, i32) {
    %c0_i32 = arith.constant 0 : i32
    %c0_i32_0 = arith.constant 0 : i32
    return %c0_i32, %arg1 : i32, i32
  }
  func.func @transform_2(%arg0: i32, %arg1: i32) -> (i32, i32) {
    %c0_i32 = arith.constant 0 : i32
    %c0_i32_0 = arith.constant 0 : i32
    return %c0_i32, %arg1 : i32, i32
  }
  func.func @transform_3(%arg0: i32, %arg1: i32) -> (i32, i32) {
    %c0_i32 = arith.constant 0 : i32
    return %arg0, %arg1 : i32, i32
  }
}

module attributes {stable_mosaic.version = 11 : i64} {
  func.func @_matmul_bias_act_kernel(%arg0: i32, %arg1: i32, %arg2: memref<240x576xbf16, #tpu.memory_space<vmem>>, %arg3: memref<576x128xbf16, #tpu.memory_space<vmem>>, %arg4: memref<1x128xf32, #tpu.memory_space<vmem>>, %arg5: memref<240x128xf32, #tpu.memory_space<vmem>>) attributes {dimension_semantics = [#tpu.dimension_semantics<parallel>, #tpu.dimension_semantics<parallel>], iteration_bounds = array<i64: 1, 1>, scalar_prefetch = 0 : i64, scratch_operands = 0 : i64, tpu.core_type = #tpu.core_type<tc>, window_params = [{transform_indices = @transform_0, window_bounds = array<i64: 240, 576>}, {transform_indices = @transform_1, window_bounds = array<i64: 576, 128>}, {transform_indices = @transform_2, window_bounds = array<i64: 1, 128>}, {transform_indices = @transform_3, window_bounds = array<i64: 240, 128>}]} {
    %c0 = arith.constant 0 : index
    %c0_0 = arith.constant 0 : index
    %0 = vector.load %arg2[%c0, %c0_0] : memref<240x576xbf16, #tpu.memory_space<vmem>>, vector<240x576xbf16>
    %c0_1 = arith.constant 0 : index
    %c0_2 = arith.constant 0 : index
    %1 = vector.load %arg3[%c0_1, %c0_2] : memref<576x128xbf16, #tpu.memory_space<vmem>>, vector<576x128xbf16>
    %cst = arith.constant dense<0.000000e+00> : vector<240x128xf32>
    %2 = tpu.matmul %0, %1, %cst {dimension_numbers = #tpu.dot_dimension_numbers<[1], [0], [0], [1], [0, 0, 1, 1], [], []>} : vector<240x576xbf16>, vector<576x128xbf16>, vector<240x128xf32> -> vector<240x128xf32>
    %c0_3 = arith.constant 0 : index
    %c0_4 = arith.constant 0 : index
    %3 = vector.load %arg4[%c0_3, %c0_4] : memref<1x128xf32, #tpu.memory_space<vmem>>, vector<1x128xf32>
    %4 = vector.broadcast %3 : vector<1x128xf32> to vector<240x128xf32>
    %5 = arith.addf %2, %4 : vector<240x128xf32>
    %cst_5 = arith.constant 0.000000e+00 : f32
    %6 = vector.broadcast %cst_5 : f32 to vector<240x128xf32>
    %7 = arith.maximumf %5, %6 : vector<240x128xf32>
    %c0_6 = arith.constant 0 : index
    %c0_7 = arith.constant 0 : index
    %8 = vector.load %arg5[%c0_6, %c0_7] : memref<240x128xf32, #tpu.memory_space<vmem>>, vector<240x128xf32>
    tpu.vector_store %arg5[%c0_6, %c0_7], %7 {strides = array<i32>} : memref<240x128xf32, #tpu.memory_space<vmem>>, vector<240x128xf32>,
    return
  }
  func.func @transform_0(%arg0: i32, %arg1: i32) -> (i32, i32) {
    %c0_i32 = arith.constant 0 : i32
    %c0_i32_0 = arith.constant 0 : i32
    return %arg0, %c0_i32 : i32, i32
  }
  func.func @transform_1(%arg0: i32, %arg1: i32) -> (i32, i32) {
    %c0_i32 = arith.constant 0 : i32
    %c0_i32_0 = arith.constant 0 : i32
    return %c0_i32, %arg1 : i32, i32
  }
  func.func @transform_2(%arg0: i32, %arg1: i32) -> (i32, i32) {
    %c0_i32 = arith.constant 0 : i32
    %c0_i32_0 = arith.constant 0 : i32
    return %c0_i32, %arg1 : i32, i32
  }
  func.func @transform_3(%arg0: i32, %arg1: i32) -> (i32, i32) {
    %c0_i32 = arith.constant 0 : i32
    return %arg0, %arg1 : i32, i32
  }
}

module attributes {stable_mosaic.version = 11 : i64} {
  func.func @_matmul_bias_act_kernel(%arg0: i32, %arg1: i32, %arg2: memref<8x512xbf16, #tpu.memory_space<vmem>>, %arg3: memref<512x128xbf16, #tpu.memory_space<vmem>>, %arg4: memref<1x128xf32, #tpu.memory_space<vmem>>, %arg5: memref<8x128xf32, #tpu.memory_space<vmem>>) attributes {dimension_semantics = [#tpu.dimension_semantics<parallel>, #tpu.dimension_semantics<parallel>], iteration_bounds = array<i64: 1, 1>, scalar_prefetch = 0 : i64, scratch_operands = 0 : i64, tpu.core_type = #tpu.core_type<tc>, window_params = [{transform_indices = @transform_0, window_bounds = array<i64: 8, 512>}, {transform_indices = @transform_1, window_bounds = array<i64: 512, 128>}, {transform_indices = @transform_2, window_bounds = array<i64: 1, 128>}, {transform_indices = @transform_3, window_bounds = array<i64: 8, 128>}]} {
    %c0 = arith.constant 0 : index
    %c0_0 = arith.constant 0 : index
    %0 = vector.load %arg2[%c0, %c0_0] : memref<8x512xbf16, #tpu.memory_space<vmem>>, vector<8x512xbf16>
    %c0_1 = arith.constant 0 : index
    %c0_2 = arith.constant 0 : index
    %1 = vector.load %arg3[%c0_1, %c0_2] : memref<512x128xbf16, #tpu.memory_space<vmem>>, vector<512x128xbf16>
    %cst = arith.constant dense<0.000000e+00> : vector<8x128xf32>
    %2 = tpu.matmul %0, %1, %cst {dimension_numbers = #tpu.dot_dimension_numbers<[1], [0], [0], [1], [0, 0, 1, 1], [], []>} : vector<8x512xbf16>, vector<512x128xbf16>, vector<8x128xf32> -> vector<8x128xf32>
    %c0_3 = arith.constant 0 : index
    %c0_4 = arith.constant 0 : index
    %3 = vector.load %arg4[%c0_3, %c0_4] : memref<1x128xf32, #tpu.memory_space<vmem>>, vector<1x128xf32>
    %4 = vector.broadcast %3 : vector<1x128xf32> to vector<8x128xf32>
    %5 = arith.addf %2, %4 : vector<8x128xf32>
    %c0_5 = arith.constant 0 : index
    %c0_6 = arith.constant 0 : index
    %6 = vector.load %arg5[%c0_5, %c0_6] : memref<8x128xf32, #tpu.memory_space<vmem>>, vector<8x128xf32>
    tpu.vector_store %arg5[%c0_5, %c0_6], %5 {strides = array<i32>} : memref<8x128xf32, #tpu.memory_space<vmem>>, vector<8x128xf32>,
    return
  }
  func.func @transform_0(%arg0: i32, %arg1: i32) -> (i32, i32) {
    %c0_i32 = arith.constant 0 : i32
    %c0_i32_0 = arith.constant 0 : i32
    return %arg0, %c0_i32 : i32, i32
  }
  func.func @transform_1(%arg0: i32, %arg1: i32) -> (i32, i32) {
    %c0_i32 = arith.constant 0 : i32
    %c0_i32_0 = arith.constant 0 : i32
    return %c0_i32, %arg1 : i32, i32
  }
  func.func @transform_2(%arg0: i32, %arg1: i32) -> (i32, i32) {
    %c0_i32 = arith.constant 0 : i32
    %c0_i32_0 = arith.constant 0 : i32
    return %c0_i32, %arg1 : i32, i32
  }
  func.func @transform_3(%arg0: i32, %arg1: i32) -> (i32, i32) {
    %c0_i32 = arith.constant 0 : i32
    return %arg0, %arg1 : i32, i32
  }
}

module attributes {stable_mosaic.version = 11 : i64} {
  func.func @_matmul_bias_act_kernel(%arg0: i32, %arg1: i32, %arg2: memref<8x7616xbf16, #tpu.memory_space<vmem>>, %arg3: memref<7616x256xbf16, #tpu.memory_space<vmem>>, %arg4: memref<1x256xf32, #tpu.memory_space<vmem>>, %arg5: memref<8x256xf32, #tpu.memory_space<vmem>>) attributes {dimension_semantics = [#tpu.dimension_semantics<parallel>, #tpu.dimension_semantics<parallel>], iteration_bounds = array<i64: 1, 2>, scalar_prefetch = 0 : i64, scratch_operands = 0 : i64, tpu.core_type = #tpu.core_type<tc>, window_params = [{transform_indices = @transform_0, window_bounds = array<i64: 8, 7616>}, {transform_indices = @transform_1, window_bounds = array<i64: 7616, 256>}, {transform_indices = @transform_2, window_bounds = array<i64: 1, 256>}, {transform_indices = @transform_3, window_bounds = array<i64: 8, 256>}]} {
    %c0 = arith.constant 0 : index
    %c0_0 = arith.constant 0 : index
    %0 = vector.load %arg2[%c0, %c0_0] : memref<8x7616xbf16, #tpu.memory_space<vmem>>, vector<8x7616xbf16>
    %c0_1 = arith.constant 0 : index
    %c0_2 = arith.constant 0 : index
    %1 = vector.load %arg3[%c0_1, %c0_2] : memref<7616x256xbf16, #tpu.memory_space<vmem>>, vector<7616x256xbf16>
    %cst = arith.constant dense<0.000000e+00> : vector<8x256xf32>
    %2 = tpu.matmul %0, %1, %cst {dimension_numbers = #tpu.dot_dimension_numbers<[1], [0], [0], [1], [0, 0, 1, 1], [], []>} : vector<8x7616xbf16>, vector<7616x256xbf16>, vector<8x256xf32> -> vector<8x256xf32>
    %c0_3 = arith.constant 0 : index
    %c0_4 = arith.constant 0 : index
    %3 = vector.load %arg4[%c0_3, %c0_4] : memref<1x256xf32, #tpu.memory_space<vmem>>, vector<1x256xf32>
    %4 = vector.broadcast %3 : vector<1x256xf32> to vector<8x256xf32>
    %5 = arith.addf %2, %4 : vector<8x256xf32>
    %cst_5 = arith.constant 0.000000e+00 : f32
    %6 = vector.broadcast %cst_5 : f32 to vector<8x256xf32>
    %7 = arith.maximumf %5, %6 : vector<8x256xf32>
    %c0_6 = arith.constant 0 : index
    %c0_7 = arith.constant 0 : index
    %8 = vector.load %arg5[%c0_6, %c0_7] : memref<8x256xf32, #tpu.memory_space<vmem>>, vector<8x256xf32>
    tpu.vector_store %arg5[%c0_6, %c0_7], %7 {strides = array<i32>} : memref<8x256xf32, #tpu.memory_space<vmem>>, vector<8x256xf32>,
    return
  }
  func.func @transform_0(%arg0: i32, %arg1: i32) -> (i32, i32) {
    %c0_i32 = arith.constant 0 : i32
    %c0_i32_0 = arith.constant 0 : i32
    return %arg0, %c0_i32 : i32, i32
  }
  func.func @transform_1(%arg0: i32, %arg1: i32) -> (i32, i32) {
    %c0_i32 = arith.constant 0 : i32
    %c0_i32_0 = arith.constant 0 : i32
    return %c0_i32, %arg1 : i32, i32
  }
  func.func @transform_2(%arg0: i32, %arg1: i32) -> (i32, i32) {
    %c0_i32 = arith.constant 0 : i32
    %c0_i32_0 = arith.constant 0 : i32
    return %c0_i32, %arg1 : i32, i32
  }
  func.func @transform_3(%arg0: i32, %arg1: i32) -> (i32, i32) {
    %c0_i32 = arith.constant 0 : i32
    return %arg0, %arg1 : i32, i32
  }
}

</mosaic_0001>

<bundles_post_ra>
// kernel: _lambda_.5
= control target key start
LH: loop header
LB: loop body
LE: loop exit
PB: predicated region body
PF: predicated region fallthrough
CT: control target
= control target key end

     0   :  { %s1372_s12 = smov 0   ;;  %s1374_s13 = smov 0   ;;  %s1651_s0 = inlined_call_operand.vmem [shape: bf16[1600,256], index: 0, kind: input, shape index: {}]   ;;  %s1652_s1 = inlined_call_operand.vmem [shape: bf16[256,128], index: 1, kind: input, shape index: {}]   ;;  %s1653_s2 = inlined_call_operand.vmem [shape: f32[1,128], index: 2, kind: input, shape index: {}]   ;;  %s1654_s3 = inlined_call_operand.vmem [shape: f32[1600,128], index: 3, kind: output, shape index: {}]  }
   0x1   :  { %s1376_s14 = smov 0  }
   0x2 LB: > { %s25_s15 = sadd.s32 1, %s1345_s13  ;;  %p1105_p0 = scmp.ge.s32.totalorder %s1349_s14, 1  ;;  %s1349_s14 = sphi %s1376_s14, %s13_s14   ;;  %s1345_s13 = sphi %s1374_s13, %s1656_s13   ;;  %s1341_s12 = sphi %s1372_s12, %s1655_s12  }
   0x3   : > { %p27_p1 = scmp.ge.s32.totalorder %s25_s15, 4  ;;  %p170_p2 = scmp.lt.s32.totalorder %s1349_s14, 5 }
   0x5   : > { %s1658_s15 = smov (%p27_p1, %s25_s15), 0  ;;  %p171_p3 = pnand %p1105_p0, %p170_p2 }
   0x6   : > { %s205_s18 = smul.u32 (!%p171_p3), 50, %s1341_s12 }
   0x7   : > { %174 = sbr.rel (%p171_p3) target bundleno = 375 (0x177), region = 32 }
   0x8   : > { %p206_p4 = scmp.lt.s32.totalorder (!%p171_p3), %s205_s18, 199 }
   0xc   : > { %v1236_v0 = vld [vmem:[%s1652_s1 + $0x38] sm:$0xff]   ;;  %v1351_v1 = vmov 0   ;;  %v1237_v2 = vld [vmem:[%s1652_s1 + $0x30] sm:$0xff]   ;;  %v1238_v3 = vld [vmem:[%s1652_s1 + $0x28] sm:$0xff]   ;;  %s1660_s18 = smov (!%p206_p4, %s205_s18), 199 }
   0xd   : > { %664 = vmatprep.subr.bf16.mxu0 %v1351_v1  ;;  %1179 = vmatprep.subr.bf16.mxu1 %v1351_v1  ;;  %v1239_v4 = vld [vmem:[%s1652_s1 + $0x20] sm:$0xff]   ;;  %s1178_s25 = sshll.u32 %s1660_s18, 3  ;;  %v1240_v5 = vld [vmem:[%s1652_s1 + $0x18] sm:$0xff]   ;;  %v1241_v7 = vld [vmem:[%s1652_s1 + $0x10] sm:$0xff]  }
   0xe   : > { %665 = vmatpush1.bf16.msra.mxu0 %v1236_v0  ;;  %1195 = vmatpush1.bf16.msra.mxu1 %v1236_v0  ;;  %s1421_s30 = scalar_lea.vmem %s1651_s0, %s1178_s25  ;;  %v1242_v9 = vld [vmem:[%s1652_s1 + $0x8] sm:$0xff]   ;;  %v1243_v10 = vld [vmem:[%s1652_s1] sm:$0xff]   ;;  %v1244_v11 = vld [vmem:[%s1652_s1 + $0x78] sm:$0xff]   ;;  %s1542_s9 = scalar_lea.vmem %s1654_s3, %s1178_s25 }
   0xf   : > { %666 = vmatprep.subr.bf16.mxu0 %v1351_v1  ;;  %1180 = vmatprep.subr.bf16.mxu1 %v1351_v1  ;;  %v1254_v6 = vld [vmem:[%s1421_s30 + $0x4] ss:$8 sps:$4 sm:$0xff]   ;;  %v1257_v8 = vld [vmem:[%s1421_s30 + $0xd4] ss:$8 sps:$4 sm:$0xff]   ;;  %v1252_v19 = vld [vmem:[%s1421_s30] ss:$8 sps:$4 sm:$0xff]  }
  0x10   : > { %696 = vmatprep.mubr.bf16.mxu0 %v1254_v6  ;;  %800 = vmatprep.mubr.bf16.mxu1 %v1257_v8  ;;  %v1245_v12 = vld [vmem:[%s1652_s1 + $0x70] sm:$0xff]   ;;  %v1246_v13 = vld [vmem:[%s1652_s1 + $0x68] sm:$0xff]   ;;  %v1247_v14 = vld [vmem:[%s1652_s1 + $0x60] sm:$0xff]  }
  0x11   : > { %v1248_v15 = vld [vmem:[%s1652_s1 + $0x58] sm:$0xff]   ;;  %v1249_v16 = vld [vmem:[%s1652_s1 + $0x50] sm:$0xff]   ;;  %v1250_v17 = vld [vmem:[%s1652_s1 + $0x48] sm:$0xff]  }
  0x12   : > { %667 = vmatpush1.bf16.msra.mxu0 %v1237_v2  ;;  %1196 = vmatpush1.bf16.msra.mxu1 %v1237_v2  ;;  %v1251_v18 = vld [vmem:[%s1652_s1 + $0x40] sm:$0xff]   ;;  %v1255_v20 = vld [vmem:[%s1421_s30 + $0xd0] ss:$8 sps:$4 sm:$0xff]   ;;  %v1258_v21 = vld [vmem:[%s1421_s30 + $0x14] ss:$8 sps:$4 sm:$0xff]  }
  0x13   : > { %668 = vmatprep.subr.bf16.mxu0 %v1351_v1  ;;  %1181 = vmatprep.subr.bf16.mxu1 %v1351_v1  ;;  %v1261_v22 = vld [vmem:[%s1421_s30 + $0xe4] ss:$8 sps:$4 sm:$0xff]   ;;  %v1260_v23 = vld [vmem:[%s1421_s30 + $0x10] ss:$8 sps:$4 sm:$0xff]   ;;  %v1263_v24 = vld [vmem:[%s1421_s30 + $0xe0] ss:$8 sps:$4 sm:$0xff]  }
  0x14   : > { %v1264_v25 = vld [vmem:[%s1421_s30 + $0x24] ss:$8 sps:$4 sm:$0xff]   ;;  %v1267_v26 = vld [vmem:[%s1421_s30 + $0xf4] ss:$8 sps:$4 sm:$0xff]   ;;  %v1266_v27 = vld [vmem:[%s1421_s30 + $0x20] ss:$8 sps:$4 sm:$0xff]  }
  0x15   : > { %v1269_v28 = vld [vmem:[%s1421_s30 + $0xf0] ss:$8 sps:$4 sm:$0xff]   ;;  %v1270_v29 = vld [vmem:[%s1421_s30 + $0x34] ss:$8 sps:$4 sm:$0xff]   ;;  %v1273_v30 = vld [vmem:[%s1421_s30 + $0x104] ss:$8 sps:$4 sm:$0xff]  }
  0x16   : > { %669 = vmatpush1.bf16.msra.mxu0 %v1238_v3  ;;  %1197 = vmatpush1.bf16.msra.mxu1 %v1238_v3  ;;  %v1272_v31 = vld [vmem:[%s1421_s30 + $0x30] ss:$8 sps:$4 sm:$0xff]   ;;  %v1275_v32 = vld [vmem:[%s1421_s30 + $0x100] ss:$8 sps:$4 sm:$0xff]   ;;  %v1276_v33 = vld [vmem:[%s1421_s30 + $0x44] ss:$8 sps:$4 sm:$0xff]  }
  0x17   : > { %670 = vmatprep.subr.bf16.mxu0 %v1351_v1  ;;  %1182 = vmatprep.subr.bf16.mxu1 %v1351_v1  ;;  %v1279_v34 = vld [vmem:[%s1421_s30 + $0x114] ss:$8 sps:$4 sm:$0xff]   ;;  %v1278_v35 = vld [vmem:[%s1421_s30 + $0x40] ss:$8 sps:$4 sm:$0xff]   ;;  %v1281_v36 = vld [vmem:[%s1421_s30 + $0x110] ss:$8 sps:$4 sm:$0xff]  }
  0x18   : > { %v1282_v37 = vld [vmem:[%s1421_s30 + $0x54] ss:$8 sps:$4 sm:$0xff]   ;;  %v1285_v38 = vld [vmem:[%s1421_s30 + $0x124] ss:$8 sps:$4 sm:$0xff]   ;;  %v1284_v39 = vld [vmem:[%s1421_s30 + $0x50] ss:$8 sps:$4 sm:$0xff]  }
  0x19   : > { %v1287_v40 = vld [vmem:[%s1421_s30 + $0x120] ss:$8 sps:$4 sm:$0xff]   ;;  %v1288_v41 = vld [vmem:[%s1421_s30 + $0x64] ss:$8 sps:$4 sm:$0xff]   ;;  %v1291_v42 = vld [vmem:[%s1421_s30 + $0x134] ss:$8 sps:$4 sm:$0xff]  }
  0x1a   : > { %671 = vmatpush1.bf16.msra.mxu0 %v1239_v4  ;;  %1198 = vmatpush1.bf16.msra.mxu1 %v1239_v4  ;;  %v1290_v43 = vld [vmem:[%s1421_s30 + $0x60] ss:$8 sps:$4 sm:$0xff]   ;;  %v1293_v44 = vld [vmem:[%s1421_s30 + $0x130] ss:$8 sps:$4 sm:$0xff]   ;;  %v1294_v45 = vld [vmem:[%s1421_s30 + $0x74] ss:$8 sps:$4 sm:$0xff]  }
  0x1b   : > { %672 = vmatprep.subr.bf16.mxu0 %v1351_v1  ;;  %1183 = vmatprep.subr.bf16.mxu1 %v1351_v1  ;;  %v1297_v46 = vld [vmem:[%s1421_s30 + $0x144] ss:$8 sps:$4 sm:$0xff]   ;;  %v1296_v47 = vld [vmem:[%s1421_s30 + $0x70] ss:$8 sps:$4 sm:$0xff]   ;;  %v1299_v48 = vld [vmem:[%s1421_s30 + $0x140] ss:$8 sps:$4 sm:$0xff]  }
  0x1c   : > { %v1300_v49 = vld [vmem:[%s1421_s30 + $0x84] ss:$8 sps:$4 sm:$0xff]   ;;  %v1303_v50 = vld [vmem:[%s1421_s30 + $0x154] ss:$8 sps:$4 sm:$0xff]   ;;  %v1302_v51 = vld [vmem:[%s1421_s30 + $0x80] ss:$8 sps:$4 sm:$0xff]  }
  0x1d   : > { %v1305_v52 = vld [vmem:[%s1421_s30 + $0x150] ss:$8 sps:$4 sm:$0xff]   ;;  %v1306_v53 = vld [vmem:[%s1421_s30 + $0x94] ss:$8 sps:$4 sm:$0xff]   ;;  %v1309_v54 = vld [vmem:[%s1421_s30 + $0x164] ss:$8 sps:$4 sm:$0xff]  }
  0x1e   : > { %673 = vmatpush1.bf16.msra.mxu0 %v1240_v5  ;;  %1199 = vmatpush1.bf16.msra.mxu1 %v1240_v5  ;;  %v1308_v55 = vld [vmem:[%s1421_s30 + $0x90] ss:$8 sps:$4 sm:$0xff]   ;;  %v1311_v56 = vld [vmem:[%s1421_s30 + $0x160] ss:$8 sps:$4 sm:$0xff]   ;;  %v1312_v57 = vld [vmem:[%s1421_s30 + $0xa4] ss:$8 sps:$4 sm:$0xff]  }
  0x1f   : > { %674 = vmatprep.subr.bf16.mxu0 %v1351_v1  ;;  %1184 = vmatprep.subr.bf16.mxu1 %v1351_v1  ;;  %v1315_v58 = vld [vmem:[%s1421_s30 + $0x174] ss:$8 sps:$4 sm:$0xff]   ;;  %v1314_v59 = vld [vmem:[%s1421_s30 + $0xa0] ss:$8 sps:$4 sm:$0xff]   ;;  %v1317_v60 = vld [vmem:[%s1421_s30 + $0x170] ss:$8 sps:$4 sm:$0xff]  }
  0x20   : > { %v1318_v61 = vld [vmem:[%s1421_s30 + $0xb4] ss:$8 sps:$4 sm:$0xff]   ;;  %v1321_v62 = vld [vmem:[%s1421_s30 + $0x184] ss:$8 sps:$4 sm:$0xff]   ;;  %v1320_v63 = vld [vmem:[%s1421_s30 + $0xb0] ss:$8 sps:$4 sm:$0xff]  }
  0x21   : > { %v1323_v0 = vld [vmem:[%s1421_s30 + $0x180] ss:$8 sps:$4 sm:$0xff]  }
  0x22   : > { %675 = vmatpush1.bf16.msra.mxu0 %v1241_v7  ;;  %1200 = vmatpush1.bf16.msra.mxu1 %v1241_v7  ;;  %v1326_v2 = vld [vmem:[%s1421_s30 + $0xc0] ss:$8 sps:$4 sm:$0xff]  }
  0x23   : > { %676 = vmatprep.subr.bf16.mxu0 %v1351_v1  ;;  %1185 = vmatprep.subr.bf16.mxu1 %v1351_v1  ;;  %v1533_v3 = vld [vmem:[%s1653_s2] ss:$0 sm:$0xff] }
  0x26   : > { %677 = vmatpush1.bf16.msra.mxu0 %v1242_v9  ;;  %1201 = vmatpush1.bf16.msra.mxu1 %v1242_v9 }
  0x27   : > { %678 = vmatprep.subr.bf16.mxu0 %v1351_v1  ;;  %1186 = vmatprep.subr.bf16.mxu1 %v1351_v1 }
  0x2a   : > { %679 = vmatpush1.bf16.msra.mxu0 %v1243_v10  ;;  %1202 = vmatpush1.bf16.msra.mxu1 %v1243_v10 }
  0x2b   : > { %680 = vmatprep.subr.bf16.mxu0 %v1351_v1  ;;  %1187 = vmatprep.subr.bf16.mxu1 %v1351_v1 }
  0x2e   : > { %681 = vmatpush2.bf16.msra.mxu0 %v1244_v11  ;;  %1203 = vmatpush2.bf16.msra.mxu1 %v1244_v11 }
  0x2f   : > { %682 = vmatprep.subr.bf16.mxu0 %v1351_v1  ;;  %1188 = vmatprep.subr.bf16.mxu1 %v1351_v1 }
  0x32   : > { %683 = vmatpush2.bf16.msra.mxu0 %v1245_v12  ;;  %1204 = vmatpush2.bf16.msra.mxu1 %v1245_v12 }
  0x33   : > { %684 = vmatprep.subr.bf16.mxu0 %v1351_v1  ;;  %1189 = vmatprep.subr.bf16.mxu1 %v1351_v1 }
  0x36   : > { %685 = vmatpush2.bf16.msra.mxu0 %v1246_v13  ;;  %1205 = vmatpush2.bf16.msra.mxu1 %v1246_v13 }
  0x37   : > { %686 = vmatprep.subr.bf16.mxu0 %v1351_v1  ;;  %1190 = vmatprep.subr.bf16.mxu1 %v1351_v1 }
  0x3a   : > { %687 = vmatpush2.bf16.msra.mxu0 %v1247_v14  ;;  %1206 = vmatpush2.bf16.msra.mxu1 %v1247_v14 }
  0x3b   : > { %688 = vmatprep.subr.bf16.mxu0 %v1351_v1  ;;  %1191 = vmatprep.subr.bf16.mxu1 %v1351_v1 }
  0x3e   : > { %689 = vmatpush2.bf16.msra.mxu0 %v1248_v15  ;;  %1207 = vmatpush2.bf16.msra.mxu1 %v1248_v15 }
  0x3f   : > { %690 = vmatprep.subr.bf16.mxu0 %v1351_v1  ;;  %1192 = vmatprep.subr.bf16.mxu1 %v1351_v1 }
  0x42   : > { %691 = vmatpush2.bf16.msra.mxu0 %v1249_v16  ;;  %1208 = vmatpush2.bf16.msra.mxu1 %v1249_v16 }
  0x43   : > { %692 = vmatprep.subr.bf16.mxu0 %v1351_v1  ;;  %1193 = vmatprep.subr.bf16.mxu1 %v1351_v1 }
  0x46   : > { %693 = vmatpush2.bf16.msra.mxu0 %v1250_v17  ;;  %1209 = vmatpush2.bf16.msra.mxu1 %v1250_v17 }
  0x47   : > { %694 = vmatprep.subr.bf16.mxu0 %v1351_v1  ;;  %1194 = vmatprep.subr.bf16.mxu1 %v1351_v1  ;;  %v1324_v1 = vld [vmem:[%s1421_s30 + $0xc4] ss:$8 sps:$4 sm:$0xff]  }
  0x4a   : > { %695 = vmatpush2.bf16.msra.mxu0 %v1251_v18  ;;  %1210 = vmatpush2.bf16.msra.mxu1 %v1251_v18 }
  0x4d   : > { %697 = vmatmul.mubr.bf16.vlgmr.msra.gmra.mxu0 %v1252_v19  ;;  %801 = vmatmul.mubr.bf16.vlgmr.msra.gmra.mxu1 %v1255_v20 }
  0x4e   : > { %704 = vmatprep.mubr.bf16.mxu0 %v1258_v21  ;;  %808 = vmatprep.mubr.bf16.mxu1 %v1261_v22 }
  0x55   : > { %705 = vmatmul.mubr.bf16.gmra.mxu0 %v1260_v23  ;;  %809 = vmatmul.mubr.bf16.gmra.mxu1 %v1263_v24 }
  0x56   : > { %712 = vmatprep.mubr.bf16.mxu0 %v1264_v25  ;;  %816 = vmatprep.mubr.bf16.mxu1 %v1267_v26 }
  0x5d   : > { %713 = vmatmul.mubr.bf16.gmra.mxu0 %v1266_v27  ;;  %817 = vmatmul.mubr.bf16.gmra.mxu1 %v1269_v28 }
  0x5e   : > { %720 = vmatprep.mubr.bf16.mxu0 %v1270_v29  ;;  %824 = vmatprep.mubr.bf16.mxu1 %v1273_v30 }
  0x65   : > { %721 = vmatmul.mubr.bf16.gmra.mxu0 %v1272_v31  ;;  %825 = vmatmul.mubr.bf16.gmra.mxu1 %v1275_v32 }
  0x66   : > { %728 = vmatprep.mubr.bf16.mxu0 %v1276_v33  ;;  %832 = vmatprep.mubr.bf16.mxu1 %v1279_v34 }
  0x6d   : > { %729 = vmatmul.mubr.bf16.gmra.mxu0 %v1278_v35  ;;  %833 = vmatmul.mubr.bf16.gmra.mxu1 %v1281_v36 }
  0x6e   : > { %736 = vmatprep.mubr.bf16.mxu0 %v1282_v37  ;;  %840 = vmatprep.mubr.bf16.mxu1 %v1285_v38 }
  0x75   : > { %737 = vmatmul.mubr.bf16.gmra.mxu0 %v1284_v39  ;;  %841 = vmatmul.mubr.bf16.gmra.mxu1 %v1287_v40 }
  0x76   : > { %744 = vmatprep.mubr.bf16.mxu0 %v1288_v41  ;;  %848 = vmatprep.mubr.bf16.mxu1 %v1291_v42 }
  0x7d   : > { %745 = vmatmul.mubr.bf16.gmra.mxu0 %v1290_v43  ;;  %849 = vmatmul.mubr.bf16.gmra.mxu1 %v1293_v44 }
  0x7e   : > { %752 = vmatprep.mubr.bf16.mxu0 %v1294_v45  ;;  %856 = vmatprep.mubr.bf16.mxu1 %v1297_v46 }
  0x85   : > { %753 = vmatmul.mubr.bf16.gmra.mxu0 %v1296_v47  ;;  %857 = vmatmul.mubr.bf16.gmra.mxu1 %v1299_v48 }
  0x86   : > { %760 = vmatprep.mubr.bf16.mxu0 %v1300_v49  ;;  %864 = vmatprep.mubr.bf16.mxu1 %v1303_v50 }
  0x8d   : > { %761 = vmatmul.mubr.bf16.gmra.mxu0 %v1302_v51  ;;  %865 = vmatmul.mubr.bf16.gmra.mxu1 %v1305_v52 }
  0x8e   : > { %768 = vmatprep.mubr.bf16.mxu0 %v1306_v53  ;;  %872 = vmatprep.mubr.bf16.mxu1 %v1309_v54 }
  0x95   : > { %769 = vmatmul.mubr.bf16.gmra.mxu0 %v1308_v55  ;;  %873 = vmatmul.mubr.bf16.gmra.mxu1 %v1311_v56 }
  0x96   : > { %776 = vmatprep.mubr.bf16.mxu0 %v1312_v57  ;;  %880 = vmatprep.mubr.bf16.mxu1 %v1315_v58 }
  0x9d   : > { %777 = vmatmul.mubr.bf16.gmra.mxu0 %v1314_v59  ;;  %881 = vmatmul.mubr.bf16.gmra.mxu1 %v1317_v60 }
  0x9e   : > { %784 = vmatprep.mubr.bf16.mxu0 %v1318_v61  ;;  %888 = vmatprep.mubr.bf16.mxu1 %v1321_v62 }
  0xa5   : > { %785 = vmatmul.mubr.bf16.gmra.mxu0 %v1320_v63  ;;  %889 = vmatmul.mubr.bf16.gmra.mxu1 %v1323_v0 }
  0xa6   : > { %792 = vmatprep.mubr.bf16.mxu0 %v1324_v1 }
  0xad   : > { %793 = vmatmul.mubr.bf16.gmra.mxu0 %v1326_v2 }
 0x10d   : > { %v698_v4 = vpop.f32.mrf.mxu0  ;;  %v802_v5 = vpop.f32.mrf.mxu1 }
 0x10e   : > { %v699_v6 = vadd.f32 %v1533_v3, %v698_v4  ;;  %v803_v7 = vadd.f32 %v1533_v3, %v802_v5 }
 0x10f   : > { %v700_v8 = vpop.f32.mrf.mxu0  ;;  %v804_v9 = vpop.f32.mrf.mxu1 }
 0x110   : > { %v897_v10 = vmax.f32 %v699_v6, 0.0  ;;  %v923_v11 = vmax.f32 %v803_v7, 0.0 }
 0x111   : > { %v701_v12 = vpop.f32.mrf.mxu0  ;;  %v805_v13 = vpop.f32.mrf.mxu1 }
 0x112   : > { %947 = vst [vmem:[%s1542_s9] sm:$0xff] %v897_v10  ;;  %973 = vst [vmem:[%s1542_s9 + $0xd0] sm:$0xff] %v923_v11  ;;  %v702_v14 = vadd.f32 %v1533_v3, %v701_v12  ;;  %v806_v15 = vadd.f32 %v1533_v3, %v805_v13 }
 0x113   : > { %v703_v16 = vpop.f32.mrf.mxu0  ;;  %v807_v17 = vpop.f32.mrf.mxu1 }
 0x114   : > { %v898_v18 = vmax.f32 %v702_v14, 0.0  ;;  %v924_v19 = vmax.f32 %v806_v15, 0.0 }
 0x115   : > { %v706_v20 = vpop.f32.mrf.mxu0  ;;  %v810_v21 = vpop.f32.mrf.mxu1 }
 0x116   : > { %948 = vst [vmem:[%s1542_s9 + $0x8] sm:$0xff] %v898_v18  ;;  %974 = vst [vmem:[%s1542_s9 + $0xd8] sm:$0xff] %v924_v19  ;;  %v707_v22 = vadd.f32 %v1533_v3, %v706_v20  ;;  %v811_v23 = vadd.f32 %v1533_v3, %v810_v21 }
 0x117   : > { %v708_v24 = vpop.f32.mrf.mxu0  ;;  %v812_v25 = vpop.f32.mrf.mxu1 }
 0x118   : > { %v899_v26 = vmax.f32 %v707_v22, 0.0  ;;  %v925_v27 = vmax.f32 %v811_v23, 0.0 }
 0x119   : > { %v709_v28 = vpop.f32.mrf.mxu0  ;;  %v813_v29 = vpop.f32.mrf.mxu1 }
 0x11a   : > { %949 = vst [vmem:[%s1542_s9 + $0x10] sm:$0xff] %v899_v26  ;;  %975 = vst [vmem:[%s1542_s9 + $0xe0] sm:$0xff] %v925_v27  ;;  %v710_v30 = vadd.f32 %v1533_v3, %v709_v28  ;;  %v814_v31 = vadd.f32 %v1533_v3, %v813_v29 }
 0x11b   : > { %v711_v32 = vpop.f32.mrf.mxu0  ;;  %v815_v33 = vpop.f32.mrf.mxu1 }
 0x11c   : > { %v900_v34 = vmax.f32 %v710_v30, 0.0  ;;  %v926_v35 = vmax.f32 %v814_v31, 0.0 }
 0x11d   : > { %v714_v36 = vpop.f32.mrf.mxu0  ;;  %v818_v37 = vpop.f32.mrf.mxu1 }
 0x11e   : > { %950 = vst [vmem:[%s1542_s9 + $0x18] sm:$0xff] %v900_v34  ;;  %976 = vst [vmem:[%s1542_s9 + $0xe8] sm:$0xff] %v926_v35  ;;  %v715_v38 = vadd.f32 %v1533_v3, %v714_v36  ;;  %v819_v39 = vadd.f32 %v1533_v3, %v818_v37 }
 0x11f   : > { %v716_v40 = vpop.f32.mrf.mxu0  ;;  %v820_v41 = vpop.f32.mrf.mxu1 }
 0x120   : > { %v901_v42 = vmax.f32 %v715_v38, 0.0  ;;  %v927_v43 = vmax.f32 %v819_v39, 0.0 }
 0x121   : > { %v717_v44 = vpop.f32.mrf.mxu0  ;;  %v821_v45 = vpop.f32.mrf.mxu1 }
 0x122   : > { %951 = vst [vmem:[%s1542_s9 + $0x20] sm:$0xff] %v901_v42  ;;  %977 = vst [vmem:[%s1542_s9 + $0xf0] sm:$0xff] %v927_v43  ;;  %v718_v46 = vadd.f32 %v1533_v3, %v717_v44  ;;  %v822_v47 = vadd.f32 %v1533_v3, %v821_v45 }
 0x123   : > { %v719_v48 = vpop.f32.mrf.mxu0  ;;  %v823_v49 = vpop.f32.mrf.mxu1 }
 0x124   : > { %v902_v50 = vmax.f32 %v718_v46, 0.0  ;;  %v928_v51 = vmax.f32 %v822_v47, 0.0 }
 0x125   : > { %v722_v52 = vpop.f32.mrf.mxu0  ;;  %v826_v53 = vpop.f32.mrf.mxu1 }
 0x126   : > { %952 = vst [vmem:[%s1542_s9 + $0x28] sm:$0xff] %v902_v50  ;;  %978 = vst [vmem:[%s1542_s9 + $0xf8] sm:$0xff] %v928_v51  ;;  %v723_v54 = vadd.f32 %v1533_v3, %v722_v52  ;;  %v827_v55 = vadd.f32 %v1533_v3, %v826_v53 }
 0x127   : > { %v724_v56 = vpop.f32.mrf.mxu0  ;;  %v828_v57 = vpop.f32.mrf.mxu1 }
 0x128   : > { %v903_v58 = vmax.f32 %v723_v54, 0.0  ;;  %v929_v59 = vmax.f32 %v827_v55, 0.0 }
 0x129   : > { %v725_v60 = vpop.f32.mrf.mxu0  ;;  %v829_v61 = vpop.f32.mrf.mxu1 }
 0x12a   : > { %953 = vst [vmem:[%s1542_s9 + $0x30] sm:$0xff] %v903_v58  ;;  %979 = vst [vmem:[%s1542_s9 + $0x100] sm:$0xff] %v929_v59  ;;  %v726_v62 = vadd.f32 %v1533_v3, %v725_v60  ;;  %v830_v63 = vadd.f32 %v1533_v3, %v829_v61 }
 0x12b   : > { %v727_v0 = vpop.f32.mrf.mxu0  ;;  %v831_v1 = vpop.f32.mrf.mxu1 }
 0x12c   : > { %v904_v2 = vmax.f32 %v726_v62, 0.0  ;;  %v930_v4 = vmax.f32 %v830_v63, 0.0 }
 0x12d   : > { %v730_v5 = vpop.f32.mrf.mxu0  ;;  %v834_v6 = vpop.f32.mrf.mxu1 }
 0x12e   : > { %954 = vst [vmem:[%s1542_s9 + $0x38] sm:$0xff] %v904_v2  ;;  %980 = vst [vmem:[%s1542_s9 + $0x108] sm:$0xff] %v930_v4  ;;  %v731_v7 = vadd.f32 %v1533_v3, %v730_v5  ;;  %v835_v8 = vadd.f32 %v1533_v3, %v834_v6 }
 0x12f   : > { %v732_v9 = vpop.f32.mrf.mxu0  ;;  %v836_v10 = vpop.f32.mrf.mxu1 }
 0x130   : > { %v905_v11 = vmax.f32 %v731_v7, 0.0  ;;  %v931_v12 = vmax.f32 %v835_v8, 0.0 }
 0x131   : > { %v733_v13 = vpop.f32.mrf.mxu0  ;;  %v837_v14 = vpop.f32.mrf.mxu1 }
 0x132   : > { %955 = vst [vmem:[%s1542_s9 + $0x40] sm:$0xff] %v905_v11  ;;  %981 = vst [vmem:[%s1542_s9 + $0x110] sm:$0xff] %v931_v12  ;;  %v734_v15 = vadd.f32 %v1533_v3, %v733_v13  ;;  %v838_v16 = vadd.f32 %v1533_v3, %v837_v14 }
 0x133   : > { %v735_v17 = vpop.f32.mrf.mxu0  ;;  %v839_v18 = vpop.f32.mrf.mxu1 }
 0x134   : > { %v906_v19 = vmax.f32 %v734_v15, 0.0  ;;  %v932_v20 = vmax.f32 %v838_v16, 0.0 }
 0x135   : > { %v738_v21 = vpop.f32.mrf.mxu0  ;;  %v842_v22 = vpop.f32.mrf.mxu1 }
 0x136   : > { %956 = vst [vmem:[%s1542_s9 + $0x48] sm:$0xff] %v906_v19  ;;  %982 = vst [vmem:[%s1542_s9 + $0x118] sm:$0xff] %v932_v20  ;;  %v739_v23 = vadd.f32 %v1533_v3, %v738_v21  ;;  %v843_v24 = vadd.f32 %v1533_v3, %v842_v22 }
 0x137   : > { %v740_v25 = vpop.f32.mrf.mxu0  ;;  %v844_v26 = vpop.f32.mrf.mxu1 }
 0x138   : > { %v907_v27 = vmax.f32 %v739_v23, 0.0  ;;  %v933_v28 = vmax.f32 %v843_v24, 0.0 }
 0x139   : > { %v741_v29 = vpop.f32.mrf.mxu0  ;;  %v845_v30 = vpop.f32.mrf.mxu1 }
 0x13a   : > { %957 = vst [vmem:[%s1542_s9 + $0x50] sm:$0xff] %v907_v27  ;;  %983 = vst [vmem:[%s1542_s9 + $0x120] sm:$0xff] %v933_v28  ;;  %v742_v31 = vadd.f32 %v1533_v3, %v741_v29  ;;  %v846_v32 = vadd.f32 %v1533_v3, %v845_v30 }
 0x13b   : > { %v743_v33 = vpop.f32.mrf.mxu0  ;;  %v847_v34 = vpop.f32.mrf.mxu1 }
 0x13c   : > { %v908_v35 = vmax.f32 %v742_v31, 0.0  ;;  %v934_v36 = vmax.f32 %v846_v32, 0.0 }
 0x13d   : > { %v746_v37 = vpop.f32.mrf.mxu0  ;;  %v850_v38 = vpop.f32.mrf.mxu1 }
 0x13e   : > { %958 = vst [vmem:[%s1542_s9 + $0x58] sm:$0xff] %v908_v35  ;;  %984 = vst [vmem:[%s1542_s9 + $0x128] sm:$0xff] %v934_v36  ;;  %v747_v39 = vadd.f32 %v1533_v3, %v746_v37  ;;  %v851_v40 = vadd.f32 %v1533_v3, %v850_v38 }
 0x13f   : > { %v748_v41 = vpop.f32.mrf.mxu0  ;;  %v852_v42 = vpop.f32.mrf.mxu1 }
 0x140   : > { %v909_v43 = vmax.f32 %v747_v39, 0.0  ;;  %v935_v44 = vmax.f32 %v851_v40, 0.0 }
 0x141   : > { %v749_v45 = vpop.f32.mrf.mxu0  ;;  %v853_v46 = vpop.f32.mrf.mxu1 }
 0x142   : > { %959 = vst [vmem:[%s1542_s9 + $0x60] sm:$0xff] %v909_v43  ;;  %985 = vst [vmem:[%s1542_s9 + $0x130] sm:$0xff] %v935_v44  ;;  %v750_v47 = vadd.f32 %v1533_v3, %v749_v45  ;;  %v854_v48 = vadd.f32 %v1533_v3, %v853_v46 }
 0x143   : > { %v751_v49 = vpop.f32.mrf.mxu0  ;;  %v855_v50 = vpop.f32.mrf.mxu1 }
 0x144   : > { %v910_v51 = vmax.f32 %v750_v47, 0.0  ;;  %v936_v52 = vmax.f32 %v854_v48, 0.0 }
 0x145   : > { %v754_v53 = vpop.f32.mrf.mxu0  ;;  %v858_v54 = vpop.f32.mrf.mxu1 }
 0x146   : > { %960 = vst [vmem:[%s1542_s9 + $0x68] sm:$0xff] %v910_v51  ;;  %986 = vst [vmem:[%s1542_s9 + $0x138] sm:$0xff] %v936_v52  ;;  %v755_v55 = vadd.f32 %v1533_v3, %v754_v53  ;;  %v859_v56 = vadd.f32 %v1533_v3, %v858_v54 }
 0x147   : > { %v756_v57 = vpop.f32.mrf.mxu0  ;;  %v860_v58 = vpop.f32.mrf.mxu1 }
 0x148   : > { %v911_v59 = vmax.f32 %v755_v55, 0.0  ;;  %v937_v60 = vmax.f32 %v859_v56, 0.0 }
 0x149   : > { %v757_v61 = vpop.f32.mrf.mxu0  ;;  %v861_v62 = vpop.f32.mrf.mxu1 }
 0x14a   : > { %961 = vst [vmem:[%s1542_s9 + $0x70] sm:$0xff] %v911_v59  ;;  %987 = vst [vmem:[%s1542_s9 + $0x140] sm:$0xff] %v937_v60  ;;  %v758_v63 = vadd.f32 %v1533_v3, %v757_v61  ;;  %v862_v0 = vadd.f32 %v1533_v3, %v861_v62 }
 0x14b   : > { %v759_v1 = vpop.f32.mrf.mxu0  ;;  %v863_v2 = vpop.f32.mrf.mxu1 }
 0x14c   : > { %v912_v4 = vmax.f32 %v758_v63, 0.0  ;;  %v938_v5 = vmax.f32 %v862_v0, 0.0 }
 0x14d   : > { %v762_v6 = vpop.f32.mrf.mxu0  ;;  %v866_v7 = vpop.f32.mrf.mxu1 }
 0x14e   : > { %962 = vst [vmem:[%s1542_s9 + $0x78] sm:$0xff] %v912_v4  ;;  %988 = vst [vmem:[%s1542_s9 + $0x148] sm:$0xff] %v938_v5  ;;  %v763_v8 = vadd.f32 %v1533_v3, %v762_v6  ;;  %v867_v9 = vadd.f32 %v1533_v3, %v866_v7 }
 0x14f   : > { %v764_v10 = vpop.f32.mrf.mxu0  ;;  %v868_v11 = vpop.f32.mrf.mxu1 }
 0x150   : > { %v913_v12 = vmax.f32 %v763_v8, 0.0  ;;  %v939_v13 = vmax.f32 %v867_v9, 0.0 }
 0x151   : > { %v765_v14 = vpop.f32.mrf.mxu0  ;;  %v869_v15 = vpop.f32.mrf.mxu1 }
 0x152   : > { %963 = vst [vmem:[%s1542_s9 + $0x80] sm:$0xff] %v913_v12  ;;  %989 = vst [vmem:[%s1542_s9 + $0x150] sm:$0xff] %v939_v13  ;;  %v766_v16 = vadd.f32 %v1533_v3, %v765_v14  ;;  %v870_v17 = vadd.f32 %v1533_v3, %v869_v15 }
 0x153   : > { %v767_v18 = vpop.f32.mrf.mxu0  ;;  %v871_v19 = vpop.f32.mrf.mxu1 }
 0x154   : > { %v914_v20 = vmax.f32 %v766_v16, 0.0  ;;  %v940_v21 = vmax.f32 %v870_v17, 0.0 }
 0x155   : > { %v770_v22 = vpop.f32.mrf.mxu0  ;;  %v874_v23 = vpop.f32.mrf.mxu1 }
 0x156   : > { %964 = vst [vmem:[%s1542_s9 + $0x88] sm:$0xff] %v914_v20  ;;  %990 = vst [vmem:[%s1542_s9 + $0x158] sm:$0xff] %v940_v21  ;;  %v771_v24 = vadd.f32 %v1533_v3, %v770_v22  ;;  %v875_v25 = vadd.f32 %v1533_v3, %v874_v23 }
 0x157   : > { %v772_v26 = vpop.f32.mrf.mxu0  ;;  %v876_v27 = vpop.f32.mrf.mxu1 }
 0x158   : > { %v915_v28 = vmax.f32 %v771_v24, 0.0  ;;  %v941_v29 = vmax.f32 %v875_v25, 0.0 }
 0x159   : > { %v773_v30 = vpop.f32.mrf.mxu0  ;;  %v877_v31 = vpop.f32.mrf.mxu1 }
 0x15a   : > { %965 = vst [vmem:[%s1542_s9 + $0x90] sm:$0xff] %v915_v28  ;;  %991 = vst [vmem:[%s1542_s9 + $0x160] sm:$0xff] %v941_v29  ;;  %v774_v32 = vadd.f32 %v1533_v3, %v773_v30  ;;  %v878_v33 = vadd.f32 %v1533_v3, %v877_v31 }
 0x15b   : > { %v775_v34 = vpop.f32.mrf.mxu0  ;;  %v879_v35 = vpop.f32.mrf.mxu1 }
 0x15c   : > { %v916_v36 = vmax.f32 %v774_v32, 0.0  ;;  %v942_v37 = vmax.f32 %v878_v33, 0.0 }
 0x15d   : > { %v778_v38 = vpop.f32.mrf.mxu0  ;;  %v882_v39 = vpop.f32.mrf.mxu1 }
 0x15e   : > { %966 = vst [vmem:[%s1542_s9 + $0x98] sm:$0xff] %v916_v36  ;;  %992 = vst [vmem:[%s1542_s9 + $0x168] sm:$0xff] %v942_v37  ;;  %v779_v40 = vadd.f32 %v1533_v3, %v778_v38  ;;  %v883_v41 = vadd.f32 %v1533_v3, %v882_v39 }
 0x15f   : > { %v780_v42 = vpop.f32.mrf.mxu0  ;;  %v884_v43 = vpop.f32.mrf.mxu1 }
 0x160   : > { %v917_v44 = vmax.f32 %v779_v40, 0.0  ;;  %v943_v45 = vmax.f32 %v883_v41, 0.0 }
 0x161   : > { %v781_v46 = vpop.f32.mrf.mxu0  ;;  %v885_v47 = vpop.f32.mrf.mxu1 }
 0x162   : > { %967 = vst [vmem:[%s1542_s9 + $0xa0] sm:$0xff] %v917_v44  ;;  %993 = vst [vmem:[%s1542_s9 + $0x170] sm:$0xff] %v943_v45  ;;  %v782_v48 = vadd.f32 %v1533_v3, %v781_v46  ;;  %v886_v49 = vadd.f32 %v1533_v3, %v885_v47 }
 0x163   : > { %v783_v50 = vpop.f32.mrf.mxu0  ;;  %v887_v51 = vpop.f32.mrf.mxu1 }
 0x164   : > { %v918_v52 = vmax.f32 %v782_v48, 0.0  ;;  %v944_v53 = vmax.f32 %v886_v49, 0.0 }
 0x165   : > { %v786_v54 = vpop.f32.mrf.mxu0  ;;  %v890_v55 = vpop.f32.mrf.mxu1 }
 0x166   : > { %968 = vst [vmem:[%s1542_s9 + $0xa8] sm:$0xff] %v918_v52  ;;  %994 = vst [vmem:[%s1542_s9 + $0x178] sm:$0xff] %v944_v53  ;;  %v787_v56 = vadd.f32 %v1533_v3, %v786_v54  ;;  %v891_v57 = vadd.f32 %v1533_v3, %v890_v55 }
 0x167   : > { %v788_v58 = vpop.f32.mrf.mxu0  ;;  %v892_v59 = vpop.f32.mrf.mxu1 }
 0x168   : > { %v919_v60 = vmax.f32 %v787_v56, 0.0  ;;  %v945_v61 = vmax.f32 %v891_v57, 0.0 }
 0x169   : > { %v789_v62 = vpop.f32.mrf.mxu0  ;;  %v893_v63 = vpop.f32.mrf.mxu1 }
 0x16a   : > { %969 = vst [vmem:[%s1542_s9 + $0xb0] sm:$0xff] %v919_v60  ;;  %995 = vst [vmem:[%s1542_s9 + $0x180] sm:$0xff] %v945_v61  ;;  %v790_v0 = vadd.f32 %v1533_v3, %v789_v62  ;;  %v894_v1 = vadd.f32 %v1533_v3, %v893_v63 }
 0x16b   : > { %v791_v2 = vpop.f32.mrf.mxu0  ;;  %v895_v4 = vpop.f32.mrf.mxu1 }
 0x16c   : > { %v920_v5 = vmax.f32 %v790_v0, 0.0  ;;  %v946_v6 = vmax.f32 %v894_v1, 0.0 }
 0x16d   : > { %v794_v7 = vpop.f32.mrf.mxu0 }
 0x16e   : > { %970 = vst [vmem:[%s1542_s9 + $0xb8] sm:$0xff] %v920_v5  ;;  %996 = vst [vmem:[%s1542_s9 + $0x188] sm:$0xff] %v946_v6  ;;  %v795_v8 = vadd.f32 %v1533_v3, %v794_v7 }
 0x16f   : > { %v796_v9 = vpop.f32.mrf.mxu0 }
 0x170   : > { %v921_v10 = vmax.f32 %v795_v8, 0.0 }
 0x171   : > { %v797_v11 = vpop.f32.mrf.mxu0 }
 0x172   : > { %971 = vst [vmem:[%s1542_s9 + $0xc0] sm:$0xff] %v921_v10  ;;  %v798_v12 = vadd.f32 %v1533_v3, %v797_v11 }
 0x173   : > { %v799_v13 = vpop.f32.mrf.mxu0 }
 0x174   : > { %v922_v14 = vmax.f32 %v798_v12, 0.0 }
 0x176   : > { %972 = vst [vmem:[%s1542_s9 + $0xc8] sm:$0xff] %v922_v14 }
 0x177 PF: > { %s13_s14 = sadd.s32 1, %s1349_s14   ;;  %s1655_s12 = smov %s1345_s13 }
 0x178   : > { %p10_p5 = scmp.ge.s32.totalorder %s13_s14, 6   ;;  %s1656_s13 = smov %s1658_s15 }
 0x17a   :  { %12 = sbr.rel (!%p10_p5) target bundleno = 2 (0x2), region = 68 }

// kernel: _lambda_.6
= control target key start
LH: loop header
LB: loop body
LE: loop exit
PB: predicated region body
PF: predicated region fallthrough
CT: control target
= control target key end

     0   :  { %v1588_v0 = vmov 0   ;;  %s2172_s1 = inlined_call_operand.vmem [shape: bf16[512,128], index: 1, kind: input, shape index: {}]   ;;  %s2173_s0 = inlined_call_operand.vmem [shape: bf16[344,512], index: 0, kind: input, shape index: {}]   ;;  %s2174_s2 = inlined_call_operand.vmem [shape: f32[1,128], index: 2, kind: input, shape index: {}]   ;;  %s2175_s3 = inlined_call_operand.vmem [shape: f32[344,128], index: 3, kind: output, shape index: {}]  }
   0x1   :  { %798 = vmatprep.subr.bf16.mxu0 %v1588_v0  ;;  %1006 = vmatprep.subr.bf16.mxu1 %v1588_v0  ;;  %v1426_v1 = vld [vmem:[%s2172_s1 + $0x38] sm:$0xff]   ;;  %v1428_v3 = vld [vmem:[%s2172_s1 + $0x30] sm:$0xff]   ;;  %v1430_v5 = vld [vmem:[%s2172_s1 + $0x28] sm:$0xff]  }
   0x2   :  { %v1427_v2 = vld [vmem:[%s2172_s1 + $0xb8] sm:$0xff]   ;;  %799 = vmatpush1.bf16.msra.mxu0 %v1426_v1  ;;  %v1429_v4 = vld [vmem:[%s2172_s1 + $0xb0] sm:$0xff]   ;;  %v1431_v6 = vld [vmem:[%s2172_s1 + $0xa8] sm:$0xff]  }
   0x3   :  { %1007 = vmatpush1.bf16.msra.mxu1 %v1427_v2  ;;  %800 = vmatprep.subr.bf16.mxu0 %v1588_v0  ;;  %v1432_v7 = vld [vmem:[%s2172_s1 + $0x20] sm:$0xff]   ;;  %v1434_v9 = vld [vmem:[%s2172_s1 + $0x18] sm:$0xff]   ;;  %v1436_v11 = vld [vmem:[%s2172_s1 + $0x10] sm:$0xff]  }
   0x4   :  { %1008 = vmatprep.subr.bf16.mxu1 %v1588_v0  ;;  %v1433_v8 = vld [vmem:[%s2172_s1 + $0xa0] sm:$0xff]   ;;  %v1435_v10 = vld [vmem:[%s2172_s1 + $0x98] sm:$0xff]   ;;  %v1437_v12 = vld [vmem:[%s2172_s1 + $0x90] sm:$0xff]  }
   0x5   :  { %v1438_v13 = vld [vmem:[%s2172_s1 + $0x8] sm:$0xff]   ;;  %v1440_v15 = vld [vmem:[%s2172_s1] sm:$0xff]   ;;  %v1442_v17 = vld [vmem:[%s2172_s1 + $0x78] sm:$0xff]  }
   0x6   :  { %801 = vmatpush1.bf16.msra.mxu0 %v1428_v3  ;;  %v1439_v14 = vld [vmem:[%s2172_s1 + $0x88] sm:$0xff]   ;;  %v1441_v16 = vld [vmem:[%s2172_s1 + $0x80] sm:$0xff]   ;;  %v1443_v18 = vld [vmem:[%s2172_s1 + $0xf8] sm:$0xff]  }
   0x7   :  { %1009 = vmatpush1.bf16.msra.mxu1 %v1429_v4  ;;  %802 = vmatprep.subr.bf16.mxu0 %v1588_v0  ;;  %v1460_v19 = vld [vmem:[%s2173_s0 + $0x4] ss:$16 sps:$4 sm:$0xff]   ;;  %v1463_v21 = vld [vmem:[%s2173_s0 + $0xc] ss:$16 sps:$4 sm:$0xff]   ;;  %v1458_v35 = vld [vmem:[%s2173_s0] ss:$16 sps:$4 sm:$0xff]  }
   0x8   :  { %1010 = vmatprep.subr.bf16.mxu1 %v1588_v0  ;;  %v1444_v20 = vld [vmem:[%s2172_s1 + $0x70] sm:$0xff]   ;;  %830 = vmatprep.mubr.bf16.mxu0 %v1460_v19  ;;  %v1446_v23 = vld [vmem:[%s2172_s1 + $0x68] sm:$0xff]   ;;  %v1448_v25 = vld [vmem:[%s2172_s1 + $0x60] sm:$0xff]  }
   0x9   :  { %v1445_v22 = vld [vmem:[%s2172_s1 + $0xf0] sm:$0xff]   ;;  %1038 = vmatprep.mubr.bf16.mxu1 %v1463_v21  ;;  %v1447_v24 = vld [vmem:[%s2172_s1 + $0xe8] sm:$0xff]   ;;  %v1449_v26 = vld [vmem:[%s2172_s1 + $0xe0] sm:$0xff]  }
   0xa   :  { %803 = vmatpush1.bf16.msra.mxu0 %v1430_v5  ;;  %v1450_v27 = vld [vmem:[%s2172_s1 + $0x58] sm:$0xff]   ;;  %v1452_v29 = vld [vmem:[%s2172_s1 + $0x50] sm:$0xff]   ;;  %v1454_v31 = vld [vmem:[%s2172_s1 + $0x48] sm:$0xff]  }
   0xb   :  { %1011 = vmatpush1.bf16.msra.mxu1 %v1431_v6  ;;  %804 = vmatprep.subr.bf16.mxu0 %v1588_v0  ;;  %v1451_v28 = vld [vmem:[%s2172_s1 + $0xd8] sm:$0xff]   ;;  %v1453_v30 = vld [vmem:[%s2172_s1 + $0xd0] sm:$0xff]   ;;  %v1455_v32 = vld [vmem:[%s2172_s1 + $0xc8] sm:$0xff]  }
   0xc   :  { %1012 = vmatprep.subr.bf16.mxu1 %v1588_v0  ;;  %v1456_v33 = vld [vmem:[%s2172_s1 + $0x40] sm:$0xff]   ;;  %v1461_v36 = vld [vmem:[%s2173_s0 + $0x8] ss:$16 sps:$4 sm:$0xff]   ;;  %v1466_v38 = vld [vmem:[%s2173_s0 + $0x2c] ss:$16 sps:$4 sm:$0xff]  }
   0xd   :  { %v1457_v34 = vld [vmem:[%s2172_s1 + $0xc0] sm:$0xff]   ;;  %v1469_v40 = vld [vmem:[%s2173_s0 + $0x28] ss:$16 sps:$4 sm:$0xff]   ;;  %v1472_v42 = vld [vmem:[%s2173_s0 + $0x4c] ss:$16 sps:$4 sm:$0xff]  }
   0xe   :  { %805 = vmatpush1.bf16.msra.mxu0 %v1432_v7  ;;  %v1464_v37 = vld [vmem:[%s2173_s0 + $0x24] ss:$16 sps:$4 sm:$0xff]   ;;  %v1468_v39 = vld [vmem:[%s2173_s0 + $0x20] ss:$16 sps:$4 sm:$0xff]   ;;  %v1475_v44 = vld [vmem:[%s2173_s0 + $0x48] ss:$16 sps:$4 sm:$0xff]  }
   0xf   :  { %1013 = vmatpush1.bf16.msra.mxu1 %v1433_v8  ;;  %806 = vmatprep.subr.bf16.mxu0 %v1588_v0  ;;  %v1470_v41 = vld [vmem:[%s2173_s0 + $0x44] ss:$16 sps:$4 sm:$0xff]   ;;  %v1474_v43 = vld [vmem:[%s2173_s0 + $0x40] ss:$16 sps:$4 sm:$0xff]   ;;  %v1478_v46 = vld [vmem:[%s2173_s0 + $0x6c] ss:$16 sps:$4 sm:$0xff]  }
  0x10   :  { %1014 = vmatprep.subr.bf16.mxu1 %v1588_v0  ;;  %v1476_v45 = vld [vmem:[%s2173_s0 + $0x64] ss:$16 sps:$4 sm:$0xff]   ;;  %v1480_v47 = vld [vmem:[%s2173_s0 + $0x60] ss:$16 sps:$4 sm:$0xff]   ;;  %v1481_v48 = vld [vmem:[%s2173_s0 + $0x68] ss:$16 sps:$4 sm:$0xff]  }
  0x11   :  { %v1482_v49 = vld [vmem:[%s2173_s0 + $0x84] ss:$16 sps:$4 sm:$0xff]   ;;  %v1484_v50 = vld [vmem:[%s2173_s0 + $0x8c] ss:$16 sps:$4 sm:$0xff]   ;;  %v1486_v51 = vld [vmem:[%s2173_s0 + $0x80] ss:$16 sps:$4 sm:$0xff]  }
  0x12   :  { %807 = vmatpush1.bf16.msra.mxu0 %v1434_v9  ;;  %v1487_v52 = vld [vmem:[%s2173_s0 + $0x88] ss:$16 sps:$4 sm:$0xff]   ;;  %v1488_v53 = vld [vmem:[%s2173_s0 + $0xa4] ss:$16 sps:$4 sm:$0xff]   ;;  %v1490_v54 = vld [vmem:[%s2173_s0 + $0xac] ss:$16 sps:$4 sm:$0xff]  }
  0x13   :  { %1015 = vmatpush1.bf16.msra.mxu1 %v1435_v10  ;;  %808 = vmatprep.subr.bf16.mxu0 %v1588_v0  ;;  %v1492_v55 = vld [vmem:[%s2173_s0 + $0xa0] ss:$16 sps:$4 sm:$0xff]   ;;  %v1493_v56 = vld [vmem:[%s2173_s0 + $0xa8] ss:$16 sps:$4 sm:$0xff]   ;;  %v1494_v57 = vld [vmem:[%s2173_s0 + $0xc4] ss:$16 sps:$4 sm:$0xff]  }
  0x14   :  { %1016 = vmatprep.subr.bf16.mxu1 %v1588_v0  ;;  %v1496_v58 = vld [vmem:[%s2173_s0 + $0xcc] ss:$16 sps:$4 sm:$0xff]   ;;  %v1498_v59 = vld [vmem:[%s2173_s0 + $0xc0] ss:$16 sps:$4 sm:$0xff]   ;;  %v1499_v60 = vld [vmem:[%s2173_s0 + $0xc8] ss:$16 sps:$4 sm:$0xff]  }
  0x15   :  { %v1500_v61 = vld [vmem:[%s2173_s0 + $0xe4] ss:$16 sps:$4 sm:$0xff]   ;;  %v1502_v62 = vld [vmem:[%s2173_s0 + $0xec] ss:$16 sps:$4 sm:$0xff]   ;;  %v1504_v63 = vld [vmem:[%s2173_s0 + $0xe0] ss:$16 sps:$4 sm:$0xff]  }
  0x16   :  { %809 = vmatpush1.bf16.msra.mxu0 %v1436_v11  ;;  %v1506_v1 = vld [vmem:[%s2173_s0 + $0x104] ss:$16 sps:$4 sm:$0xff]   ;;  %v1508_v2 = vld [vmem:[%s2173_s0 + $0x10c] ss:$16 sps:$4 sm:$0xff]   ;;  %v1510_v3 = vld [vmem:[%s2173_s0 + $0x100] ss:$16 sps:$4 sm:$0xff]  }
  0x17   :  { %1017 = vmatpush1.bf16.msra.mxu1 %v1437_v12  ;;  %810 = vmatprep.subr.bf16.mxu0 %v1588_v0  ;;  %v1511_v4 = vld [vmem:[%s2173_s0 + $0x108] ss:$16 sps:$4 sm:$0xff]   ;;  %v1512_v5 = vld [vmem:[%s2173_s0 + $0x124] ss:$16 sps:$4 sm:$0xff]   ;;  %v1514_v6 = vld [vmem:[%s2173_s0 + $0x12c] ss:$16 sps:$4 sm:$0xff]  }
  0x18   :  { %1018 = vmatprep.subr.bf16.mxu1 %v1588_v0  ;;  %v1516_v7 = vld [vmem:[%s2173_s0 + $0x120] ss:$16 sps:$4 sm:$0xff]   ;;  %v1517_v8 = vld [vmem:[%s2173_s0 + $0x128] ss:$16 sps:$4 sm:$0xff]   ;;  %v1518_v9 = vld [vmem:[%s2173_s0 + $0x144] ss:$16 sps:$4 sm:$0xff]  }
  0x19   :  { %v1520_v10 = vld [vmem:[%s2173_s0 + $0x14c] ss:$16 sps:$4 sm:$0xff]   ;;  %v1522_v11 = vld [vmem:[%s2173_s0 + $0x140] ss:$16 sps:$4 sm:$0xff]   ;;  %v1523_v12 = vld [vmem:[%s2173_s0 + $0x148] ss:$16 sps:$4 sm:$0xff]  }
  0x1a   :  { %811 = vmatpush1.bf16.msra.mxu0 %v1438_v13  ;;  %v1524_v13 = vld [vmem:[%s2173_s0 + $0x164] ss:$16 sps:$4 sm:$0xff]   ;;  %v1534_v19 = vld [vmem:[%s2173_s0 + $0x180] ss:$16 sps:$4 sm:$0xff]  }
  0x1b   :  { %1019 = vmatpush1.bf16.msra.mxu1 %v1439_v14  ;;  %812 = vmatprep.subr.bf16.mxu0 %v1588_v0  ;;  %v1526_v14 = vld [vmem:[%s2173_s0 + $0x16c] ss:$16 sps:$4 sm:$0xff]   ;;  %v1536_v21 = vld [vmem:[%s2173_s0 + $0x1a4] ss:$16 sps:$4 sm:$0xff]  }
  0x1c   :  { %1020 = vmatprep.subr.bf16.mxu1 %v1588_v0 }
  0x1e   :  { %813 = vmatpush1.bf16.msra.mxu0 %v1440_v15  ;;  %v1528_v15 = vld [vmem:[%s2173_s0 + $0x160] ss:$16 sps:$4 sm:$0xff]  }
  0x1f   :  { %1021 = vmatpush1.bf16.msra.mxu1 %v1441_v16  ;;  %814 = vmatprep.subr.bf16.mxu0 %v1588_v0  ;;  %v1529_v16 = vld [vmem:[%s2173_s0 + $0x168] ss:$16 sps:$4 sm:$0xff]  }
  0x20   :  { %1022 = vmatprep.subr.bf16.mxu1 %v1588_v0 }
  0x22   :  { %815 = vmatpush2.bf16.msra.mxu0 %v1442_v17  ;;  %v1530_v17 = vld [vmem:[%s2173_s0 + $0x184] ss:$16 sps:$4 sm:$0xff]  }
  0x23   :  { %1023 = vmatpush2.bf16.msra.mxu1 %v1443_v18  ;;  %816 = vmatprep.subr.bf16.mxu0 %v1588_v0  ;;  %v1532_v18 = vld [vmem:[%s2173_s0 + $0x18c] ss:$16 sps:$4 sm:$0xff]  }
  0x24   :  { %1024 = vmatprep.subr.bf16.mxu1 %v1588_v0 }
  0x26   :  { %817 = vmatpush2.bf16.msra.mxu0 %v1444_v20  ;;  %v1535_v20 = vld [vmem:[%s2173_s0 + $0x188] ss:$16 sps:$4 sm:$0xff]  }
  0x27   :  { %1025 = vmatpush2.bf16.msra.mxu1 %v1445_v22  ;;  %818 = vmatprep.subr.bf16.mxu0 %v1588_v0  ;;  %v1538_v22 = vld [vmem:[%s2173_s0 + $0x1ac] ss:$16 sps:$4 sm:$0xff]  }
  0x28   :  { %1026 = vmatprep.subr.bf16.mxu1 %v1588_v0 }
  0x2a   :  { %819 = vmatpush2.bf16.msra.mxu0 %v1446_v23  ;;  %v1540_v23 = vld [vmem:[%s2173_s0 + $0x1a0] ss:$16 sps:$4 sm:$0xff]  }
  0x2b   :  { %1027 = vmatpush2.bf16.msra.mxu1 %v1447_v24  ;;  %820 = vmatprep.subr.bf16.mxu0 %v1588_v0  ;;  %v1541_v24 = vld [vmem:[%s2173_s0 + $0x1a8] ss:$16 sps:$4 sm:$0xff]  }
  0x2c   :  { %1028 = vmatprep.subr.bf16.mxu1 %v1588_v0 }
  0x2e   :  { %821 = vmatpush2.bf16.msra.mxu0 %v1448_v25  ;;  %v1542_v25 = vld [vmem:[%s2173_s0 + $0x1c4] ss:$16 sps:$4 sm:$0xff]  }
  0x2f   :  { %1029 = vmatpush2.bf16.msra.mxu1 %v1449_v26  ;;  %822 = vmatprep.subr.bf16.mxu0 %v1588_v0  ;;  %v1544_v26 = vld [vmem:[%s2173_s0 + $0x1cc] ss:$16 sps:$4 sm:$0xff]  }
  0x30   :  { %1030 = vmatprep.subr.bf16.mxu1 %v1588_v0 }
  0x32   :  { %823 = vmatpush2.bf16.msra.mxu0 %v1450_v27  ;;  %v1546_v27 = vld [vmem:[%s2173_s0 + $0x1c0] ss:$16 sps:$4 sm:$0xff]  }
  0x33   :  { %1031 = vmatpush2.bf16.msra.mxu1 %v1451_v28  ;;  %824 = vmatprep.subr.bf16.mxu0 %v1588_v0  ;;  %v1547_v28 = vld [vmem:[%s2173_s0 + $0x1c8] ss:$16 sps:$4 sm:$0xff]  }
  0x34   :  { %1032 = vmatprep.subr.bf16.mxu1 %v1588_v0 }
  0x36   :  { %825 = vmatpush2.bf16.msra.mxu0 %v1452_v29  ;;  %v1548_v29 = vld [vmem:[%s2173_s0 + $0x1e4] ss:$16 sps:$4 sm:$0xff]  }
  0x37   :  { %1033 = vmatpush2.bf16.msra.mxu1 %v1453_v30  ;;  %826 = vmatprep.subr.bf16.mxu0 %v1588_v0  ;;  %v1550_v30 = vld [vmem:[%s2173_s0 + $0x1ec] ss:$16 sps:$4 sm:$0xff]  }
  0x38   :  { %1034 = vmatprep.subr.bf16.mxu1 %v1588_v0 }
  0x3a   :  { %827 = vmatpush2.bf16.msra.mxu0 %v1454_v31  ;;  %v1552_v31 = vld [vmem:[%s2173_s0 + $0x1e0] ss:$16 sps:$4 sm:$0xff]  }
  0x3b   :  { %1035 = vmatpush2.bf16.msra.mxu1 %v1455_v32  ;;  %828 = vmatprep.subr.bf16.mxu0 %v1588_v0  ;;  %v1553_v32 = vld [vmem:[%s2173_s0 + $0x1e8] ss:$16 sps:$4 sm:$0xff]  }
  0x3c   :  { %1036 = vmatprep.subr.bf16.mxu1 %v1588_v0  ;;  %v1505_v0 = vld [vmem:[%s2173_s0 + $0xe8] ss:$16 sps:$4 sm:$0xff]  }
  0x3e   :  { %829 = vmatpush2.bf16.msra.mxu0 %v1456_v33  ;;  %v1554_v33 = vld [vmem:[%s2173_s0 + $0x204] ss:$16 sps:$4 sm:$0xff]  }
  0x3f   :  { %1037 = vmatpush2.bf16.msra.mxu1 %v1457_v34  ;;  %v1556_v34 = vld [vmem:[%s2173_s0 + $0x20c] ss:$16 sps:$4 sm:$0xff]  }
  0x41   :  { %831 = vmatmul.mubr.bf16.vlgmr.msra.gmra.mxu0 %v1458_v35  ;;  %v1558_v35 = vld [vmem:[%s2173_s0 + $0x200] ss:$16 sps:$4 sm:$0xff]  }
  0x42   :  { %1039 = vmatmul.mubr.bf16.vlgmr.msra.gmra.mxu1 %v1461_v36  ;;  %838 = vmatprep.mubr.bf16.mxu0 %v1464_v37  ;;  %v1559_v36 = vld [vmem:[%s2173_s0 + $0x208] ss:$16 sps:$4 sm:$0xff]   ;;  %v1560_v37 = vld [vmem:[%s2173_s0 + $0x224] ss:$16 sps:$4 sm:$0xff]  }
  0x43   :  { %1046 = vmatprep.mubr.bf16.mxu1 %v1466_v38  ;;  %v1562_v38 = vld [vmem:[%s2173_s0 + $0x22c] ss:$16 sps:$4 sm:$0xff]  }
  0x49   :  { %839 = vmatmul.mubr.bf16.gmra.mxu0 %v1468_v39  ;;  %v1564_v39 = vld [vmem:[%s2173_s0 + $0x220] ss:$16 sps:$4 sm:$0xff]  }
  0x4a   :  { %1047 = vmatmul.mubr.bf16.gmra.mxu1 %v1469_v40  ;;  %846 = vmatprep.mubr.bf16.mxu0 %v1470_v41  ;;  %v1565_v40 = vld [vmem:[%s2173_s0 + $0x228] ss:$16 sps:$4 sm:$0xff]   ;;  %v1566_v41 = vld [vmem:[%s2173_s0 + $0x244] ss:$16 sps:$4 sm:$0xff]  }
  0x4b   :  { %1054 = vmatprep.mubr.bf16.mxu1 %v1472_v42  ;;  %v1568_v42 = vld [vmem:[%s2173_s0 + $0x24c] ss:$16 sps:$4 sm:$0xff]  }
  0x51   :  { %847 = vmatmul.mubr.bf16.gmra.mxu0 %v1474_v43  ;;  %v1570_v43 = vld [vmem:[%s2173_s0 + $0x240] ss:$16 sps:$4 sm:$0xff]  }
  0x52   :  { %1055 = vmatmul.mubr.bf16.gmra.mxu1 %v1475_v44  ;;  %854 = vmatprep.mubr.bf16.mxu0 %v1476_v45  ;;  %v1571_v44 = vld [vmem:[%s2173_s0 + $0x248] ss:$16 sps:$4 sm:$0xff]   ;;  %v1572_v45 = vld [vmem:[%s2173_s0 + $0x264] ss:$16 sps:$4 sm:$0xff]  }
  0x53   :  { %1062 = vmatprep.mubr.bf16.mxu1 %v1478_v46  ;;  %v1574_v46 = vld [vmem:[%s2173_s0 + $0x26c] ss:$16 sps:$4 sm:$0xff]  }
  0x59   :  { %855 = vmatmul.mubr.bf16.gmra.mxu0 %v1480_v47  ;;  %v1576_v47 = vld [vmem:[%s2173_s0 + $0x260] ss:$16 sps:$4 sm:$0xff]  }
  0x5a   :  { %1063 = vmatmul.mubr.bf16.gmra.mxu1 %v1481_v48  ;;  %862 = vmatprep.mubr.bf16.mxu0 %v1482_v49  ;;  %v1577_v48 = vld [vmem:[%s2173_s0 + $0x268] ss:$16 sps:$4 sm:$0xff]   ;;  %v1578_v49 = vld [vmem:[%s2173_s0 + $0x284] ss:$16 sps:$4 sm:$0xff]  }
  0x5b   :  { %1070 = vmatprep.mubr.bf16.mxu1 %v1484_v50  ;;  %v1580_v50 = vld [vmem:[%s2173_s0 + $0x28c] ss:$16 sps:$4 sm:$0xff]  }
  0x61   :  { %863 = vmatmul.mubr.bf16.gmra.mxu0 %v1486_v51  ;;  %v99_v51 = vld [vmem:[%s2173_s0 + $0x2a0] sm:$0xff] }
  0x62   :  { %1071 = vmatmul.mubr.bf16.gmra.mxu1 %v1487_v52  ;;  %870 = vmatprep.mubr.bf16.mxu0 %v1488_v53  ;;  %v100_v52 = vld [vmem:[%s2173_s0 + $0x2a8] sm:$0xff]  ;;  %v1582_v53 = vld [vmem:[%s2173_s0 + $0x280] ss:$16 sps:$4 sm:$0xff]  }
  0x63   :  { %1078 = vmatprep.mubr.bf16.mxu1 %v1490_v54  ;;  %v1583_v54 = vld [vmem:[%s2173_s0 + $0x288] ss:$16 sps:$4 sm:$0xff]  }
  0x69   :  { %871 = vmatmul.mubr.bf16.gmra.mxu0 %v1492_v55  ;;  %v1390_v55 = vcombine.high %v99_v51, %v99_v51 }
  0x6a   :  { %1079 = vmatmul.mubr.bf16.gmra.mxu1 %v1493_v56  ;;  %878 = vmatprep.mubr.bf16.mxu0 %v1494_v57  ;;  %v1392_v56 = vcombine.high %v100_v52, %v100_v52  ;;  %v1389_v57 = vcombine.low %v99_v51, %v99_v51 }
  0x6b   :  { %1086 = vmatprep.mubr.bf16.mxu1 %v1496_v58  ;;  %v1391_v58 = vcombine.low %v100_v52, %v100_v52 }
  0x71   :  { %879 = vmatmul.mubr.bf16.gmra.mxu0 %v1498_v59  ;;  %v1998_v59 = vld [vmem:[%s2174_s2] ss:$0 sm:$0xff] }
  0x72   :  { %1087 = vmatmul.mubr.bf16.gmra.mxu1 %v1499_v60  ;;  %886 = vmatprep.mubr.bf16.mxu0 %v1500_v61 }
  0x73   :  { %1094 = vmatprep.mubr.bf16.mxu1 %v1502_v62 }
  0x79   :  { %887 = vmatmul.mubr.bf16.gmra.mxu0 %v1504_v63 }
  0x7a   :  { %1095 = vmatmul.mubr.bf16.gmra.mxu1 %v1505_v0  ;;  %894 = vmatprep.mubr.bf16.mxu0 %v1506_v1 }
  0x7b   :  { %1102 = vmatprep.mubr.bf16.mxu1 %v1508_v2 }
  0x81   :  { %895 = vmatmul.mubr.bf16.gmra.mxu0 %v1510_v3 }
  0x82   :  { %1103 = vmatmul.mubr.bf16.gmra.mxu1 %v1511_v4  ;;  %902 = vmatprep.mubr.bf16.mxu0 %v1512_v5 }
  0x83   :  { %1110 = vmatprep.mubr.bf16.mxu1 %v1514_v6 }
  0x89   :  { %903 = vmatmul.mubr.bf16.gmra.mxu0 %v1516_v7 }
  0x8a   :  { %1111 = vmatmul.mubr.bf16.gmra.mxu1 %v1517_v8  ;;  %910 = vmatprep.mubr.bf16.mxu0 %v1518_v9 }
  0x8b   :  { %1118 = vmatprep.mubr.bf16.mxu1 %v1520_v10 }
  0x91   :  { %911 = vmatmul.mubr.bf16.gmra.mxu0 %v1522_v11 }
  0x92   :  { %1119 = vmatmul.mubr.bf16.gmra.mxu1 %v1523_v12  ;;  %918 = vmatprep.mubr.bf16.mxu0 %v1524_v13 }
  0x93   :  { %1126 = vmatprep.mubr.bf16.mxu1 %v1526_v14 }
  0x99   :  { %919 = vmatmul.mubr.bf16.gmra.mxu0 %v1528_v15 }
  0x9a   :  { %1127 = vmatmul.mubr.bf16.gmra.mxu1 %v1529_v16  ;;  %926 = vmatprep.mubr.bf16.mxu0 %v1530_v17 }
  0x9b   :  { %1134 = vmatprep.mubr.bf16.mxu1 %v1532_v18 }
  0xa1   :  { %927 = vmatmul.mubr.bf16.gmra.mxu0 %v1534_v19 }
  0xa2   :  { %1135 = vmatmul.mubr.bf16.gmra.mxu1 %v1535_v20  ;;  %934 = vmatprep.mubr.bf16.mxu0 %v1536_v21 }
  0xa3   :  { %1142 = vmatprep.mubr.bf16.mxu1 %v1538_v22 }
  0xa9   :  { %935 = vmatmul.mubr.bf16.gmra.mxu0 %v1540_v23 }
  0xaa   :  { %1143 = vmatmul.mubr.bf16.gmra.mxu1 %v1541_v24  ;;  %942 = vmatprep.mubr.bf16.mxu0 %v1542_v25 }
  0xab   :  { %1150 = vmatprep.mubr.bf16.mxu1 %v1544_v26 }
  0xb1   :  { %943 = vmatmul.mubr.bf16.gmra.mxu0 %v1546_v27 }
  0xb2   :  { %1151 = vmatmul.mubr.bf16.gmra.mxu1 %v1547_v28  ;;  %950 = vmatprep.mubr.bf16.mxu0 %v1548_v29 }
  0xb3   :  { %1158 = vmatprep.mubr.bf16.mxu1 %v1550_v30 }
  0xb9   :  { %951 = vmatmul.mubr.bf16.gmra.mxu0 %v1552_v31 }
  0xba   :  { %1159 = vmatmul.mubr.bf16.gmra.mxu1 %v1553_v32  ;;  %958 = vmatprep.mubr.bf16.mxu0 %v1554_v33 }
  0xbb   :  { %1166 = vmatprep.mubr.bf16.mxu1 %v1556_v34 }
  0xc1   :  { %959 = vmatmul.mubr.bf16.gmra.mxu0 %v1558_v35 }
  0xc2   :  { %1167 = vmatmul.mubr.bf16.gmra.mxu1 %v1559_v36  ;;  %966 = vmatprep.mubr.bf16.mxu0 %v1560_v37 }
  0xc3   :  { %1174 = vmatprep.mubr.bf16.mxu1 %v1562_v38 }
  0xc9   :  { %967 = vmatmul.mubr.bf16.gmra.mxu0 %v1564_v39 }
  0xca   :  { %1175 = vmatmul.mubr.bf16.gmra.mxu1 %v1565_v40  ;;  %974 = vmatprep.mubr.bf16.mxu0 %v1566_v41 }
  0xcb   :  { %1182 = vmatprep.mubr.bf16.mxu1 %v1568_v42 }
  0xd1   :  { %975 = vmatmul.mubr.bf16.gmra.mxu0 %v1570_v43 }
  0xd2   :  { %1183 = vmatmul.mubr.bf16.gmra.mxu1 %v1571_v44  ;;  %982 = vmatprep.mubr.bf16.mxu0 %v1572_v45 }
  0xd3   :  { %1190 = vmatprep.mubr.bf16.mxu1 %v1574_v46 }
  0xd9   :  { %983 = vmatmul.mubr.bf16.gmra.mxu0 %v1576_v47 }
  0xda   :  { %1191 = vmatmul.mubr.bf16.gmra.mxu1 %v1577_v48  ;;  %990 = vmatprep.mubr.bf16.mxu0 %v1578_v49 }
  0xdb   :  { %1198 = vmatprep.mubr.bf16.mxu1 %v1580_v50 }
  0xe1   :  { %991 = vmatmul.mubr.bf16.gmra.mxu0 %v1582_v53 }
  0xe2   :  { %1199 = vmatmul.mubr.bf16.gmra.mxu1 %v1583_v54  ;;  %998 = vmatprep.mubr.bf16.mxu0 %v1390_v55 }
  0xe3   :  { %1206 = vmatprep.mubr.bf16.mxu1 %v1392_v56 }
  0xe9   :  { %999 = vmatmul.mubr.bf16.gmra.mxu0 %v1389_v57 }
  0xea   :  { %1207 = vmatmul.mubr.bf16.gmra.mxu1 %v1391_v58 }
 0x101   :  { %v832_v60 = vpop.f32.mrf.mxu0 }
 0x102   :  { %v833_v61 = vadd.f32 %v1998_v59, %v832_v60  ;;  %v1040_v62 = vpop.f32.mrf.mxu1 }
 0x103   :  { %v834_v63 = vpop.f32.mrf.mxu0 }
 0x104   :  { %v1041_v0 = vadd.f32 %v1040_v62, %v833_v61  ;;  %v1042_v1 = vpop.f32.mrf.mxu1 }
 0x105   :  { %v835_v2 = vpop.f32.mrf.mxu0 }
 0x106   :  { %v1214_v3 = vmax.f32 %v1041_v0, 0.0  ;;  %v836_v4 = vadd.f32 %v1998_v59, %v835_v2  ;;  %v1043_v5 = vpop.f32.mrf.mxu1 }
 0x107   :  { %v837_v6 = vpop.f32.mrf.mxu0 }
 0x108   :  { %1257 = vst [vmem:[%s2175_s3] sm:$0xff] %v1214_v3  ;;  %v1044_v7 = vadd.f32 %v1043_v5, %v836_v4  ;;  %v1045_v8 = vpop.f32.mrf.mxu1 }
 0x109   :  { %v840_v9 = vpop.f32.mrf.mxu0 }
 0x10a   :  { %v1215_v10 = vmax.f32 %v1044_v7, 0.0  ;;  %v841_v11 = vadd.f32 %v1998_v59, %v840_v9  ;;  %v1048_v12 = vpop.f32.mrf.mxu1 }
 0x10b   :  { %v842_v13 = vpop.f32.mrf.mxu0 }
 0x10c   :  { %1258 = vst [vmem:[%s2175_s3 + $0x8] sm:$0xff] %v1215_v10  ;;  %v1049_v14 = vadd.f32 %v1048_v12, %v841_v11  ;;  %v1050_v15 = vpop.f32.mrf.mxu1 }
 0x10d   :  { %v843_v16 = vpop.f32.mrf.mxu0 }
 0x10e   :  { %v1216_v17 = vmax.f32 %v1049_v14, 0.0  ;;  %v844_v18 = vadd.f32 %v1998_v59, %v843_v16  ;;  %v1051_v19 = vpop.f32.mrf.mxu1 }
 0x10f   :  { %v845_v20 = vpop.f32.mrf.mxu0 }
 0x110   :  { %1259 = vst [vmem:[%s2175_s3 + $0x10] sm:$0xff] %v1216_v17  ;;  %v1052_v21 = vadd.f32 %v1051_v19, %v844_v18  ;;  %v1053_v22 = vpop.f32.mrf.mxu1 }
 0x111   :  { %v848_v23 = vpop.f32.mrf.mxu0 }
 0x112   :  { %v1217_v24 = vmax.f32 %v1052_v21, 0.0  ;;  %v849_v25 = vadd.f32 %v1998_v59, %v848_v23  ;;  %v1056_v26 = vpop.f32.mrf.mxu1 }
 0x113   :  { %v850_v27 = vpop.f32.mrf.mxu0 }
 0x114   :  { %1260 = vst [vmem:[%s2175_s3 + $0x18] sm:$0xff] %v1217_v24  ;;  %v1057_v28 = vadd.f32 %v1056_v26, %v849_v25  ;;  %v1058_v29 = vpop.f32.mrf.mxu1 }
 0x115   :  { %v851_v30 = vpop.f32.mrf.mxu0 }
 0x116   :  { %v1218_v31 = vmax.f32 %v1057_v28, 0.0  ;;  %v852_v32 = vadd.f32 %v1998_v59, %v851_v30  ;;  %v1059_v33 = vpop.f32.mrf.mxu1 }
 0x117   :  { %v853_v34 = vpop.f32.mrf.mxu0 }
 0x118   :  { %1261 = vst [vmem:[%s2175_s3 + $0x20] sm:$0xff] %v1218_v31  ;;  %v1060_v35 = vadd.f32 %v1059_v33, %v852_v32  ;;  %v1061_v36 = vpop.f32.mrf.mxu1 }
 0x119   :  { %v856_v37 = vpop.f32.mrf.mxu0 }
 0x11a   :  { %v1219_v38 = vmax.f32 %v1060_v35, 0.0  ;;  %v857_v39 = vadd.f32 %v1998_v59, %v856_v37  ;;  %v1064_v40 = vpop.f32.mrf.mxu1 }
 0x11b   :  { %v858_v41 = vpop.f32.mrf.mxu0 }
 0x11c   :  { %1262 = vst [vmem:[%s2175_s3 + $0x28] sm:$0xff] %v1219_v38  ;;  %v1065_v42 = vadd.f32 %v1064_v40, %v857_v39  ;;  %v1066_v43 = vpop.f32.mrf.mxu1 }
 0x11d   :  { %v859_v44 = vpop.f32.mrf.mxu0 }
 0x11e   :  { %v1220_v45 = vmax.f32 %v1065_v42, 0.0  ;;  %v860_v46 = vadd.f32 %v1998_v59, %v859_v44  ;;  %v1067_v47 = vpop.f32.mrf.mxu1 }
 0x11f   :  { %v861_v48 = vpop.f32.mrf.mxu0 }
 0x120   :  { %1263 = vst [vmem:[%s2175_s3 + $0x30] sm:$0xff] %v1220_v45  ;;  %v1068_v49 = vadd.f32 %v1067_v47, %v860_v46  ;;  %v1069_v50 = vpop.f32.mrf.mxu1 }
 0x121   :  { %v864_v51 = vpop.f32.mrf.mxu0 }
 0x122   :  { %v1221_v52 = vmax.f32 %v1068_v49, 0.0  ;;  %v865_v53 = vadd.f32 %v1998_v59, %v864_v51  ;;  %v1072_v54 = vpop.f32.mrf.mxu1 }
 0x123   :  { %v866_v55 = vpop.f32.mrf.mxu0 }
 0x124   :  { %1264 = vst [vmem:[%s2175_s3 + $0x38] sm:$0xff] %v1221_v52  ;;  %v1073_v56 = vadd.f32 %v1072_v54, %v865_v53  ;;  %v1074_v57 = vpop.f32.mrf.mxu1 }
 0x125   :  { %v867_v58 = vpop.f32.mrf.mxu0 }
 0x126   :  { %v1222_v60 = vmax.f32 %v1073_v56, 0.0  ;;  %v868_v61 = vadd.f32 %v1998_v59, %v867_v58  ;;  %v1075_v62 = vpop.f32.mrf.mxu1 }
 0x127   :  { %v869_v63 = vpop.f32.mrf.mxu0 }
 0x128   :  { %1265 = vst [vmem:[%s2175_s3 + $0x40] sm:$0xff] %v1222_v60  ;;  %v1076_v0 = vadd.f32 %v1075_v62, %v868_v61  ;;  %v1077_v1 = vpop.f32.mrf.mxu1 }
 0x129   :  { %v872_v2 = vpop.f32.mrf.mxu0 }
 0x12a   :  { %v1223_v3 = vmax.f32 %v1076_v0, 0.0  ;;  %v873_v4 = vadd.f32 %v1998_v59, %v872_v2  ;;  %v1080_v5 = vpop.f32.mrf.mxu1 }
 0x12b   :  { %v874_v6 = vpop.f32.mrf.mxu0 }
 0x12c   :  { %1266 = vst [vmem:[%s2175_s3 + $0x48] sm:$0xff] %v1223_v3  ;;  %v1081_v7 = vadd.f32 %v1080_v5, %v873_v4  ;;  %v1082_v8 = vpop.f32.mrf.mxu1 }
 0x12d   :  { %v875_v9 = vpop.f32.mrf.mxu0 }
 0x12e   :  { %v1224_v10 = vmax.f32 %v1081_v7, 0.0  ;;  %v876_v11 = vadd.f32 %v1998_v59, %v875_v9  ;;  %v1083_v12 = vpop.f32.mrf.mxu1 }
 0x12f   :  { %v877_v13 = vpop.f32.mrf.mxu0 }
 0x130   :  { %1267 = vst [vmem:[%s2175_s3 + $0x50] sm:$0xff] %v1224_v10  ;;  %v1084_v14 = vadd.f32 %v1083_v12, %v876_v11  ;;  %v1085_v15 = vpop.f32.mrf.mxu1 }
 0x131   :  { %v880_v16 = vpop.f32.mrf.mxu0 }
 0x132   :  { %v1225_v17 = vmax.f32 %v1084_v14, 0.0  ;;  %v881_v18 = vadd.f32 %v1998_v59, %v880_v16  ;;  %v1088_v19 = vpop.f32.mrf.mxu1 }
 0x133   :  { %v882_v20 = vpop.f32.mrf.mxu0 }
 0x134   :  { %1268 = vst [vmem:[%s2175_s3 + $0x58] sm:$0xff] %v1225_v17  ;;  %v1089_v21 = vadd.f32 %v1088_v19, %v881_v18  ;;  %v1090_v22 = vpop.f32.mrf.mxu1 }
 0x135   :  { %v883_v23 = vpop.f32.mrf.mxu0 }
 0x136   :  { %v1226_v24 = vmax.f32 %v1089_v21, 0.0  ;;  %v884_v25 = vadd.f32 %v1998_v59, %v883_v23  ;;  %v1091_v26 = vpop.f32.mrf.mxu1 }
 0x137   :  { %v885_v27 = vpop.f32.mrf.mxu0 }
 0x138   :  { %1269 = vst [vmem:[%s2175_s3 + $0x60] sm:$0xff] %v1226_v24  ;;  %v1092_v28 = vadd.f32 %v1091_v26, %v884_v25  ;;  %v1093_v29 = vpop.f32.mrf.mxu1 }
 0x139   :  { %v888_v30 = vpop.f32.mrf.mxu0 }
 0x13a   :  { %v1227_v31 = vmax.f32 %v1092_v28, 0.0  ;;  %v889_v32 = vadd.f32 %v1998_v59, %v888_v30  ;;  %v1096_v33 = vpop.f32.mrf.mxu1 }
 0x13b   :  { %v890_v34 = vpop.f32.mrf.mxu0 }
 0x13c   :  { %1270 = vst [vmem:[%s2175_s3 + $0x68] sm:$0xff] %v1227_v31  ;;  %v1097_v35 = vadd.f32 %v1096_v33, %v889_v32  ;;  %v1098_v36 = vpop.f32.mrf.mxu1 }
 0x13d   :  { %v891_v37 = vpop.f32.mrf.mxu0 }
 0x13e   :  { %v1228_v38 = vmax.f32 %v1097_v35, 0.0  ;;  %v892_v39 = vadd.f32 %v1998_v59, %v891_v37  ;;  %v1099_v40 = vpop.f32.mrf.mxu1 }
 0x13f   :  { %v893_v41 = vpop.f32.mrf.mxu0 }
 0x140   :  { %1271 = vst [vmem:[%s2175_s3 + $0x70] sm:$0xff] %v1228_v38  ;;  %v1100_v42 = vadd.f32 %v1099_v40, %v892_v39  ;;  %v1101_v43 = vpop.f32.mrf.mxu1 }
 0x141   :  { %v896_v44 = vpop.f32.mrf.mxu0 }
 0x142   :  { %v1229_v45 = vmax.f32 %v1100_v42, 0.0  ;;  %v897_v46 = vadd.f32 %v1998_v59, %v896_v44  ;;  %v1104_v47 = vpop.f32.mrf.mxu1 }
 0x143   :  { %v898_v48 = vpop.f32.mrf.mxu0 }
 0x144   :  { %1272 = vst [vmem:[%s2175_s3 + $0x78] sm:$0xff] %v1229_v45  ;;  %v1105_v49 = vadd.f32 %v1104_v47, %v897_v46  ;;  %v1106_v50 = vpop.f32.mrf.mxu1 }
 0x145   :  { %v899_v51 = vpop.f32.mrf.mxu0 }
 0x146   :  { %v1230_v52 = vmax.f32 %v1105_v49, 0.0  ;;  %v900_v53 = vadd.f32 %v1998_v59, %v899_v51  ;;  %v1107_v54 = vpop.f32.mrf.mxu1 }
 0x147   :  { %v901_v55 = vpop.f32.mrf.mxu0 }
 0x148   :  { %1273 = vst [vmem:[%s2175_s3 + $0x80] sm:$0xff] %v1230_v52  ;;  %v1108_v56 = vadd.f32 %v1107_v54, %v900_v53  ;;  %v1109_v57 = vpop.f32.mrf.mxu1 }
 0x149   :  { %v904_v58 = vpop.f32.mrf.mxu0 }
 0x14a   :  { %v1231_v60 = vmax.f32 %v1108_v56, 0.0  ;;  %v905_v61 = vadd.f32 %v1998_v59, %v904_v58  ;;  %v1112_v62 = vpop.f32.mrf.mxu1 }
 0x14b   :  { %v906_v63 = vpop.f32.mrf.mxu0 }
 0x14c   :  { %1274 = vst [vmem:[%s2175_s3 + $0x88] sm:$0xff] %v1231_v60  ;;  %v1113_v0 = vadd.f32 %v1112_v62, %v905_v61  ;;  %v1114_v1 = vpop.f32.mrf.mxu1 }
 0x14d   :  { %v907_v2 = vpop.f32.mrf.mxu0 }
 0x14e   :  { %v1232_v3 = vmax.f32 %v1113_v0, 0.0  ;;  %v908_v4 = vadd.f32 %v1998_v59, %v907_v2  ;;  %v1115_v5 = vpop.f32.mrf.mxu1 }
 0x14f   :  { %v909_v6 = vpop.f32.mrf.mxu0 }
 0x150   :  { %1275 = vst [vmem:[%s2175_s3 + $0x90] sm:$0xff] %v1232_v3  ;;  %v1116_v7 = vadd.f32 %v1115_v5, %v908_v4  ;;  %v1117_v8 = vpop.f32.mrf.mxu1 }
 0x151   :  { %v912_v9 = vpop.f32.mrf.mxu0 }
 0x152   :  { %v1233_v10 = vmax.f32 %v1116_v7, 0.0  ;;  %v913_v11 = vadd.f32 %v1998_v59, %v912_v9  ;;  %v1120_v12 = vpop.f32.mrf.mxu1 }
 0x153   :  { %v914_v13 = vpop.f32.mrf.mxu0 }
 0x154   :  { %1276 = vst [vmem:[%s2175_s3 + $0x98] sm:$0xff] %v1233_v10  ;;  %v1121_v14 = vadd.f32 %v1120_v12, %v913_v11  ;;  %v1122_v15 = vpop.f32.mrf.mxu1 }
 0x155   :  { %v915_v16 = vpop.f32.mrf.mxu0 }
 0x156   :  { %v1234_v17 = vmax.f32 %v1121_v14, 0.0  ;;  %v916_v18 = vadd.f32 %v1998_v59, %v915_v16  ;;  %v1123_v19 = vpop.f32.mrf.mxu1 }
 0x157   :  { %v917_v20 = vpop.f32.mrf.mxu0 }
 0x158   :  { %1277 = vst [vmem:[%s2175_s3 + $0xa0] sm:$0xff] %v1234_v17  ;;  %v1124_v21 = vadd.f32 %v1123_v19, %v916_v18  ;;  %v1125_v22 = vpop.f32.mrf.mxu1 }
 0x159   :  { %v920_v23 = vpop.f32.mrf.mxu0 }
 0x15a   :  { %v1235_v24 = vmax.f32 %v1124_v21, 0.0  ;;  %v921_v25 = vadd.f32 %v1998_v59, %v920_v23  ;;  %v1128_v26 = vpop.f32.mrf.mxu1 }
 0x15b   :  { %v922_v27 = vpop.f32.mrf.mxu0 }
 0x15c   :  { %1278 = vst [vmem:[%s2175_s3 + $0xa8] sm:$0xff] %v1235_v24  ;;  %v1129_v28 = vadd.f32 %v1128_v26, %v921_v25  ;;  %v1130_v29 = vpop.f32.mrf.mxu1 }
 0x15d   :  { %v923_v30 = vpop.f32.mrf.mxu0 }
 0x15e   :  { %v1236_v31 = vmax.f32 %v1129_v28, 0.0  ;;  %v924_v32 = vadd.f32 %v1998_v59, %v923_v30  ;;  %v1131_v33 = vpop.f32.mrf.mxu1 }
 0x15f   :  { %v925_v34 = vpop.f32.mrf.mxu0 }
 0x160   :  { %1279 = vst [vmem:[%s2175_s3 + $0xb0] sm:$0xff] %v1236_v31  ;;  %v1132_v35 = vadd.f32 %v1131_v33, %v924_v32  ;;  %v1133_v36 = vpop.f32.mrf.mxu1 }
 0x161   :  { %v928_v37 = vpop.f32.mrf.mxu0 }
 0x162   :  { %v1237_v38 = vmax.f32 %v1132_v35, 0.0  ;;  %v929_v39 = vadd.f32 %v1998_v59, %v928_v37  ;;  %v1136_v40 = vpop.f32.mrf.mxu1 }
 0x163   :  { %v930_v41 = vpop.f32.mrf.mxu0 }
 0x164   :  { %1280 = vst [vmem:[%s2175_s3 + $0xb8] sm:$0xff] %v1237_v38  ;;  %v1137_v42 = vadd.f32 %v1136_v40, %v929_v39  ;;  %v1138_v43 = vpop.f32.mrf.mxu1 }
 0x165   :  { %v931_v44 = vpop.f32.mrf.mxu0 }
 0x166   :  { %v1238_v45 = vmax.f32 %v1137_v42, 0.0  ;;  %v932_v46 = vadd.f32 %v1998_v59, %v931_v44  ;;  %v1139_v47 = vpop.f32.mrf.mxu1 }
 0x167   :  { %v933_v48 = vpop.f32.mrf.mxu0 }
 0x168   :  { %1281 = vst [vmem:[%s2175_s3 + $0xc0] sm:$0xff] %v1238_v45  ;;  %v1140_v49 = vadd.f32 %v1139_v47, %v932_v46  ;;  %v1141_v50 = vpop.f32.mrf.mxu1 }
 0x169   :  { %v936_v51 = vpop.f32.mrf.mxu0 }
 0x16a   :  { %v1239_v52 = vmax.f32 %v1140_v49, 0.0  ;;  %v937_v53 = vadd.f32 %v1998_v59, %v936_v51  ;;  %v1144_v54 = vpop.f32.mrf.mxu1 }
 0x16b   :  { %v938_v55 = vpop.f32.mrf.mxu0 }
 0x16c   :  { %1282 = vst [vmem:[%s2175_s3 + $0xc8] sm:$0xff] %v1239_v52  ;;  %v1145_v56 = vadd.f32 %v1144_v54, %v937_v53  ;;  %v1146_v57 = vpop.f32.mrf.mxu1 }
 0x16d   :  { %v939_v58 = vpop.f32.mrf.mxu0 }
 0x16e   :  { %v1240_v60 = vmax.f32 %v1145_v56, 0.0  ;;  %v940_v61 = vadd.f32 %v1998_v59, %v939_v58  ;;  %v1147_v62 = vpop.f32.mrf.mxu1 }
 0x16f   :  { %v941_v63 = vpop.f32.mrf.mxu0 }
 0x170   :  { %1283 = vst [vmem:[%s2175_s3 + $0xd0] sm:$0xff] %v1240_v60  ;;  %v1148_v0 = vadd.f32 %v1147_v62, %v940_v61  ;;  %v1149_v1 = vpop.f32.mrf.mxu1 }
 0x171   :  { %v944_v2 = vpop.f32.mrf.mxu0 }
 0x172   :  { %v1241_v3 = vmax.f32 %v1148_v0, 0.0  ;;  %v945_v4 = vadd.f32 %v1998_v59, %v944_v2  ;;  %v1152_v5 = vpop.f32.mrf.mxu1 }
 0x173   :  { %v946_v6 = vpop.f32.mrf.mxu0 }
 0x174   :  { %1284 = vst [vmem:[%s2175_s3 + $0xd8] sm:$0xff] %v1241_v3  ;;  %v1153_v7 = vadd.f32 %v1152_v5, %v945_v4  ;;  %v1154_v8 = vpop.f32.mrf.mxu1 }
 0x175   :  { %v947_v9 = vpop.f32.mrf.mxu0 }
 0x176   :  { %v1242_v10 = vmax.f32 %v1153_v7, 0.0  ;;  %v948_v11 = vadd.f32 %v1998_v59, %v947_v9  ;;  %v1155_v12 = vpop.f32.mrf.mxu1 }
 0x177   :  { %v949_v13 = vpop.f32.mrf.mxu0 }
 0x178   :  { %1285 = vst [vmem:[%s2175_s3 + $0xe0] sm:$0xff] %v1242_v10  ;;  %v1156_v14 = vadd.f32 %v1155_v12, %v948_v11  ;;  %v1157_v15 = vpop.f32.mrf.mxu1 }
 0x179   :  { %v952_v16 = vpop.f32.mrf.mxu0 }
 0x17a   :  { %v1243_v17 = vmax.f32 %v1156_v14, 0.0  ;;  %v953_v18 = vadd.f32 %v1998_v59, %v952_v16  ;;  %v1160_v19 = vpop.f32.mrf.mxu1 }
 0x17b   :  { %v954_v20 = vpop.f32.mrf.mxu0 }
 0x17c   :  { %1286 = vst [vmem:[%s2175_s3 + $0xe8] sm:$0xff] %v1243_v17  ;;  %v1161_v21 = vadd.f32 %v1160_v19, %v953_v18  ;;  %v1162_v22 = vpop.f32.mrf.mxu1 }
 0x17d   :  { %v955_v23 = vpop.f32.mrf.mxu0 }
 0x17e   :  { %v1244_v24 = vmax.f32 %v1161_v21, 0.0  ;;  %v956_v25 = vadd.f32 %v1998_v59, %v955_v23  ;;  %v1163_v26 = vpop.f32.mrf.mxu1 }
 0x17f   :  { %v957_v27 = vpop.f32.mrf.mxu0 }
 0x180   :  { %1287 = vst [vmem:[%s2175_s3 + $0xf0] sm:$0xff] %v1244_v24  ;;  %v1164_v28 = vadd.f32 %v1163_v26, %v956_v25  ;;  %v1165_v29 = vpop.f32.mrf.mxu1 }
 0x181   :  { %v960_v30 = vpop.f32.mrf.mxu0 }
 0x182   :  { %v1245_v31 = vmax.f32 %v1164_v28, 0.0  ;;  %v961_v32 = vadd.f32 %v1998_v59, %v960_v30  ;;  %v1168_v33 = vpop.f32.mrf.mxu1 }
 0x183   :  { %v962_v34 = vpop.f32.mrf.mxu0 }
 0x184   :  { %1288 = vst [vmem:[%s2175_s3 + $0xf8] sm:$0xff] %v1245_v31  ;;  %v1169_v35 = vadd.f32 %v1168_v33, %v961_v32  ;;  %v1170_v36 = vpop.f32.mrf.mxu1 }
 0x185   :  { %v963_v37 = vpop.f32.mrf.mxu0 }
 0x186   :  { %v1246_v38 = vmax.f32 %v1169_v35, 0.0  ;;  %v964_v39 = vadd.f32 %v1998_v59, %v963_v37  ;;  %v1171_v40 = vpop.f32.mrf.mxu1 }
 0x187   :  { %v965_v41 = vpop.f32.mrf.mxu0 }
 0x188   :  { %1289 = vst [vmem:[%s2175_s3 + $0x100] sm:$0xff] %v1246_v38  ;;  %v1172_v42 = vadd.f32 %v1171_v40, %v964_v39  ;;  %v1173_v43 = vpop.f32.mrf.mxu1 }
 0x189   :  { %v968_v44 = vpop.f32.mrf.mxu0 }
 0x18a   :  { %v1247_v45 = vmax.f32 %v1172_v42, 0.0  ;;  %v969_v46 = vadd.f32 %v1998_v59, %v968_v44  ;;  %v1176_v47 = vpop.f32.mrf.mxu1 }
 0x18b   :  { %v970_v48 = vpop.f32.mrf.mxu0 }
 0x18c   :  { %1290 = vst [vmem:[%s2175_s3 + $0x108] sm:$0xff] %v1247_v45  ;;  %v1177_v49 = vadd.f32 %v1176_v47, %v969_v46  ;;  %v1178_v50 = vpop.f32.mrf.mxu1 }
 0x18d   :  { %v971_v51 = vpop.f32.mrf.mxu0 }
 0x18e   :  { %v1248_v52 = vmax.f32 %v1177_v49, 0.0  ;;  %v972_v53 = vadd.f32 %v1998_v59, %v971_v51  ;;  %v1179_v54 = vpop.f32.mrf.mxu1 }
 0x18f   :  { %v973_v55 = vpop.f32.mrf.mxu0 }
 0x190   :  { %1291 = vst [vmem:[%s2175_s3 + $0x110] sm:$0xff] %v1248_v52  ;;  %v1180_v56 = vadd.f32 %v1179_v54, %v972_v53  ;;  %v1181_v57 = vpop.f32.mrf.mxu1 }
 0x191   :  { %v976_v58 = vpop.f32.mrf.mxu0 }
 0x192   :  { %v1249_v60 = vmax.f32 %v1180_v56, 0.0  ;;  %v977_v61 = vadd.f32 %v1998_v59, %v976_v58  ;;  %v1184_v62 = vpop.f32.mrf.mxu1 }
 0x193   :  { %v978_v63 = vpop.f32.mrf.mxu0 }
 0x194   :  { %1292 = vst [vmem:[%s2175_s3 + $0x118] sm:$0xff] %v1249_v60  ;;  %v1185_v0 = vadd.f32 %v1184_v62, %v977_v61  ;;  %v1186_v1 = vpop.f32.mrf.mxu1 }
 0x195   :  { %v979_v2 = vpop.f32.mrf.mxu0 }
 0x196   :  { %v1250_v3 = vmax.f32 %v1185_v0, 0.0  ;;  %v980_v4 = vadd.f32 %v1998_v59, %v979_v2  ;;  %v1187_v5 = vpop.f32.mrf.mxu1 }
 0x197   :  { %v981_v6 = vpop.f32.mrf.mxu0 }
 0x198   :  { %1293 = vst [vmem:[%s2175_s3 + $0x120] sm:$0xff] %v1250_v3  ;;  %v1188_v7 = vadd.f32 %v1187_v5, %v980_v4  ;;  %v1189_v8 = vpop.f32.mrf.mxu1 }
 0x199   :  { %v984_v9 = vpop.f32.mrf.mxu0 }
 0x19a   :  { %v1251_v10 = vmax.f32 %v1188_v7, 0.0  ;;  %v985_v11 = vadd.f32 %v1998_v59, %v984_v9  ;;  %v1192_v12 = vpop.f32.mrf.mxu1 }
 0x19b   :  { %v986_v13 = vpop.f32.mrf.mxu0 }
 0x19c   :  { %1294 = vst [vmem:[%s2175_s3 + $0x128] sm:$0xff] %v1251_v10  ;;  %v1193_v14 = vadd.f32 %v1192_v12, %v985_v11  ;;  %v1194_v15 = vpop.f32.mrf.mxu1 }
 0x19d   :  { %v987_v16 = vpop.f32.mrf.mxu0 }
 0x19e   :  { %v1252_v17 = vmax.f32 %v1193_v14, 0.0  ;;  %v988_v18 = vadd.f32 %v1998_v59, %v987_v16  ;;  %v1195_v19 = vpop.f32.mrf.mxu1 }
 0x19f   :  { %v989_v20 = vpop.f32.mrf.mxu0 }
 0x1a0   :  { %1295 = vst [vmem:[%s2175_s3 + $0x130] sm:$0xff] %v1252_v17  ;;  %v1196_v21 = vadd.f32 %v1195_v19, %v988_v18  ;;  %v1197_v22 = vpop.f32.mrf.mxu1 }
 0x1a1   :  { %v992_v23 = vpop.f32.mrf.mxu0 }
 0x1a2   :  { %v1253_v24 = vmax.f32 %v1196_v21, 0.0  ;;  %v993_v25 = vadd.f32 %v1998_v59, %v992_v23  ;;  %v1200_v26 = vpop.f32.mrf.mxu1 }
 0x1a3   :  { %v994_v27 = vpop.f32.mrf.mxu0 }
 0x1a4   :  { %1296 = vst [vmem:[%s2175_s3 + $0x138] sm:$0xff] %v1253_v24  ;;  %v1201_v28 = vadd.f32 %v1200_v26, %v993_v25  ;;  %v1202_v29 = vpop.f32.mrf.mxu1 }
 0x1a5   :  { %v995_v30 = vpop.f32.mrf.mxu0 }
 0x1a6   :  { %v1254_v31 = vmax.f32 %v1201_v28, 0.0  ;;  %v996_v32 = vadd.f32 %v1998_v59, %v995_v30  ;;  %v1203_v33 = vpop.f32.mrf.mxu1 }
 0x1a7   :  { %v997_v34 = vpop.f32.mrf.mxu0 }
 0x1a8   :  { %1297 = vst [vmem:[%s2175_s3 + $0x140] sm:$0xff] %v1254_v31  ;;  %v1204_v35 = vadd.f32 %v1203_v33, %v996_v32  ;;  %v1205_v36 = vpop.f32.mrf.mxu1 }
 0x1a9   :  { %v1000_v37 = vpop.f32.mrf.mxu0 }
 0x1aa   :  { %v1255_v38 = vmax.f32 %v1204_v35, 0.0  ;;  %v1001_v39 = vadd.f32 %v1998_v59, %v1000_v37  ;;  %v1208_v40 = vpop.f32.mrf.mxu1 }
 0x1ab   :  { %v1002_v41 = vpop.f32.mrf.mxu0 }
 0x1ac   :  { %1298 = vst [vmem:[%s2175_s3 + $0x148] sm:$0xff] %v1255_v38  ;;  %v1209_v42 = vadd.f32 %v1208_v40, %v1001_v39  ;;  %v1210_v43 = vpop.f32.mrf.mxu1 }
 0x1ad   :  { %v1003_v44 = vpop.f32.mrf.mxu0 }
 0x1ae   :  { %v1256_v45 = vmax.f32 %v1209_v42, 0.0  ;;  %v1211_v46 = vpop.f32.mrf.mxu1 }
 0x1af   :  { %v1004_v47 = vpop.f32.mrf.mxu0 }
 0x1b0   :  { %1299 = vst [vmem:[%s2175_s3 + $0x150] sm:$0xff] %v1256_v45  ;;  %v1212_v48 = vpop.f32.mrf.mxu1 }

// kernel: _lambda_.9
= control target key start
LH: loop header
LB: loop body
LE: loop exit
PB: predicated region body
PF: predicated region fallthrough
CT: control target
= control target key end

     0   :  { %s624_s1 = inlined_call_operand.vmem [shape: bf16[512,128], index: 1, kind: input, shape index: {}]   ;;  %s625_s0 = inlined_call_operand.vmem [shape: bf16[8,512], index: 0, kind: input, shape index: {}]   ;;  %s626_s2 = inlined_call_operand.vmem [shape: f32[1,128], index: 2, kind: input, shape index: {}]   ;;  %s627_s3 = inlined_call_operand.vmem [shape: f32[8,128], index: 3, kind: output, shape index: {}]  }
   0x1   :  { %v460_v0 = vld [vmem:[%s624_s1 + $0x78] sm:$0xff]   ;;  %v464_v4 = vld [vmem:[%s624_s1 + $0x70] sm:$0xff]   ;;  %v468_v8 = vld [vmem:[%s624_s1 + $0x68] sm:$0xff]  }
   0x2   :  { %v461_v1 = vld [vmem:[%s624_s1 + $0xf8] sm:$0xff]   ;;  %416 = vmatprep.subr.bf16.mxu0 %v460_v0  ;;  %v465_v5 = vld [vmem:[%s624_s1 + $0xf0] sm:$0xff]   ;;  %v469_v9 = vld [vmem:[%s624_s1 + $0xe8] sm:$0xff]  }
   0x3   :  { %v462_v2 = vld [vmem:[%s624_s1 + $0x38] sm:$0xff]   ;;  %438 = vmatprep.subr.bf16.mxu1 %v461_v1  ;;  %v466_v6 = vld [vmem:[%s624_s1 + $0x30] sm:$0xff]   ;;  %v470_v10 = vld [vmem:[%s624_s1 + $0x28] sm:$0xff]  }
   0x4   :  { %v463_v3 = vld [vmem:[%s624_s1 + $0xb8] sm:$0xff]   ;;  %417 = vmatpush3.bf16.msra.mxu0 %v462_v2  ;;  %v467_v7 = vld [vmem:[%s624_s1 + $0xb0] sm:$0xff]   ;;  %v471_v11 = vld [vmem:[%s624_s1 + $0xa8] sm:$0xff]  }
   0x5   :  { %439 = vmatpush3.bf16.msra.mxu1 %v463_v3  ;;  %418 = vmatprep.subr.bf16.mxu0 %v464_v4  ;;  %v472_v12 = vld [vmem:[%s624_s1 + $0x60] sm:$0xff]   ;;  %v476_v16 = vld [vmem:[%s624_s1 + $0x58] sm:$0xff]   ;;  %v480_v20 = vld [vmem:[%s624_s1 + $0x50] sm:$0xff]  }
   0x6   :  { %440 = vmatprep.subr.bf16.mxu1 %v465_v5  ;;  %v473_v13 = vld [vmem:[%s624_s1 + $0xe0] sm:$0xff]   ;;  %v477_v17 = vld [vmem:[%s624_s1 + $0xd8] sm:$0xff]   ;;  %v481_v21 = vld [vmem:[%s624_s1 + $0xd0] sm:$0xff]  }
   0x7   :  { %v474_v14 = vld [vmem:[%s624_s1 + $0x20] sm:$0xff]   ;;  %v478_v18 = vld [vmem:[%s624_s1 + $0x18] sm:$0xff]   ;;  %v482_v22 = vld [vmem:[%s624_s1 + $0x10] sm:$0xff]  }
   0x8   :  { %419 = vmatpush3.bf16.msra.mxu0 %v466_v6  ;;  %v475_v15 = vld [vmem:[%s624_s1 + $0xa0] sm:$0xff]   ;;  %v479_v19 = vld [vmem:[%s624_s1 + $0x98] sm:$0xff]   ;;  %v483_v23 = vld [vmem:[%s624_s1 + $0x90] sm:$0xff]  }
   0x9   :  { %441 = vmatpush3.bf16.msra.mxu1 %v467_v7  ;;  %420 = vmatprep.subr.bf16.mxu0 %v468_v8  ;;  %v484_v24 = vld [vmem:[%s624_s1 + $0x48] sm:$0xff]   ;;  %v488_v28 = vld [vmem:[%s624_s1 + $0x40] sm:$0xff]  }
   0xa   :  { %442 = vmatprep.subr.bf16.mxu1 %v469_v9  ;;  %v485_v25 = vld [vmem:[%s624_s1 + $0xc8] sm:$0xff]   ;;  %v489_v29 = vld [vmem:[%s624_s1 + $0xc0] sm:$0xff]  }
   0xb   :  { %v486_v26 = vld [vmem:[%s624_s1 + $0x8] sm:$0xff]   ;;  %v490_v30 = vld [vmem:[%s624_s1] sm:$0xff]  }
   0xc   :  { %421 = vmatpush3.bf16.msra.mxu0 %v470_v10  ;;  %v487_v27 = vld [vmem:[%s624_s1 + $0x88] sm:$0xff]   ;;  %v491_v31 = vld [vmem:[%s624_s1 + $0x80] sm:$0xff]  }
   0xd   :  { %443 = vmatpush3.bf16.msra.mxu1 %v471_v11  ;;  %422 = vmatprep.subr.bf16.mxu0 %v472_v12  ;;  %v15_v32 = vld [vmem:[%s625_s0] sm:$0xff]  ;;  %v16_v33 = vld [vmem:[%s625_s0 + $0x8] sm:$0xff] }
   0xe   :  { %444 = vmatprep.subr.bf16.mxu1 %v473_v13  ;;  %v380_v34 = vcombine.low %v15_v32, %v15_v32  ;;  %v381_v35 = vcombine.high %v15_v32, %v15_v32  ;;  %v382_v36 = vcombine.low %v16_v33, %v16_v33  ;;  %v383_v37 = vcombine.high %v16_v33, %v16_v33  ;;  %v379_v40 = vld [vmem:[%s626_s2] ss:$0 sm:$0xff] }
  0x10   :  { %423 = vmatpush3.bf16.msra.mxu0 %v474_v14  ;;  %326 = vmatprep.mubr.bf16.mxu0 %v381_v35 }
  0x11   :  { %445 = vmatpush3.bf16.msra.mxu1 %v475_v15  ;;  %424 = vmatprep.subr.bf16.mxu0 %v476_v16 }
  0x12   :  { %446 = vmatprep.subr.bf16.mxu1 %v477_v17  ;;  %366 = vmatprep.mubr.bf16.mxu1 %v383_v37 }
  0x14   :  { %425 = vmatpush3.bf16.msra.mxu0 %v478_v18 }
  0x15   :  { %447 = vmatpush3.bf16.msra.mxu1 %v479_v19  ;;  %426 = vmatprep.subr.bf16.mxu0 %v480_v20 }
  0x16   :  { %448 = vmatprep.subr.bf16.mxu1 %v481_v21 }
  0x18   :  { %427 = vmatpush3.bf16.msra.mxu0 %v482_v22 }
  0x19   :  { %449 = vmatpush3.bf16.msra.mxu1 %v483_v23  ;;  %428 = vmatprep.subr.bf16.mxu0 %v484_v24 }
  0x1a   :  { %450 = vmatprep.subr.bf16.mxu1 %v485_v25 }
  0x1c   :  { %429 = vmatpush3.bf16.msra.mxu0 %v486_v26 }
  0x1d   :  { %451 = vmatpush3.bf16.msra.mxu1 %v487_v27  ;;  %430 = vmatprep.subr.bf16.mxu0 %v488_v28 }
  0x1e   :  { %452 = vmatprep.subr.bf16.mxu1 %v489_v29 }
  0x20   :  { %431 = vmatpush3.bf16.msra.mxu0 %v490_v30 }
  0x21   :  { %453 = vmatpush3.bf16.msra.mxu1 %v491_v31 }
  0x23   :  { %327 = vmatmul.mubr.bf16.vlgmr.msra.gmra.mxu0 %v380_v34 }
  0x24   :  { %367 = vmatmul.mubr.bf16.vlgmr.msra.gmra.mxu1 %v382_v36 }
  0xe3   :  { %v432_v38 = vpop.f32.mrf.mxu0 }
  0xe4   :  { %v454_v39 = vpop.f32.mrf.mxu1 }
  0xe5   :  { %v433_v41 = vpop.f32.mrf.mxu0 }
  0xe6   :  { %v455_v42 = vpop.f32.mrf.mxu1  ;;  %v434_v43 = vadd.f32 %v433_v41, %v432_v38 }
  0xe7   :  { %v435_v44 = vpop.f32.mrf.mxu0  ;;  %v456_v47 = vadd.f32 %v455_v42, %v454_v39 }
  0xe8   :  { %v457_v45 = vpop.f32.mrf.mxu1  ;;  %v329_v46 = vadd.f32 %v434_v43, %v379_v40 }
  0xe9   :  { %v436_v48 = vpop.f32.mrf.mxu0 }
  0xea   :  { %v458_v49 = vpop.f32.mrf.mxu1  ;;  %v369_v50 = vadd.f32 %v456_v47, %v329_v46 }
  0xec   :  { %374 = vst [vmem:[%s627_s3] sm:$0xff] %v369_v50 }

// kernel: _lambda_.7
= control target key start
LH: loop header
LB: loop body
LE: loop exit
PB: predicated region body
PF: predicated region fallthrough
CT: control target
= control target key end

     0   :  { %v1929_v24 = vmov 0.0   ;;  %vm1930_vm0 = vmmov 0   ;;  %vm775_vm1 = vcmask 523264   ;;  %s2596_s1 = inlined_call_operand.vmem [shape: bf16[576,128], index: 1, kind: input, shape index: {}]   ;;  %s2597_s0 = inlined_call_operand.vmem [shape: bf16[240,576], index: 0, kind: input, shape index: {}]   ;;  %s2598_s2 = inlined_call_operand.vmem [shape: f32[1,128], index: 2, kind: input, shape index: {}]   ;;  %s2599_s3 = inlined_call_operand.vmem [shape: f32[240,128], index: 3, kind: output, shape index: {}]  }
   0x1   :  { %v1788_v0 = vld [vmem:[%s2596_s1 + $0x78] sm:$0xff]   ;;  %v1790_v2 = vld [vmem:[%s2596_s1 + $0x70] sm:$0xff]   ;;  %v1792_v4 = vld [vmem:[%s2596_s1 + $0x68] sm:$0xff]  }
   0x2   :  { %v1789_v1 = vld [vmem:[%s2596_s1 + $0x38] sm:$0xff]   ;;  %1471 = vmatprep.subr.bf16.mxu0 %v1788_v0  ;;  %1770 = vmatprep.subr.bf16.mxu1 %v1788_v0  ;;  %v1791_v3 = vld [vmem:[%s2596_s1 + $0x30] sm:$0xff]   ;;  %v1793_v5 = vld [vmem:[%s2596_s1 + $0x28] sm:$0xff]  }
   0x3   :  { %1472 = vmatpush3.bf16.msra.mxu0 %v1789_v1  ;;  %1778 = vmatpush3.bf16.msra.mxu1 %v1789_v1  ;;  %v1794_v6 = vld [vmem:[%s2596_s1 + $0x60] sm:$0xff]   ;;  %v1796_v8 = vld [vmem:[%s2596_s1 + $0x58] sm:$0xff]   ;;  %v1798_v10 = vld [vmem:[%s2596_s1 + $0x50] sm:$0xff]  }
   0x4   :  { %1473 = vmatprep.subr.bf16.mxu0 %v1790_v2  ;;  %1771 = vmatprep.subr.bf16.mxu1 %v1790_v2  ;;  %v1795_v7 = vld [vmem:[%s2596_s1 + $0x20] sm:$0xff]   ;;  %v1797_v9 = vld [vmem:[%s2596_s1 + $0x18] sm:$0xff]   ;;  %v1799_v13 = vld [vmem:[%s2596_s1 + $0x10] sm:$0xff]  }
   0x5   :  { %v1806_v11 = vld [vmem:[%s2597_s0 + $0x4] ss:$20 sps:$4 sm:$0xff]   ;;  %v1800_v14 = vld [vmem:[%s2596_s1 + $0x48] sm:$0xff]   ;;  %v1804_v18 = vld [vmem:[%s2597_s0] ss:$20 sps:$4 sm:$0xff]  }
   0x6   :  { %v1809_v12 = vld [vmem:[%s2597_s0 + $0x144] ss:$20 sps:$4 sm:$0xff]   ;;  %853 = vmatprep.mubr.bf16.mxu0 %v1806_v11  ;;  %v1801_v15 = vld [vmem:[%s2596_s1 + $0x8] sm:$0xff]   ;;  %v1807_v19 = vld [vmem:[%s2597_s0 + $0x140] ss:$20 sps:$4 sm:$0xff]  }
   0x7   :  { %1474 = vmatpush3.bf16.msra.mxu0 %v1791_v3  ;;  %1779 = vmatpush3.bf16.msra.mxu1 %v1791_v3  ;;  %v1802_v16 = vld [vmem:[%s2596_s1 + $0x40] sm:$0xff]   ;;  %v1811_v20 = vld [vmem:[%s2596_s1 + $0xf8] sm:$0xff]   ;;  %v1819_v26 = vld [vmem:[%s2596_s1 + $0xf0] sm:$0xff]  }
   0x8   :  { %1475 = vmatprep.subr.bf16.mxu0 %v1792_v4  ;;  %1772 = vmatprep.subr.bf16.mxu1 %v1792_v4  ;;  %v1803_v17 = vld [vmem:[%s2596_s1] sm:$0xff]   ;;  %v1810_v21 = vld [vmem:[%s2596_s1 + $0x118] sm:$0xff]   ;;  %v1820_v27 = vld [vmem:[%s2596_s1 + $0xb0] sm:$0xff]  }
   0x9   :  { %917 = vmatprep.mubr.bf16.mxu1 %v1809_v12  ;;  %v1812_v22 = vld [vmem:[%s2596_s1 + $0xb8] sm:$0xff]   ;;  %v1813_v23 = vld [vmem:[%s2597_s0 + $0x2c] ss:$20 sps:$4 sm:$0xff]   ;;  %v1829_v28 = vld [vmem:[%s2596_s1 + $0x110] sm:$0xff]  }
   0xa   :  { %v1815_v25 = vld [vmem:[%s2597_s0 + $0x16c] ss:$20 sps:$4 sm:$0xff]   ;;  %v1817_v29 = vld [vmem:[%s2597_s0 + $0x28] ss:$20 sps:$4 sm:$0xff]   ;;  %v1825_v39 = vld [vmem:[%s2597_s0 + $0x50] ss:$20 sps:$4 sm:$0xff]  }
   0xb   :  { %1476 = vmatpush3.bf16.msra.mxu0 %v1793_v5  ;;  %1780 = vmatpush3.bf16.msra.mxu1 %v1793_v5  ;;  %v1827_v30 = vld [vmem:[%s2596_s1 + $0xe8] sm:$0xff]   ;;  %v1834_v35 = vld [vmem:[%s2596_s1 + $0xe0] sm:$0xff]   ;;  %v1838_v38 = vld [vmem:[%s2596_s1 + $0xd8] sm:$0xff]  }
   0xc   :  { %1477 = vmatprep.subr.bf16.mxu0 %v1794_v6  ;;  %1773 = vmatprep.subr.bf16.mxu1 %v1794_v6  ;;  %v1818_v31 = vld [vmem:[%s2597_s0 + $0x168] ss:$20 sps:$4 sm:$0xff]   ;;  %v1837_v37 = vld [vmem:[%s2596_s1 + $0xa0] sm:$0xff]   ;;  %v1847_v44 = vld [vmem:[%s2596_s1 + $0xd0] sm:$0xff]  }
   0xd   :  { %v1821_v32 = vld [vmem:[%s2597_s0 + $0x54] ss:$20 sps:$4 sm:$0xff]   ;;  %v1826_v40 = vld [vmem:[%s2597_s0 + $0x190] ss:$20 sps:$4 sm:$0xff]   ;;  %v1843_v43 = vld [vmem:[%s2596_s1 + $0x98] sm:$0xff]  }
   0xe   :  { %v1823_v33 = vld [vmem:[%s2597_s0 + $0x194] ss:$20 sps:$4 sm:$0xff]   ;;  %v1830_v41 = vld [vmem:[%s2597_s0 + $0x7c] ss:$20 sps:$4 sm:$0xff]   ;;  %v1835_v46 = vld [vmem:[%s2597_s0 + $0x78] ss:$20 sps:$4 sm:$0xff]  }
   0xf   :  { %1478 = vmatpush3.bf16.msra.mxu0 %v1795_v7  ;;  %1781 = vmatpush3.bf16.msra.mxu1 %v1795_v7  ;;  %v1828_v34 = vld [vmem:[%s2596_s1 + $0xa8] sm:$0xff]   ;;  %v1832_v42 = vld [vmem:[%s2597_s0 + $0x1bc] ss:$20 sps:$4 sm:$0xff]   ;;  %v1863_v48 = vld [vmem:[%s2596_s1 + $0x100] sm:$0xff]  }
  0x10   :  { %1479 = vmatprep.subr.bf16.mxu0 %v1796_v8  ;;  %1774 = vmatprep.subr.bf16.mxu1 %v1796_v8  ;;  %v1846_v36 = vld [vmem:[%s2596_s1 + $0x108] sm:$0xff]   ;;  %v1848_v45 = vld [vmem:[%s2596_s1 + $0x90] sm:$0xff]   ;;  %v1839_v50 = vld [vmem:[%s2597_s0 + $0xa4] ss:$20 sps:$4 sm:$0xff]  }
  0x11   :  { %v1836_v47 = vld [vmem:[%s2597_s0 + $0x1b8] ss:$20 sps:$4 sm:$0xff]   ;;  %v1864_v53 = vld [vmem:[%s2596_s1 + $0xc0] sm:$0xff]   ;;  %v1853_v59 = vld [vmem:[%s2597_s0 + $0xc8] ss:$20 sps:$4 sm:$0xff]  }
  0x12   :  { %v1855_v49 = vld [vmem:[%s2596_s1 + $0xc8] sm:$0xff]   ;;  %v1841_v51 = vld [vmem:[%s2597_s0 + $0x1e4] ss:$20 sps:$4 sm:$0xff]   ;;  %v1844_v54 = vld [vmem:[%s2597_s0 + $0xa0] ss:$20 sps:$4 sm:$0xff]  }
  0x13   :  { %1480 = vmatpush3.bf16.msra.mxu0 %v1797_v9  ;;  %1782 = vmatpush3.bf16.msra.mxu1 %v1797_v9  ;;  %v1856_v52 = vld [vmem:[%s2596_s1 + $0x88] sm:$0xff]   ;;  %v1865_v55 = vld [vmem:[%s2596_s1 + $0x80] sm:$0xff]   ;;  %v1866_v1 = vld [vmem:[%s2597_s0 + $0x11c] ss:$20 sps:$4 sm:$0xff]  }
  0x14   :  { %1481 = vmatprep.subr.bf16.mxu0 %v1798_v10  ;;  %1775 = vmatprep.subr.bf16.mxu1 %v1798_v10  ;;  %v1845_v56 = vld [vmem:[%s2597_s0 + $0x1e0] ss:$20 sps:$4 sm:$0xff]   ;;  %v1854_v60 = vld [vmem:[%s2597_s0 + $0x208] ss:$20 sps:$4 sm:$0xff]   ;;  %v1861_v63 = vld [vmem:[%s2597_s0 + $0xf0] ss:$20 sps:$4 sm:$0xff]  }
  0x15   :  { %v1849_v57 = vld [vmem:[%s2597_s0 + $0xcc] ss:$20 sps:$4 sm:$0xff]   ;;  %v1857_v61 = vld [vmem:[%s2597_s0 + $0xf4] ss:$20 sps:$4 sm:$0xff]   ;;  %v1862_v0 = vld [vmem:[%s2597_s0 + $0x230] ss:$20 sps:$4 sm:$0xff]  }
  0x16   :  { %v1851_v58 = vld [vmem:[%s2597_s0 + $0x20c] ss:$20 sps:$4 sm:$0xff]   ;;  %v1859_v62 = vld [vmem:[%s2597_s0 + $0x234] ss:$20 sps:$4 sm:$0xff]   ;;  %v1874_v6 = vld [vmem:[%s2597_s0 + $0x30] ss:$20 sps:$4 sm:$0xff]  }
  0x17   :  { %1482 = vmatpush3.bf16.msra.mxu0 %v1799_v13  ;;  %1783 = vmatpush3.bf16.msra.mxu1 %v1799_v13  ;;  %v1870_v2 = vld [vmem:[%s2597_s0 + $0xc] ss:$20 sps:$4 sm:$0xff]   ;;  %v1868_v3 = vld [vmem:[%s2597_s0 + $0x8] ss:$20 sps:$4 sm:$0xff]   ;;  %v1875_v7 = vld [vmem:[%s2597_s0 + $0x10] ss:$20 sps:$4 sm:$0xff]  }
  0x18   :  { %1483 = vmatprep.subr.bf16.mxu0 %v1800_v14  ;;  %1776 = vmatprep.subr.bf16.mxu1 %v1800_v14  ;;  %v1871_v4 = vld [vmem:[%s2597_s0 + $0x118] ss:$20 sps:$4 sm:$0xff]   ;;  %v1872_v5 = vld [vmem:[%s2597_s0 + $0x34] ss:$20 sps:$4 sm:$0xff]   ;;  %v1876_v8 = vld [vmem:[%s2597_s0 + $0x5c] ss:$20 sps:$4 sm:$0xff]  }
  0x19   :  { %v1878_v9 = vld [vmem:[%s2597_s0 + $0x58] ss:$20 sps:$4 sm:$0xff]   ;;  %v1882_v12 = vld [vmem:[%s2597_s0 + $0x80] ss:$20 sps:$4 sm:$0xff]  }
  0x1a   :  { %v1879_v10 = vld [vmem:[%s2597_s0 + $0x38] ss:$20 sps:$4 sm:$0xff]   ;;  %v1883_v13 = vld [vmem:[%s2597_s0 + $0x60] ss:$20 sps:$4 sm:$0xff]  }
  0x1b   :  { %1484 = vmatpush3.bf16.msra.mxu0 %v1801_v15  ;;  %1784 = vmatpush3.bf16.msra.mxu1 %v1801_v15  ;;  %v1880_v11 = vld [vmem:[%s2597_s0 + $0x84] ss:$20 sps:$4 sm:$0xff]   ;;  %v1884_v14 = vld [vmem:[%s2597_s0 + $0xac] ss:$20 sps:$4 sm:$0xff]   ;;  %v1886_v15 = vld [vmem:[%s2597_s0 + $0xa8] ss:$20 sps:$4 sm:$0xff]  }
  0x1c   :  { %1485 = vmatprep.subr.bf16.mxu0 %v1802_v16  ;;  %1777 = vmatprep.subr.bf16.mxu1 %v1802_v16  ;;  %v1887_v16 = vld [vmem:[%s2597_s0 + $0x88] ss:$20 sps:$4 sm:$0xff]  }
  0x1f   :  { %1486 = vmatpush3.bf16.msra.mxu0 %v1803_v17  ;;  %1785 = vmatpush3.bf16.msra.mxu1 %v1803_v17  ;;  %v1888_v17 = vld [vmem:[%s2597_s0 + $0xd4] ss:$20 sps:$4 sm:$0xff]  }
  0x20   :  { %1702 = vmatprep.subr.bf16.mxu0 %v1929_v24  ;;  %1577 = vmatprep.subr.bf16.mxu1 %v1811_v20  ;;  %v1892_v20 = vld [vmem:[%s2597_s0 + $0xfc] ss:$20 sps:$4 sm:$0xff]  }
  0x22   :  { %854 = vmatmul.mubr.bf16.vlgmr.msra.gmra.mxu0 %v1804_v18  ;;  %918 = vmatmul.mubr.bf16.vlgmr.msra.gmra.mxu1 %v1807_v19  ;;  %v1890_v18 = vld [vmem:[%s2597_s0 + $0xd0] ss:$20 sps:$4 sm:$0xff]  }
  0x23   :  { %1703 = vmatpush3.bf16.msra.mxu0 %v1810_v21  ;;  %1578 = vmatpush3.bf16.msra.mxu1 %v1812_v22  ;;  %v1891_v19 = vld [vmem:[%s2597_s0 + $0xb0] ss:$20 sps:$4 sm:$0xff]   ;;  %v1894_v21 = vld [vmem:[%s2597_s0 + $0xf8] ss:$20 sps:$4 sm:$0xff]  }
  0x24   :  { %861 = vmatprep.mubr.bf16.mxu0 %v1813_v23  ;;  %925 = vmatprep.mubr.bf16.mxu1 %v1815_v25  ;;  %v1895_v22 = vld [vmem:[%s2597_s0 + $0xd8] ss:$20 sps:$4 sm:$0xff]   ;;  %v1898_v25 = vld [vmem:[%s2597_s0 + $0x120] ss:$20 sps:$4 sm:$0xff]  }
  0x25   :  { %1579 = vmatprep.subr.bf16.mxu1 %v1819_v26  ;;  %1704 = vmatprep.subr.bf16.mxu0 %v1929_v24  ;;  %v1896_v23 = vld [vmem:[%s2597_s0 + $0x124] ss:$20 sps:$4 sm:$0xff]   ;;  %v1899_v26 = vld [vmem:[%s2597_s0 + $0x100] ss:$20 sps:$4 sm:$0xff]  }
  0x27   :  { %1580 = vmatpush3.bf16.msra.mxu1 %v1820_v27  ;;  %1705 = vmatpush3.bf16.msra.mxu0 %v1829_v28  ;;  %v1900_v27 = vld [vmem:[%s2597_s0 + $0x14c] ss:$20 sps:$4 sm:$0xff]   ;;  %v1902_v28 = vld [vmem:[%s2597_s0 + $0x148] ss:$20 sps:$4 sm:$0xff]  }
  0x28   :  { %1581 = vmatprep.subr.bf16.mxu1 %v1827_v30  ;;  %1706 = vmatprep.subr.bf16.mxu0 %v1929_v24  ;;  %v1904_v30 = vld [vmem:[%s2597_s0 + $0x174] ss:$20 sps:$4 sm:$0xff]  }
  0x2a   :  { %862 = vmatmul.mubr.bf16.gmra.mxu0 %v1817_v29  ;;  %926 = vmatmul.mubr.bf16.gmra.mxu1 %v1818_v31  ;;  %v1903_v29 = vld [vmem:[%s2597_s0 + $0x128] ss:$20 sps:$4 sm:$0xff]   ;;  %v1906_v31 = vld [vmem:[%s2597_s0 + $0x170] ss:$20 sps:$4 sm:$0xff]  }
  0x2b   :  { %869 = vmatprep.mubr.bf16.mxu0 %v1821_v32  ;;  %933 = vmatprep.mubr.bf16.mxu1 %v1823_v33  ;;  %v1907_v32 = vld [vmem:[%s2597_s0 + $0x150] ss:$20 sps:$4 sm:$0xff]  }
  0x2c   :  { %1582 = vmatpush3.bf16.msra.mxu1 %v1828_v34  ;;  %1707 = vmatpush3.bf16.msra.mxu0 %v1846_v36  ;;  %v1908_v33 = vld [vmem:[%s2597_s0 + $0x19c] ss:$20 sps:$4 sm:$0xff]   ;;  %v1910_v34 = vld [vmem:[%s2597_s0 + $0x198] ss:$20 sps:$4 sm:$0xff]  }
  0x2d   :  { %1583 = vmatprep.subr.bf16.mxu1 %v1834_v35  ;;  %1708 = vmatprep.subr.bf16.mxu0 %v1929_v24  ;;  %v1911_v35 = vld [vmem:[%s2597_s0 + $0x178] ss:$20 sps:$4 sm:$0xff]  }
  0x2e   :  { %v1912_v36 = vld [vmem:[%s2597_s0 + $0x1c4] ss:$20 sps:$4 sm:$0xff]  }
  0x30   :  { %1584 = vmatpush3.bf16.msra.mxu1 %v1837_v37  ;;  %1709 = vmatpush3.bf16.msra.mxu0 %v1863_v48  ;;  %v1914_v37 = vld [vmem:[%s2597_s0 + $0x1c0] ss:$20 sps:$4 sm:$0xff]  }
  0x31   :  { %1585 = vmatprep.subr.bf16.mxu1 %v1838_v38  ;;  %v1915_v38 = vld [vmem:[%s2597_s0 + $0x1a0] ss:$20 sps:$4 sm:$0xff]  }
  0x32   :  { %870 = vmatmul.mubr.bf16.gmra.mxu0 %v1825_v39  ;;  %934 = vmatmul.mubr.bf16.gmra.mxu1 %v1826_v40  ;;  %v1916_v39 = vld [vmem:[%s2597_s0 + $0x1ec] ss:$20 sps:$4 sm:$0xff]   ;;  %v1918_v40 = vld [vmem:[%s2597_s0 + $0x1e8] ss:$20 sps:$4 sm:$0xff]  }
  0x33   :  { %877 = vmatprep.mubr.bf16.mxu0 %v1830_v41  ;;  %941 = vmatprep.mubr.bf16.mxu1 %v1832_v42  ;;  %v1919_v41 = vld [vmem:[%s2597_s0 + $0x1c8] ss:$20 sps:$4 sm:$0xff]   ;;  %v1928_v48 = vld [vmem:[%s2597_s0 + $0x240] ss:$20 sps:$4 sm:$0xff]  }
  0x34   :  { %1586 = vmatpush3.bf16.msra.mxu1 %v1843_v43  ;;  %v1920_v42 = vld [vmem:[%s2597_s0 + $0x214] ss:$20 sps:$4 sm:$0xff]   ;;  %v1922_v43 = vld [vmem:[%s2597_s0 + $0x210] ss:$20 sps:$4 sm:$0xff]  }
  0x35   :  { %1587 = vmatprep.subr.bf16.mxu1 %v1847_v44  ;;  %v1923_v44 = vld [vmem:[%s2597_s0 + $0x1f0] ss:$20 sps:$4 sm:$0xff]  }
  0x38   :  { %1588 = vmatpush3.bf16.msra.mxu1 %v1848_v45  ;;  %v1924_v45 = vld [vmem:[%s2597_s0 + $0x23c] ss:$20 sps:$4 sm:$0xff]  }
  0x39   :  { %1589 = vmatprep.subr.bf16.mxu1 %v1855_v49 }
  0x3a   :  { %878 = vmatmul.mubr.bf16.gmra.mxu0 %v1835_v46  ;;  %942 = vmatmul.mubr.bf16.gmra.mxu1 %v1836_v47  ;;  %v1926_v46 = vld [vmem:[%s2597_s0 + $0x238] ss:$20 sps:$4 sm:$0xff]  }
  0x3b   :  { %885 = vmatprep.mubr.bf16.mxu0 %v1839_v50  ;;  %949 = vmatprep.mubr.bf16.mxu1 %v1841_v51  ;;  %v1927_v47 = vld [vmem:[%s2597_s0 + $0x218] ss:$20 sps:$4 sm:$0xff]   ;;  %v2338_v51 = vld [vmem:[%s2598_s2] ss:$0 sm:$0xff] }
  0x3c   :  { %1590 = vmatpush3.bf16.msra.mxu1 %v1856_v52 }
  0x3d   :  { %1591 = vmatprep.subr.bf16.mxu1 %v1864_v53 }
  0x40   :  { %1592 = vmatpush3.bf16.msra.mxu1 %v1865_v55 }
  0x42   :  { %886 = vmatmul.mubr.bf16.gmra.mxu0 %v1844_v54  ;;  %950 = vmatmul.mubr.bf16.gmra.mxu1 %v1845_v56 }
  0x43   :  { %893 = vmatprep.mubr.bf16.mxu0 %v1849_v57  ;;  %957 = vmatprep.mubr.bf16.mxu1 %v1851_v58 }
  0x4a   :  { %894 = vmatmul.mubr.bf16.gmra.mxu0 %v1853_v59  ;;  %958 = vmatmul.mubr.bf16.gmra.mxu1 %v1854_v60 }
  0x4b   :  { %901 = vmatprep.mubr.bf16.mxu0 %v1857_v61  ;;  %965 = vmatprep.mubr.bf16.mxu1 %v1859_v62 }
  0x52   :  { %902 = vmatmul.mubr.bf16.gmra.mxu0 %v1861_v63  ;;  %966 = vmatmul.mubr.bf16.gmra.mxu1 %v1862_v0 }
  0x53   :  { %909 = vmatprep.mubr.bf16.mxu0 %v1866_v1  ;;  %1006 = vmatprep.mubr.bf16.mxu1 %v1870_v2 }
  0x5a   :  { %910 = vmatmul.mubr.bf16.gmra.mxu0 %v1871_v4  ;;  %1007 = vmatmul.mubr.bf16.vlgmr.msra.gmra.mxu1 %v1868_v3 }
  0x5b   :  { %1014 = vmatprep.mubr.bf16.mxu1 %v1872_v5  ;;  %1710 = vmatprep.mubr.msk.bf16.mxu0 %vm1930_vm0, %v1929_v24 }
  0x62   :  { %1015 = vmatmul.mubr.bf16.gmra.mxu1 %v1874_v6  ;;  %1711 = vmatmul.mubr.msk.bf16.vlgmr.msra.gmra.mxu0 %vm775_vm1, %v1875_v7 }
  0x63   :  { %1022 = vmatprep.mubr.bf16.mxu1 %v1876_v8  ;;  %1714 = vmatprep.mubr.msk.bf16.mxu0 %vm1930_vm0, %v1929_v24 }
  0x6a   :  { %1023 = vmatmul.mubr.bf16.gmra.mxu1 %v1878_v9  ;;  %1715 = vmatmul.mubr.msk.bf16.gmra.mxu0 %vm775_vm1, %v1879_v10 }
  0x6b   :  { %1030 = vmatprep.mubr.bf16.mxu1 %v1880_v11  ;;  %1718 = vmatprep.mubr.msk.bf16.mxu0 %vm1930_vm0, %v1929_v24 }
  0x72   :  { %1031 = vmatmul.mubr.bf16.gmra.mxu1 %v1882_v12  ;;  %1719 = vmatmul.mubr.msk.bf16.gmra.mxu0 %vm775_vm1, %v1883_v13 }
  0x73   :  { %1038 = vmatprep.mubr.bf16.mxu1 %v1884_v14  ;;  %1722 = vmatprep.mubr.msk.bf16.mxu0 %vm1930_vm0, %v1929_v24 }
  0x7a   :  { %1039 = vmatmul.mubr.bf16.gmra.mxu1 %v1886_v15  ;;  %1723 = vmatmul.mubr.msk.bf16.gmra.mxu0 %vm775_vm1, %v1887_v16 }
  0x7b   :  { %1046 = vmatprep.mubr.bf16.mxu1 %v1888_v17  ;;  %1726 = vmatprep.mubr.msk.bf16.mxu0 %vm1930_vm0, %v1929_v24 }
  0x82   :  { %1047 = vmatmul.mubr.bf16.gmra.mxu1 %v1890_v18  ;;  %1727 = vmatmul.mubr.msk.bf16.gmra.mxu0 %vm775_vm1, %v1891_v19 }
  0x83   :  { %1054 = vmatprep.mubr.bf16.mxu1 %v1892_v20  ;;  %1730 = vmatprep.mubr.msk.bf16.mxu0 %vm1930_vm0, %v1929_v24 }
  0x8a   :  { %1055 = vmatmul.mubr.bf16.gmra.mxu1 %v1894_v21  ;;  %1731 = vmatmul.mubr.msk.bf16.gmra.mxu0 %vm775_vm1, %v1895_v22 }
  0x8b   :  { %1062 = vmatprep.mubr.bf16.mxu1 %v1896_v23  ;;  %1734 = vmatprep.mubr.msk.bf16.mxu0 %vm1930_vm0, %v1929_v24 }
  0x92   :  { %1063 = vmatmul.mubr.bf16.gmra.mxu1 %v1898_v25  ;;  %1735 = vmatmul.mubr.msk.bf16.gmra.mxu0 %vm775_vm1, %v1899_v26 }
  0x93   :  { %1070 = vmatprep.mubr.bf16.mxu1 %v1900_v27  ;;  %1738 = vmatprep.mubr.msk.bf16.mxu0 %vm1930_vm0, %v1929_v24 }
  0x9a   :  { %1071 = vmatmul.mubr.bf16.gmra.mxu1 %v1902_v28  ;;  %1739 = vmatmul.mubr.msk.bf16.gmra.mxu0 %vm775_vm1, %v1903_v29 }
  0x9b   :  { %1078 = vmatprep.mubr.bf16.mxu1 %v1904_v30  ;;  %1742 = vmatprep.mubr.msk.bf16.mxu0 %vm1930_vm0, %v1929_v24 }
  0xa2   :  { %1079 = vmatmul.mubr.bf16.gmra.mxu1 %v1906_v31  ;;  %1743 = vmatmul.mubr.msk.bf16.gmra.mxu0 %vm775_vm1, %v1907_v32 }
  0xa3   :  { %1086 = vmatprep.mubr.bf16.mxu1 %v1908_v33  ;;  %1746 = vmatprep.mubr.msk.bf16.mxu0 %vm1930_vm0, %v1929_v24 }
  0xaa   :  { %1087 = vmatmul.mubr.bf16.gmra.mxu1 %v1910_v34  ;;  %1747 = vmatmul.mubr.msk.bf16.gmra.mxu0 %vm775_vm1, %v1911_v35 }
  0xab   :  { %1094 = vmatprep.mubr.bf16.mxu1 %v1912_v36  ;;  %1750 = vmatprep.mubr.msk.bf16.mxu0 %vm1930_vm0, %v1929_v24 }
  0xb2   :  { %1095 = vmatmul.mubr.bf16.gmra.mxu1 %v1914_v37  ;;  %1751 = vmatmul.mubr.msk.bf16.gmra.mxu0 %vm775_vm1, %v1915_v38 }
  0xb3   :  { %1102 = vmatprep.mubr.bf16.mxu1 %v1916_v39  ;;  %1754 = vmatprep.mubr.msk.bf16.mxu0 %vm1930_vm0, %v1929_v24 }
  0xba   :  { %1103 = vmatmul.mubr.bf16.gmra.mxu1 %v1918_v40  ;;  %1755 = vmatmul.mubr.msk.bf16.gmra.mxu0 %vm775_vm1, %v1919_v41 }
  0xbb   :  { %1110 = vmatprep.mubr.bf16.mxu1 %v1920_v42  ;;  %1758 = vmatprep.mubr.msk.bf16.mxu0 %vm1930_vm0, %v1929_v24 }
  0xc2   :  { %1111 = vmatmul.mubr.bf16.gmra.mxu1 %v1922_v43  ;;  %1759 = vmatmul.mubr.msk.bf16.gmra.mxu0 %vm775_vm1, %v1923_v44 }
  0xc3   :  { %1118 = vmatprep.mubr.bf16.mxu1 %v1924_v45  ;;  %1762 = vmatprep.mubr.msk.bf16.mxu0 %vm1930_vm0, %v1929_v24 }
  0xca   :  { %1119 = vmatmul.mubr.bf16.gmra.mxu1 %v1926_v46  ;;  %1763 = vmatmul.mubr.msk.bf16.gmra.mxu0 %vm775_vm1, %v1927_v47 }
  0xcb   :  { %1766 = vmatprep.mubr.msk.bf16.mxu0 %vm1930_vm0, %v1929_v24 }
  0xd2   :  { %1767 = vmatmul.mubr.msk.bf16.gmra.mxu0 %vm775_vm1, %v1928_v48 }
  0xe2   :  { %v2333_v49 = vpop.f32.mrf.mxu0  ;;  %v1535_v50 = vpop.f32.mrf.mxu1 }
  0xe4   :  { %v2340_v52 = vpop.f32.mrf.mxu0  ;;  %v1536_v53 = vpop.f32.mrf.mxu1 }
  0xe5   :  { %v1537_v54 = vadd.f32 %v1536_v53, %v1535_v50 }
  0xe6   :  { %v2342_v55 = vpop.f32.mrf.mxu0  ;;  %v1538_v24 = vpop.f32.mrf.mxu1 }
  0xe7   :  { %v2345_v56 = vadd.f32 %v1537_v54, %v2338_v51 }
  0xe8   :  { %v2347_v57 = vpop.f32.mrf.mxu0  ;;  %v1539_v58 = vpop.f32.mrf.mxu1 }
  0xe9   :  { %v1540_v59 = vadd.f32 %v1539_v58, %v1538_v24 }
  0xea   :  { %v2349_v60 = vpop.f32.mrf.mxu0  ;;  %v1541_v61 = vpop.f32.mrf.mxu1 }
  0xeb   :  { %v2352_v62 = vadd.f32 %v1540_v59, %v2338_v51 }
  0xec   :  { %v2354_v63 = vpop.f32.mrf.mxu0  ;;  %v1542_v0 = vpop.f32.mrf.mxu1 }
  0xed   :  { %v1543_v1 = vadd.f32 %v1542_v0, %v1541_v61 }
  0xee   :  { %v2356_v2 = vpop.f32.mrf.mxu0  ;;  %v1544_v3 = vpop.f32.mrf.mxu1 }
  0xef   :  { %v2359_v4 = vadd.f32 %v1543_v1, %v2338_v51 }
  0xf0   :  { %v2361_v5 = vpop.f32.mrf.mxu0  ;;  %v1545_v6 = vpop.f32.mrf.mxu1 }
  0xf1   :  { %v1546_v7 = vadd.f32 %v1545_v6, %v1544_v3 }
  0xf2   :  { %v2363_v8 = vpop.f32.mrf.mxu0  ;;  %v1547_v9 = vpop.f32.mrf.mxu1 }
  0xf3   :  { %v2366_v10 = vadd.f32 %v1546_v7, %v2338_v51 }
  0xf4   :  { %v2368_v11 = vpop.f32.mrf.mxu0  ;;  %v1548_v12 = vpop.f32.mrf.mxu1 }
  0xf5   :  { %v1549_v13 = vadd.f32 %v1548_v12, %v1547_v9 }
  0xf6   :  { %v2370_v14 = vpop.f32.mrf.mxu0  ;;  %v1550_v15 = vpop.f32.mrf.mxu1 }
  0xf7   :  { %v2373_v16 = vadd.f32 %v1549_v13, %v2338_v51 }
  0xf8   :  { %v2375_v17 = vpop.f32.mrf.mxu0  ;;  %v1551_v18 = vpop.f32.mrf.mxu1 }
  0xf9   :  { %v1552_v19 = vadd.f32 %v1551_v18, %v1550_v15 }
  0xfa   :  { %v2377_v20 = vpop.f32.mrf.mxu0  ;;  %v1553_v21 = vpop.f32.mrf.mxu1 }
  0xfb   :  { %v2380_v22 = vadd.f32 %v1552_v19, %v2338_v51 }
  0xfc   :  { %v2382_v23 = vpop.f32.mrf.mxu0  ;;  %v1554_v25 = vpop.f32.mrf.mxu1 }
  0xfd   :  { %v1555_v26 = vadd.f32 %v1554_v25, %v1553_v21 }
  0xfe   :  { %v2384_v27 = vpop.f32.mrf.mxu0  ;;  %v1556_v28 = vpop.f32.mrf.mxu1 }
  0xff   :  { %v2387_v29 = vadd.f32 %v1555_v26, %v2338_v51 }
 0x100   :  { %v2389_v30 = vpop.f32.mrf.mxu0  ;;  %v1557_v31 = vpop.f32.mrf.mxu1 }
 0x101   :  { %v1558_v32 = vadd.f32 %v1557_v31, %v1556_v28  ;;  %v1489_v31 = vadd.f32 %v2340_v52, %v2333_v49 }
 0x102   :  { %v2391_v33 = vpop.f32.mrf.mxu0  ;;  %v1559_v34 = vpop.f32.mrf.mxu1 }
 0x103   :  { %v2394_v35 = vadd.f32 %v1558_v32, %v2338_v51 }
 0x104   :  { %v2396_v36 = vpop.f32.mrf.mxu0  ;;  %v1560_v37 = vpop.f32.mrf.mxu1 }
 0x105   :  { %v1561_v38 = vadd.f32 %v1560_v37, %v1559_v34 }
 0x106   :  { %v2398_v39 = vpop.f32.mrf.mxu0  ;;  %v1562_v40 = vpop.f32.mrf.mxu1 }
 0x107   :  { %v2401_v41 = vadd.f32 %v1561_v38, %v2338_v51 }
 0x108   :  { %v2403_v42 = vpop.f32.mrf.mxu0  ;;  %v1563_v43 = vpop.f32.mrf.mxu1 }
 0x109   :  { %v1564_v44 = vadd.f32 %v1563_v43, %v1562_v40 }
 0x10a   :  { %v2405_v45 = vpop.f32.mrf.mxu0  ;;  %v1565_v46 = vpop.f32.mrf.mxu1 }
 0x10b   :  { %v2408_v47 = vadd.f32 %v1564_v44, %v2338_v51  ;;  %v856_v44 = vadd.f32 %v1489_v31, %v2338_v51 }
 0x10c   :  { %v2410_v48 = vpop.f32.mrf.mxu0  ;;  %v1566_v50 = vpop.f32.mrf.mxu1 }
 0x10d   :  { %v1567_v53 = vadd.f32 %v1566_v50, %v1565_v46  ;;  %v1492_v46 = vadd.f32 %v2347_v57, %v2342_v55 }
 0x10e   :  { %v2412_v54 = vpop.f32.mrf.mxu0  ;;  %v1568_v24 = vpop.f32.mrf.mxu1 }
 0x10f   :  { %v2415_v58 = vadd.f32 %v1567_v53, %v2338_v51 }
 0x110   :  { %v2417_v59 = vpop.f32.mrf.mxu0  ;;  %v1569_v61 = vpop.f32.mrf.mxu1 }
 0x111   :  { %v1570_v0 = vadd.f32 %v1569_v61, %v1568_v24 }
 0x112   :  { %v2419_v1 = vpop.f32.mrf.mxu0  ;;  %v1571_v3 = vpop.f32.mrf.mxu1 }
 0x113   :  { %v2422_v6 = vadd.f32 %v1570_v0, %v2338_v51  ;;  %v859_v0 = vadd.f32 %v1492_v46, %v2338_v51 }
 0x114   :  { %v2424_v7 = vpop.f32.mrf.mxu0  ;;  %v1572_v9 = vpop.f32.mrf.mxu1 }
 0x115   :  { %v1573_v12 = vadd.f32 %v1572_v9, %v1571_v3  ;;  %v1495_v3 = vadd.f32 %v2354_v63, %v2349_v60 }
 0x116   :  { %v2426_v13 = vpop.f32.mrf.mxu0  ;;  %v1574_v15 = vpop.f32.mrf.mxu1 }
 0x117   :  { %v2429_v18 = vadd.f32 %v1573_v12, %v2338_v51  ;;  %v864_v57 = vadd.f32 %v1495_v3, %v2338_v51 }
 0x118   :  { %v2431_v19 = vpop.f32.mrf.mxu0  ;;  %v1575_v21 = vpop.f32.mrf.mxu1 }
 0x119   :  { %v1576_v25 = vadd.f32 %v1575_v21, %v1574_v15 }
 0x11a   :  { %v2433_v26 = vpop.f32.mrf.mxu0  ;;  %v1593_v28 = vpop.f32.mrf.mxu1 }
 0x11b   :  { %v2438_v32 = vadd.f32 %v1576_v25, %v2338_v51 }
 0x11c   :  { %v2440_v34 = vpop.f32.mrf.mxu0  ;;  %v1594_v37 = vpop.f32.mrf.mxu1 }
 0x11d   :  { %v1595_v38 = vadd.f32 %v1594_v37, %v1593_v28  ;;  %v1498_v37 = vadd.f32 %v2361_v5, %v2356_v2 }
 0x11e   :  { %v2442_v40 = vpop.f32.mrf.mxu0  ;;  %v1596_v43 = vpop.f32.mrf.mxu1 }
 0x11f   :  { %v1009_v49 = vadd.f32 %v1595_v38, %v856_v44 }
 0x120   :  { %v2447_v50 = vpop.f32.mrf.mxu0  ;;  %v1597_v53 = vpop.f32.mrf.mxu1 }
 0x121   :  { %v1598_v24 = vadd.f32 %v1597_v53, %v1596_v43 }
 0x122   :  { %v1599_v52 = vpop.f32.mrf.mxu1  ;;  %v1161_v61 = vpop.f32.mrf.mxu0 }
 0x123   :  { %v1162_v9 = vadd.f32 %v1161_v61, %v1009_v49  ;;  %v1012_v28 = vadd.f32 %v1598_v24, %v859_v0  ;;  %v867_v24 = vadd.f32 %v1498_v37, %v2338_v51 }
 0x124   :  { %v1600_v12 = vpop.f32.mrf.mxu1  ;;  %v1712_v15 = vpop.f32.mrf.mxu0 }
 0x125   :  { %v1280_v21 = vmax.f32 %v1162_v9, 0.0  ;;  %v1601_v25 = vadd.f32 %v1600_v12, %v1599_v52  ;;  %v1501_v52 = vadd.f32 %v2368_v11, %v2363_v8 }
 0x126   :  { %v1602_v31 = vpop.f32.mrf.mxu1  ;;  %v1164_v55 = vpop.f32.mrf.mxu0 }
 0x127   :  { %1310 = vst [vmem:[%s2599_s3] sm:$0xff] %v1280_v21  ;;  %v1165_v38 = vadd.f32 %v1164_v55, %v1012_v28  ;;  %v1017_v46 = vadd.f32 %v1601_v25, %v864_v57  ;;  %v872_v21 = vadd.f32 %v1501_v52, %v2338_v51  ;;  %v1504_v25 = vadd.f32 %v2375_v17, %v2370_v14 }
 0x128   :  { %v1603_v43 = vpop.f32.mrf.mxu1  ;;  %v1713_v60 = vpop.f32.mrf.mxu0 }
 0x129   :  { %v1281_v63 = vmax.f32 %v1165_v38, 0.0  ;;  %v1604_v44 = vadd.f32 %v1603_v43, %v1602_v31  ;;  %v875_v43 = vadd.f32 %v1504_v25, %v2338_v51  ;;  %v1507_v60 = vadd.f32 %v2382_v23, %v2377_v20 }
 0x12a   :  { %v1605_v53 = vpop.f32.mrf.mxu1  ;;  %v1169_v49 = vpop.f32.mrf.mxu0 }
 0x12b   :  { %1311 = vst [vmem:[%s2599_s3 + $0x8] sm:$0xff] %v1281_v63  ;;  %v1170_v2 = vadd.f32 %v1169_v49, %v1017_v46  ;;  %v1020_v9 = vadd.f32 %v1604_v44, %v867_v24  ;;  %v880_v52 = vadd.f32 %v1507_v60, %v2338_v51 }
 0x12c   :  { %v1606_v5 = vpop.f32.mrf.mxu1  ;;  %v1716_v61 = vpop.f32.mrf.mxu0 }
 0x12d   :  { %v1282_v0 = vmax.f32 %v1170_v2, 0.0  ;;  %v1607_v3 = vadd.f32 %v1606_v5, %v1605_v53  ;;  %v1510_v2 = vadd.f32 %v2389_v30, %v2384_v27 }
 0x12e   :  { %v1608_v12 = vpop.f32.mrf.mxu1  ;;  %v1172_v15 = vpop.f32.mrf.mxu0 }
 0x12f   :  { %1312 = vst [vmem:[%s2599_s3 + $0x10] sm:$0xff] %v1282_v0  ;;  %v1173_v8 = vadd.f32 %v1172_v15, %v1020_v9  ;;  %v1025_v57 = vadd.f32 %v1607_v3, %v872_v21  ;;  %v883_v15 = vadd.f32 %v1510_v2, %v2338_v51  ;;  %v1513_v21 = vadd.f32 %v2396_v36, %v2391_v33 }
 0x130   :  { %v1609_v11 = vpop.f32.mrf.mxu1  ;;  %v1717_v28 = vpop.f32.mrf.mxu0 }
 0x131   :  { %v1283_v31 = vmax.f32 %v1173_v8, 0.0  ;;  %v1610_v55 = vadd.f32 %v1609_v11, %v1608_v12 }
 0x132   :  { %v1611_v37 = vpop.f32.mrf.mxu1  ;;  %v1177_v38 = vpop.f32.mrf.mxu0 }
 0x133   :  { %1313 = vst [vmem:[%s2599_s3 + $0x18] sm:$0xff] %v1283_v31  ;;  %v1178_v14 = vadd.f32 %v1177_v38, %v1025_v57  ;;  %v1028_v53 = vadd.f32 %v1610_v55, %v875_v43  ;;  %v888_v57 = vadd.f32 %v1513_v21, %v2338_v51 }
 0x134   :  { %v1612_v17 = vpop.f32.mrf.mxu1  ;;  %v1720_v63 = vpop.f32.mrf.mxu0 }
 0x135   :  { %v1284_v44 = vmax.f32 %v1178_v14, 0.0  ;;  %v1613_v46 = vadd.f32 %v1612_v17, %v1611_v37  ;;  %v1516_v37 = vadd.f32 %v2403_v42, %v2398_v39 }
 0x136   :  { %v1614_v49 = vpop.f32.mrf.mxu1  ;;  %v1180_v24 = vpop.f32.mrf.mxu0 }
 0x137   :  { %1314 = vst [vmem:[%s2599_s3 + $0x20] sm:$0xff] %v1284_v44  ;;  %v1181_v20 = vadd.f32 %v1180_v24, %v1028_v53  ;;  %v1033_v3 = vadd.f32 %v1613_v46, %v880_v52  ;;  %v891_v44 = vadd.f32 %v1516_v37, %v2338_v51  ;;  %v1519_v46 = vadd.f32 %v2410_v48, %v2405_v45 }
 0x138   :  { %v1615_v23 = vpop.f32.mrf.mxu1  ;;  %v1721_v5 = vpop.f32.mrf.mxu0 }
 0x139   :  { %v1285_v61 = vmax.f32 %v1181_v20, 0.0  ;;  %v1616_v0 = vadd.f32 %v1615_v23, %v1614_v49  ;;  %v896_v23 = vadd.f32 %v1519_v46, %v2338_v51  ;;  %v1522_v5 = vadd.f32 %v2417_v59, %v2412_v54 }
 0x13a   :  { %v1617_v9 = vpop.f32.mrf.mxu1  ;;  %v1185_v12 = vpop.f32.mrf.mxu0 }
 0x13b   :  { %1315 = vst [vmem:[%s2599_s3 + $0x28] sm:$0xff] %v1285_v61  ;;  %v1186_v27 = vadd.f32 %v1185_v12, %v1033_v3  ;;  %v1036_v28 = vadd.f32 %v1616_v0, %v883_v15  ;;  %v899_v21 = vadd.f32 %v1522_v5, %v2338_v51 }
 0x13c   :  { %v1618_v30 = vpop.f32.mrf.mxu1  ;;  %v1724_v25 = vpop.f32.mrf.mxu0 }
 0x13d   :  { %v1286_v8 = vmax.f32 %v1186_v27, 0.0  ;;  %v1619_v11 = vadd.f32 %v1618_v30, %v1617_v9  ;;  %v1525_v27 = vadd.f32 %v2424_v7, %v2419_v1 }
 0x13e   :  { %v1620_v31 = vpop.f32.mrf.mxu1  ;;  %v1188_v55 = vpop.f32.mrf.mxu0 }
 0x13f   :  { %1316 = vst [vmem:[%s2599_s3 + $0x30] sm:$0xff] %v1286_v8  ;;  %v1189_v33 = vadd.f32 %v1188_v55, %v1036_v28  ;;  %v1041_v14 = vadd.f32 %v1619_v11, %v888_v57  ;;  %v904_v55 = vadd.f32 %v1525_v27, %v2338_v51  ;;  %v1528_v57 = vadd.f32 %v2431_v19, %v2426_v13 }
 0x140   :  { %v1621_v36 = vpop.f32.mrf.mxu1  ;;  %v1725_v38 = vpop.f32.mrf.mxu0 }
 0x141   :  { %v1287_v43 = vmax.f32 %v1189_v33, 0.0  ;;  %v1622_v60 = vadd.f32 %v1621_v36, %v1620_v31 }
 0x142   :  { %v1623_v17 = vpop.f32.mrf.mxu1  ;;  %v1193_v63 = vpop.f32.mrf.mxu0 }
 0x143   :  { %1317 = vst [vmem:[%s2599_s3 + $0x38] sm:$0xff] %v1287_v43  ;;  %v1194_v39 = vadd.f32 %v1193_v63, %v1041_v14  ;;  %v1044_v52 = vadd.f32 %v1622_v60, %v891_v44  ;;  %v907_v14 = vadd.f32 %v1528_v57, %v2338_v51 }
 0x144   :  { %v1624_v42 = vpop.f32.mrf.mxu1  ;;  %v1728_v53 = vpop.f32.mrf.mxu0 }
 0x145   :  { %v1288_v49 = vmax.f32 %v1194_v39, 0.0  ;;  %v1625_v24 = vadd.f32 %v1624_v42, %v1623_v17  ;;  %v1531_v17 = vadd.f32 %v2440_v34, %v2433_v26 }
 0x146   :  { %v1626_v2 = vpop.f32.mrf.mxu1  ;;  %v1196_v20 = vpop.f32.mrf.mxu0 }
 0x147   :  { %1318 = vst [vmem:[%s2599_s3 + $0x40] sm:$0xff] %v1288_v49  ;;  %v1197_v45 = vadd.f32 %v1196_v20, %v1044_v52  ;;  %v1049_v9 = vadd.f32 %v1625_v24, %v896_v23  ;;  %v912_v49 = vadd.f32 %v1531_v17, %v2338_v51  ;;  %v1534_v24 = vadd.f32 %v2447_v50, %v2442_v40 }
 0x148   :  { %v1627_v48 = vpop.f32.mrf.mxu1  ;;  %v1729_v61 = vpop.f32.mrf.mxu0 }
 0x149   :  { %v1289_v0 = vmax.f32 %v1197_v45, 0.0  ;;  %v1628_v3 = vadd.f32 %v1627_v48, %v1626_v2  ;;  %v915_v48 = vadd.f32 %v1534_v24, %v2338_v51 }
 0x14a   :  { %v1629_v12 = vpop.f32.mrf.mxu1  ;;  %v1201_v15 = vpop.f32.mrf.mxu0 }
 0x14b   :  { %1319 = vst [vmem:[%s2599_s3 + $0x48] sm:$0xff] %v1289_v0  ;;  %v1202_v54 = vadd.f32 %v1201_v15, %v1049_v9  ;;  %v1052_v11 = vadd.f32 %v1628_v3, %v899_v21 }
 0x14c   :  { %v1630_v59 = vpop.f32.mrf.mxu1  ;;  %v1732_v30 = vpop.f32.mrf.mxu0 }
 0x14d   :  { %v1290_v25 = vmax.f32 %v1202_v54, 0.0  ;;  %v1631_v8 = vadd.f32 %v1630_v59, %v1629_v12 }
 0x14e   :  { %v1632_v28 = vpop.f32.mrf.mxu1  ;;  %v1204_v31 = vpop.f32.mrf.mxu0 }
 0x14f   :  { %1320 = vst [vmem:[%s2599_s3 + $0x50] sm:$0xff] %v1290_v25  ;;  %v1205_v1 = vadd.f32 %v1204_v31, %v1052_v11  ;;  %v1057_v38 = vadd.f32 %v1631_v8, %v904_v55 }
 0x150   :  { %v1633_v7 = vpop.f32.mrf.mxu1  ;;  %v1733_v37 = vpop.f32.mrf.mxu0 }
 0x151   :  { %v1291_v33 = vmax.f32 %v1205_v1, 0.0  ;;  %v1634_v36 = vadd.f32 %v1633_v7, %v1632_v28 }
 0x152   :  { %v1635_v43 = vpop.f32.mrf.mxu1  ;;  %v1209_v60 = vpop.f32.mrf.mxu0 }
 0x153   :  { %1321 = vst [vmem:[%s2599_s3 + $0x58] sm:$0xff] %v1291_v33  ;;  %v1210_v13 = vadd.f32 %v1209_v60, %v1057_v38  ;;  %v1060_v39 = vadd.f32 %v1634_v36, %v907_v14 }
 0x154   :  { %v1636_v19 = vpop.f32.mrf.mxu1  ;;  %v1736_v63 = vpop.f32.mrf.mxu0 }
 0x155   :  { %v1292_v44 = vmax.f32 %v1210_v13, 0.0  ;;  %v1637_v46 = vadd.f32 %v1636_v19, %v1635_v43 }
 0x156   :  { %v1638_v42 = vpop.f32.mrf.mxu1  ;;  %v1212_v53 = vpop.f32.mrf.mxu0 }
 0x157   :  { %1322 = vst [vmem:[%s2599_s3 + $0x60] sm:$0xff] %v1292_v44  ;;  %v1213_v26 = vadd.f32 %v1212_v53, %v1060_v39  ;;  %v1065_v23 = vadd.f32 %v1637_v46, %v912_v49 }
 0x158   :  { %v1639_v34 = vpop.f32.mrf.mxu1  ;;  %v1737_v52 = vpop.f32.mrf.mxu0 }
 0x159   :  { %v1293_v2 = vmax.f32 %v1213_v26, 0.0  ;;  %v1640_v20 = vadd.f32 %v1639_v34, %v1638_v42 }
 0x15a   :  { %v1641_v5 = vpop.f32.mrf.mxu1  ;;  %v1217_v45 = vpop.f32.mrf.mxu0 }
 0x15b   :  { %1323 = vst [vmem:[%s2599_s3 + $0x68] sm:$0xff] %v1293_v2  ;;  %v1218_v61 = vadd.f32 %v1217_v45, %v1065_v23  ;;  %v1068_v9 = vadd.f32 %v1640_v20, %v915_v48 }
 0x15c   :  { %v1642_v40 = vpop.f32.mrf.mxu1  ;;  %v1740_v50 = vpop.f32.mrf.mxu0 }
 0x15d   :  { %v1294_v0 = vmax.f32 %v1218_v61, 0.0  ;;  %v1643_v3 = vadd.f32 %v1642_v40, %v1641_v5 }
 0x15e   :  { %v1644_v12 = vpop.f32.mrf.mxu1  ;;  %v1220_v15 = vpop.f32.mrf.mxu0 }
 0x15f   :  { %1324 = vst [vmem:[%s2599_s3 + $0x70] sm:$0xff] %v1294_v0  ;;  %v1221_v21 = vadd.f32 %v1220_v15, %v1068_v9  ;;  %v1073_v30 = vadd.f32 %v1643_v3, %v2345_v56 }
 0x160   :  { %v1645_v27 = vpop.f32.mrf.mxu1  ;;  %v1741_v54 = vpop.f32.mrf.mxu0 }
 0x161   :  { %v1295_v51 = vmax.f32 %v1221_v21, 0.0  ;;  %v1646_v59 = vadd.f32 %v1645_v27, %v1644_v12 }
 0x162   :  { %v1647_v25 = vpop.f32.mrf.mxu1  ;;  %v1225_v8 = vpop.f32.mrf.mxu0 }
 0x163   :  { %1325 = vst [vmem:[%s2599_s3 + $0x78] sm:$0xff] %v1295_v51  ;;  %v1226_v11 = vadd.f32 %v1225_v8, %v1073_v30  ;;  %v1076_v1 = vadd.f32 %v1646_v59, %v2352_v62 }
 0x164   :  { %v1648_v28 = vpop.f32.mrf.mxu1  ;;  %v1744_v31 = vpop.f32.mrf.mxu0 }
 0x165   :  { %v1296_v55 = vmax.f32 %v1226_v11, 0.0  ;;  %v1649_v57 = vadd.f32 %v1648_v28, %v1647_v25 }
 0x166   :  { %v1650_v7 = vpop.f32.mrf.mxu1  ;;  %v1228_v37 = vpop.f32.mrf.mxu0 }
 0x167   :  { %1326 = vst [vmem:[%s2599_s3 + $0x80] sm:$0xff] %v1296_v55  ;;  %v1229_v56 = vadd.f32 %v1228_v37, %v1076_v1  ;;  %v1081_v60 = vadd.f32 %v1649_v57, %v2359_v4 }
 0x168   :  { %v1651_v33 = vpop.f32.mrf.mxu1  ;;  %v1745_v36 = vpop.f32.mrf.mxu0 }
 0x169   :  { %v1297_v38 = vmax.f32 %v1229_v56, 0.0  ;;  %v1652_v43 = vadd.f32 %v1651_v33, %v1650_v7 }
 0x16a   :  { %v1653_v14 = vpop.f32.mrf.mxu1  ;;  %v1233_v17 = vpop.f32.mrf.mxu0 }
 0x16b   :  { %1327 = vst [vmem:[%s2599_s3 + $0x88] sm:$0xff] %v1297_v38  ;;  %v1234_v62 = vadd.f32 %v1233_v17, %v1081_v60  ;;  %v1084_v46 = vadd.f32 %v1652_v43, %v2366_v10 }
 0x16c   :  { %v1654_v13 = vpop.f32.mrf.mxu1  ;;  %v1748_v19 = vpop.f32.mrf.mxu0 }
 0x16d   :  { %v1298_v63 = vmax.f32 %v1234_v62, 0.0  ;;  %v1655_v44 = vadd.f32 %v1654_v13, %v1653_v14 }
 0x16e   :  { %v1656_v39 = vpop.f32.mrf.mxu1  ;;  %v1236_v42 = vpop.f32.mrf.mxu0 }
 0x16f   :  { %1328 = vst [vmem:[%s2599_s3 + $0x90] sm:$0xff] %v1298_v63  ;;  %v1237_v4 = vadd.f32 %v1236_v42, %v1084_v46  ;;  %v1089_v34 = vadd.f32 %v1655_v44, %v2373_v16 }
 0x170   :  { %v1657_v53 = vpop.f32.mrf.mxu1  ;;  %v1749_v49 = vpop.f32.mrf.mxu0 }
 0x171   :  { %v1299_v24 = vmax.f32 %v1237_v4, 0.0  ;;  %v1658_v26 = vadd.f32 %v1657_v53, %v1656_v39 }
 0x172   :  { %v1659_v52 = vpop.f32.mrf.mxu1  ;;  %v1241_v2 = vpop.f32.mrf.mxu0 }
 0x173   :  { %1329 = vst [vmem:[%s2599_s3 + $0x98] sm:$0xff] %v1299_v24  ;;  %v1242_v10 = vadd.f32 %v1241_v2, %v1089_v34  ;;  %v1092_v48 = vadd.f32 %v1658_v26, %v2380_v22 }
 0x174   :  { %v1660_v20 = vpop.f32.mrf.mxu1  ;;  %v1752_v23 = vpop.f32.mrf.mxu0 }
 0x175   :  { %v1300_v5 = vmax.f32 %v1242_v10, 0.0  ;;  %v1661_v45 = vadd.f32 %v1660_v20, %v1659_v52 }
 0x176   :  { %v1662_v61 = vpop.f32.mrf.mxu1  ;;  %v1244_v40 = vpop.f32.mrf.mxu0 }
 0x177   :  { %1330 = vst [vmem:[%s2599_s3 + $0xa0] sm:$0xff] %v1300_v5  ;;  %v1245_v16 = vadd.f32 %v1244_v40, %v1092_v48  ;;  %v1097_v12 = vadd.f32 %v1661_v45, %v2387_v29 }
 0x178   :  { %v1663_v50 = vpop.f32.mrf.mxu1  ;;  %v1753_v0 = vpop.f32.mrf.mxu0 }
 0x179   :  { %v1301_v3 = vmax.f32 %v1245_v16, 0.0  ;;  %v1664_v9 = vadd.f32 %v1663_v50, %v1662_v61 }
 0x17a   :  { %v1665_v15 = vpop.f32.mrf.mxu1  ;;  %v1249_v21 = vpop.f32.mrf.mxu0 }
 0x17b   :  { %1331 = vst [vmem:[%s2599_s3 + $0xa8] sm:$0xff] %v1301_v3  ;;  %v1250_v22 = vadd.f32 %v1249_v21, %v1097_v12  ;;  %v1100_v30 = vadd.f32 %v1664_v9, %v2394_v35 }
 0x17c   :  { %v1666_v27 = vpop.f32.mrf.mxu1  ;;  %v1756_v54 = vpop.f32.mrf.mxu0 }
 0x17d   :  { %v1302_v51 = vmax.f32 %v1250_v22, 0.0  ;;  %v1667_v59 = vadd.f32 %v1666_v27, %v1665_v15 }
 0x17e   :  { %v1668_v25 = vpop.f32.mrf.mxu1  ;;  %v1252_v8 = vpop.f32.mrf.mxu0 }
 0x17f   :  { %1332 = vst [vmem:[%s2599_s3 + $0xb0] sm:$0xff] %v1302_v51  ;;  %v1253_v29 = vadd.f32 %v1252_v8, %v1100_v30  ;;  %v1105_v57 = vadd.f32 %v1667_v59, %v2401_v41 }
 0x180   :  { %v1669_v11 = vpop.f32.mrf.mxu1  ;;  %v1757_v28 = vpop.f32.mrf.mxu0 }
 0x181   :  { %v1303_v31 = vmax.f32 %v1253_v29, 0.0  ;;  %v1670_v55 = vadd.f32 %v1669_v11, %v1668_v25 }
 0x182   :  { %v1671_v1 = vpop.f32.mrf.mxu1  ;;  %v1257_v7 = vpop.f32.mrf.mxu0 }
 0x183   :  { %1333 = vst [vmem:[%s2599_s3 + $0xb8] sm:$0xff] %v1303_v31  ;;  %v1258_v35 = vadd.f32 %v1257_v7, %v1105_v57  ;;  %v1108_v38 = vadd.f32 %v1670_v55, %v2408_v47 }
 0x184   :  { %v1672_v37 = vpop.f32.mrf.mxu1  ;;  %v1760_v56 = vpop.f32.mrf.mxu0 }
 0x185   :  { %v1304_v33 = vmax.f32 %v1258_v35, 0.0  ;;  %v1673_v36 = vadd.f32 %v1672_v37, %v1671_v1 }
 0x186   :  { %v1674_v43 = vpop.f32.mrf.mxu1  ;;  %v1260_v60 = vpop.f32.mrf.mxu0 }
 0x187   :  { %1334 = vst [vmem:[%s2599_s3 + $0xc0] sm:$0xff] %v1304_v33  ;;  %v1261_v41 = vadd.f32 %v1260_v60, %v1108_v38  ;;  %v1113_v19 = vadd.f32 %v1673_v36, %v2415_v58 }
 0x188   :  { %v1675_v14 = vpop.f32.mrf.mxu1  ;;  %v1761_v17 = vpop.f32.mrf.mxu0 }
 0x189   :  { %v1305_v62 = vmax.f32 %v1261_v41, 0.0  ;;  %v1676_v13 = vadd.f32 %v1675_v14, %v1674_v43 }
 0x18a   :  { %v1677_v63 = vpop.f32.mrf.mxu1  ;;  %v1265_v44 = vpop.f32.mrf.mxu0 }
 0x18b   :  { %1335 = vst [vmem:[%s2599_s3 + $0xc8] sm:$0xff] %v1305_v62  ;;  %v1266_v47 = vadd.f32 %v1265_v44, %v1113_v19  ;;  %v1116_v53 = vadd.f32 %v1676_v13, %v2422_v6 }
 0x18c   :  { %v1678_v46 = vpop.f32.mrf.mxu1  ;;  %v1764_v39 = vpop.f32.mrf.mxu0 }
 0x18d   :  { %v1306_v42 = vmax.f32 %v1266_v47, 0.0  ;;  %v1679_v4 = vadd.f32 %v1678_v46, %v1677_v63 }
 0x18e   :  { %v1680_v49 = vpop.f32.mrf.mxu1  ;;  %v1268_v24 = vpop.f32.mrf.mxu0 }
 0x18f   :  { %1336 = vst [vmem:[%s2599_s3 + $0xd0] sm:$0xff] %v1306_v42  ;;  %v1269_v58 = vadd.f32 %v1268_v24, %v1116_v53  ;;  %v1121_v10 = vadd.f32 %v1679_v4, %v2429_v18 }
 0x190   :  { %v1681_v26 = vpop.f32.mrf.mxu1  ;;  %v1765_v34 = vpop.f32.mrf.mxu0 }
 0x191   :  { %v1307_v52 = vmax.f32 %v1269_v58, 0.0  ;;  %v1682_v2 = vadd.f32 %v1681_v26, %v1680_v49 }
 0x192   :  { %v1273_v20 = vpop.f32.mrf.mxu0 }
 0x193   :  { %1337 = vst [vmem:[%s2599_s3 + $0xd8] sm:$0xff] %v1307_v52  ;;  %v1274_v23 = vadd.f32 %v1273_v20, %v1121_v10  ;;  %v1124_v45 = vadd.f32 %v1682_v2, %v2438_v32 }
 0x194   :  { %v1768_v6 = vpop.f32.mrf.mxu0 }
 0x195   :  { %v1308_v5 = vmax.f32 %v1274_v23, 0.0 }
 0x196   :  { %v1276_v48 = vpop.f32.mrf.mxu0 }
 0x197   :  { %1338 = vst [vmem:[%s2599_s3 + $0xe0] sm:$0xff] %v1308_v5  ;;  %v1277_v61 = vadd.f32 %v1276_v48, %v1124_v45 }
 0x198   :  { %v1769_v40 = vpop.f32.mrf.mxu0 }
 0x199   :  { %v1309_v16 = vmax.f32 %v1277_v61, 0.0 }
 0x19b   :  { %1339 = vst [vmem:[%s2599_s3 + $0xe8] sm:$0xff] %v1309_v16 }

// kernel: _lambda_.8
= control target key start
LH: loop header
LB: loop body
LE: loop exit
PB: predicated region body
PF: predicated region fallthrough
CT: control target
= control target key end

     0   :  { %s17861_s12 = smov 0   ;;  %s17863_s13 = smov 0   ;;  %s21131_s0 = inlined_call_operand.vmem [shape: bf16[8,7616], index: 0, kind: input, shape index: {}]   ;;  %s21132_s1 = inlined_call_operand.vmem [shape: bf16[7616,512], index: 1, kind: input, shape index: {}]   ;;  %s21133_s2 = inlined_call_operand.vmem [shape: f32[1,512], index: 2, kind: input, shape index: {}]   ;;  %s21134_s3 = inlined_call_operand.vmem [shape: f32[8,512], index: 3, kind: output, shape index: {}]  }
   0x1   :  { %s17865_s14 = smov 0   ;;  %s17867_s15 = smov 0  }
   0x2   :  { %s17869_s16 = smov 0  }
   0x3 LB: > { %s22_s17 = sadd.s32 1, %s17835_s15  ;;  %p65_p1 = scmp.ne.s32.totalorder %s17827_s13, %s17823_s12  ;;  %s17839_s16 = sphi %s17869_s16, %s13_s16   ;;  %s17835_s15 = sphi %s17867_s15, %s21138_s15   ;;  %s17831_s14 = sphi %s17865_s14, %s21137_s14   ;;  %s17827_s13 = sphi %s17863_s13, %s21136_s13   ;;  %s17823_s12 = sphi %s17861_s12, %s21135_s12  }
   0x4   : > { %p23_p0 = scmp.ge.s32.totalorder %s22_s17, 2  ;;  %p66_p2 = scmp.eq.s32.totalorder %s17839_s16, 0 }
   0x5   : > { %s58_s19 = sadd.s32 1, %s17827_s13  ;;  %p15248_p5 = scmp.ge.s32.totalorder %s17839_s16, 2 }
   0x6   : > { %s21140_s17 = smov (%p23_p0, %s22_s17), 0  ;;  %p67_p3 = por %p66_p2, %p65_p1 }
   0x7   : > { %s55_s18 = ssub.s32 %s17835_s15, %s21140_s17  ;;  %153 = sbr.rel (%p15248_p5) target bundleno = 492 (0x1ec), region = 20 }
   0x8   : > { %p56_p4 = scmp.eq.s32.totalorder %s55_s18, 0 }
   0xa   : > { %s17896_s20 = scalar_select %p56_p4, %s17827_s13, %s58_s19  }
   0xc   : > { %156 = sbr.rel (!%p67_p3) target bundleno = 492 (0x1ec), region = 24  ;;  %s158_s21 = sand.u32 (%p67_p3), 1, %s17827_s13  }
   0xd   : > { %s16270_s22 = sshll.u32 (%p67_p3), %s17835_s15, 3  ;;  %s16271_s23 = smul.u32 (%p67_p3), 7616, %s158_s21 }
   0xe   : > { %s17904_s26 = scalar_lea.vmem (%p67_p3), %s21132_s1, %s16270_s22 }
   0xf   : > { %v2097_v0 = vld [vmem:[%s17904_s26] sm:$0xff] (%p67_p3)  ;;  %v2099_v1 = vld [vmem:[%s17904_s26 + $0x10] sm:$0xff] (%p67_p3)  ;;  %s17912_s27 = scalar_lea.vmem (%p67_p3), [#allocation2], %s16271_s23 }
  0x10   : > { %v2101_v2 = vld [vmem:[%s17904_s26 + $0x20] sm:$0xff] (%p67_p3)  ;;  %v2103_v3 = vld [vmem:[%s17904_s26 + $0x30] sm:$0xff] (%p67_p3)  ;;  %2098 = vst [vmem:[%s17912_s27] sm:$0xff] (%p67_p3), %v2097_v0  ;;  %2100 = vst [vmem:[%s17912_s27 + $0x8] sm:$0xff] (%p67_p3), %v2099_v1 }
  0x11   : > { %v2105_v4 = vld [vmem:[%s17904_s26 + $0x40] sm:$0xff]  ;;  %v2107_v5 = vld [vmem:[%s17904_s26 + $0x50] sm:$0xff]  ;;  %2102 = vst [vmem:[%s17912_s27 + $0x10] sm:$0xff] %v2101_v2  ;;  %2104 = vst [vmem:[%s17912_s27 + $0x18] sm:$0xff] %v2103_v3 }
  0x12   : > { %2106 = vst [vmem:[%s17912_s27 + $0x20] sm:$0xff] %v2105_v4  ;;  %2108 = vst [vmem:[%s17912_s27 + $0x28] sm:$0xff] %v2107_v5  ;;  %v2109_v6 = vld [vmem:[%s17904_s26 + $0x60] sm:$0xff]  ;;  %v2111_v7 = vld [vmem:[%s17904_s26 + $0x70] sm:$0xff] }
  0x13   : > { %v2113_v8 = vld [vmem:[%s17904_s26 + $0x80] sm:$0xff]  ;;  %2110 = vst [vmem:[%s17912_s27 + $0x30] sm:$0xff] %v2109_v6  ;;  %2112 = vst [vmem:[%s17912_s27 + $0x38] sm:$0xff] %v2111_v7  ;;  %v2115_v9 = vld [vmem:[%s17904_s26 + $0x90] sm:$0xff] }
  0x14   : > { %2114 = vst [vmem:[%s17912_s27 + $0x40] sm:$0xff] %v2113_v8  ;;  %v2117_v10 = vld [vmem:[%s17904_s26 + $0xa0] sm:$0xff]  ;;  %v2119_v11 = vld [vmem:[%s17904_s26 + $0xb0] sm:$0xff]  ;;  %2116 = vst [vmem:[%s17912_s27 + $0x48] sm:$0xff] %v2115_v9 }
  0x15   : > { %2118 = vst [vmem:[%s17912_s27 + $0x50] sm:$0xff] %v2117_v10  ;;  %2120 = vst [vmem:[%s17912_s27 + $0x58] sm:$0xff] %v2119_v11  ;;  %v2121_v12 = vld [vmem:[%s17904_s26 + $0xc0] sm:$0xff]  ;;  %v2123_v13 = vld [vmem:[%s17904_s26 + $0xd0] sm:$0xff] }
  0x16   : > { %v2125_v14 = vld [vmem:[%s17904_s26 + $0xe0] sm:$0xff]  ;;  %2122 = vst [vmem:[%s17912_s27 + $0x60] sm:$0xff] %v2121_v12  ;;  %2124 = vst [vmem:[%s17912_s27 + $0x68] sm:$0xff] %v2123_v13  ;;  %v2127_v15 = vld [vmem:[%s17904_s26 + $0xf0] sm:$0xff] }
  0x17   : > { %2126 = vst [vmem:[%s17912_s27 + $0x70] sm:$0xff] %v2125_v14  ;;  %v2129_v16 = vld [vmem:[%s17904_s26 + $0x100] sm:$0xff]  ;;  %v2131_v17 = vld [vmem:[%s17904_s26 + $0x110] sm:$0xff]  ;;  %2128 = vst [vmem:[%s17912_s27 + $0x78] sm:$0xff] %v2127_v15 }
  0x18   : > { %2130 = vst [vmem:[%s17912_s27 + $0x80] sm:$0xff] %v2129_v16  ;;  %2132 = vst [vmem:[%s17912_s27 + $0x88] sm:$0xff] %v2131_v17  ;;  %v2133_v18 = vld [vmem:[%s17904_s26 + $0x120] sm:$0xff]  ;;  %v2135_v19 = vld [vmem:[%s17904_s26 + $0x130] sm:$0xff] }
  0x19   : > { %v2137_v20 = vld [vmem:[%s17904_s26 + $0x140] sm:$0xff]  ;;  %2134 = vst [vmem:[%s17912_s27 + $0x90] sm:$0xff] %v2133_v18  ;;  %2136 = vst [vmem:[%s17912_s27 + $0x98] sm:$0xff] %v2135_v19  ;;  %v2139_v21 = vld [vmem:[%s17904_s26 + $0x150] sm:$0xff] }
  0x1a   : > { %2138 = vst [vmem:[%s17912_s27 + $0xa0] sm:$0xff] %v2137_v20  ;;  %v2141_v22 = vld [vmem:[%s17904_s26 + $0x160] sm:$0xff]  ;;  %v2143_v23 = vld [vmem:[%s17904_s26 + $0x170] sm:$0xff]  ;;  %2140 = vst [vmem:[%s17912_s27 + $0xa8] sm:$0xff] %v2139_v21 }
  0x1b   : > { %2142 = vst [vmem:[%s17912_s27 + $0xb0] sm:$0xff] %v2141_v22  ;;  %2144 = vst [vmem:[%s17912_s27 + $0xb8] sm:$0xff] %v2143_v23  ;;  %v2145_v24 = vld [vmem:[%s17904_s26 + $0x180] sm:$0xff]  ;;  %v2147_v25 = vld [vmem:[%s17904_s26 + $0x190] sm:$0xff] }
  0x1c   : > { %v2149_v26 = vld [vmem:[%s17904_s26 + $0x1a0] sm:$0xff]  ;;  %2146 = vst [vmem:[%s17912_s27 + $0xc0] sm:$0xff] %v2145_v24  ;;  %2148 = vst [vmem:[%s17912_s27 + $0xc8] sm:$0xff] %v2147_v25  ;;  %v2151_v27 = vld [vmem:[%s17904_s26 + $0x1b0] sm:$0xff] }
  0x1d   : > { %2150 = vst [vmem:[%s17912_s27 + $0xd0] sm:$0xff] %v2149_v26  ;;  %v2153_v28 = vld [vmem:[%s17904_s26 + $0x1c0] sm:$0xff]  ;;  %v2155_v29 = vld [vmem:[%s17904_s26 + $0x1d0] sm:$0xff]  ;;  %2152 = vst [vmem:[%s17912_s27 + $0xd8] sm:$0xff] %v2151_v27 }
  0x1e   : > { %2154 = vst [vmem:[%s17912_s27 + $0xe0] sm:$0xff] %v2153_v28  ;;  %2156 = vst [vmem:[%s17912_s27 + $0xe8] sm:$0xff] %v2155_v29  ;;  %v2157_v30 = vld [vmem:[%s17904_s26 + $0x1e0] sm:$0xff]  ;;  %v2159_v31 = vld [vmem:[%s17904_s26 + $0x1f0] sm:$0xff] }
  0x1f   : > { %v2161_v32 = vld [vmem:[%s17904_s26 + $0x200] sm:$0xff]  ;;  %2158 = vst [vmem:[%s17912_s27 + $0xf0] sm:$0xff] %v2157_v30  ;;  %2160 = vst [vmem:[%s17912_s27 + $0xf8] sm:$0xff] %v2159_v31  ;;  %v2163_v33 = vld [vmem:[%s17904_s26 + $0x210] sm:$0xff] }
  0x20   : > { %2162 = vst [vmem:[%s17912_s27 + $0x100] sm:$0xff] %v2161_v32  ;;  %v2165_v34 = vld [vmem:[%s17904_s26 + $0x220] sm:$0xff]  ;;  %v2167_v35 = vld [vmem:[%s17904_s26 + $0x230] sm:$0xff]  ;;  %2164 = vst [vmem:[%s17912_s27 + $0x108] sm:$0xff] %v2163_v33 }
  0x21   : > { %2166 = vst [vmem:[%s17912_s27 + $0x110] sm:$0xff] %v2165_v34  ;;  %2168 = vst [vmem:[%s17912_s27 + $0x118] sm:$0xff] %v2167_v35  ;;  %v2169_v36 = vld [vmem:[%s17904_s26 + $0x240] sm:$0xff]  ;;  %v2171_v37 = vld [vmem:[%s17904_s26 + $0x250] sm:$0xff] }
  0x22   : > { %v2173_v38 = vld [vmem:[%s17904_s26 + $0x260] sm:$0xff]  ;;  %2170 = vst [vmem:[%s17912_s27 + $0x120] sm:$0xff] %v2169_v36  ;;  %2172 = vst [vmem:[%s17912_s27 + $0x128] sm:$0xff] %v2171_v37  ;;  %v2175_v39 = vld [vmem:[%s17904_s26 + $0x270] sm:$0xff] }
  0x23   : > { %2174 = vst [vmem:[%s17912_s27 + $0x130] sm:$0xff] %v2173_v38  ;;  %v2177_v40 = vld [vmem:[%s17904_s26 + $0x280] sm:$0xff]  ;;  %v2179_v41 = vld [vmem:[%s17904_s26 + $0x290] sm:$0xff]  ;;  %2176 = vst [vmem:[%s17912_s27 + $0x138] sm:$0xff] %v2175_v39 }
  0x24   : > { %2178 = vst [vmem:[%s17912_s27 + $0x140] sm:$0xff] %v2177_v40  ;;  %2180 = vst [vmem:[%s17912_s27 + $0x148] sm:$0xff] %v2179_v41  ;;  %v2181_v42 = vld [vmem:[%s17904_s26 + $0x2a0] sm:$0xff]  ;;  %v2183_v43 = vld [vmem:[%s17904_s26 + $0x2b0] sm:$0xff] }
  0x25   : > { %v2185_v44 = vld [vmem:[%s17904_s26 + $0x2c0] sm:$0xff]  ;;  %2182 = vst [vmem:[%s17912_s27 + $0x150] sm:$0xff] %v2181_v42  ;;  %2184 = vst [vmem:[%s17912_s27 + $0x158] sm:$0xff] %v2183_v43  ;;  %v2187_v45 = vld [vmem:[%s17904_s26 + $0x2d0] sm:$0xff] }
  0x26   : > { %2186 = vst [vmem:[%s17912_s27 + $0x160] sm:$0xff] %v2185_v44  ;;  %v2189_v46 = vld [vmem:[%s17904_s26 + $0x2e0] sm:$0xff]  ;;  %v2191_v47 = vld [vmem:[%s17904_s26 + $0x2f0] sm:$0xff]  ;;  %2188 = vst [vmem:[%s17912_s27 + $0x168] sm:$0xff] %v2187_v45 }
  0x27   : > { %2190 = vst [vmem:[%s17912_s27 + $0x170] sm:$0xff] %v2189_v46  ;;  %2192 = vst [vmem:[%s17912_s27 + $0x178] sm:$0xff] %v2191_v47  ;;  %v2193_v48 = vld [vmem:[%s17904_s26 + $0x300] sm:$0xff]  ;;  %v2195_v49 = vld [vmem:[%s17904_s26 + $0x310] sm:$0xff] }
  0x28   : > { %v2197_v50 = vld [vmem:[%s17904_s26 + $0x320] sm:$0xff]  ;;  %2194 = vst [vmem:[%s17912_s27 + $0x180] sm:$0xff] %v2193_v48  ;;  %2196 = vst [vmem:[%s17912_s27 + $0x188] sm:$0xff] %v2195_v49  ;;  %v2199_v51 = vld [vmem:[%s17904_s26 + $0x330] sm:$0xff] }
  0x29   : > { %2198 = vst [vmem:[%s17912_s27 + $0x190] sm:$0xff] %v2197_v50  ;;  %v2201_v52 = vld [vmem:[%s17904_s26 + $0x340] sm:$0xff]  ;;  %v2203_v53 = vld [vmem:[%s17904_s26 + $0x350] sm:$0xff]  ;;  %2200 = vst [vmem:[%s17912_s27 + $0x198] sm:$0xff] %v2199_v51 }
  0x2a   : > { %2202 = vst [vmem:[%s17912_s27 + $0x1a0] sm:$0xff] %v2201_v52  ;;  %2204 = vst [vmem:[%s17912_s27 + $0x1a8] sm:$0xff] %v2203_v53  ;;  %v2205_v54 = vld [vmem:[%s17904_s26 + $0x360] sm:$0xff]  ;;  %v2207_v55 = vld [vmem:[%s17904_s26 + $0x370] sm:$0xff] }
  0x2b   : > { %v2209_v56 = vld [vmem:[%s17904_s26 + $0x380] sm:$0xff]  ;;  %2206 = vst [vmem:[%s17912_s27 + $0x1b0] sm:$0xff] %v2205_v54  ;;  %2208 = vst [vmem:[%s17912_s27 + $0x1b8] sm:$0xff] %v2207_v55  ;;  %v2211_v57 = vld [vmem:[%s17904_s26 + $0x390] sm:$0xff] }
  0x2c   : > { %2210 = vst [vmem:[%s17912_s27 + $0x1c0] sm:$0xff] %v2209_v56  ;;  %v2213_v58 = vld [vmem:[%s17904_s26 + $0x3a0] sm:$0xff]  ;;  %v2215_v59 = vld [vmem:[%s17904_s26 + $0x3b0] sm:$0xff]  ;;  %2212 = vst [vmem:[%s17912_s27 + $0x1c8] sm:$0xff] %v2211_v57 }
  0x2d   : > { %2214 = vst [vmem:[%s17912_s27 + $0x1d0] sm:$0xff] %v2213_v58  ;;  %2216 = vst [vmem:[%s17912_s27 + $0x1d8] sm:$0xff] %v2215_v59  ;;  %v2217_v60 = vld [vmem:[%s17904_s26 + $0x3c0] sm:$0xff]  ;;  %v2219_v61 = vld [vmem:[%s17904_s26 + $0x3d0] sm:$0xff] }
  0x2e   : > { %v2221_v62 = vld [vmem:[%s17904_s26 + $0x3e0] sm:$0xff]  ;;  %2218 = vst [vmem:[%s17912_s27 + $0x1e0] sm:$0xff] %v2217_v60  ;;  %2220 = vst [vmem:[%s17912_s27 + $0x1e8] sm:$0xff] %v2219_v61  ;;  %v2223_v63 = vld [vmem:[%s17904_s26 + $0x3f0] sm:$0xff] }
  0x2f   : > { %2222 = vst [vmem:[%s17912_s27 + $0x1f0] sm:$0xff] %v2221_v62  ;;  %v2225_v0 = vld [vmem:[%s17904_s26 + $0x400] sm:$0xff]  ;;  %v2227_v1 = vld [vmem:[%s17904_s26 + $0x410] sm:$0xff]  ;;  %2224 = vst [vmem:[%s17912_s27 + $0x1f8] sm:$0xff] %v2223_v63 }
  0x30   : > { %2226 = vst [vmem:[%s17912_s27 + $0x200] sm:$0xff] %v2225_v0  ;;  %2228 = vst [vmem:[%s17912_s27 + $0x208] sm:$0xff] %v2227_v1  ;;  %v2229_v2 = vld [vmem:[%s17904_s26 + $0x420] sm:$0xff]  ;;  %v2231_v3 = vld [vmem:[%s17904_s26 + $0x430] sm:$0xff] }
  0x31   : > { %v2233_v4 = vld [vmem:[%s17904_s26 + $0x440] sm:$0xff]  ;;  %2230 = vst [vmem:[%s17912_s27 + $0x210] sm:$0xff] %v2229_v2  ;;  %2232 = vst [vmem:[%s17912_s27 + $0x218] sm:$0xff] %v2231_v3  ;;  %v2235_v5 = vld [vmem:[%s17904_s26 + $0x450] sm:$0xff] }
  0x32   : > { %2234 = vst [vmem:[%s17912_s27 + $0x220] sm:$0xff] %v2233_v4  ;;  %v2237_v6 = vld [vmem:[%s17904_s26 + $0x460] sm:$0xff]  ;;  %v2239_v7 = vld [vmem:[%s17904_s26 + $0x470] sm:$0xff]  ;;  %2236 = vst [vmem:[%s17912_s27 + $0x228] sm:$0xff] %v2235_v5 }
  0x33   : > { %2238 = vst [vmem:[%s17912_s27 + $0x230] sm:$0xff] %v2237_v6  ;;  %2240 = vst [vmem:[%s17912_s27 + $0x238] sm:$0xff] %v2239_v7  ;;  %v2241_v8 = vld [vmem:[%s17904_s26 + $0x480] sm:$0xff]  ;;  %v2243_v9 = vld [vmem:[%s17904_s26 + $0x490] sm:$0xff] }
  0x34   : > { %v2245_v10 = vld [vmem:[%s17904_s26 + $0x4a0] sm:$0xff]  ;;  %2242 = vst [vmem:[%s17912_s27 + $0x240] sm:$0xff] %v2241_v8  ;;  %2244 = vst [vmem:[%s17912_s27 + $0x248] sm:$0xff] %v2243_v9  ;;  %v2247_v11 = vld [vmem:[%s17904_s26 + $0x4b0] sm:$0xff] }
  0x35   : > { %2246 = vst [vmem:[%s17912_s27 + $0x250] sm:$0xff] %v2245_v10  ;;  %v2249_v12 = vld [vmem:[%s17904_s26 + $0x4c0] sm:$0xff]  ;;  %v2251_v13 = vld [vmem:[%s17904_s26 + $0x4d0] sm:$0xff]  ;;  %2248 = vst [vmem:[%s17912_s27 + $0x258] sm:$0xff] %v2247_v11 }
  0x36   : > { %2250 = vst [vmem:[%s17912_s27 + $0x260] sm:$0xff] %v2249_v12  ;;  %2252 = vst [vmem:[%s17912_s27 + $0x268] sm:$0xff] %v2251_v13  ;;  %v2253_v14 = vld [vmem:[%s17904_s26 + $0x4e0] sm:$0xff]  ;;  %v2255_v15 = vld [vmem:[%s17904_s26 + $0x4f0] sm:$0xff] }
  0x37   : > { %v2257_v16 = vld [vmem:[%s17904_s26 + $0x500] sm:$0xff]  ;;  %2254 = vst [vmem:[%s17912_s27 + $0x270] sm:$0xff] %v2253_v14  ;;  %2256 = vst [vmem:[%s17912_s27 + $0x278] sm:$0xff] %v2255_v15  ;;  %v2259_v17 = vld [vmem:[%s17904_s26 + $0x510] sm:$0xff] }
  0x38   : > { %2258 = vst [vmem:[%s17912_s27 + $0x280] sm:$0xff] %v2257_v16  ;;  %v2261_v18 = vld [vmem:[%s17904_s26 + $0x520] sm:$0xff]  ;;  %v2263_v19 = vld [vmem:[%s17904_s26 + $0x530] sm:$0xff]  ;;  %2260 = vst [vmem:[%s17912_s27 + $0x288] sm:$0xff] %v2259_v17 }
  0x39   : > { %2262 = vst [vmem:[%s17912_s27 + $0x290] sm:$0xff] %v2261_v18  ;;  %2264 = vst [vmem:[%s17912_s27 + $0x298] sm:$0xff] %v2263_v19  ;;  %v2265_v20 = vld [vmem:[%s17904_s26 + $0x540] sm:$0xff]  ;;  %v2267_v21 = vld [vmem:[%s17904_s26 + $0x550] sm:$0xff] }
  0x3a   : > { %v2269_v22 = vld [vmem:[%s17904_s26 + $0x560] sm:$0xff]  ;;  %2266 = vst [vmem:[%s17912_s27 + $0x2a0] sm:$0xff] %v2265_v20  ;;  %2268 = vst [vmem:[%s17912_s27 + $0x2a8] sm:$0xff] %v2267_v21  ;;  %v2271_v23 = vld [vmem:[%s17904_s26 + $0x570] sm:$0xff] }
  0x3b   : > { %2270 = vst [vmem:[%s17912_s27 + $0x2b0] sm:$0xff] %v2269_v22  ;;  %v2273_v24 = vld [vmem:[%s17904_s26 + $0x580] sm:$0xff]  ;;  %v2275_v25 = vld [vmem:[%s17904_s26 + $0x590] sm:$0xff]  ;;  %2272 = vst [vmem:[%s17912_s27 + $0x2b8] sm:$0xff] %v2271_v23 }
  0x3c   : > { %2274 = vst [vmem:[%s17912_s27 + $0x2c0] sm:$0xff] %v2273_v24  ;;  %2276 = vst [vmem:[%s17912_s27 + $0x2c8] sm:$0xff] %v2275_v25  ;;  %v2277_v26 = vld [vmem:[%s17904_s26 + $0x5a0] sm:$0xff]  ;;  %v2279_v27 = vld [vmem:[%s17904_s26 + $0x5b0] sm:$0xff] }
  0x3d   : > { %v2281_v28 = vld [vmem:[%s17904_s26 + $0x5c0] sm:$0xff]  ;;  %2278 = vst [vmem:[%s17912_s27 + $0x2d0] sm:$0xff] %v2277_v26  ;;  %2280 = vst [vmem:[%s17912_s27 + $0x2d8] sm:$0xff] %v2279_v27  ;;  %v2283_v29 = vld [vmem:[%s17904_s26 + $0x5d0] sm:$0xff] }
  0x3e   : > { %2282 = vst [vmem:[%s17912_s27 + $0x2e0] sm:$0xff] %v2281_v28  ;;  %v2285_v30 = vld [vmem:[%s17904_s26 + $0x5e0] sm:$0xff]  ;;  %v2287_v31 = vld [vmem:[%s17904_s26 + $0x5f0] sm:$0xff]  ;;  %2284 = vst [vmem:[%s17912_s27 + $0x2e8] sm:$0xff] %v2283_v29 }
  0x3f   : > { %2286 = vst [vmem:[%s17912_s27 + $0x2f0] sm:$0xff] %v2285_v30  ;;  %2288 = vst [vmem:[%s17912_s27 + $0x2f8] sm:$0xff] %v2287_v31  ;;  %v2289_v32 = vld [vmem:[%s17904_s26 + $0x600] sm:$0xff]  ;;  %v2291_v33 = vld [vmem:[%s17904_s26 + $0x610] sm:$0xff] }
  0x40   : > { %v2293_v34 = vld [vmem:[%s17904_s26 + $0x620] sm:$0xff]  ;;  %2290 = vst [vmem:[%s17912_s27 + $0x300] sm:$0xff] %v2289_v32  ;;  %2292 = vst [vmem:[%s17912_s27 + $0x308] sm:$0xff] %v2291_v33  ;;  %v2295_v35 = vld [vmem:[%s17904_s26 + $0x630] sm:$0xff] }
  0x41   : > { %2294 = vst [vmem:[%s17912_s27 + $0x310] sm:$0xff] %v2293_v34  ;;  %v2297_v36 = vld [vmem:[%s17904_s26 + $0x640] sm:$0xff]  ;;  %v2299_v37 = vld [vmem:[%s17904_s26 + $0x650] sm:$0xff]  ;;  %2296 = vst [vmem:[%s17912_s27 + $0x318] sm:$0xff] %v2295_v35 }
  0x42   : > { %2298 = vst [vmem:[%s17912_s27 + $0x320] sm:$0xff] %v2297_v36  ;;  %2300 = vst [vmem:[%s17912_s27 + $0x328] sm:$0xff] %v2299_v37  ;;  %v2301_v38 = vld [vmem:[%s17904_s26 + $0x660] sm:$0xff]  ;;  %v2303_v39 = vld [vmem:[%s17904_s26 + $0x670] sm:$0xff] }
  0x43   : > { %v2305_v40 = vld [vmem:[%s17904_s26 + $0x680] sm:$0xff]  ;;  %2302 = vst [vmem:[%s17912_s27 + $0x330] sm:$0xff] %v2301_v38  ;;  %2304 = vst [vmem:[%s17912_s27 + $0x338] sm:$0xff] %v2303_v39  ;;  %v2307_v41 = vld [vmem:[%s17904_s26 + $0x690] sm:$0xff] }
  0x44   : > { %2306 = vst [vmem:[%s17912_s27 + $0x340] sm:$0xff] %v2305_v40  ;;  %v2309_v42 = vld [vmem:[%s17904_s26 + $0x6a0] sm:$0xff]  ;;  %v2311_v43 = vld [vmem:[%s17904_s26 + $0x6b0] sm:$0xff]  ;;  %2308 = vst [vmem:[%s17912_s27 + $0x348] sm:$0xff] %v2307_v41 }
  0x45   : > { %2310 = vst [vmem:[%s17912_s27 + $0x350] sm:$0xff] %v2309_v42  ;;  %2312 = vst [vmem:[%s17912_s27 + $0x358] sm:$0xff] %v2311_v43  ;;  %v2313_v44 = vld [vmem:[%s17904_s26 + $0x6c0] sm:$0xff]  ;;  %v2315_v45 = vld [vmem:[%s17904_s26 + $0x6d0] sm:$0xff] }
  0x46   : > { %v2317_v46 = vld [vmem:[%s17904_s26 + $0x6e0] sm:$0xff]  ;;  %2314 = vst [vmem:[%s17912_s27 + $0x360] sm:$0xff] %v2313_v44  ;;  %2316 = vst [vmem:[%s17912_s27 + $0x368] sm:$0xff] %v2315_v45  ;;  %v2319_v47 = vld [vmem:[%s17904_s26 + $0x6f0] sm:$0xff] }
  0x47   : > { %2318 = vst [vmem:[%s17912_s27 + $0x370] sm:$0xff] %v2317_v46  ;;  %v2321_v48 = vld [vmem:[%s17904_s26 + $0x700] sm:$0xff]  ;;  %v2323_v49 = vld [vmem:[%s17904_s26 + $0x710] sm:$0xff]  ;;  %2320 = vst [vmem:[%s17912_s27 + $0x378] sm:$0xff] %v2319_v47 }
  0x48   : > { %2322 = vst [vmem:[%s17912_s27 + $0x380] sm:$0xff] %v2321_v48  ;;  %2324 = vst [vmem:[%s17912_s27 + $0x388] sm:$0xff] %v2323_v49  ;;  %v2325_v50 = vld [vmem:[%s17904_s26 + $0x720] sm:$0xff]  ;;  %v2327_v51 = vld [vmem:[%s17904_s26 + $0x730] sm:$0xff] }
  0x49   : > { %v2329_v52 = vld [vmem:[%s17904_s26 + $0x740] sm:$0xff]  ;;  %2326 = vst [vmem:[%s17912_s27 + $0x390] sm:$0xff] %v2325_v50  ;;  %2328 = vst [vmem:[%s17912_s27 + $0x398] sm:$0xff] %v2327_v51  ;;  %v2331_v53 = vld [vmem:[%s17904_s26 + $0x750] sm:$0xff] }
  0x4a   : > { %2330 = vst [vmem:[%s17912_s27 + $0x3a0] sm:$0xff] %v2329_v52  ;;  %v2333_v54 = vld [vmem:[%s17904_s26 + $0x760] sm:$0xff]  ;;  %v2335_v55 = vld [vmem:[%s17904_s26 + $0x770] sm:$0xff]  ;;  %2332 = vst [vmem:[%s17912_s27 + $0x3a8] sm:$0xff] %v2331_v53 }
  0x4b   : > { %2334 = vst [vmem:[%s17912_s27 + $0x3b0] sm:$0xff] %v2333_v54  ;;  %2336 = vst [vmem:[%s17912_s27 + $0x3b8] sm:$0xff] %v2335_v55  ;;  %v2337_v56 = vld [vmem:[%s17904_s26 + $0x780] sm:$0xff]  ;;  %v2339_v57 = vld [vmem:[%s17904_s26 + $0x790] sm:$0xff] }
  0x4c   : > { %v2341_v58 = vld [vmem:[%s17904_s26 + $0x7a0] sm:$0xff]  ;;  %2338 = vst [vmem:[%s17912_s27 + $0x3c0] sm:$0xff] %v2337_v56  ;;  %2340 = vst [vmem:[%s17912_s27 + $0x3c8] sm:$0xff] %v2339_v57  ;;  %v2343_v59 = vld [vmem:[%s17904_s26 + $0x7b0] sm:$0xff] }
  0x4d   : > { %2342 = vst [vmem:[%s17912_s27 + $0x3d0] sm:$0xff] %v2341_v58  ;;  %v2345_v60 = vld [vmem:[%s17904_s26 + $0x7c0] sm:$0xff]  ;;  %v2347_v61 = vld [vmem:[%s17904_s26 + $0x7d0] sm:$0xff]  ;;  %2344 = vst [vmem:[%s17912_s27 + $0x3d8] sm:$0xff] %v2343_v59 }
  0x4e   : > { %2346 = vst [vmem:[%s17912_s27 + $0x3e0] sm:$0xff] %v2345_v60  ;;  %2348 = vst [vmem:[%s17912_s27 + $0x3e8] sm:$0xff] %v2347_v61  ;;  %v2349_v62 = vld [vmem:[%s17904_s26 + $0x7e0] sm:$0xff]  ;;  %v2351_v63 = vld [vmem:[%s17904_s26 + $0x7f0] sm:$0xff] }
  0x4f   : > { %v2353_v0 = vld [vmem:[%s17904_s26 + $0x800] sm:$0xff]  ;;  %2350 = vst [vmem:[%s17912_s27 + $0x3f0] sm:$0xff] %v2349_v62  ;;  %2352 = vst [vmem:[%s17912_s27 + $0x3f8] sm:$0xff] %v2351_v63  ;;  %v2355_v1 = vld [vmem:[%s17904_s26 + $0x810] sm:$0xff] }
  0x50   : > { %2354 = vst [vmem:[%s17912_s27 + $0x400] sm:$0xff] %v2353_v0  ;;  %v2357_v2 = vld [vmem:[%s17904_s26 + $0x820] sm:$0xff]  ;;  %v2359_v3 = vld [vmem:[%s17904_s26 + $0x830] sm:$0xff]  ;;  %2356 = vst [vmem:[%s17912_s27 + $0x408] sm:$0xff] %v2355_v1 }
  0x51   : > { %2358 = vst [vmem:[%s17912_s27 + $0x410] sm:$0xff] %v2357_v2  ;;  %2360 = vst [vmem:[%s17912_s27 + $0x418] sm:$0xff] %v2359_v3  ;;  %v2361_v4 = vld [vmem:[%s17904_s26 + $0x840] sm:$0xff]  ;;  %v2363_v5 = vld [vmem:[%s17904_s26 + $0x850] sm:$0xff] }
  0x52   : > { %v2365_v6 = vld [vmem:[%s17904_s26 + $0x860] sm:$0xff]  ;;  %2362 = vst [vmem:[%s17912_s27 + $0x420] sm:$0xff] %v2361_v4  ;;  %2364 = vst [vmem:[%s17912_s27 + $0x428] sm:$0xff] %v2363_v5  ;;  %v2367_v7 = vld [vmem:[%s17904_s26 + $0x870] sm:$0xff] }
  0x53   : > { %2366 = vst [vmem:[%s17912_s27 + $0x430] sm:$0xff] %v2365_v6  ;;  %v2369_v8 = vld [vmem:[%s17904_s26 + $0x880] sm:$0xff]  ;;  %v2371_v9 = vld [vmem:[%s17904_s26 + $0x890] sm:$0xff]  ;;  %2368 = vst [vmem:[%s17912_s27 + $0x438] sm:$0xff] %v2367_v7 }
  0x54   : > { %2370 = vst [vmem:[%s17912_s27 + $0x440] sm:$0xff] %v2369_v8  ;;  %2372 = vst [vmem:[%s17912_s27 + $0x448] sm:$0xff] %v2371_v9  ;;  %v2373_v10 = vld [vmem:[%s17904_s26 + $0x8a0] sm:$0xff]  ;;  %v2375_v11 = vld [vmem:[%s17904_s26 + $0x8b0] sm:$0xff] }
  0x55   : > { %v2377_v12 = vld [vmem:[%s17904_s26 + $0x8c0] sm:$0xff]  ;;  %2374 = vst [vmem:[%s17912_s27 + $0x450] sm:$0xff] %v2373_v10  ;;  %2376 = vst [vmem:[%s17912_s27 + $0x458] sm:$0xff] %v2375_v11  ;;  %v2379_v13 = vld [vmem:[%s17904_s26 + $0x8d0] sm:$0xff] }
  0x56   : > { %2378 = vst [vmem:[%s17912_s27 + $0x460] sm:$0xff] %v2377_v12  ;;  %v2381_v14 = vld [vmem:[%s17904_s26 + $0x8e0] sm:$0xff]  ;;  %v2383_v15 = vld [vmem:[%s17904_s26 + $0x8f0] sm:$0xff]  ;;  %2380 = vst [vmem:[%s17912_s27 + $0x468] sm:$0xff] %v2379_v13 }
  0x57   : > { %2382 = vst [vmem:[%s17912_s27 + $0x470] sm:$0xff] %v2381_v14  ;;  %2384 = vst [vmem:[%s17912_s27 + $0x478] sm:$0xff] %v2383_v15  ;;  %v2385_v16 = vld [vmem:[%s17904_s26 + $0x900] sm:$0xff]  ;;  %v2387_v17 = vld [vmem:[%s17904_s26 + $0x910] sm:$0xff] }
  0x58   : > { %v2389_v18 = vld [vmem:[%s17904_s26 + $0x920] sm:$0xff]  ;;  %2386 = vst [vmem:[%s17912_s27 + $0x480] sm:$0xff] %v2385_v16  ;;  %2388 = vst [vmem:[%s17912_s27 + $0x488] sm:$0xff] %v2387_v17  ;;  %v2391_v19 = vld [vmem:[%s17904_s26 + $0x930] sm:$0xff] }
  0x59   : > { %2390 = vst [vmem:[%s17912_s27 + $0x490] sm:$0xff] %v2389_v18  ;;  %v2393_v20 = vld [vmem:[%s17904_s26 + $0x940] sm:$0xff]  ;;  %v2395_v21 = vld [vmem:[%s17904_s26 + $0x950] sm:$0xff]  ;;  %2392 = vst [vmem:[%s17912_s27 + $0x498] sm:$0xff] %v2391_v19 }
  0x5a   : > { %2394 = vst [vmem:[%s17912_s27 + $0x4a0] sm:$0xff] %v2393_v20  ;;  %2396 = vst [vmem:[%s17912_s27 + $0x4a8] sm:$0xff] %v2395_v21  ;;  %v2397_v22 = vld [vmem:[%s17904_s26 + $0x960] sm:$0xff]  ;;  %v2399_v23 = vld [vmem:[%s17904_s26 + $0x970] sm:$0xff] }
  0x5b   : > { %v2401_v24 = vld [vmem:[%s17904_s26 + $0x980] sm:$0xff]  ;;  %2398 = vst [vmem:[%s17912_s27 + $0x4b0] sm:$0xff] %v2397_v22  ;;  %2400 = vst [vmem:[%s17912_s27 + $0x4b8] sm:$0xff] %v2399_v23  ;;  %v2403_v25 = vld [vmem:[%s17904_s26 + $0x990] sm:$0xff] }
  0x5c   : > { %2402 = vst [vmem:[%s17912_s27 + $0x4c0] sm:$0xff] %v2401_v24  ;;  %v2405_v26 = vld [vmem:[%s17904_s26 + $0x9a0] sm:$0xff]  ;;  %v2407_v27 = vld [vmem:[%s17904_s26 + $0x9b0] sm:$0xff]  ;;  %2404 = vst [vmem:[%s17912_s27 + $0x4c8] sm:$0xff] %v2403_v25 }
  0x5d   : > { %2406 = vst [vmem:[%s17912_s27 + $0x4d0] sm:$0xff] %v2405_v26  ;;  %2408 = vst [vmem:[%s17912_s27 + $0x4d8] sm:$0xff] %v2407_v27  ;;  %v2409_v28 = vld [vmem:[%s17904_s26 + $0x9c0] sm:$0xff]  ;;  %v2411_v29 = vld [vmem:[%s17904_s26 + $0x9d0] sm:$0xff] }
  0x5e   : > { %v2413_v30 = vld [vmem:[%s17904_s26 + $0x9e0] sm:$0xff]  ;;  %2410 = vst [vmem:[%s17912_s27 + $0x4e0] sm:$0xff] %v2409_v28  ;;  %2412 = vst [vmem:[%s17912_s27 + $0x4e8] sm:$0xff] %v2411_v29  ;;  %v2415_v31 = vld [vmem:[%s17904_s26 + $0x9f0] sm:$0xff] }
  0x5f   : > { %2414 = vst [vmem:[%s17912_s27 + $0x4f0] sm:$0xff] %v2413_v30  ;;  %v2417_v32 = vld [vmem:[%s17904_s26 + $0xa00] sm:$0xff]  ;;  %v2419_v33 = vld [vmem:[%s17904_s26 + $0xa10] sm:$0xff]  ;;  %2416 = vst [vmem:[%s17912_s27 + $0x4f8] sm:$0xff] %v2415_v31 }
  0x60   : > { %2418 = vst [vmem:[%s17912_s27 + $0x500] sm:$0xff] %v2417_v32  ;;  %2420 = vst [vmem:[%s17912_s27 + $0x508] sm:$0xff] %v2419_v33  ;;  %v2421_v34 = vld [vmem:[%s17904_s26 + $0xa20] sm:$0xff]  ;;  %v2423_v35 = vld [vmem:[%s17904_s26 + $0xa30] sm:$0xff] }
  0x61   : > { %v2425_v36 = vld [vmem:[%s17904_s26 + $0xa40] sm:$0xff]  ;;  %2422 = vst [vmem:[%s17912_s27 + $0x510] sm:$0xff] %v2421_v34  ;;  %2424 = vst [vmem:[%s17912_s27 + $0x518] sm:$0xff] %v2423_v35  ;;  %v2427_v37 = vld [vmem:[%s17904_s26 + $0xa50] sm:$0xff] }
  0x62   : > { %2426 = vst [vmem:[%s17912_s27 + $0x520] sm:$0xff] %v2425_v36  ;;  %v2429_v38 = vld [vmem:[%s17904_s26 + $0xa60] sm:$0xff]  ;;  %v2431_v39 = vld [vmem:[%s17904_s26 + $0xa70] sm:$0xff]  ;;  %2428 = vst [vmem:[%s17912_s27 + $0x528] sm:$0xff] %v2427_v37 }
  0x63   : > { %2430 = vst [vmem:[%s17912_s27 + $0x530] sm:$0xff] %v2429_v38  ;;  %2432 = vst [vmem:[%s17912_s27 + $0x538] sm:$0xff] %v2431_v39  ;;  %v2433_v40 = vld [vmem:[%s17904_s26 + $0xa80] sm:$0xff]  ;;  %v2435_v41 = vld [vmem:[%s17904_s26 + $0xa90] sm:$0xff] }
  0x64   : > { %v2437_v42 = vld [vmem:[%s17904_s26 + $0xaa0] sm:$0xff]  ;;  %2434 = vst [vmem:[%s17912_s27 + $0x540] sm:$0xff] %v2433_v40  ;;  %2436 = vst [vmem:[%s17912_s27 + $0x548] sm:$0xff] %v2435_v41  ;;  %v2439_v43 = vld [vmem:[%s17904_s26 + $0xab0] sm:$0xff] }
  0x65   : > { %2438 = vst [vmem:[%s17912_s27 + $0x550] sm:$0xff] %v2437_v42  ;;  %v2441_v44 = vld [vmem:[%s17904_s26 + $0xac0] sm:$0xff]  ;;  %v2443_v45 = vld [vmem:[%s17904_s26 + $0xad0] sm:$0xff]  ;;  %2440 = vst [vmem:[%s17912_s27 + $0x558] sm:$0xff] %v2439_v43 }
  0x66   : > { %2442 = vst [vmem:[%s17912_s27 + $0x560] sm:$0xff] %v2441_v44  ;;  %2444 = vst [vmem:[%s17912_s27 + $0x568] sm:$0xff] %v2443_v45  ;;  %v2445_v46 = vld [vmem:[%s17904_s26 + $0xae0] sm:$0xff]  ;;  %v2447_v47 = vld [vmem:[%s17904_s26 + $0xaf0] sm:$0xff] }
  0x67   : > { %v2449_v48 = vld [vmem:[%s17904_s26 + $0xb00] sm:$0xff]  ;;  %2446 = vst [vmem:[%s17912_s27 + $0x570] sm:$0xff] %v2445_v46  ;;  %2448 = vst [vmem:[%s17912_s27 + $0x578] sm:$0xff] %v2447_v47  ;;  %v2451_v49 = vld [vmem:[%s17904_s26 + $0xb10] sm:$0xff] }
  0x68   : > { %2450 = vst [vmem:[%s17912_s27 + $0x580] sm:$0xff] %v2449_v48  ;;  %v2453_v50 = vld [vmem:[%s17904_s26 + $0xb20] sm:$0xff]  ;;  %v2455_v51 = vld [vmem:[%s17904_s26 + $0xb30] sm:$0xff]  ;;  %2452 = vst [vmem:[%s17912_s27 + $0x588] sm:$0xff] %v2451_v49 }
  0x69   : > { %2454 = vst [vmem:[%s17912_s27 + $0x590] sm:$0xff] %v2453_v50  ;;  %2456 = vst [vmem:[%s17912_s27 + $0x598] sm:$0xff] %v2455_v51  ;;  %v2457_v52 = vld [vmem:[%s17904_s26 + $0xb40] sm:$0xff]  ;;  %v2459_v53 = vld [vmem:[%s17904_s26 + $0xb50] sm:$0xff] }
  0x6a   : > { %v2461_v54 = vld [vmem:[%s17904_s26 + $0xb60] sm:$0xff]  ;;  %2458 = vst [vmem:[%s17912_s27 + $0x5a0] sm:$0xff] %v2457_v52  ;;  %2460 = vst [vmem:[%s17912_s27 + $0x5a8] sm:$0xff] %v2459_v53  ;;  %v2463_v55 = vld [vmem:[%s17904_s26 + $0xb70] sm:$0xff] }
  0x6b   : > { %2462 = vst [vmem:[%s17912_s27 + $0x5b0] sm:$0xff] %v2461_v54  ;;  %v2465_v56 = vld [vmem:[%s17904_s26 + $0xb80] sm:$0xff]  ;;  %v2467_v57 = vld [vmem:[%s17904_s26 + $0xb90] sm:$0xff]  ;;  %2464 = vst [vmem:[%s17912_s27 + $0x5b8] sm:$0xff] %v2463_v55 }
  0x6c   : > { %2466 = vst [vmem:[%s17912_s27 + $0x5c0] sm:$0xff] %v2465_v56  ;;  %2468 = vst [vmem:[%s17912_s27 + $0x5c8] sm:$0xff] %v2467_v57  ;;  %v2469_v58 = vld [vmem:[%s17904_s26 + $0xba0] sm:$0xff]  ;;  %v2471_v59 = vld [vmem:[%s17904_s26 + $0xbb0] sm:$0xff] }
  0x6d   : > { %v2473_v60 = vld [vmem:[%s17904_s26 + $0xbc0] sm:$0xff]  ;;  %2470 = vst [vmem:[%s17912_s27 + $0x5d0] sm:$0xff] %v2469_v58  ;;  %2472 = vst [vmem:[%s17912_s27 + $0x5d8] sm:$0xff] %v2471_v59  ;;  %v2475_v61 = vld [vmem:[%s17904_s26 + $0xbd0] sm:$0xff] }
  0x6e   : > { %2474 = vst [vmem:[%s17912_s27 + $0x5e0] sm:$0xff] %v2473_v60  ;;  %v2477_v62 = vld [vmem:[%s17904_s26 + $0xbe0] sm:$0xff]  ;;  %v2479_v63 = vld [vmem:[%s17904_s26 + $0xbf0] sm:$0xff]  ;;  %2476 = vst [vmem:[%s17912_s27 + $0x5e8] sm:$0xff] %v2475_v61 }
  0x6f   : > { %2478 = vst [vmem:[%s17912_s27 + $0x5f0] sm:$0xff] %v2477_v62  ;;  %2480 = vst [vmem:[%s17912_s27 + $0x5f8] sm:$0xff] %v2479_v63  ;;  %v2481_v0 = vld [vmem:[%s17904_s26 + $0xc00] sm:$0xff]  ;;  %v2483_v1 = vld [vmem:[%s17904_s26 + $0xc10] sm:$0xff] }
  0x70   : > { %v2485_v2 = vld [vmem:[%s17904_s26 + $0xc20] sm:$0xff]  ;;  %2482 = vst [vmem:[%s17912_s27 + $0x600] sm:$0xff] %v2481_v0  ;;  %2484 = vst [vmem:[%s17912_s27 + $0x608] sm:$0xff] %v2483_v1  ;;  %v2487_v3 = vld [vmem:[%s17904_s26 + $0xc30] sm:$0xff] }
  0x71   : > { %2486 = vst [vmem:[%s17912_s27 + $0x610] sm:$0xff] %v2485_v2  ;;  %v2489_v4 = vld [vmem:[%s17904_s26 + $0xc40] sm:$0xff]  ;;  %v2491_v5 = vld [vmem:[%s17904_s26 + $0xc50] sm:$0xff]  ;;  %2488 = vst [vmem:[%s17912_s27 + $0x618] sm:$0xff] %v2487_v3 }
  0x72   : > { %2490 = vst [vmem:[%s17912_s27 + $0x620] sm:$0xff] %v2489_v4  ;;  %2492 = vst [vmem:[%s17912_s27 + $0x628] sm:$0xff] %v2491_v5  ;;  %v2493_v6 = vld [vmem:[%s17904_s26 + $0xc60] sm:$0xff]  ;;  %v2495_v7 = vld [vmem:[%s17904_s26 + $0xc70] sm:$0xff] }
  0x73   : > { %v2497_v8 = vld [vmem:[%s17904_s26 + $0xc80] sm:$0xff]  ;;  %2494 = vst [vmem:[%s17912_s27 + $0x630] sm:$0xff] %v2493_v6  ;;  %2496 = vst [vmem:[%s17912_s27 + $0x638] sm:$0xff] %v2495_v7  ;;  %v2499_v9 = vld [vmem:[%s17904_s26 + $0xc90] sm:$0xff] }
  0x74   : > { %2498 = vst [vmem:[%s17912_s27 + $0x640] sm:$0xff] %v2497_v8  ;;  %v2501_v10 = vld [vmem:[%s17904_s26 + $0xca0] sm:$0xff]  ;;  %v2503_v11 = vld [vmem:[%s17904_s26 + $0xcb0] sm:$0xff]  ;;  %2500 = vst [vmem:[%s17912_s27 + $0x648] sm:$0xff] %v2499_v9 }
  0x75   : > { %2502 = vst [vmem:[%s17912_s27 + $0x650] sm:$0xff] %v2501_v10  ;;  %2504 = vst [vmem:[%s17912_s27 + $0x658] sm:$0xff] %v2503_v11  ;;  %v2505_v12 = vld [vmem:[%s17904_s26 + $0xcc0] sm:$0xff]  ;;  %v2507_v13 = vld [vmem:[%s17904_s26 + $0xcd0] sm:$0xff] }
  0x76   : > { %v2509_v14 = vld [vmem:[%s17904_s26 + $0xce0] sm:$0xff]  ;;  %2506 = vst [vmem:[%s17912_s27 + $0x660] sm:$0xff] %v2505_v12  ;;  %2508 = vst [vmem:[%s17912_s27 + $0x668] sm:$0xff] %v2507_v13  ;;  %v2511_v15 = vld [vmem:[%s17904_s26 + $0xcf0] sm:$0xff] }
  0x77   : > { %2510 = vst [vmem:[%s17912_s27 + $0x670] sm:$0xff] %v2509_v14  ;;  %v2513_v16 = vld [vmem:[%s17904_s26 + $0xd00] sm:$0xff]  ;;  %v2515_v17 = vld [vmem:[%s17904_s26 + $0xd10] sm:$0xff]  ;;  %2512 = vst [vmem:[%s17912_s27 + $0x678] sm:$0xff] %v2511_v15 }
  0x78   : > { %2514 = vst [vmem:[%s17912_s27 + $0x680] sm:$0xff] %v2513_v16  ;;  %2516 = vst [vmem:[%s17912_s27 + $0x688] sm:$0xff] %v2515_v17  ;;  %v2517_v18 = vld [vmem:[%s17904_s26 + $0xd20] sm:$0xff]  ;;  %v2519_v19 = vld [vmem:[%s17904_s26 + $0xd30] sm:$0xff] }
  0x79   : > { %v2521_v20 = vld [vmem:[%s17904_s26 + $0xd40] sm:$0xff]  ;;  %2518 = vst [vmem:[%s17912_s27 + $0x690] sm:$0xff] %v2517_v18  ;;  %2520 = vst [vmem:[%s17912_s27 + $0x698] sm:$0xff] %v2519_v19  ;;  %v2523_v21 = vld [vmem:[%s17904_s26 + $0xd50] sm:$0xff] }
  0x7a   : > { %2522 = vst [vmem:[%s17912_s27 + $0x6a0] sm:$0xff] %v2521_v20  ;;  %v2525_v22 = vld [vmem:[%s17904_s26 + $0xd60] sm:$0xff]  ;;  %v2527_v23 = vld [vmem:[%s17904_s26 + $0xd70] sm:$0xff]  ;;  %2524 = vst [vmem:[%s17912_s27 + $0x6a8] sm:$0xff] %v2523_v21 }
  0x7b   : > { %2526 = vst [vmem:[%s17912_s27 + $0x6b0] sm:$0xff] %v2525_v22  ;;  %2528 = vst [vmem:[%s17912_s27 + $0x6b8] sm:$0xff] %v2527_v23  ;;  %v2529_v24 = vld [vmem:[%s17904_s26 + $0xd80] sm:$0xff]  ;;  %v2531_v25 = vld [vmem:[%s17904_s26 + $0xd90] sm:$0xff] }
  0x7c   : > { %v2533_v26 = vld [vmem:[%s17904_s26 + $0xda0] sm:$0xff]  ;;  %2530 = vst [vmem:[%s17912_s27 + $0x6c0] sm:$0xff] %v2529_v24  ;;  %2532 = vst [vmem:[%s17912_s27 + $0x6c8] sm:$0xff] %v2531_v25  ;;  %v2535_v27 = vld [vmem:[%s17904_s26 + $0xdb0] sm:$0xff] }
  0x7d   : > { %2534 = vst [vmem:[%s17912_s27 + $0x6d0] sm:$0xff] %v2533_v26  ;;  %v2537_v28 = vld [vmem:[%s17904_s26 + $0xdc0] sm:$0xff]  ;;  %v2539_v29 = vld [vmem:[%s17904_s26 + $0xdd0] sm:$0xff]  ;;  %2536 = vst [vmem:[%s17912_s27 + $0x6d8] sm:$0xff] %v2535_v27 }
  0x7e   : > { %2538 = vst [vmem:[%s17912_s27 + $0x6e0] sm:$0xff] %v2537_v28  ;;  %2540 = vst [vmem:[%s17912_s27 + $0x6e8] sm:$0xff] %v2539_v29  ;;  %v2541_v30 = vld [vmem:[%s17904_s26 + $0xde0] sm:$0xff]  ;;  %v2543_v31 = vld [vmem:[%s17904_s26 + $0xdf0] sm:$0xff] }
  0x7f   : > { %v2545_v32 = vld [vmem:[%s17904_s26 + $0xe00] sm:$0xff]  ;;  %2542 = vst [vmem:[%s17912_s27 + $0x6f0] sm:$0xff] %v2541_v30  ;;  %2544 = vst [vmem:[%s17912_s27 + $0x6f8] sm:$0xff] %v2543_v31  ;;  %v2547_v33 = vld [vmem:[%s17904_s26 + $0xe10] sm:$0xff] }
  0x80   : > { %2546 = vst [vmem:[%s17912_s27 + $0x700] sm:$0xff] %v2545_v32  ;;  %v2549_v34 = vld [vmem:[%s17904_s26 + $0xe20] sm:$0xff]  ;;  %v2551_v35 = vld [vmem:[%s17904_s26 + $0xe30] sm:$0xff]  ;;  %2548 = vst [vmem:[%s17912_s27 + $0x708] sm:$0xff] %v2547_v33 }
  0x81   : > { %2550 = vst [vmem:[%s17912_s27 + $0x710] sm:$0xff] %v2549_v34  ;;  %2552 = vst [vmem:[%s17912_s27 + $0x718] sm:$0xff] %v2551_v35  ;;  %v2553_v36 = vld [vmem:[%s17904_s26 + $0xe40] sm:$0xff]  ;;  %v2555_v37 = vld [vmem:[%s17904_s26 + $0xe50] sm:$0xff] }
  0x82   : > { %v2557_v38 = vld [vmem:[%s17904_s26 + $0xe60] sm:$0xff]  ;;  %2554 = vst [vmem:[%s17912_s27 + $0x720] sm:$0xff] %v2553_v36  ;;  %2556 = vst [vmem:[%s17912_s27 + $0x728] sm:$0xff] %v2555_v37  ;;  %v2559_v39 = vld [vmem:[%s17904_s26 + $0xe70] sm:$0xff] }
  0x83   : > { %2558 = vst [vmem:[%s17912_s27 + $0x730] sm:$0xff] %v2557_v38  ;;  %v2561_v40 = vld [vmem:[%s17904_s26 + $0xe80] sm:$0xff]  ;;  %v2563_v41 = vld [vmem:[%s17904_s26 + $0xe90] sm:$0xff]  ;;  %2560 = vst [vmem:[%s17912_s27 + $0x738] sm:$0xff] %v2559_v39 }
  0x84   : > { %2562 = vst [vmem:[%s17912_s27 + $0x740] sm:$0xff] %v2561_v40  ;;  %2564 = vst [vmem:[%s17912_s27 + $0x748] sm:$0xff] %v2563_v41  ;;  %v2565_v42 = vld [vmem:[%s17904_s26 + $0xea0] sm:$0xff]  ;;  %v2567_v43 = vld [vmem:[%s17904_s26 + $0xeb0] sm:$0xff] }
  0x85   : > { %v2569_v44 = vld [vmem:[%s17904_s26 + $0xec0] sm:$0xff]  ;;  %2566 = vst [vmem:[%s17912_s27 + $0x750] sm:$0xff] %v2565_v42  ;;  %2568 = vst [vmem:[%s17912_s27 + $0x758] sm:$0xff] %v2567_v43  ;;  %v2571_v45 = vld [vmem:[%s17904_s26 + $0xed0] sm:$0xff] }
  0x86   : > { %2570 = vst [vmem:[%s17912_s27 + $0x760] sm:$0xff] %v2569_v44  ;;  %v2573_v46 = vld [vmem:[%s17904_s26 + $0xee0] sm:$0xff]  ;;  %v2575_v47 = vld [vmem:[%s17904_s26 + $0xef0] sm:$0xff]  ;;  %2572 = vst [vmem:[%s17912_s27 + $0x768] sm:$0xff] %v2571_v45 }
  0x87   : > { %2574 = vst [vmem:[%s17912_s27 + $0x770] sm:$0xff] %v2573_v46  ;;  %2576 = vst [vmem:[%s17912_s27 + $0x778] sm:$0xff] %v2575_v47  ;;  %v2577_v48 = vld [vmem:[%s17904_s26 + $0xf00] sm:$0xff]  ;;  %v2579_v49 = vld [vmem:[%s17904_s26 + $0xf10] sm:$0xff] }
  0x88   : > { %v2581_v50 = vld [vmem:[%s17904_s26 + $0xf20] sm:$0xff]  ;;  %2578 = vst [vmem:[%s17912_s27 + $0x780] sm:$0xff] %v2577_v48  ;;  %2580 = vst [vmem:[%s17912_s27 + $0x788] sm:$0xff] %v2579_v49  ;;  %v2583_v51 = vld [vmem:[%s17904_s26 + $0xf30] sm:$0xff] }
  0x89   : > { %2582 = vst [vmem:[%s17912_s27 + $0x790] sm:$0xff] %v2581_v50  ;;  %v2585_v52 = vld [vmem:[%s17904_s26 + $0xf40] sm:$0xff]  ;;  %v2587_v53 = vld [vmem:[%s17904_s26 + $0xf50] sm:$0xff]  ;;  %2584 = vst [vmem:[%s17912_s27 + $0x798] sm:$0xff] %v2583_v51 }
  0x8a   : > { %2586 = vst [vmem:[%s17912_s27 + $0x7a0] sm:$0xff] %v2585_v52  ;;  %2588 = vst [vmem:[%s17912_s27 + $0x7a8] sm:$0xff] %v2587_v53  ;;  %v2589_v54 = vld [vmem:[%s17904_s26 + $0xf60] sm:$0xff]  ;;  %v2591_v55 = vld [vmem:[%s17904_s26 + $0xf70] sm:$0xff] }
  0x8b   : > { %v2593_v56 = vld [vmem:[%s17904_s26 + $0xf80] sm:$0xff]  ;;  %2590 = vst [vmem:[%s17912_s27 + $0x7b0] sm:$0xff] %v2589_v54  ;;  %2592 = vst [vmem:[%s17912_s27 + $0x7b8] sm:$0xff] %v2591_v55  ;;  %v2595_v57 = vld [vmem:[%s17904_s26 + $0xf90] sm:$0xff] }
  0x8c   : > { %2594 = vst [vmem:[%s17912_s27 + $0x7c0] sm:$0xff] %v2593_v56  ;;  %v2597_v58 = vld [vmem:[%s17904_s26 + $0xfa0] sm:$0xff]  ;;  %v2599_v59 = vld [vmem:[%s17904_s26 + $0xfb0] sm:$0xff]  ;;  %2596 = vst [vmem:[%s17912_s27 + $0x7c8] sm:$0xff] %v2595_v57 }
  0x8d   : > { %2598 = vst [vmem:[%s17912_s27 + $0x7d0] sm:$0xff] %v2597_v58  ;;  %2600 = vst [vmem:[%s17912_s27 + $0x7d8] sm:$0xff] %v2599_v59  ;;  %v2601_v60 = vld [vmem:[%s17904_s26 + $0xfc0] sm:$0xff]  ;;  %v2603_v61 = vld [vmem:[%s17904_s26 + $0xfd0] sm:$0xff] }
  0x8e   : > { %v2605_v62 = vld [vmem:[%s17904_s26 + $0xfe0] sm:$0xff]  ;;  %2602 = vst [vmem:[%s17912_s27 + $0x7e0] sm:$0xff] %v2601_v60  ;;  %2604 = vst [vmem:[%s17912_s27 + $0x7e8] sm:$0xff] %v2603_v61  ;;  %v2607_v63 = vld [vmem:[%s17904_s26 + $0xff0] sm:$0xff] }
  0x8f   : > { %2606 = vst [vmem:[%s17912_s27 + $0x7f0] sm:$0xff] %v2605_v62  ;;  %v2609_v0 = vld [vmem:[%s17904_s26 + $0x1000] sm:$0xff]  ;;  %v2611_v1 = vld [vmem:[%s17904_s26 + $0x1010] sm:$0xff]  ;;  %2608 = vst [vmem:[%s17912_s27 + $0x7f8] sm:$0xff] %v2607_v63 }
  0x90   : > { %2610 = vst [vmem:[%s17912_s27 + $0x800] sm:$0xff] %v2609_v0  ;;  %2612 = vst [vmem:[%s17912_s27 + $0x808] sm:$0xff] %v2611_v1  ;;  %v2613_v2 = vld [vmem:[%s17904_s26 + $0x1020] sm:$0xff]  ;;  %v2615_v3 = vld [vmem:[%s17904_s26 + $0x1030] sm:$0xff] }
  0x91   : > { %v2617_v4 = vld [vmem:[%s17904_s26 + $0x1040] sm:$0xff]  ;;  %2614 = vst [vmem:[%s17912_s27 + $0x810] sm:$0xff] %v2613_v2  ;;  %2616 = vst [vmem:[%s17912_s27 + $0x818] sm:$0xff] %v2615_v3  ;;  %v2619_v5 = vld [vmem:[%s17904_s26 + $0x1050] sm:$0xff] }
  0x92   : > { %2618 = vst [vmem:[%s17912_s27 + $0x820] sm:$0xff] %v2617_v4  ;;  %v2621_v6 = vld [vmem:[%s17904_s26 + $0x1060] sm:$0xff]  ;;  %v2623_v7 = vld [vmem:[%s17904_s26 + $0x1070] sm:$0xff]  ;;  %2620 = vst [vmem:[%s17912_s27 + $0x828] sm:$0xff] %v2619_v5 }
  0x93   : > { %2622 = vst [vmem:[%s17912_s27 + $0x830] sm:$0xff] %v2621_v6  ;;  %2624 = vst [vmem:[%s17912_s27 + $0x838] sm:$0xff] %v2623_v7  ;;  %v2625_v8 = vld [vmem:[%s17904_s26 + $0x1080] sm:$0xff]  ;;  %v2627_v9 = vld [vmem:[%s17904_s26 + $0x1090] sm:$0xff] }
  0x94   : > { %v2629_v10 = vld [vmem:[%s17904_s26 + $0x10a0] sm:$0xff]  ;;  %2626 = vst [vmem:[%s17912_s27 + $0x840] sm:$0xff] %v2625_v8  ;;  %2628 = vst [vmem:[%s17912_s27 + $0x848] sm:$0xff] %v2627_v9  ;;  %v2631_v11 = vld [vmem:[%s17904_s26 + $0x10b0] sm:$0xff] }
  0x95   : > { %2630 = vst [vmem:[%s17912_s27 + $0x850] sm:$0xff] %v2629_v10  ;;  %v2633_v12 = vld [vmem:[%s17904_s26 + $0x10c0] sm:$0xff]  ;;  %v2635_v13 = vld [vmem:[%s17904_s26 + $0x10d0] sm:$0xff]  ;;  %2632 = vst [vmem:[%s17912_s27 + $0x858] sm:$0xff] %v2631_v11 }
  0x96   : > { %2634 = vst [vmem:[%s17912_s27 + $0x860] sm:$0xff] %v2633_v12  ;;  %2636 = vst [vmem:[%s17912_s27 + $0x868] sm:$0xff] %v2635_v13  ;;  %v2637_v14 = vld [vmem:[%s17904_s26 + $0x10e0] sm:$0xff]  ;;  %v2639_v15 = vld [vmem:[%s17904_s26 + $0x10f0] sm:$0xff] }
  0x97   : > { %v2641_v16 = vld [vmem:[%s17904_s26 + $0x1100] sm:$0xff]  ;;  %2638 = vst [vmem:[%s17912_s27 + $0x870] sm:$0xff] %v2637_v14  ;;  %2640 = vst [vmem:[%s17912_s27 + $0x878] sm:$0xff] %v2639_v15  ;;  %v2643_v17 = vld [vmem:[%s17904_s26 + $0x1110] sm:$0xff] }
  0x98   : > { %2642 = vst [vmem:[%s17912_s27 + $0x880] sm:$0xff] %v2641_v16  ;;  %v2645_v18 = vld [vmem:[%s17904_s26 + $0x1120] sm:$0xff]  ;;  %v2647_v19 = vld [vmem:[%s17904_s26 + $0x1130] sm:$0xff]  ;;  %2644 = vst [vmem:[%s17912_s27 + $0x888] sm:$0xff] %v2643_v17 }
  0x99   : > { %2646 = vst [vmem:[%s17912_s27 + $0x890] sm:$0xff] %v2645_v18  ;;  %2648 = vst [vmem:[%s17912_s27 + $0x898] sm:$0xff] %v2647_v19  ;;  %v2649_v20 = vld [vmem:[%s17904_s26 + $0x1140] sm:$0xff]  ;;  %v2651_v21 = vld [vmem:[%s17904_s26 + $0x1150] sm:$0xff] }
  0x9a   : > { %v2653_v22 = vld [vmem:[%s17904_s26 + $0x1160] sm:$0xff]  ;;  %2650 = vst [vmem:[%s17912_s27 + $0x8a0] sm:$0xff] %v2649_v20  ;;  %2652 = vst [vmem:[%s17912_s27 + $0x8a8] sm:$0xff] %v2651_v21  ;;  %v2655_v23 = vld [vmem:[%s17904_s26 + $0x1170] sm:$0xff] }
  0x9b   : > { %2654 = vst [vmem:[%s17912_s27 + $0x8b0] sm:$0xff] %v2653_v22  ;;  %v2657_v24 = vld [vmem:[%s17904_s26 + $0x1180] sm:$0xff]  ;;  %v2659_v25 = vld [vmem:[%s17904_s26 + $0x1190] sm:$0xff]  ;;  %2656 = vst [vmem:[%s17912_s27 + $0x8b8] sm:$0xff] %v2655_v23 }
  0x9c   : > { %2658 = vst [vmem:[%s17912_s27 + $0x8c0] sm:$0xff] %v2657_v24  ;;  %2660 = vst [vmem:[%s17912_s27 + $0x8c8] sm:$0xff] %v2659_v25  ;;  %v2661_v26 = vld [vmem:[%s17904_s26 + $0x11a0] sm:$0xff]  ;;  %v2663_v27 = vld [vmem:[%s17904_s26 + $0x11b0] sm:$0xff] }
  0x9d   : > { %v2665_v28 = vld [vmem:[%s17904_s26 + $0x11c0] sm:$0xff]  ;;  %2662 = vst [vmem:[%s17912_s27 + $0x8d0] sm:$0xff] %v2661_v26  ;;  %2664 = vst [vmem:[%s17912_s27 + $0x8d8] sm:$0xff] %v2663_v27  ;;  %v2667_v29 = vld [vmem:[%s17904_s26 + $0x11d0] sm:$0xff] }
  0x9e   : > { %2666 = vst [vmem:[%s17912_s27 + $0x8e0] sm:$0xff] %v2665_v28  ;;  %v2669_v30 = vld [vmem:[%s17904_s26 + $0x11e0] sm:$0xff]  ;;  %v2671_v31 = vld [vmem:[%s17904_s26 + $0x11f0] sm:$0xff]  ;;  %2668 = vst [vmem:[%s17912_s27 + $0x8e8] sm:$0xff] %v2667_v29 }
  0x9f   : > { %2670 = vst [vmem:[%s17912_s27 + $0x8f0] sm:$0xff] %v2669_v30  ;;  %2672 = vst [vmem:[%s17912_s27 + $0x8f8] sm:$0xff] %v2671_v31  ;;  %v2673_v32 = vld [vmem:[%s17904_s26 + $0x1200] sm:$0xff]  ;;  %v2675_v33 = vld [vmem:[%s17904_s26 + $0x1210] sm:$0xff] }
  0xa0   : > { %v2677_v34 = vld [vmem:[%s17904_s26 + $0x1220] sm:$0xff]  ;;  %2674 = vst [vmem:[%s17912_s27 + $0x900] sm:$0xff] %v2673_v32  ;;  %2676 = vst [vmem:[%s17912_s27 + $0x908] sm:$0xff] %v2675_v33  ;;  %v2679_v35 = vld [vmem:[%s17904_s26 + $0x1230] sm:$0xff] }
  0xa1   : > { %2678 = vst [vmem:[%s17912_s27 + $0x910] sm:$0xff] %v2677_v34  ;;  %v2681_v36 = vld [vmem:[%s17904_s26 + $0x1240] sm:$0xff]  ;;  %v2683_v37 = vld [vmem:[%s17904_s26 + $0x1250] sm:$0xff]  ;;  %2680 = vst [vmem:[%s17912_s27 + $0x918] sm:$0xff] %v2679_v35 }
  0xa2   : > { %2682 = vst [vmem:[%s17912_s27 + $0x920] sm:$0xff] %v2681_v36  ;;  %2684 = vst [vmem:[%s17912_s27 + $0x928] sm:$0xff] %v2683_v37  ;;  %v2685_v38 = vld [vmem:[%s17904_s26 + $0x1260] sm:$0xff]  ;;  %v2687_v39 = vld [vmem:[%s17904_s26 + $0x1270] sm:$0xff] }
  0xa3   : > { %v2689_v40 = vld [vmem:[%s17904_s26 + $0x1280] sm:$0xff]  ;;  %2686 = vst [vmem:[%s17912_s27 + $0x930] sm:$0xff] %v2685_v38  ;;  %2688 = vst [vmem:[%s17912_s27 + $0x938] sm:$0xff] %v2687_v39  ;;  %v2691_v41 = vld [vmem:[%s17904_s26 + $0x1290] sm:$0xff] }
  0xa4   : > { %2690 = vst [vmem:[%s17912_s27 + $0x940] sm:$0xff] %v2689_v40  ;;  %v2693_v42 = vld [vmem:[%s17904_s26 + $0x12a0] sm:$0xff]  ;;  %v2695_v43 = vld [vmem:[%s17904_s26 + $0x12b0] sm:$0xff]  ;;  %2692 = vst [vmem:[%s17912_s27 + $0x948] sm:$0xff] %v2691_v41 }
  0xa5   : > { %2694 = vst [vmem:[%s17912_s27 + $0x950] sm:$0xff] %v2693_v42  ;;  %2696 = vst [vmem:[%s17912_s27 + $0x958] sm:$0xff] %v2695_v43  ;;  %v2697_v44 = vld [vmem:[%s17904_s26 + $0x12c0] sm:$0xff]  ;;  %v2699_v45 = vld [vmem:[%s17904_s26 + $0x12d0] sm:$0xff] }
  0xa6   : > { %v2701_v46 = vld [vmem:[%s17904_s26 + $0x12e0] sm:$0xff]  ;;  %2698 = vst [vmem:[%s17912_s27 + $0x960] sm:$0xff] %v2697_v44  ;;  %2700 = vst [vmem:[%s17912_s27 + $0x968] sm:$0xff] %v2699_v45  ;;  %v2703_v47 = vld [vmem:[%s17904_s26 + $0x12f0] sm:$0xff] }
  0xa7   : > { %2702 = vst [vmem:[%s17912_s27 + $0x970] sm:$0xff] %v2701_v46  ;;  %v2705_v48 = vld [vmem:[%s17904_s26 + $0x1300] sm:$0xff]  ;;  %v2707_v49 = vld [vmem:[%s17904_s26 + $0x1310] sm:$0xff]  ;;  %2704 = vst [vmem:[%s17912_s27 + $0x978] sm:$0xff] %v2703_v47 }
  0xa8   : > { %2706 = vst [vmem:[%s17912_s27 + $0x980] sm:$0xff] %v2705_v48  ;;  %2708 = vst [vmem:[%s17912_s27 + $0x988] sm:$0xff] %v2707_v49  ;;  %v2709_v50 = vld [vmem:[%s17904_s26 + $0x1320] sm:$0xff]  ;;  %v2711_v51 = vld [vmem:[%s17904_s26 + $0x1330] sm:$0xff] }
  0xa9   : > { %v2713_v52 = vld [vmem:[%s17904_s26 + $0x1340] sm:$0xff]  ;;  %2710 = vst [vmem:[%s17912_s27 + $0x990] sm:$0xff] %v2709_v50  ;;  %2712 = vst [vmem:[%s17912_s27 + $0x998] sm:$0xff] %v2711_v51  ;;  %v2715_v53 = vld [vmem:[%s17904_s26 + $0x1350] sm:$0xff] }
  0xaa   : > { %2714 = vst [vmem:[%s17912_s27 + $0x9a0] sm:$0xff] %v2713_v52  ;;  %v2717_v54 = vld [vmem:[%s17904_s26 + $0x1360] sm:$0xff]  ;;  %v2719_v55 = vld [vmem:[%s17904_s26 + $0x1370] sm:$0xff]  ;;  %2716 = vst [vmem:[%s17912_s27 + $0x9a8] sm:$0xff] %v2715_v53 }
  0xab   : > { %2718 = vst [vmem:[%s17912_s27 + $0x9b0] sm:$0xff] %v2717_v54  ;;  %2720 = vst [vmem:[%s17912_s27 + $0x9b8] sm:$0xff] %v2719_v55  ;;  %v2721_v56 = vld [vmem:[%s17904_s26 + $0x1380] sm:$0xff]  ;;  %v2723_v57 = vld [vmem:[%s17904_s26 + $0x1390] sm:$0xff] }
  0xac   : > { %v2725_v58 = vld [vmem:[%s17904_s26 + $0x13a0] sm:$0xff]  ;;  %2722 = vst [vmem:[%s17912_s27 + $0x9c0] sm:$0xff] %v2721_v56  ;;  %2724 = vst [vmem:[%s17912_s27 + $0x9c8] sm:$0xff] %v2723_v57  ;;  %v2727_v59 = vld [vmem:[%s17904_s26 + $0x13b0] sm:$0xff] }
  0xad   : > { %2726 = vst [vmem:[%s17912_s27 + $0x9d0] sm:$0xff] %v2725_v58  ;;  %v2729_v60 = vld [vmem:[%s17904_s26 + $0x13c0] sm:$0xff]  ;;  %v2731_v61 = vld [vmem:[%s17904_s26 + $0x13d0] sm:$0xff]  ;;  %2728 = vst [vmem:[%s17912_s27 + $0x9d8] sm:$0xff] %v2727_v59 }
  0xae   : > { %2730 = vst [vmem:[%s17912_s27 + $0x9e0] sm:$0xff] %v2729_v60  ;;  %2732 = vst [vmem:[%s17912_s27 + $0x9e8] sm:$0xff] %v2731_v61  ;;  %v2733_v62 = vld [vmem:[%s17904_s26 + $0x13e0] sm:$0xff]  ;;  %v2735_v63 = vld [vmem:[%s17904_s26 + $0x13f0] sm:$0xff] }
  0xaf   : > { %v2737_v0 = vld [vmem:[%s17904_s26 + $0x1400] sm:$0xff]  ;;  %2734 = vst [vmem:[%s17912_s27 + $0x9f0] sm:$0xff] %v2733_v62  ;;  %2736 = vst [vmem:[%s17912_s27 + $0x9f8] sm:$0xff] %v2735_v63  ;;  %v2739_v1 = vld [vmem:[%s17904_s26 + $0x1410] sm:$0xff] }
  0xb0   : > { %2738 = vst [vmem:[%s17912_s27 + $0xa00] sm:$0xff] %v2737_v0  ;;  %v2741_v2 = vld [vmem:[%s17904_s26 + $0x1420] sm:$0xff]  ;;  %v2743_v3 = vld [vmem:[%s17904_s26 + $0x1430] sm:$0xff]  ;;  %2740 = vst [vmem:[%s17912_s27 + $0xa08] sm:$0xff] %v2739_v1 }
  0xb1   : > { %2742 = vst [vmem:[%s17912_s27 + $0xa10] sm:$0xff] %v2741_v2  ;;  %2744 = vst [vmem:[%s17912_s27 + $0xa18] sm:$0xff] %v2743_v3  ;;  %v2745_v4 = vld [vmem:[%s17904_s26 + $0x1440] sm:$0xff]  ;;  %v2747_v5 = vld [vmem:[%s17904_s26 + $0x1450] sm:$0xff] }
  0xb2   : > { %v2749_v6 = vld [vmem:[%s17904_s26 + $0x1460] sm:$0xff]  ;;  %2746 = vst [vmem:[%s17912_s27 + $0xa20] sm:$0xff] %v2745_v4  ;;  %2748 = vst [vmem:[%s17912_s27 + $0xa28] sm:$0xff] %v2747_v5  ;;  %v2751_v7 = vld [vmem:[%s17904_s26 + $0x1470] sm:$0xff] }
  0xb3   : > { %2750 = vst [vmem:[%s17912_s27 + $0xa30] sm:$0xff] %v2749_v6  ;;  %v2753_v8 = vld [vmem:[%s17904_s26 + $0x1480] sm:$0xff]  ;;  %v2755_v9 = vld [vmem:[%s17904_s26 + $0x1490] sm:$0xff]  ;;  %2752 = vst [vmem:[%s17912_s27 + $0xa38] sm:$0xff] %v2751_v7 }
  0xb4   : > { %2754 = vst [vmem:[%s17912_s27 + $0xa40] sm:$0xff] %v2753_v8  ;;  %2756 = vst [vmem:[%s17912_s27 + $0xa48] sm:$0xff] %v2755_v9  ;;  %v2757_v10 = vld [vmem:[%s17904_s26 + $0x14a0] sm:$0xff]  ;;  %v2759_v11 = vld [vmem:[%s17904_s26 + $0x14b0] sm:$0xff] }
  0xb5   : > { %v2761_v12 = vld [vmem:[%s17904_s26 + $0x14c0] sm:$0xff]  ;;  %2758 = vst [vmem:[%s17912_s27 + $0xa50] sm:$0xff] %v2757_v10  ;;  %2760 = vst [vmem:[%s17912_s27 + $0xa58] sm:$0xff] %v2759_v11  ;;  %v2763_v13 = vld [vmem:[%s17904_s26 + $0x14d0] sm:$0xff] }
  0xb6   : > { %2762 = vst [vmem:[%s17912_s27 + $0xa60] sm:$0xff] %v2761_v12  ;;  %v2765_v14 = vld [vmem:[%s17904_s26 + $0x14e0] sm:$0xff]  ;;  %v2767_v15 = vld [vmem:[%s17904_s26 + $0x14f0] sm:$0xff]  ;;  %2764 = vst [vmem:[%s17912_s27 + $0xa68] sm:$0xff] %v2763_v13 }
  0xb7   : > { %2766 = vst [vmem:[%s17912_s27 + $0xa70] sm:$0xff] %v2765_v14  ;;  %2768 = vst [vmem:[%s17912_s27 + $0xa78] sm:$0xff] %v2767_v15  ;;  %v2769_v16 = vld [vmem:[%s17904_s26 + $0x1500] sm:$0xff]  ;;  %v2771_v17 = vld [vmem:[%s17904_s26 + $0x1510] sm:$0xff] }
  0xb8   : > { %v2773_v18 = vld [vmem:[%s17904_s26 + $0x1520] sm:$0xff]  ;;  %2770 = vst [vmem:[%s17912_s27 + $0xa80] sm:$0xff] %v2769_v16  ;;  %2772 = vst [vmem:[%s17912_s27 + $0xa88] sm:$0xff] %v2771_v17  ;;  %v2775_v19 = vld [vmem:[%s17904_s26 + $0x1530] sm:$0xff] }
  0xb9   : > { %2774 = vst [vmem:[%s17912_s27 + $0xa90] sm:$0xff] %v2773_v18  ;;  %v2777_v20 = vld [vmem:[%s17904_s26 + $0x1540] sm:$0xff]  ;;  %v2779_v21 = vld [vmem:[%s17904_s26 + $0x1550] sm:$0xff]  ;;  %2776 = vst [vmem:[%s17912_s27 + $0xa98] sm:$0xff] %v2775_v19 }
  0xba   : > { %2778 = vst [vmem:[%s17912_s27 + $0xaa0] sm:$0xff] %v2777_v20  ;;  %2780 = vst [vmem:[%s17912_s27 + $0xaa8] sm:$0xff] %v2779_v21  ;;  %v2781_v22 = vld [vmem:[%s17904_s26 + $0x1560] sm:$0xff]  ;;  %v2783_v23 = vld [vmem:[%s17904_s26 + $0x1570] sm:$0xff] }
  0xbb   : > { %v2785_v24 = vld [vmem:[%s17904_s26 + $0x1580] sm:$0xff]  ;;  %2782 = vst [vmem:[%s17912_s27 + $0xab0] sm:$0xff] %v2781_v22  ;;  %2784 = vst [vmem:[%s17912_s27 + $0xab8] sm:$0xff] %v2783_v23  ;;  %v2787_v25 = vld [vmem:[%s17904_s26 + $0x1590] sm:$0xff] }
  0xbc   : > { %2786 = vst [vmem:[%s17912_s27 + $0xac0] sm:$0xff] %v2785_v24  ;;  %v2789_v26 = vld [vmem:[%s17904_s26 + $0x15a0] sm:$0xff]  ;;  %v2791_v27 = vld [vmem:[%s17904_s26 + $0x15b0] sm:$0xff]  ;;  %2788 = vst [vmem:[%s17912_s27 + $0xac8] sm:$0xff] %v2787_v25 }
  0xbd   : > { %2790 = vst [vmem:[%s17912_s27 + $0xad0] sm:$0xff] %v2789_v26  ;;  %2792 = vst [vmem:[%s17912_s27 + $0xad8] sm:$0xff] %v2791_v27  ;;  %v2793_v28 = vld [vmem:[%s17904_s26 + $0x15c0] sm:$0xff]  ;;  %v2795_v29 = vld [vmem:[%s17904_s26 + $0x15d0] sm:$0xff] }
  0xbe   : > { %v2797_v30 = vld [vmem:[%s17904_s26 + $0x15e0] sm:$0xff]  ;;  %2794 = vst [vmem:[%s17912_s27 + $0xae0] sm:$0xff] %v2793_v28  ;;  %2796 = vst [vmem:[%s17912_s27 + $0xae8] sm:$0xff] %v2795_v29  ;;  %v2799_v31 = vld [vmem:[%s17904_s26 + $0x15f0] sm:$0xff] }
  0xbf   : > { %2798 = vst [vmem:[%s17912_s27 + $0xaf0] sm:$0xff] %v2797_v30  ;;  %v2801_v32 = vld [vmem:[%s17904_s26 + $0x1600] sm:$0xff]  ;;  %v2803_v33 = vld [vmem:[%s17904_s26 + $0x1610] sm:$0xff]  ;;  %2800 = vst [vmem:[%s17912_s27 + $0xaf8] sm:$0xff] %v2799_v31 }
  0xc0   : > { %2802 = vst [vmem:[%s17912_s27 + $0xb00] sm:$0xff] %v2801_v32  ;;  %2804 = vst [vmem:[%s17912_s27 + $0xb08] sm:$0xff] %v2803_v33  ;;  %v2805_v34 = vld [vmem:[%s17904_s26 + $0x1620] sm:$0xff]  ;;  %v2807_v35 = vld [vmem:[%s17904_s26 + $0x1630] sm:$0xff] }
  0xc1   : > { %v2809_v36 = vld [vmem:[%s17904_s26 + $0x1640] sm:$0xff]  ;;  %2806 = vst [vmem:[%s17912_s27 + $0xb10] sm:$0xff] %v2805_v34  ;;  %2808 = vst [vmem:[%s17912_s27 + $0xb18] sm:$0xff] %v2807_v35  ;;  %v2811_v37 = vld [vmem:[%s17904_s26 + $0x1650] sm:$0xff] }
  0xc2   : > { %2810 = vst [vmem:[%s17912_s27 + $0xb20] sm:$0xff] %v2809_v36  ;;  %v2813_v38 = vld [vmem:[%s17904_s26 + $0x1660] sm:$0xff]  ;;  %v2815_v39 = vld [vmem:[%s17904_s26 + $0x1670] sm:$0xff]  ;;  %2812 = vst [vmem:[%s17912_s27 + $0xb28] sm:$0xff] %v2811_v37 }
  0xc3   : > { %2814 = vst [vmem:[%s17912_s27 + $0xb30] sm:$0xff] %v2813_v38  ;;  %2816 = vst [vmem:[%s17912_s27 + $0xb38] sm:$0xff] %v2815_v39  ;;  %v2817_v40 = vld [vmem:[%s17904_s26 + $0x1680] sm:$0xff]  ;;  %v2819_v41 = vld [vmem:[%s17904_s26 + $0x1690] sm:$0xff] }
  0xc4   : > { %v2821_v42 = vld [vmem:[%s17904_s26 + $0x16a0] sm:$0xff]  ;;  %2818 = vst [vmem:[%s17912_s27 + $0xb40] sm:$0xff] %v2817_v40  ;;  %2820 = vst [vmem:[%s17912_s27 + $0xb48] sm:$0xff] %v2819_v41  ;;  %v2823_v43 = vld [vmem:[%s17904_s26 + $0x16b0] sm:$0xff] }
  0xc5   : > { %2822 = vst [vmem:[%s17912_s27 + $0xb50] sm:$0xff] %v2821_v42  ;;  %v2825_v44 = vld [vmem:[%s17904_s26 + $0x16c0] sm:$0xff]  ;;  %v2827_v45 = vld [vmem:[%s17904_s26 + $0x16d0] sm:$0xff]  ;;  %2824 = vst [vmem:[%s17912_s27 + $0xb58] sm:$0xff] %v2823_v43 }
  0xc6   : > { %2826 = vst [vmem:[%s17912_s27 + $0xb60] sm:$0xff] %v2825_v44  ;;  %2828 = vst [vmem:[%s17912_s27 + $0xb68] sm:$0xff] %v2827_v45  ;;  %v2829_v46 = vld [vmem:[%s17904_s26 + $0x16e0] sm:$0xff]  ;;  %v2831_v47 = vld [vmem:[%s17904_s26 + $0x16f0] sm:$0xff] }
  0xc7   : > { %v2833_v48 = vld [vmem:[%s17904_s26 + $0x1700] sm:$0xff]  ;;  %2830 = vst [vmem:[%s17912_s27 + $0xb70] sm:$0xff] %v2829_v46  ;;  %2832 = vst [vmem:[%s17912_s27 + $0xb78] sm:$0xff] %v2831_v47  ;;  %v2835_v49 = vld [vmem:[%s17904_s26 + $0x1710] sm:$0xff] }
  0xc8   : > { %2834 = vst [vmem:[%s17912_s27 + $0xb80] sm:$0xff] %v2833_v48  ;;  %v2837_v50 = vld [vmem:[%s17904_s26 + $0x1720] sm:$0xff]  ;;  %v2839_v51 = vld [vmem:[%s17904_s26 + $0x1730] sm:$0xff]  ;;  %2836 = vst [vmem:[%s17912_s27 + $0xb88] sm:$0xff] %v2835_v49 }
  0xc9   : > { %2838 = vst [vmem:[%s17912_s27 + $0xb90] sm:$0xff] %v2837_v50  ;;  %2840 = vst [vmem:[%s17912_s27 + $0xb98] sm:$0xff] %v2839_v51  ;;  %v2841_v52 = vld [vmem:[%s17904_s26 + $0x1740] sm:$0xff]  ;;  %v2843_v53 = vld [vmem:[%s17904_s26 + $0x1750] sm:$0xff] }
  0xca   : > { %v2845_v54 = vld [vmem:[%s17904_s26 + $0x1760] sm:$0xff]  ;;  %2842 = vst [vmem:[%s17912_s27 + $0xba0] sm:$0xff] %v2841_v52  ;;  %2844 = vst [vmem:[%s17912_s27 + $0xba8] sm:$0xff] %v2843_v53  ;;  %v2847_v55 = vld [vmem:[%s17904_s26 + $0x1770] sm:$0xff] }
  0xcb   : > { %2846 = vst [vmem:[%s17912_s27 + $0xbb0] sm:$0xff] %v2845_v54  ;;  %v2849_v56 = vld [vmem:[%s17904_s26 + $0x1780] sm:$0xff]  ;;  %v2851_v57 = vld [vmem:[%s17904_s26 + $0x1790] sm:$0xff]  ;;  %2848 = vst [vmem:[%s17912_s27 + $0xbb8] sm:$0xff] %v2847_v55 }
  0xcc   : > { %2850 = vst [vmem:[%s17912_s27 + $0xbc0] sm:$0xff] %v2849_v56  ;;  %2852 = vst [vmem:[%s17912_s27 + $0xbc8] sm:$0xff] %v2851_v57  ;;  %v2853_v58 = vld [vmem:[%s17904_s26 + $0x17a0] sm:$0xff]  ;;  %v2855_v59 = vld [vmem:[%s17904_s26 + $0x17b0] sm:$0xff] }
  0xcd   : > { %v2857_v60 = vld [vmem:[%s17904_s26 + $0x17c0] sm:$0xff]  ;;  %2854 = vst [vmem:[%s17912_s27 + $0xbd0] sm:$0xff] %v2853_v58  ;;  %2856 = vst [vmem:[%s17912_s27 + $0xbd8] sm:$0xff] %v2855_v59  ;;  %v2859_v61 = vld [vmem:[%s17904_s26 + $0x17d0] sm:$0xff] }
  0xce   : > { %2858 = vst [vmem:[%s17912_s27 + $0xbe0] sm:$0xff] %v2857_v60  ;;  %v2861_v62 = vld [vmem:[%s17904_s26 + $0x17e0] sm:$0xff]  ;;  %v2863_v63 = vld [vmem:[%s17904_s26 + $0x17f0] sm:$0xff]  ;;  %2860 = vst [vmem:[%s17912_s27 + $0xbe8] sm:$0xff] %v2859_v61 }
  0xcf   : > { %2862 = vst [vmem:[%s17912_s27 + $0xbf0] sm:$0xff] %v2861_v62  ;;  %2864 = vst [vmem:[%s17912_s27 + $0xbf8] sm:$0xff] %v2863_v63  ;;  %v2865_v0 = vld [vmem:[%s17904_s26 + $0x1800] sm:$0xff]  ;;  %v2867_v1 = vld [vmem:[%s17904_s26 + $0x1810] sm:$0xff] }
  0xd0   : > { %v2869_v2 = vld [vmem:[%s17904_s26 + $0x1820] sm:$0xff]  ;;  %2866 = vst [vmem:[%s17912_s27 + $0xc00] sm:$0xff] %v2865_v0  ;;  %2868 = vst [vmem:[%s17912_s27 + $0xc08] sm:$0xff] %v2867_v1  ;;  %v2871_v3 = vld [vmem:[%s17904_s26 + $0x1830] sm:$0xff] }
  0xd1   : > { %2870 = vst [vmem:[%s17912_s27 + $0xc10] sm:$0xff] %v2869_v2  ;;  %v2873_v4 = vld [vmem:[%s17904_s26 + $0x1840] sm:$0xff]  ;;  %v2875_v5 = vld [vmem:[%s17904_s26 + $0x1850] sm:$0xff]  ;;  %2872 = vst [vmem:[%s17912_s27 + $0xc18] sm:$0xff] %v2871_v3 }
  0xd2   : > { %2874 = vst [vmem:[%s17912_s27 + $0xc20] sm:$0xff] %v2873_v4  ;;  %2876 = vst [vmem:[%s17912_s27 + $0xc28] sm:$0xff] %v2875_v5  ;;  %v2877_v6 = vld [vmem:[%s17904_s26 + $0x1860] sm:$0xff]  ;;  %v2879_v7 = vld [vmem:[%s17904_s26 + $0x1870] sm:$0xff] }
  0xd3   : > { %v2881_v8 = vld [vmem:[%s17904_s26 + $0x1880] sm:$0xff]  ;;  %2878 = vst [vmem:[%s17912_s27 + $0xc30] sm:$0xff] %v2877_v6  ;;  %2880 = vst [vmem:[%s17912_s27 + $0xc38] sm:$0xff] %v2879_v7  ;;  %v2883_v9 = vld [vmem:[%s17904_s26 + $0x1890] sm:$0xff] }
  0xd4   : > { %2882 = vst [vmem:[%s17912_s27 + $0xc40] sm:$0xff] %v2881_v8  ;;  %v2885_v10 = vld [vmem:[%s17904_s26 + $0x18a0] sm:$0xff]  ;;  %v2887_v11 = vld [vmem:[%s17904_s26 + $0x18b0] sm:$0xff]  ;;  %2884 = vst [vmem:[%s17912_s27 + $0xc48] sm:$0xff] %v2883_v9 }
  0xd5   : > { %2886 = vst [vmem:[%s17912_s27 + $0xc50] sm:$0xff] %v2885_v10  ;;  %2888 = vst [vmem:[%s17912_s27 + $0xc58] sm:$0xff] %v2887_v11  ;;  %v2889_v12 = vld [vmem:[%s17904_s26 + $0x18c0] sm:$0xff]  ;;  %v2891_v13 = vld [vmem:[%s17904_s26 + $0x18d0] sm:$0xff] }
  0xd6   : > { %v2893_v14 = vld [vmem:[%s17904_s26 + $0x18e0] sm:$0xff]  ;;  %2890 = vst [vmem:[%s17912_s27 + $0xc60] sm:$0xff] %v2889_v12  ;;  %2892 = vst [vmem:[%s17912_s27 + $0xc68] sm:$0xff] %v2891_v13  ;;  %v2895_v15 = vld [vmem:[%s17904_s26 + $0x18f0] sm:$0xff] }
  0xd7   : > { %2894 = vst [vmem:[%s17912_s27 + $0xc70] sm:$0xff] %v2893_v14  ;;  %v2897_v16 = vld [vmem:[%s17904_s26 + $0x1900] sm:$0xff]  ;;  %v2899_v17 = vld [vmem:[%s17904_s26 + $0x1910] sm:$0xff]  ;;  %2896 = vst [vmem:[%s17912_s27 + $0xc78] sm:$0xff] %v2895_v15 }
  0xd8   : > { %2898 = vst [vmem:[%s17912_s27 + $0xc80] sm:$0xff] %v2897_v16  ;;  %2900 = vst [vmem:[%s17912_s27 + $0xc88] sm:$0xff] %v2899_v17  ;;  %v2901_v18 = vld [vmem:[%s17904_s26 + $0x1920] sm:$0xff]  ;;  %v2903_v19 = vld [vmem:[%s17904_s26 + $0x1930] sm:$0xff] }
  0xd9   : > { %v2905_v20 = vld [vmem:[%s17904_s26 + $0x1940] sm:$0xff]  ;;  %2902 = vst [vmem:[%s17912_s27 + $0xc90] sm:$0xff] %v2901_v18  ;;  %2904 = vst [vmem:[%s17912_s27 + $0xc98] sm:$0xff] %v2903_v19  ;;  %v2907_v21 = vld [vmem:[%s17904_s26 + $0x1950] sm:$0xff] }
  0xda   : > { %2906 = vst [vmem:[%s17912_s27 + $0xca0] sm:$0xff] %v2905_v20  ;;  %v2909_v22 = vld [vmem:[%s17904_s26 + $0x1960] sm:$0xff]  ;;  %v2911_v23 = vld [vmem:[%s17904_s26 + $0x1970] sm:$0xff]  ;;  %2908 = vst [vmem:[%s17912_s27 + $0xca8] sm:$0xff] %v2907_v21 }
  0xdb   : > { %2910 = vst [vmem:[%s17912_s27 + $0xcb0] sm:$0xff] %v2909_v22  ;;  %2912 = vst [vmem:[%s17912_s27 + $0xcb8] sm:$0xff] %v2911_v23  ;;  %v2913_v24 = vld [vmem:[%s17904_s26 + $0x1980] sm:$0xff]  ;;  %v2915_v25 = vld [vmem:[%s17904_s26 + $0x1990] sm:$0xff] }
  0xdc   : > { %v2917_v26 = vld [vmem:[%s17904_s26 + $0x19a0] sm:$0xff]  ;;  %2914 = vst [vmem:[%s17912_s27 + $0xcc0] sm:$0xff] %v2913_v24  ;;  %2916 = vst [vmem:[%s17912_s27 + $0xcc8] sm:$0xff] %v2915_v25  ;;  %v2919_v27 = vld [vmem:[%s17904_s26 + $0x19b0] sm:$0xff] }
  0xdd   : > { %2918 = vst [vmem:[%s17912_s27 + $0xcd0] sm:$0xff] %v2917_v26  ;;  %v2921_v28 = vld [vmem:[%s17904_s26 + $0x19c0] sm:$0xff]  ;;  %v2923_v29 = vld [vmem:[%s17904_s26 + $0x19d0] sm:$0xff]  ;;  %2920 = vst [vmem:[%s17912_s27 + $0xcd8] sm:$0xff] %v2919_v27 }
  0xde   : > { %2922 = vst [vmem:[%s17912_s27 + $0xce0] sm:$0xff] %v2921_v28  ;;  %2924 = vst [vmem:[%s17912_s27 + $0xce8] sm:$0xff] %v2923_v29  ;;  %v2925_v30 = vld [vmem:[%s17904_s26 + $0x19e0] sm:$0xff]  ;;  %v2927_v31 = vld [vmem:[%s17904_s26 + $0x19f0] sm:$0xff] }
  0xdf   : > { %v2929_v32 = vld [vmem:[%s17904_s26 + $0x1a00] sm:$0xff]  ;;  %2926 = vst [vmem:[%s17912_s27 + $0xcf0] sm:$0xff] %v2925_v30  ;;  %2928 = vst [vmem:[%s17912_s27 + $0xcf8] sm:$0xff] %v2927_v31  ;;  %v2931_v33 = vld [vmem:[%s17904_s26 + $0x1a10] sm:$0xff] }
  0xe0   : > { %2930 = vst [vmem:[%s17912_s27 + $0xd00] sm:$0xff] %v2929_v32  ;;  %v2933_v34 = vld [vmem:[%s17904_s26 + $0x1a20] sm:$0xff]  ;;  %v2935_v35 = vld [vmem:[%s17904_s26 + $0x1a30] sm:$0xff]  ;;  %2932 = vst [vmem:[%s17912_s27 + $0xd08] sm:$0xff] %v2931_v33 }
  0xe1   : > { %2934 = vst [vmem:[%s17912_s27 + $0xd10] sm:$0xff] %v2933_v34  ;;  %2936 = vst [vmem:[%s17912_s27 + $0xd18] sm:$0xff] %v2935_v35  ;;  %v2937_v36 = vld [vmem:[%s17904_s26 + $0x1a40] sm:$0xff]  ;;  %v2939_v37 = vld [vmem:[%s17904_s26 + $0x1a50] sm:$0xff] }
  0xe2   : > { %v2941_v38 = vld [vmem:[%s17904_s26 + $0x1a60] sm:$0xff]  ;;  %2938 = vst [vmem:[%s17912_s27 + $0xd20] sm:$0xff] %v2937_v36  ;;  %2940 = vst [vmem:[%s17912_s27 + $0xd28] sm:$0xff] %v2939_v37  ;;  %v2943_v39 = vld [vmem:[%s17904_s26 + $0x1a70] sm:$0xff] }
  0xe3   : > { %2942 = vst [vmem:[%s17912_s27 + $0xd30] sm:$0xff] %v2941_v38  ;;  %v2945_v40 = vld [vmem:[%s17904_s26 + $0x1a80] sm:$0xff]  ;;  %v2947_v41 = vld [vmem:[%s17904_s26 + $0x1a90] sm:$0xff]  ;;  %2944 = vst [vmem:[%s17912_s27 + $0xd38] sm:$0xff] %v2943_v39 }
  0xe4   : > { %2946 = vst [vmem:[%s17912_s27 + $0xd40] sm:$0xff] %v2945_v40  ;;  %2948 = vst [vmem:[%s17912_s27 + $0xd48] sm:$0xff] %v2947_v41  ;;  %v2949_v42 = vld [vmem:[%s17904_s26 + $0x1aa0] sm:$0xff]  ;;  %v2951_v43 = vld [vmem:[%s17904_s26 + $0x1ab0] sm:$0xff] }
  0xe5   : > { %v2953_v44 = vld [vmem:[%s17904_s26 + $0x1ac0] sm:$0xff]  ;;  %2950 = vst [vmem:[%s17912_s27 + $0xd50] sm:$0xff] %v2949_v42  ;;  %2952 = vst [vmem:[%s17912_s27 + $0xd58] sm:$0xff] %v2951_v43  ;;  %v2955_v45 = vld [vmem:[%s17904_s26 + $0x1ad0] sm:$0xff] }
  0xe6   : > { %2954 = vst [vmem:[%s17912_s27 + $0xd60] sm:$0xff] %v2953_v44  ;;  %v2957_v46 = vld [vmem:[%s17904_s26 + $0x1ae0] sm:$0xff]  ;;  %v2959_v47 = vld [vmem:[%s17904_s26 + $0x1af0] sm:$0xff]  ;;  %2956 = vst [vmem:[%s17912_s27 + $0xd68] sm:$0xff] %v2955_v45 }
  0xe7   : > { %2958 = vst [vmem:[%s17912_s27 + $0xd70] sm:$0xff] %v2957_v46  ;;  %2960 = vst [vmem:[%s17912_s27 + $0xd78] sm:$0xff] %v2959_v47  ;;  %v2961_v48 = vld [vmem:[%s17904_s26 + $0x1b00] sm:$0xff]  ;;  %v2963_v49 = vld [vmem:[%s17904_s26 + $0x1b10] sm:$0xff] }
  0xe8   : > { %v2965_v50 = vld [vmem:[%s17904_s26 + $0x1b20] sm:$0xff]  ;;  %2962 = vst [vmem:[%s17912_s27 + $0xd80] sm:$0xff] %v2961_v48  ;;  %2964 = vst [vmem:[%s17912_s27 + $0xd88] sm:$0xff] %v2963_v49  ;;  %v2967_v51 = vld [vmem:[%s17904_s26 + $0x1b30] sm:$0xff] }
  0xe9   : > { %2966 = vst [vmem:[%s17912_s27 + $0xd90] sm:$0xff] %v2965_v50  ;;  %v2969_v52 = vld [vmem:[%s17904_s26 + $0x1b40] sm:$0xff]  ;;  %v2971_v53 = vld [vmem:[%s17904_s26 + $0x1b50] sm:$0xff]  ;;  %2968 = vst [vmem:[%s17912_s27 + $0xd98] sm:$0xff] %v2967_v51 }
  0xea   : > { %2970 = vst [vmem:[%s17912_s27 + $0xda0] sm:$0xff] %v2969_v52  ;;  %2972 = vst [vmem:[%s17912_s27 + $0xda8] sm:$0xff] %v2971_v53  ;;  %v2973_v54 = vld [vmem:[%s17904_s26 + $0x1b60] sm:$0xff]  ;;  %v2975_v55 = vld [vmem:[%s17904_s26 + $0x1b70] sm:$0xff] }
  0xeb   : > { %v2977_v56 = vld [vmem:[%s17904_s26 + $0x1b80] sm:$0xff]  ;;  %2974 = vst [vmem:[%s17912_s27 + $0xdb0] sm:$0xff] %v2973_v54  ;;  %2976 = vst [vmem:[%s17912_s27 + $0xdb8] sm:$0xff] %v2975_v55  ;;  %v2979_v57 = vld [vmem:[%s17904_s26 + $0x1b90] sm:$0xff] }
  0xec   : > { %2978 = vst [vmem:[%s17912_s27 + $0xdc0] sm:$0xff] %v2977_v56  ;;  %v2981_v58 = vld [vmem:[%s17904_s26 + $0x1ba0] sm:$0xff]  ;;  %v2983_v59 = vld [vmem:[%s17904_s26 + $0x1bb0] sm:$0xff]  ;;  %2980 = vst [vmem:[%s17912_s27 + $0xdc8] sm:$0xff] %v2979_v57 }
  0xed   : > { %2982 = vst [vmem:[%s17912_s27 + $0xdd0] sm:$0xff] %v2981_v58  ;;  %2984 = vst [vmem:[%s17912_s27 + $0xdd8] sm:$0xff] %v2983_v59  ;;  %v2985_v60 = vld [vmem:[%s17904_s26 + $0x1bc0] sm:$0xff]  ;;  %v2987_v61 = vld [vmem:[%s17904_s26 + $0x1bd0] sm:$0xff] }
  0xee   : > { %v2989_v62 = vld [vmem:[%s17904_s26 + $0x1be0] sm:$0xff]  ;;  %2986 = vst [vmem:[%s17912_s27 + $0xde0] sm:$0xff] %v2985_v60  ;;  %2988 = vst [vmem:[%s17912_s27 + $0xde8] sm:$0xff] %v2987_v61  ;;  %v2991_v63 = vld [vmem:[%s17904_s26 + $0x1bf0] sm:$0xff] }
  0xef   : > { %2990 = vst [vmem:[%s17912_s27 + $0xdf0] sm:$0xff] %v2989_v62  ;;  %v2993_v0 = vld [vmem:[%s17904_s26 + $0x1c00] sm:$0xff]  ;;  %v2995_v1 = vld [vmem:[%s17904_s26 + $0x1c10] sm:$0xff]  ;;  %2992 = vst [vmem:[%s17912_s27 + $0xdf8] sm:$0xff] %v2991_v63 }
  0xf0   : > { %2994 = vst [vmem:[%s17912_s27 + $0xe00] sm:$0xff] %v2993_v0  ;;  %2996 = vst [vmem:[%s17912_s27 + $0xe08] sm:$0xff] %v2995_v1  ;;  %v2997_v2 = vld [vmem:[%s17904_s26 + $0x1c20] sm:$0xff]  ;;  %v2999_v3 = vld [vmem:[%s17904_s26 + $0x1c30] sm:$0xff] }
  0xf1   : > { %v3001_v4 = vld [vmem:[%s17904_s26 + $0x1c40] sm:$0xff]  ;;  %2998 = vst [vmem:[%s17912_s27 + $0xe10] sm:$0xff] %v2997_v2  ;;  %3000 = vst [vmem:[%s17912_s27 + $0xe18] sm:$0xff] %v2999_v3  ;;  %v3003_v5 = vld [vmem:[%s17904_s26 + $0x1c50] sm:$0xff] }
  0xf2   : > { %3002 = vst [vmem:[%s17912_s27 + $0xe20] sm:$0xff] %v3001_v4  ;;  %v3005_v6 = vld [vmem:[%s17904_s26 + $0x1c60] sm:$0xff]  ;;  %v3007_v7 = vld [vmem:[%s17904_s26 + $0x1c70] sm:$0xff]  ;;  %3004 = vst [vmem:[%s17912_s27 + $0xe28] sm:$0xff] %v3003_v5 }
  0xf3   : > { %3006 = vst [vmem:[%s17912_s27 + $0xe30] sm:$0xff] %v3005_v6  ;;  %3008 = vst [vmem:[%s17912_s27 + $0xe38] sm:$0xff] %v3007_v7  ;;  %v3009_v8 = vld [vmem:[%s17904_s26 + $0x1c80] sm:$0xff]  ;;  %v3011_v9 = vld [vmem:[%s17904_s26 + $0x1c90] sm:$0xff] }
  0xf4   : > { %v3013_v10 = vld [vmem:[%s17904_s26 + $0x1ca0] sm:$0xff]  ;;  %3010 = vst [vmem:[%s17912_s27 + $0xe40] sm:$0xff] %v3009_v8  ;;  %3012 = vst [vmem:[%s17912_s27 + $0xe48] sm:$0xff] %v3011_v9  ;;  %v3015_v11 = vld [vmem:[%s17904_s26 + $0x1cb0] sm:$0xff] }
  0xf5   : > { %3014 = vst [vmem:[%s17912_s27 + $0xe50] sm:$0xff] %v3013_v10  ;;  %v3017_v12 = vld [vmem:[%s17904_s26 + $0x1cc0] sm:$0xff]  ;;  %v3019_v13 = vld [vmem:[%s17904_s26 + $0x1cd0] sm:$0xff]  ;;  %3016 = vst [vmem:[%s17912_s27 + $0xe58] sm:$0xff] %v3015_v11 }
  0xf6   : > { %3018 = vst [vmem:[%s17912_s27 + $0xe60] sm:$0xff] %v3017_v12  ;;  %3020 = vst [vmem:[%s17912_s27 + $0xe68] sm:$0xff] %v3019_v13  ;;  %v3021_v14 = vld [vmem:[%s17904_s26 + $0x1ce0] sm:$0xff]  ;;  %v3023_v15 = vld [vmem:[%s17904_s26 + $0x1cf0] sm:$0xff] }
  0xf7   : > { %v3025_v16 = vld [vmem:[%s17904_s26 + $0x1d00] sm:$0xff]  ;;  %3022 = vst [vmem:[%s17912_s27 + $0xe70] sm:$0xff] %v3021_v14  ;;  %3024 = vst [vmem:[%s17912_s27 + $0xe78] sm:$0xff] %v3023_v15  ;;  %v3027_v17 = vld [vmem:[%s17904_s26 + $0x1d10] sm:$0xff] }
  0xf8   : > { %3026 = vst [vmem:[%s17912_s27 + $0xe80] sm:$0xff] %v3025_v16  ;;  %v3029_v18 = vld [vmem:[%s17904_s26 + $0x1d20] sm:$0xff]  ;;  %v3031_v19 = vld [vmem:[%s17904_s26 + $0x1d30] sm:$0xff]  ;;  %3028 = vst [vmem:[%s17912_s27 + $0xe88] sm:$0xff] %v3027_v17 }
  0xf9   : > { %3030 = vst [vmem:[%s17912_s27 + $0xe90] sm:$0xff] %v3029_v18  ;;  %3032 = vst [vmem:[%s17912_s27 + $0xe98] sm:$0xff] %v3031_v19  ;;  %v3033_v20 = vld [vmem:[%s17904_s26 + $0x1d40] sm:$0xff]  ;;  %v3035_v21 = vld [vmem:[%s17904_s26 + $0x1d50] sm:$0xff] }
  0xfa   : > { %v3037_v22 = vld [vmem:[%s17904_s26 + $0x1d60] sm:$0xff]  ;;  %3034 = vst [vmem:[%s17912_s27 + $0xea0] sm:$0xff] %v3033_v20  ;;  %3036 = vst [vmem:[%s17912_s27 + $0xea8] sm:$0xff] %v3035_v21  ;;  %v3039_v23 = vld [vmem:[%s17904_s26 + $0x1d70] sm:$0xff] }
  0xfb   : > { %3038 = vst [vmem:[%s17912_s27 + $0xeb0] sm:$0xff] %v3037_v22  ;;  %v3041_v24 = vld [vmem:[%s17904_s26 + $0x1d80] sm:$0xff]  ;;  %v3043_v25 = vld [vmem:[%s17904_s26 + $0x1d90] sm:$0xff]  ;;  %3040 = vst [vmem:[%s17912_s27 + $0xeb8] sm:$0xff] %v3039_v23 }
  0xfc   : > { %3042 = vst [vmem:[%s17912_s27 + $0xec0] sm:$0xff] %v3041_v24  ;;  %3044 = vst [vmem:[%s17912_s27 + $0xec8] sm:$0xff] %v3043_v25  ;;  %v3045_v26 = vld [vmem:[%s17904_s26 + $0x1da0] sm:$0xff]  ;;  %v3047_v27 = vld [vmem:[%s17904_s26 + $0x1db0] sm:$0xff] }
  0xfd   : > { %v3049_v28 = vld [vmem:[%s17904_s26 + $0x1dc0] sm:$0xff]  ;;  %3046 = vst [vmem:[%s17912_s27 + $0xed0] sm:$0xff] %v3045_v26  ;;  %3048 = vst [vmem:[%s17912_s27 + $0xed8] sm:$0xff] %v3047_v27  ;;  %v3051_v29 = vld [vmem:[%s17904_s26 + $0x1dd0] sm:$0xff] }
  0xfe   : > { %3050 = vst [vmem:[%s17912_s27 + $0xee0] sm:$0xff] %v3049_v28  ;;  %v3053_v30 = vld [vmem:[%s17904_s26 + $0x1de0] sm:$0xff]  ;;  %v3055_v31 = vld [vmem:[%s17904_s26 + $0x1df0] sm:$0xff]  ;;  %3052 = vst [vmem:[%s17912_s27 + $0xee8] sm:$0xff] %v3051_v29 }
  0xff   : > { %3054 = vst [vmem:[%s17912_s27 + $0xef0] sm:$0xff] %v3053_v30  ;;  %3056 = vst [vmem:[%s17912_s27 + $0xef8] sm:$0xff] %v3055_v31  ;;  %v3057_v32 = vld [vmem:[%s17904_s26 + $0x1e00] sm:$0xff]  ;;  %v3059_v33 = vld [vmem:[%s17904_s26 + $0x1e10] sm:$0xff] }
 0x100   : > { %v3061_v34 = vld [vmem:[%s17904_s26 + $0x1e20] sm:$0xff]  ;;  %3058 = vst [vmem:[%s17912_s27 + $0xf00] sm:$0xff] %v3057_v32  ;;  %3060 = vst [vmem:[%s17912_s27 + $0xf08] sm:$0xff] %v3059_v33  ;;  %v3063_v35 = vld [vmem:[%s17904_s26 + $0x1e30] sm:$0xff] }
 0x101   : > { %3062 = vst [vmem:[%s17912_s27 + $0xf10] sm:$0xff] %v3061_v34  ;;  %v3065_v36 = vld [vmem:[%s17904_s26 + $0x1e40] sm:$0xff]  ;;  %v3067_v37 = vld [vmem:[%s17904_s26 + $0x1e50] sm:$0xff]  ;;  %3064 = vst [vmem:[%s17912_s27 + $0xf18] sm:$0xff] %v3063_v35 }
 0x102   : > { %3066 = vst [vmem:[%s17912_s27 + $0xf20] sm:$0xff] %v3065_v36  ;;  %3068 = vst [vmem:[%s17912_s27 + $0xf28] sm:$0xff] %v3067_v37  ;;  %v3069_v38 = vld [vmem:[%s17904_s26 + $0x1e60] sm:$0xff]  ;;  %v3071_v39 = vld [vmem:[%s17904_s26 + $0x1e70] sm:$0xff] }
 0x103   : > { %v3073_v40 = vld [vmem:[%s17904_s26 + $0x1e80] sm:$0xff]  ;;  %3070 = vst [vmem:[%s17912_s27 + $0xf30] sm:$0xff] %v3069_v38  ;;  %3072 = vst [vmem:[%s17912_s27 + $0xf38] sm:$0xff] %v3071_v39  ;;  %v3075_v41 = vld [vmem:[%s17904_s26 + $0x1e90] sm:$0xff] }
 0x104   : > { %3074 = vst [vmem:[%s17912_s27 + $0xf40] sm:$0xff] %v3073_v40  ;;  %v3077_v42 = vld [vmem:[%s17904_s26 + $0x1ea0] sm:$0xff]  ;;  %v3079_v43 = vld [vmem:[%s17904_s26 + $0x1eb0] sm:$0xff]  ;;  %3076 = vst [vmem:[%s17912_s27 + $0xf48] sm:$0xff] %v3075_v41 }
 0x105   : > { %3078 = vst [vmem:[%s17912_s27 + $0xf50] sm:$0xff] %v3077_v42  ;;  %3080 = vst [vmem:[%s17912_s27 + $0xf58] sm:$0xff] %v3079_v43  ;;  %v3081_v44 = vld [vmem:[%s17904_s26 + $0x1ec0] sm:$0xff]  ;;  %v3083_v45 = vld [vmem:[%s17904_s26 + $0x1ed0] sm:$0xff] }
 0x106   : > { %v3085_v46 = vld [vmem:[%s17904_s26 + $0x1ee0] sm:$0xff]  ;;  %3082 = vst [vmem:[%s17912_s27 + $0xf60] sm:$0xff] %v3081_v44  ;;  %3084 = vst [vmem:[%s17912_s27 + $0xf68] sm:$0xff] %v3083_v45  ;;  %v3087_v47 = vld [vmem:[%s17904_s26 + $0x1ef0] sm:$0xff] }
 0x107   : > { %3086 = vst [vmem:[%s17912_s27 + $0xf70] sm:$0xff] %v3085_v46  ;;  %v3089_v48 = vld [vmem:[%s17904_s26 + $0x1f00] sm:$0xff]  ;;  %v3091_v49 = vld [vmem:[%s17904_s26 + $0x1f10] sm:$0xff]  ;;  %3088 = vst [vmem:[%s17912_s27 + $0xf78] sm:$0xff] %v3087_v47 }
 0x108   : > { %3090 = vst [vmem:[%s17912_s27 + $0xf80] sm:$0xff] %v3089_v48  ;;  %3092 = vst [vmem:[%s17912_s27 + $0xf88] sm:$0xff] %v3091_v49  ;;  %v3093_v50 = vld [vmem:[%s17904_s26 + $0x1f20] sm:$0xff]  ;;  %v3095_v51 = vld [vmem:[%s17904_s26 + $0x1f30] sm:$0xff] }
 0x109   : > { %v3097_v52 = vld [vmem:[%s17904_s26 + $0x1f40] sm:$0xff]  ;;  %3094 = vst [vmem:[%s17912_s27 + $0xf90] sm:$0xff] %v3093_v50  ;;  %3096 = vst [vmem:[%s17912_s27 + $0xf98] sm:$0xff] %v3095_v51  ;;  %v3099_v53 = vld [vmem:[%s17904_s26 + $0x1f50] sm:$0xff] }
 0x10a   : > { %3098 = vst [vmem:[%s17912_s27 + $0xfa0] sm:$0xff] %v3097_v52  ;;  %v3101_v54 = vld [vmem:[%s17904_s26 + $0x1f60] sm:$0xff]  ;;  %v3103_v55 = vld [vmem:[%s17904_s26 + $0x1f70] sm:$0xff]  ;;  %3100 = vst [vmem:[%s17912_s27 + $0xfa8] sm:$0xff] %v3099_v53 }
 0x10b   : > { %3102 = vst [vmem:[%s17912_s27 + $0xfb0] sm:$0xff] %v3101_v54  ;;  %3104 = vst [vmem:[%s17912_s27 + $0xfb8] sm:$0xff] %v3103_v55  ;;  %v3105_v56 = vld [vmem:[%s17904_s26 + $0x1f80] sm:$0xff]  ;;  %v3107_v57 = vld [vmem:[%s17904_s26 + $0x1f90] sm:$0xff] }
 0x10c   : > { %v3109_v58 = vld [vmem:[%s17904_s26 + $0x1fa0] sm:$0xff]  ;;  %3106 = vst [vmem:[%s17912_s27 + $0xfc0] sm:$0xff] %v3105_v56  ;;  %3108 = vst [vmem:[%s17912_s27 + $0xfc8] sm:$0xff] %v3107_v57  ;;  %v3111_v59 = vld [vmem:[%s17904_s26 + $0x1fb0] sm:$0xff] }
 0x10d   : > { %3110 = vst [vmem:[%s17912_s27 + $0xfd0] sm:$0xff] %v3109_v58  ;;  %v3113_v60 = vld [vmem:[%s17904_s26 + $0x1fc0] sm:$0xff]  ;;  %v3115_v61 = vld [vmem:[%s17904_s26 + $0x1fd0] sm:$0xff]  ;;  %3112 = vst [vmem:[%s17912_s27 + $0xfd8] sm:$0xff] %v3111_v59 }
 0x10e   : > { %3114 = vst [vmem:[%s17912_s27 + $0xfe0] sm:$0xff] %v3113_v60  ;;  %3116 = vst [vmem:[%s17912_s27 + $0xfe8] sm:$0xff] %v3115_v61  ;;  %v3117_v62 = vld [vmem:[%s17904_s26 + $0x1fe0] sm:$0xff]  ;;  %v3119_v63 = vld [vmem:[%s17904_s26 + $0x1ff0] sm:$0xff] }
 0x10f   : > { %v3121_v0 = vld [vmem:[%s17904_s26 + $0x2000] sm:$0xff]  ;;  %3118 = vst [vmem:[%s17912_s27 + $0xff0] sm:$0xff] %v3117_v62  ;;  %3120 = vst [vmem:[%s17912_s27 + $0xff8] sm:$0xff] %v3119_v63  ;;  %v3123_v1 = vld [vmem:[%s17904_s26 + $0x2010] sm:$0xff] }
 0x110   : > { %3122 = vst [vmem:[%s17912_s27 + $0x1000] sm:$0xff] %v3121_v0  ;;  %v3125_v2 = vld [vmem:[%s17904_s26 + $0x2020] sm:$0xff]  ;;  %v3127_v3 = vld [vmem:[%s17904_s26 + $0x2030] sm:$0xff]  ;;  %3124 = vst [vmem:[%s17912_s27 + $0x1008] sm:$0xff] %v3123_v1 }
 0x111   : > { %3126 = vst [vmem:[%s17912_s27 + $0x1010] sm:$0xff] %v3125_v2  ;;  %3128 = vst [vmem:[%s17912_s27 + $0x1018] sm:$0xff] %v3127_v3  ;;  %v3129_v4 = vld [vmem:[%s17904_s26 + $0x2040] sm:$0xff]  ;;  %v3131_v5 = vld [vmem:[%s17904_s26 + $0x2050] sm:$0xff] }
 0x112   : > { %v3133_v6 = vld [vmem:[%s17904_s26 + $0x2060] sm:$0xff]  ;;  %3130 = vst [vmem:[%s17912_s27 + $0x1020] sm:$0xff] %v3129_v4  ;;  %3132 = vst [vmem:[%s17912_s27 + $0x1028] sm:$0xff] %v3131_v5  ;;  %v3135_v7 = vld [vmem:[%s17904_s26 + $0x2070] sm:$0xff] }
 0x113   : > { %3134 = vst [vmem:[%s17912_s27 + $0x1030] sm:$0xff] %v3133_v6  ;;  %v3137_v8 = vld [vmem:[%s17904_s26 + $0x2080] sm:$0xff]  ;;  %v3139_v9 = vld [vmem:[%s17904_s26 + $0x2090] sm:$0xff]  ;;  %3136 = vst [vmem:[%s17912_s27 + $0x1038] sm:$0xff] %v3135_v7 }
 0x114   : > { %3138 = vst [vmem:[%s17912_s27 + $0x1040] sm:$0xff] %v3137_v8  ;;  %3140 = vst [vmem:[%s17912_s27 + $0x1048] sm:$0xff] %v3139_v9  ;;  %v3141_v10 = vld [vmem:[%s17904_s26 + $0x20a0] sm:$0xff]  ;;  %v3143_v11 = vld [vmem:[%s17904_s26 + $0x20b0] sm:$0xff] }
 0x115   : > { %v3145_v12 = vld [vmem:[%s17904_s26 + $0x20c0] sm:$0xff]  ;;  %3142 = vst [vmem:[%s17912_s27 + $0x1050] sm:$0xff] %v3141_v10  ;;  %3144 = vst [vmem:[%s17912_s27 + $0x1058] sm:$0xff] %v3143_v11  ;;  %v3147_v13 = vld [vmem:[%s17904_s26 + $0x20d0] sm:$0xff] }
 0x116   : > { %3146 = vst [vmem:[%s17912_s27 + $0x1060] sm:$0xff] %v3145_v12  ;;  %v3149_v14 = vld [vmem:[%s17904_s26 + $0x20e0] sm:$0xff]  ;;  %v3151_v15 = vld [vmem:[%s17904_s26 + $0x20f0] sm:$0xff]  ;;  %3148 = vst [vmem:[%s17912_s27 + $0x1068] sm:$0xff] %v3147_v13 }
 0x117   : > { %3150 = vst [vmem:[%s17912_s27 + $0x1070] sm:$0xff] %v3149_v14  ;;  %3152 = vst [vmem:[%s17912_s27 + $0x1078] sm:$0xff] %v3151_v15  ;;  %v3153_v16 = vld [vmem:[%s17904_s26 + $0x2100] sm:$0xff]  ;;  %v3155_v17 = vld [vmem:[%s17904_s26 + $0x2110] sm:$0xff] }
 0x118   : > { %v3157_v18 = vld [vmem:[%s17904_s26 + $0x2120] sm:$0xff]  ;;  %3154 = vst [vmem:[%s17912_s27 + $0x1080] sm:$0xff] %v3153_v16  ;;  %3156 = vst [vmem:[%s17912_s27 + $0x1088] sm:$0xff] %v3155_v17  ;;  %v3159_v19 = vld [vmem:[%s17904_s26 + $0x2130] sm:$0xff] }
 0x119   : > { %3158 = vst [vmem:[%s17912_s27 + $0x1090] sm:$0xff] %v3157_v18  ;;  %v3161_v20 = vld [vmem:[%s17904_s26 + $0x2140] sm:$0xff]  ;;  %v3163_v21 = vld [vmem:[%s17904_s26 + $0x2150] sm:$0xff]  ;;  %3160 = vst [vmem:[%s17912_s27 + $0x1098] sm:$0xff] %v3159_v19 }
 0x11a   : > { %3162 = vst [vmem:[%s17912_s27 + $0x10a0] sm:$0xff] %v3161_v20  ;;  %3164 = vst [vmem:[%s17912_s27 + $0x10a8] sm:$0xff] %v3163_v21  ;;  %v3165_v22 = vld [vmem:[%s17904_s26 + $0x2160] sm:$0xff]  ;;  %v3167_v23 = vld [vmem:[%s17904_s26 + $0x2170] sm:$0xff] }
 0x11b   : > { %v3169_v24 = vld [vmem:[%s17904_s26 + $0x2180] sm:$0xff]  ;;  %3166 = vst [vmem:[%s17912_s27 + $0x10b0] sm:$0xff] %v3165_v22  ;;  %3168 = vst [vmem:[%s17912_s27 + $0x10b8] sm:$0xff] %v3167_v23  ;;  %v3171_v25 = vld [vmem:[%s17904_s26 + $0x2190] sm:$0xff] }
 0x11c   : > { %3170 = vst [vmem:[%s17912_s27 + $0x10c0] sm:$0xff] %v3169_v24  ;;  %v3173_v26 = vld [vmem:[%s17904_s26 + $0x21a0] sm:$0xff]  ;;  %v3175_v27 = vld [vmem:[%s17904_s26 + $0x21b0] sm:$0xff]  ;;  %3172 = vst [vmem:[%s17912_s27 + $0x10c8] sm:$0xff] %v3171_v25 }
 0x11d   : > { %3174 = vst [vmem:[%s17912_s27 + $0x10d0] sm:$0xff] %v3173_v26  ;;  %3176 = vst [vmem:[%s17912_s27 + $0x10d8] sm:$0xff] %v3175_v27  ;;  %v3177_v28 = vld [vmem:[%s17904_s26 + $0x21c0] sm:$0xff]  ;;  %v3179_v29 = vld [vmem:[%s17904_s26 + $0x21d0] sm:$0xff] }
 0x11e   : > { %v3181_v30 = vld [vmem:[%s17904_s26 + $0x21e0] sm:$0xff]  ;;  %3178 = vst [vmem:[%s17912_s27 + $0x10e0] sm:$0xff] %v3177_v28  ;;  %3180 = vst [vmem:[%s17912_s27 + $0x10e8] sm:$0xff] %v3179_v29  ;;  %v3183_v31 = vld [vmem:[%s17904_s26 + $0x21f0] sm:$0xff] }
 0x11f   : > { %3182 = vst [vmem:[%s17912_s27 + $0x10f0] sm:$0xff] %v3181_v30  ;;  %v3185_v32 = vld [vmem:[%s17904_s26 + $0x2200] sm:$0xff]  ;;  %v3187_v33 = vld [vmem:[%s17904_s26 + $0x2210] sm:$0xff]  ;;  %3184 = vst [vmem:[%s17912_s27 + $0x10f8] sm:$0xff] %v3183_v31 }
 0x120   : > { %3186 = vst [vmem:[%s17912_s27 + $0x1100] sm:$0xff] %v3185_v32  ;;  %3188 = vst [vmem:[%s17912_s27 + $0x1108] sm:$0xff] %v3187_v33  ;;  %v3189_v34 = vld [vmem:[%s17904_s26 + $0x2220] sm:$0xff]  ;;  %v3191_v35 = vld [vmem:[%s17904_s26 + $0x2230] sm:$0xff] }
 0x121   : > { %v3193_v36 = vld [vmem:[%s17904_s26 + $0x2240] sm:$0xff]  ;;  %3190 = vst [vmem:[%s17912_s27 + $0x1110] sm:$0xff] %v3189_v34  ;;  %3192 = vst [vmem:[%s17912_s27 + $0x1118] sm:$0xff] %v3191_v35  ;;  %v3195_v37 = vld [vmem:[%s17904_s26 + $0x2250] sm:$0xff] }
 0x122   : > { %3194 = vst [vmem:[%s17912_s27 + $0x1120] sm:$0xff] %v3193_v36  ;;  %v3197_v38 = vld [vmem:[%s17904_s26 + $0x2260] sm:$0xff]  ;;  %v3199_v39 = vld [vmem:[%s17904_s26 + $0x2270] sm:$0xff]  ;;  %3196 = vst [vmem:[%s17912_s27 + $0x1128] sm:$0xff] %v3195_v37 }
 0x123   : > { %3198 = vst [vmem:[%s17912_s27 + $0x1130] sm:$0xff] %v3197_v38  ;;  %3200 = vst [vmem:[%s17912_s27 + $0x1138] sm:$0xff] %v3199_v39  ;;  %v3201_v40 = vld [vmem:[%s17904_s26 + $0x2280] sm:$0xff]  ;;  %v3203_v41 = vld [vmem:[%s17904_s26 + $0x2290] sm:$0xff] }
 0x124   : > { %v3205_v42 = vld [vmem:[%s17904_s26 + $0x22a0] sm:$0xff]  ;;  %3202 = vst [vmem:[%s17912_s27 + $0x1140] sm:$0xff] %v3201_v40  ;;  %3204 = vst [vmem:[%s17912_s27 + $0x1148] sm:$0xff] %v3203_v41  ;;  %v3207_v43 = vld [vmem:[%s17904_s26 + $0x22b0] sm:$0xff] }
 0x125   : > { %3206 = vst [vmem:[%s17912_s27 + $0x1150] sm:$0xff] %v3205_v42  ;;  %v3209_v44 = vld [vmem:[%s17904_s26 + $0x22c0] sm:$0xff]  ;;  %v3211_v45 = vld [vmem:[%s17904_s26 + $0x22d0] sm:$0xff]  ;;  %3208 = vst [vmem:[%s17912_s27 + $0x1158] sm:$0xff] %v3207_v43 }
 0x126   : > { %3210 = vst [vmem:[%s17912_s27 + $0x1160] sm:$0xff] %v3209_v44  ;;  %3212 = vst [vmem:[%s17912_s27 + $0x1168] sm:$0xff] %v3211_v45  ;;  %v3213_v46 = vld [vmem:[%s17904_s26 + $0x22e0] sm:$0xff]  ;;  %v3215_v47 = vld [vmem:[%s17904_s26 + $0x22f0] sm:$0xff] }
 0x127   : > { %v3217_v48 = vld [vmem:[%s17904_s26 + $0x2300] sm:$0xff]  ;;  %3214 = vst [vmem:[%s17912_s27 + $0x1170] sm:$0xff] %v3213_v46  ;;  %3216 = vst [vmem:[%s17912_s27 + $0x1178] sm:$0xff] %v3215_v47  ;;  %v3219_v49 = vld [vmem:[%s17904_s26 + $0x2310] sm:$0xff] }
 0x128   : > { %3218 = vst [vmem:[%s17912_s27 + $0x1180] sm:$0xff] %v3217_v48  ;;  %v3221_v50 = vld [vmem:[%s17904_s26 + $0x2320] sm:$0xff]  ;;  %v3223_v51 = vld [vmem:[%s17904_s26 + $0x2330] sm:$0xff]  ;;  %3220 = vst [vmem:[%s17912_s27 + $0x1188] sm:$0xff] %v3219_v49 }
 0x129   : > { %3222 = vst [vmem:[%s17912_s27 + $0x1190] sm:$0xff] %v3221_v50  ;;  %3224 = vst [vmem:[%s17912_s27 + $0x1198] sm:$0xff] %v3223_v51  ;;  %v3225_v52 = vld [vmem:[%s17904_s26 + $0x2340] sm:$0xff]  ;;  %v3227_v53 = vld [vmem:[%s17904_s26 + $0x2350] sm:$0xff] }
 0x12a   : > { %v3229_v54 = vld [vmem:[%s17904_s26 + $0x2360] sm:$0xff]  ;;  %3226 = vst [vmem:[%s17912_s27 + $0x11a0] sm:$0xff] %v3225_v52  ;;  %3228 = vst [vmem:[%s17912_s27 + $0x11a8] sm:$0xff] %v3227_v53  ;;  %v3231_v55 = vld [vmem:[%s17904_s26 + $0x2370] sm:$0xff] }
 0x12b   : > { %3230 = vst [vmem:[%s17912_s27 + $0x11b0] sm:$0xff] %v3229_v54  ;;  %v3233_v56 = vld [vmem:[%s17904_s26 + $0x2380] sm:$0xff]  ;;  %v3235_v57 = vld [vmem:[%s17904_s26 + $0x2390] sm:$0xff]  ;;  %3232 = vst [vmem:[%s17912_s27 + $0x11b8] sm:$0xff] %v3231_v55 }
 0x12c   : > { %3234 = vst [vmem:[%s17912_s27 + $0x11c0] sm:$0xff] %v3233_v56  ;;  %3236 = vst [vmem:[%s17912_s27 + $0x11c8] sm:$0xff] %v3235_v57  ;;  %v3237_v58 = vld [vmem:[%s17904_s26 + $0x23a0] sm:$0xff]  ;;  %v3239_v59 = vld [vmem:[%s17904_s26 + $0x23b0] sm:$0xff] }
 0x12d   : > { %v3241_v60 = vld [vmem:[%s17904_s26 + $0x23c0] sm:$0xff]  ;;  %3238 = vst [vmem:[%s17912_s27 + $0x11d0] sm:$0xff] %v3237_v58  ;;  %3240 = vst [vmem:[%s17912_s27 + $0x11d8] sm:$0xff] %v3239_v59  ;;  %v3243_v61 = vld [vmem:[%s17904_s26 + $0x23d0] sm:$0xff] }
 0x12e   : > { %3242 = vst [vmem:[%s17912_s27 + $0x11e0] sm:$0xff] %v3241_v60  ;;  %v3245_v62 = vld [vmem:[%s17904_s26 + $0x23e0] sm:$0xff]  ;;  %v3247_v63 = vld [vmem:[%s17904_s26 + $0x23f0] sm:$0xff]  ;;  %3244 = vst [vmem:[%s17912_s27 + $0x11e8] sm:$0xff] %v3243_v61 }
 0x12f   : > { %3246 = vst [vmem:[%s17912_s27 + $0x11f0] sm:$0xff] %v3245_v62  ;;  %3248 = vst [vmem:[%s17912_s27 + $0x11f8] sm:$0xff] %v3247_v63  ;;  %v3249_v0 = vld [vmem:[%s17904_s26 + $0x2400] sm:$0xff]  ;;  %v3251_v1 = vld [vmem:[%s17904_s26 + $0x2410] sm:$0xff] }
 0x130   : > { %v3253_v2 = vld [vmem:[%s17904_s26 + $0x2420] sm:$0xff]  ;;  %3250 = vst [vmem:[%s17912_s27 + $0x1200] sm:$0xff] %v3249_v0  ;;  %3252 = vst [vmem:[%s17912_s27 + $0x1208] sm:$0xff] %v3251_v1  ;;  %v3255_v3 = vld [vmem:[%s17904_s26 + $0x2430] sm:$0xff] }
 0x131   : > { %3254 = vst [vmem:[%s17912_s27 + $0x1210] sm:$0xff] %v3253_v2  ;;  %v3257_v4 = vld [vmem:[%s17904_s26 + $0x2440] sm:$0xff]  ;;  %v3259_v5 = vld [vmem:[%s17904_s26 + $0x2450] sm:$0xff]  ;;  %3256 = vst [vmem:[%s17912_s27 + $0x1218] sm:$0xff] %v3255_v3 }
 0x132   : > { %3258 = vst [vmem:[%s17912_s27 + $0x1220] sm:$0xff] %v3257_v4  ;;  %3260 = vst [vmem:[%s17912_s27 + $0x1228] sm:$0xff] %v3259_v5  ;;  %v3261_v6 = vld [vmem:[%s17904_s26 + $0x2460] sm:$0xff]  ;;  %v3263_v7 = vld [vmem:[%s17904_s26 + $0x2470] sm:$0xff] }
 0x133   : > { %v3265_v8 = vld [vmem:[%s17904_s26 + $0x2480] sm:$0xff]  ;;  %3262 = vst [vmem:[%s17912_s27 + $0x1230] sm:$0xff] %v3261_v6  ;;  %3264 = vst [vmem:[%s17912_s27 + $0x1238] sm:$0xff] %v3263_v7  ;;  %v3267_v9 = vld [vmem:[%s17904_s26 + $0x2490] sm:$0xff] }
 0x134   : > { %3266 = vst [vmem:[%s17912_s27 + $0x1240] sm:$0xff] %v3265_v8  ;;  %v3269_v10 = vld [vmem:[%s17904_s26 + $0x24a0] sm:$0xff]  ;;  %v3271_v11 = vld [vmem:[%s17904_s26 + $0x24b0] sm:$0xff]  ;;  %3268 = vst [vmem:[%s17912_s27 + $0x1248] sm:$0xff] %v3267_v9 }
 0x135   : > { %3270 = vst [vmem:[%s17912_s27 + $0x1250] sm:$0xff] %v3269_v10  ;;  %3272 = vst [vmem:[%s17912_s27 + $0x1258] sm:$0xff] %v3271_v11  ;;  %v3273_v12 = vld [vmem:[%s17904_s26 + $0x24c0] sm:$0xff]  ;;  %v3275_v13 = vld [vmem:[%s17904_s26 + $0x24d0] sm:$0xff] }
 0x136   : > { %v3277_v14 = vld [vmem:[%s17904_s26 + $0x24e0] sm:$0xff]  ;;  %3274 = vst [vmem:[%s17912_s27 + $0x1260] sm:$0xff] %v3273_v12  ;;  %3276 = vst [vmem:[%s17912_s27 + $0x1268] sm:$0xff] %v3275_v13  ;;  %v3279_v15 = vld [vmem:[%s17904_s26 + $0x24f0] sm:$0xff] }
 0x137   : > { %3278 = vst [vmem:[%s17912_s27 + $0x1270] sm:$0xff] %v3277_v14  ;;  %v3281_v16 = vld [vmem:[%s17904_s26 + $0x2500] sm:$0xff]  ;;  %v3283_v17 = vld [vmem:[%s17904_s26 + $0x2510] sm:$0xff]  ;;  %3280 = vst [vmem:[%s17912_s27 + $0x1278] sm:$0xff] %v3279_v15 }
 0x138   : > { %3282 = vst [vmem:[%s17912_s27 + $0x1280] sm:$0xff] %v3281_v16  ;;  %3284 = vst [vmem:[%s17912_s27 + $0x1288] sm:$0xff] %v3283_v17  ;;  %v3285_v18 = vld [vmem:[%s17904_s26 + $0x2520] sm:$0xff]  ;;  %v3287_v19 = vld [vmem:[%s17904_s26 + $0x2530] sm:$0xff] }
 0x139   : > { %v3289_v20 = vld [vmem:[%s17904_s26 + $0x2540] sm:$0xff]  ;;  %3286 = vst [vmem:[%s17912_s27 + $0x1290] sm:$0xff] %v3285_v18  ;;  %3288 = vst [vmem:[%s17912_s27 + $0x1298] sm:$0xff] %v3287_v19  ;;  %v3291_v21 = vld [vmem:[%s17904_s26 + $0x2550] sm:$0xff] }
 0x13a   : > { %3290 = vst [vmem:[%s17912_s27 + $0x12a0] sm:$0xff] %v3289_v20  ;;  %v3293_v22 = vld [vmem:[%s17904_s26 + $0x2560] sm:$0xff]  ;;  %v3295_v23 = vld [vmem:[%s17904_s26 + $0x2570] sm:$0xff]  ;;  %3292 = vst [vmem:[%s17912_s27 + $0x12a8] sm:$0xff] %v3291_v21 }
 0x13b   : > { %3294 = vst [vmem:[%s17912_s27 + $0x12b0] sm:$0xff] %v3293_v22  ;;  %3296 = vst [vmem:[%s17912_s27 + $0x12b8] sm:$0xff] %v3295_v23  ;;  %v3297_v24 = vld [vmem:[%s17904_s26 + $0x2580] sm:$0xff]  ;;  %v3299_v25 = vld [vmem:[%s17904_s26 + $0x2590] sm:$0xff] }
 0x13c   : > { %v3301_v26 = vld [vmem:[%s17904_s26 + $0x25a0] sm:$0xff]  ;;  %3298 = vst [vmem:[%s17912_s27 + $0x12c0] sm:$0xff] %v3297_v24  ;;  %3300 = vst [vmem:[%s17912_s27 + $0x12c8] sm:$0xff] %v3299_v25  ;;  %v3303_v27 = vld [vmem:[%s17904_s26 + $0x25b0] sm:$0xff] }
 0x13d   : > { %3302 = vst [vmem:[%s17912_s27 + $0x12d0] sm:$0xff] %v3301_v26  ;;  %v3305_v28 = vld [vmem:[%s17904_s26 + $0x25c0] sm:$0xff]  ;;  %v3307_v29 = vld [vmem:[%s17904_s26 + $0x25d0] sm:$0xff]  ;;  %3304 = vst [vmem:[%s17912_s27 + $0x12d8] sm:$0xff] %v3303_v27 }
 0x13e   : > { %3306 = vst [vmem:[%s17912_s27 + $0x12e0] sm:$0xff] %v3305_v28  ;;  %3308 = vst [vmem:[%s17912_s27 + $0x12e8] sm:$0xff] %v3307_v29  ;;  %v3309_v30 = vld [vmem:[%s17904_s26 + $0x25e0] sm:$0xff]  ;;  %v3311_v31 = vld [vmem:[%s17904_s26 + $0x25f0] sm:$0xff] }
 0x13f   : > { %v3313_v32 = vld [vmem:[%s17904_s26 + $0x2600] sm:$0xff]  ;;  %3310 = vst [vmem:[%s17912_s27 + $0x12f0] sm:$0xff] %v3309_v30  ;;  %3312 = vst [vmem:[%s17912_s27 + $0x12f8] sm:$0xff] %v3311_v31  ;;  %v3315_v33 = vld [vmem:[%s17904_s26 + $0x2610] sm:$0xff] }
 0x140   : > { %3314 = vst [vmem:[%s17912_s27 + $0x1300] sm:$0xff] %v3313_v32  ;;  %v3317_v34 = vld [vmem:[%s17904_s26 + $0x2620] sm:$0xff]  ;;  %v3319_v35 = vld [vmem:[%s17904_s26 + $0x2630] sm:$0xff]  ;;  %3316 = vst [vmem:[%s17912_s27 + $0x1308] sm:$0xff] %v3315_v33 }
 0x141   : > { %3318 = vst [vmem:[%s17912_s27 + $0x1310] sm:$0xff] %v3317_v34  ;;  %3320 = vst [vmem:[%s17912_s27 + $0x1318] sm:$0xff] %v3319_v35  ;;  %v3321_v36 = vld [vmem:[%s17904_s26 + $0x2640] sm:$0xff]  ;;  %v3323_v37 = vld [vmem:[%s17904_s26 + $0x2650] sm:$0xff] }
 0x142   : > { %v3325_v38 = vld [vmem:[%s17904_s26 + $0x2660] sm:$0xff]  ;;  %3322 = vst [vmem:[%s17912_s27 + $0x1320] sm:$0xff] %v3321_v36  ;;  %3324 = vst [vmem:[%s17912_s27 + $0x1328] sm:$0xff] %v3323_v37  ;;  %v3327_v39 = vld [vmem:[%s17904_s26 + $0x2670] sm:$0xff] }
 0x143   : > { %3326 = vst [vmem:[%s17912_s27 + $0x1330] sm:$0xff] %v3325_v38  ;;  %v3329_v40 = vld [vmem:[%s17904_s26 + $0x2680] sm:$0xff]  ;;  %v3331_v41 = vld [vmem:[%s17904_s26 + $0x2690] sm:$0xff]  ;;  %3328 = vst [vmem:[%s17912_s27 + $0x1338] sm:$0xff] %v3327_v39 }
 0x144   : > { %3330 = vst [vmem:[%s17912_s27 + $0x1340] sm:$0xff] %v3329_v40  ;;  %3332 = vst [vmem:[%s17912_s27 + $0x1348] sm:$0xff] %v3331_v41  ;;  %v3333_v42 = vld [vmem:[%s17904_s26 + $0x26a0] sm:$0xff]  ;;  %v3335_v43 = vld [vmem:[%s17904_s26 + $0x26b0] sm:$0xff] }
 0x145   : > { %v3337_v44 = vld [vmem:[%s17904_s26 + $0x26c0] sm:$0xff]  ;;  %3334 = vst [vmem:[%s17912_s27 + $0x1350] sm:$0xff] %v3333_v42  ;;  %3336 = vst [vmem:[%s17912_s27 + $0x1358] sm:$0xff] %v3335_v43  ;;  %v3339_v45 = vld [vmem:[%s17904_s26 + $0x26d0] sm:$0xff] }
 0x146   : > { %3338 = vst [vmem:[%s17912_s27 + $0x1360] sm:$0xff] %v3337_v44  ;;  %v3341_v46 = vld [vmem:[%s17904_s26 + $0x26e0] sm:$0xff]  ;;  %v3343_v47 = vld [vmem:[%s17904_s26 + $0x26f0] sm:$0xff]  ;;  %3340 = vst [vmem:[%s17912_s27 + $0x1368] sm:$0xff] %v3339_v45 }
 0x147   : > { %3342 = vst [vmem:[%s17912_s27 + $0x1370] sm:$0xff] %v3341_v46  ;;  %3344 = vst [vmem:[%s17912_s27 + $0x1378] sm:$0xff] %v3343_v47  ;;  %v3345_v48 = vld [vmem:[%s17904_s26 + $0x2700] sm:$0xff]  ;;  %v3347_v49 = vld [vmem:[%s17904_s26 + $0x2710] sm:$0xff] }
 0x148   : > { %v3349_v50 = vld [vmem:[%s17904_s26 + $0x2720] sm:$0xff]  ;;  %3346 = vst [vmem:[%s17912_s27 + $0x1380] sm:$0xff] %v3345_v48  ;;  %3348 = vst [vmem:[%s17912_s27 + $0x1388] sm:$0xff] %v3347_v49  ;;  %v3351_v51 = vld [vmem:[%s17904_s26 + $0x2730] sm:$0xff] }
 0x149   : > { %3350 = vst [vmem:[%s17912_s27 + $0x1390] sm:$0xff] %v3349_v50  ;;  %v3353_v52 = vld [vmem:[%s17904_s26 + $0x2740] sm:$0xff]  ;;  %v3355_v53 = vld [vmem:[%s17904_s26 + $0x2750] sm:$0xff]  ;;  %3352 = vst [vmem:[%s17912_s27 + $0x1398] sm:$0xff] %v3351_v51 }
 0x14a   : > { %3354 = vst [vmem:[%s17912_s27 + $0x13a0] sm:$0xff] %v3353_v52  ;;  %3356 = vst [vmem:[%s17912_s27 + $0x13a8] sm:$0xff] %v3355_v53  ;;  %v3357_v54 = vld [vmem:[%s17904_s26 + $0x2760] sm:$0xff]  ;;  %v3359_v55 = vld [vmem:[%s17904_s26 + $0x2770] sm:$0xff] }
 0x14b   : > { %v3361_v56 = vld [vmem:[%s17904_s26 + $0x2780] sm:$0xff]  ;;  %3358 = vst [vmem:[%s17912_s27 + $0x13b0] sm:$0xff] %v3357_v54  ;;  %3360 = vst [vmem:[%s17912_s27 + $0x13b8] sm:$0xff] %v3359_v55  ;;  %v3363_v57 = vld [vmem:[%s17904_s26 + $0x2790] sm:$0xff] }
 0x14c   : > { %3362 = vst [vmem:[%s17912_s27 + $0x13c0] sm:$0xff] %v3361_v56  ;;  %v3365_v58 = vld [vmem:[%s17904_s26 + $0x27a0] sm:$0xff]  ;;  %v3367_v59 = vld [vmem:[%s17904_s26 + $0x27b0] sm:$0xff]  ;;  %3364 = vst [vmem:[%s17912_s27 + $0x13c8] sm:$0xff] %v3363_v57 }
 0x14d   : > { %3366 = vst [vmem:[%s17912_s27 + $0x13d0] sm:$0xff] %v3365_v58  ;;  %3368 = vst [vmem:[%s17912_s27 + $0x13d8] sm:$0xff] %v3367_v59  ;;  %v3369_v60 = vld [vmem:[%s17904_s26 + $0x27c0] sm:$0xff]  ;;  %v3371_v61 = vld [vmem:[%s17904_s26 + $0x27d0] sm:$0xff] }
 0x14e   : > { %v3373_v62 = vld [vmem:[%s17904_s26 + $0x27e0] sm:$0xff]  ;;  %3370 = vst [vmem:[%s17912_s27 + $0x13e0] sm:$0xff] %v3369_v60  ;;  %3372 = vst [vmem:[%s17912_s27 + $0x13e8] sm:$0xff] %v3371_v61  ;;  %v3375_v63 = vld [vmem:[%s17904_s26 + $0x27f0] sm:$0xff] }
 0x14f   : > { %3374 = vst [vmem:[%s17912_s27 + $0x13f0] sm:$0xff] %v3373_v62  ;;  %v3377_v0 = vld [vmem:[%s17904_s26 + $0x2800] sm:$0xff]  ;;  %v3379_v1 = vld [vmem:[%s17904_s26 + $0x2810] sm:$0xff]  ;;  %3376 = vst [vmem:[%s17912_s27 + $0x13f8] sm:$0xff] %v3375_v63 }
 0x150   : > { %3378 = vst [vmem:[%s17912_s27 + $0x1400] sm:$0xff] %v3377_v0  ;;  %3380 = vst [vmem:[%s17912_s27 + $0x1408] sm:$0xff] %v3379_v1  ;;  %v3381_v2 = vld [vmem:[%s17904_s26 + $0x2820] sm:$0xff]  ;;  %v3383_v3 = vld [vmem:[%s17904_s26 + $0x2830] sm:$0xff] }
 0x151   : > { %v3385_v4 = vld [vmem:[%s17904_s26 + $0x2840] sm:$0xff]  ;;  %3382 = vst [vmem:[%s17912_s27 + $0x1410] sm:$0xff] %v3381_v2  ;;  %3384 = vst [vmem:[%s17912_s27 + $0x1418] sm:$0xff] %v3383_v3  ;;  %v3387_v5 = vld [vmem:[%s17904_s26 + $0x2850] sm:$0xff] }
 0x152   : > { %3386 = vst [vmem:[%s17912_s27 + $0x1420] sm:$0xff] %v3385_v4  ;;  %v3389_v6 = vld [vmem:[%s17904_s26 + $0x2860] sm:$0xff]  ;;  %v3391_v7 = vld [vmem:[%s17904_s26 + $0x2870] sm:$0xff]  ;;  %3388 = vst [vmem:[%s17912_s27 + $0x1428] sm:$0xff] %v3387_v5 }
 0x153   : > { %3390 = vst [vmem:[%s17912_s27 + $0x1430] sm:$0xff] %v3389_v6  ;;  %3392 = vst [vmem:[%s17912_s27 + $0x1438] sm:$0xff] %v3391_v7  ;;  %v3393_v8 = vld [vmem:[%s17904_s26 + $0x2880] sm:$0xff]  ;;  %v3395_v9 = vld [vmem:[%s17904_s26 + $0x2890] sm:$0xff] }
 0x154   : > { %v3397_v10 = vld [vmem:[%s17904_s26 + $0x28a0] sm:$0xff]  ;;  %3394 = vst [vmem:[%s17912_s27 + $0x1440] sm:$0xff] %v3393_v8  ;;  %3396 = vst [vmem:[%s17912_s27 + $0x1448] sm:$0xff] %v3395_v9  ;;  %v3399_v11 = vld [vmem:[%s17904_s26 + $0x28b0] sm:$0xff] }
 0x155   : > { %3398 = vst [vmem:[%s17912_s27 + $0x1450] sm:$0xff] %v3397_v10  ;;  %v3401_v12 = vld [vmem:[%s17904_s26 + $0x28c0] sm:$0xff]  ;;  %v3403_v13 = vld [vmem:[%s17904_s26 + $0x28d0] sm:$0xff]  ;;  %3400 = vst [vmem:[%s17912_s27 + $0x1458] sm:$0xff] %v3399_v11 }
 0x156   : > { %3402 = vst [vmem:[%s17912_s27 + $0x1460] sm:$0xff] %v3401_v12  ;;  %3404 = vst [vmem:[%s17912_s27 + $0x1468] sm:$0xff] %v3403_v13  ;;  %v3405_v14 = vld [vmem:[%s17904_s26 + $0x28e0] sm:$0xff]  ;;  %v3407_v15 = vld [vmem:[%s17904_s26 + $0x28f0] sm:$0xff] }
 0x157   : > { %v3409_v16 = vld [vmem:[%s17904_s26 + $0x2900] sm:$0xff]  ;;  %3406 = vst [vmem:[%s17912_s27 + $0x1470] sm:$0xff] %v3405_v14  ;;  %3408 = vst [vmem:[%s17912_s27 + $0x1478] sm:$0xff] %v3407_v15  ;;  %v3411_v17 = vld [vmem:[%s17904_s26 + $0x2910] sm:$0xff] }
 0x158   : > { %3410 = vst [vmem:[%s17912_s27 + $0x1480] sm:$0xff] %v3409_v16  ;;  %v3413_v18 = vld [vmem:[%s17904_s26 + $0x2920] sm:$0xff]  ;;  %v3415_v19 = vld [vmem:[%s17904_s26 + $0x2930] sm:$0xff]  ;;  %3412 = vst [vmem:[%s17912_s27 + $0x1488] sm:$0xff] %v3411_v17 }
 0x159   : > { %3414 = vst [vmem:[%s17912_s27 + $0x1490] sm:$0xff] %v3413_v18  ;;  %3416 = vst [vmem:[%s17912_s27 + $0x1498] sm:$0xff] %v3415_v19  ;;  %v3417_v20 = vld [vmem:[%s17904_s26 + $0x2940] sm:$0xff]  ;;  %v3419_v21 = vld [vmem:[%s17904_s26 + $0x2950] sm:$0xff] }
 0x15a   : > { %v3421_v22 = vld [vmem:[%s17904_s26 + $0x2960] sm:$0xff]  ;;  %3418 = vst [vmem:[%s17912_s27 + $0x14a0] sm:$0xff] %v3417_v20  ;;  %3420 = vst [vmem:[%s17912_s27 + $0x14a8] sm:$0xff] %v3419_v21  ;;  %v3423_v23 = vld [vmem:[%s17904_s26 + $0x2970] sm:$0xff] }
 0x15b   : > { %3422 = vst [vmem:[%s17912_s27 + $0x14b0] sm:$0xff] %v3421_v22  ;;  %v3425_v24 = vld [vmem:[%s17904_s26 + $0x2980] sm:$0xff]  ;;  %v3427_v25 = vld [vmem:[%s17904_s26 + $0x2990] sm:$0xff]  ;;  %3424 = vst [vmem:[%s17912_s27 + $0x14b8] sm:$0xff] %v3423_v23 }
 0x15c   : > { %3426 = vst [vmem:[%s17912_s27 + $0x14c0] sm:$0xff] %v3425_v24  ;;  %3428 = vst [vmem:[%s17912_s27 + $0x14c8] sm:$0xff] %v3427_v25  ;;  %v3429_v26 = vld [vmem:[%s17904_s26 + $0x29a0] sm:$0xff]  ;;  %v3431_v27 = vld [vmem:[%s17904_s26 + $0x29b0] sm:$0xff] }
 0x15d   : > { %v3433_v28 = vld [vmem:[%s17904_s26 + $0x29c0] sm:$0xff]  ;;  %3430 = vst [vmem:[%s17912_s27 + $0x14d0] sm:$0xff] %v3429_v26  ;;  %3432 = vst [vmem:[%s17912_s27 + $0x14d8] sm:$0xff] %v3431_v27  ;;  %v3435_v29 = vld [vmem:[%s17904_s26 + $0x29d0] sm:$0xff] }
 0x15e   : > { %3434 = vst [vmem:[%s17912_s27 + $0x14e0] sm:$0xff] %v3433_v28  ;;  %v3437_v30 = vld [vmem:[%s17904_s26 + $0x29e0] sm:$0xff]  ;;  %v3439_v31 = vld [vmem:[%s17904_s26 + $0x29f0] sm:$0xff]  ;;  %3436 = vst [vmem:[%s17912_s27 + $0x14e8] sm:$0xff] %v3435_v29 }
 0x15f   : > { %3438 = vst [vmem:[%s17912_s27 + $0x14f0] sm:$0xff] %v3437_v30  ;;  %3440 = vst [vmem:[%s17912_s27 + $0x14f8] sm:$0xff] %v3439_v31  ;;  %v3441_v32 = vld [vmem:[%s17904_s26 + $0x2a00] sm:$0xff]  ;;  %v3443_v33 = vld [vmem:[%s17904_s26 + $0x2a10] sm:$0xff] }
 0x160   : > { %v3445_v34 = vld [vmem:[%s17904_s26 + $0x2a20] sm:$0xff]  ;;  %3442 = vst [vmem:[%s17912_s27 + $0x1500] sm:$0xff] %v3441_v32  ;;  %3444 = vst [vmem:[%s17912_s27 + $0x1508] sm:$0xff] %v3443_v33  ;;  %v3447_v35 = vld [vmem:[%s17904_s26 + $0x2a30] sm:$0xff] }
 0x161   : > { %3446 = vst [vmem:[%s17912_s27 + $0x1510] sm:$0xff] %v3445_v34  ;;  %v3449_v36 = vld [vmem:[%s17904_s26 + $0x2a40] sm:$0xff]  ;;  %v3451_v37 = vld [vmem:[%s17904_s26 + $0x2a50] sm:$0xff]  ;;  %3448 = vst [vmem:[%s17912_s27 + $0x1518] sm:$0xff] %v3447_v35 }
 0x162   : > { %3450 = vst [vmem:[%s17912_s27 + $0x1520] sm:$0xff] %v3449_v36  ;;  %3452 = vst [vmem:[%s17912_s27 + $0x1528] sm:$0xff] %v3451_v37  ;;  %v3453_v38 = vld [vmem:[%s17904_s26 + $0x2a60] sm:$0xff]  ;;  %v3455_v39 = vld [vmem:[%s17904_s26 + $0x2a70] sm:$0xff] }
 0x163   : > { %v3457_v40 = vld [vmem:[%s17904_s26 + $0x2a80] sm:$0xff]  ;;  %3454 = vst [vmem:[%s17912_s27 + $0x1530] sm:$0xff] %v3453_v38  ;;  %3456 = vst [vmem:[%s17912_s27 + $0x1538] sm:$0xff] %v3455_v39  ;;  %v3459_v41 = vld [vmem:[%s17904_s26 + $0x2a90] sm:$0xff] }
 0x164   : > { %3458 = vst [vmem:[%s17912_s27 + $0x1540] sm:$0xff] %v3457_v40  ;;  %v3461_v42 = vld [vmem:[%s17904_s26 + $0x2aa0] sm:$0xff]  ;;  %v3463_v43 = vld [vmem:[%s17904_s26 + $0x2ab0] sm:$0xff]  ;;  %3460 = vst [vmem:[%s17912_s27 + $0x1548] sm:$0xff] %v3459_v41 }
 0x165   : > { %3462 = vst [vmem:[%s17912_s27 + $0x1550] sm:$0xff] %v3461_v42  ;;  %3464 = vst [vmem:[%s17912_s27 + $0x1558] sm:$0xff] %v3463_v43  ;;  %v3465_v44 = vld [vmem:[%s17904_s26 + $0x2ac0] sm:$0xff]  ;;  %v3467_v45 = vld [vmem:[%s17904_s26 + $0x2ad0] sm:$0xff] }
 0x166   : > { %v3469_v46 = vld [vmem:[%s17904_s26 + $0x2ae0] sm:$0xff]  ;;  %3466 = vst [vmem:[%s17912_s27 + $0x1560] sm:$0xff] %v3465_v44  ;;  %3468 = vst [vmem:[%s17912_s27 + $0x1568] sm:$0xff] %v3467_v45  ;;  %v3471_v47 = vld [vmem:[%s17904_s26 + $0x2af0] sm:$0xff] }
 0x167   : > { %3470 = vst [vmem:[%s17912_s27 + $0x1570] sm:$0xff] %v3469_v46  ;;  %v3473_v48 = vld [vmem:[%s17904_s26 + $0x2b00] sm:$0xff]  ;;  %v3475_v49 = vld [vmem:[%s17904_s26 + $0x2b10] sm:$0xff]  ;;  %3472 = vst [vmem:[%s17912_s27 + $0x1578] sm:$0xff] %v3471_v47 }
 0x168   : > { %3474 = vst [vmem:[%s17912_s27 + $0x1580] sm:$0xff] %v3473_v48  ;;  %3476 = vst [vmem:[%s17912_s27 + $0x1588] sm:$0xff] %v3475_v49  ;;  %v3477_v50 = vld [vmem:[%s17904_s26 + $0x2b20] sm:$0xff]  ;;  %v3479_v51 = vld [vmem:[%s17904_s26 + $0x2b30] sm:$0xff] }
 0x169   : > { %v3481_v52 = vld [vmem:[%s17904_s26 + $0x2b40] sm:$0xff]  ;;  %3478 = vst [vmem:[%s17912_s27 + $0x1590] sm:$0xff] %v3477_v50  ;;  %3480 = vst [vmem:[%s17912_s27 + $0x1598] sm:$0xff] %v3479_v51  ;;  %v3483_v53 = vld [vmem:[%s17904_s26 + $0x2b50] sm:$0xff] }
 0x16a   : > { %3482 = vst [vmem:[%s17912_s27 + $0x15a0] sm:$0xff] %v3481_v52  ;;  %v3485_v54 = vld [vmem:[%s17904_s26 + $0x2b60] sm:$0xff]  ;;  %v3487_v55 = vld [vmem:[%s17904_s26 + $0x2b70] sm:$0xff]  ;;  %3484 = vst [vmem:[%s17912_s27 + $0x15a8] sm:$0xff] %v3483_v53 }
 0x16b   : > { %3486 = vst [vmem:[%s17912_s27 + $0x15b0] sm:$0xff] %v3485_v54  ;;  %3488 = vst [vmem:[%s17912_s27 + $0x15b8] sm:$0xff] %v3487_v55  ;;  %v3489_v56 = vld [vmem:[%s17904_s26 + $0x2b80] sm:$0xff]  ;;  %v3491_v57 = vld [vmem:[%s17904_s26 + $0x2b90] sm:$0xff] }
 0x16c   : > { %v3493_v58 = vld [vmem:[%s17904_s26 + $0x2ba0] sm:$0xff]  ;;  %3490 = vst [vmem:[%s17912_s27 + $0x15c0] sm:$0xff] %v3489_v56  ;;  %3492 = vst [vmem:[%s17912_s27 + $0x15c8] sm:$0xff] %v3491_v57  ;;  %v3495_v59 = vld [vmem:[%s17904_s26 + $0x2bb0] sm:$0xff] }
 0x16d   : > { %3494 = vst [vmem:[%s17912_s27 + $0x15d0] sm:$0xff] %v3493_v58  ;;  %v3497_v60 = vld [vmem:[%s17904_s26 + $0x2bc0] sm:$0xff]  ;;  %v3499_v61 = vld [vmem:[%s17904_s26 + $0x2bd0] sm:$0xff]  ;;  %3496 = vst [vmem:[%s17912_s27 + $0x15d8] sm:$0xff] %v3495_v59 }
 0x16e   : > { %3498 = vst [vmem:[%s17912_s27 + $0x15e0] sm:$0xff] %v3497_v60  ;;  %3500 = vst [vmem:[%s17912_s27 + $0x15e8] sm:$0xff] %v3499_v61  ;;  %v3501_v62 = vld [vmem:[%s17904_s26 + $0x2be0] sm:$0xff]  ;;  %v3503_v63 = vld [vmem:[%s17904_s26 + $0x2bf0] sm:$0xff] }
 0x16f   : > { %v3505_v0 = vld [vmem:[%s17904_s26 + $0x2c00] sm:$0xff]  ;;  %3502 = vst [vmem:[%s17912_s27 + $0x15f0] sm:$0xff] %v3501_v62  ;;  %3504 = vst [vmem:[%s17912_s27 + $0x15f8] sm:$0xff] %v3503_v63  ;;  %v3507_v1 = vld [vmem:[%s17904_s26 + $0x2c10] sm:$0xff] }
 0x170   : > { %3506 = vst [vmem:[%s17912_s27 + $0x1600] sm:$0xff] %v3505_v0  ;;  %v3509_v2 = vld [vmem:[%s17904_s26 + $0x2c20] sm:$0xff]  ;;  %v3511_v3 = vld [vmem:[%s17904_s26 + $0x2c30] sm:$0xff]  ;;  %3508 = vst [vmem:[%s17912_s27 + $0x1608] sm:$0xff] %v3507_v1 }
 0x171   : > { %3510 = vst [vmem:[%s17912_s27 + $0x1610] sm:$0xff] %v3509_v2  ;;  %3512 = vst [vmem:[%s17912_s27 + $0x1618] sm:$0xff] %v3511_v3  ;;  %v3513_v4 = vld [vmem:[%s17904_s26 + $0x2c40] sm:$0xff]  ;;  %v3515_v5 = vld [vmem:[%s17904_s26 + $0x2c50] sm:$0xff] }
 0x172   : > { %v3517_v6 = vld [vmem:[%s17904_s26 + $0x2c60] sm:$0xff]  ;;  %3514 = vst [vmem:[%s17912_s27 + $0x1620] sm:$0xff] %v3513_v4  ;;  %3516 = vst [vmem:[%s17912_s27 + $0x1628] sm:$0xff] %v3515_v5  ;;  %v3519_v7 = vld [vmem:[%s17904_s26 + $0x2c70] sm:$0xff] }
 0x173   : > { %3518 = vst [vmem:[%s17912_s27 + $0x1630] sm:$0xff] %v3517_v6  ;;  %v3521_v8 = vld [vmem:[%s17904_s26 + $0x2c80] sm:$0xff]  ;;  %v3523_v9 = vld [vmem:[%s17904_s26 + $0x2c90] sm:$0xff]  ;;  %3520 = vst [vmem:[%s17912_s27 + $0x1638] sm:$0xff] %v3519_v7 }
 0x174   : > { %3522 = vst [vmem:[%s17912_s27 + $0x1640] sm:$0xff] %v3521_v8  ;;  %3524 = vst [vmem:[%s17912_s27 + $0x1648] sm:$0xff] %v3523_v9  ;;  %v3525_v10 = vld [vmem:[%s17904_s26 + $0x2ca0] sm:$0xff]  ;;  %v3527_v11 = vld [vmem:[%s17904_s26 + $0x2cb0] sm:$0xff] }
 0x175   : > { %v3529_v12 = vld [vmem:[%s17904_s26 + $0x2cc0] sm:$0xff]  ;;  %3526 = vst [vmem:[%s17912_s27 + $0x1650] sm:$0xff] %v3525_v10  ;;  %3528 = vst [vmem:[%s17912_s27 + $0x1658] sm:$0xff] %v3527_v11  ;;  %v3531_v13 = vld [vmem:[%s17904_s26 + $0x2cd0] sm:$0xff] }
 0x176   : > { %3530 = vst [vmem:[%s17912_s27 + $0x1660] sm:$0xff] %v3529_v12  ;;  %v3533_v14 = vld [vmem:[%s17904_s26 + $0x2ce0] sm:$0xff]  ;;  %v3535_v15 = vld [vmem:[%s17904_s26 + $0x2cf0] sm:$0xff]  ;;  %3532 = vst [vmem:[%s17912_s27 + $0x1668] sm:$0xff] %v3531_v13 }
 0x177   : > { %3534 = vst [vmem:[%s17912_s27 + $0x1670] sm:$0xff] %v3533_v14  ;;  %3536 = vst [vmem:[%s17912_s27 + $0x1678] sm:$0xff] %v3535_v15  ;;  %v3537_v16 = vld [vmem:[%s17904_s26 + $0x2d00] sm:$0xff]  ;;  %v3539_v17 = vld [vmem:[%s17904_s26 + $0x2d10] sm:$0xff] }
 0x178   : > { %v3541_v18 = vld [vmem:[%s17904_s26 + $0x2d20] sm:$0xff]  ;;  %3538 = vst [vmem:[%s17912_s27 + $0x1680] sm:$0xff] %v3537_v16  ;;  %3540 = vst [vmem:[%s17912_s27 + $0x1688] sm:$0xff] %v3539_v17  ;;  %v3543_v19 = vld [vmem:[%s17904_s26 + $0x2d30] sm:$0xff] }
 0x179   : > { %3542 = vst [vmem:[%s17912_s27 + $0x1690] sm:$0xff] %v3541_v18  ;;  %v3545_v20 = vld [vmem:[%s17904_s26 + $0x2d40] sm:$0xff]  ;;  %v3547_v21 = vld [vmem:[%s17904_s26 + $0x2d50] sm:$0xff]  ;;  %3544 = vst [vmem:[%s17912_s27 + $0x1698] sm:$0xff] %v3543_v19 }
 0x17a   : > { %3546 = vst [vmem:[%s17912_s27 + $0x16a0] sm:$0xff] %v3545_v20  ;;  %3548 = vst [vmem:[%s17912_s27 + $0x16a8] sm:$0xff] %v3547_v21  ;;  %v3549_v22 = vld [vmem:[%s17904_s26 + $0x2d60] sm:$0xff]  ;;  %v3551_v23 = vld [vmem:[%s17904_s26 + $0x2d70] sm:$0xff] }
 0x17b   : > { %v3553_v24 = vld [vmem:[%s17904_s26 + $0x2d80] sm:$0xff]  ;;  %3550 = vst [vmem:[%s17912_s27 + $0x16b0] sm:$0xff] %v3549_v22  ;;  %3552 = vst [vmem:[%s17912_s27 + $0x16b8] sm:$0xff] %v3551_v23  ;;  %v3555_v25 = vld [vmem:[%s17904_s26 + $0x2d90] sm:$0xff] }
 0x17c   : > { %3554 = vst [vmem:[%s17912_s27 + $0x16c0] sm:$0xff] %v3553_v24  ;;  %v3557_v26 = vld [vmem:[%s17904_s26 + $0x2da0] sm:$0xff]  ;;  %v3559_v27 = vld [vmem:[%s17904_s26 + $0x2db0] sm:$0xff]  ;;  %3556 = vst [vmem:[%s17912_s27 + $0x16c8] sm:$0xff] %v3555_v25 }
 0x17d   : > { %3558 = vst [vmem:[%s17912_s27 + $0x16d0] sm:$0xff] %v3557_v26  ;;  %3560 = vst [vmem:[%s17912_s27 + $0x16d8] sm:$0xff] %v3559_v27  ;;  %v3561_v28 = vld [vmem:[%s17904_s26 + $0x2dc0] sm:$0xff]  ;;  %v3563_v29 = vld [vmem:[%s17904_s26 + $0x2dd0] sm:$0xff] }
 0x17e   : > { %v3565_v30 = vld [vmem:[%s17904_s26 + $0x2de0] sm:$0xff]  ;;  %3562 = vst [vmem:[%s17912_s27 + $0x16e0] sm:$0xff] %v3561_v28  ;;  %3564 = vst [vmem:[%s17912_s27 + $0x16e8] sm:$0xff] %v3563_v29  ;;  %v3567_v31 = vld [vmem:[%s17904_s26 + $0x2df0] sm:$0xff] }
 0x17f   : > { %3566 = vst [vmem:[%s17912_s27 + $0x16f0] sm:$0xff] %v3565_v30  ;;  %v3569_v32 = vld [vmem:[%s17904_s26 + $0x2e00] sm:$0xff]  ;;  %v3571_v33 = vld [vmem:[%s17904_s26 + $0x2e10] sm:$0xff]  ;;  %3568 = vst [vmem:[%s17912_s27 + $0x16f8] sm:$0xff] %v3567_v31 }
 0x180   : > { %3570 = vst [vmem:[%s17912_s27 + $0x1700] sm:$0xff] %v3569_v32  ;;  %3572 = vst [vmem:[%s17912_s27 + $0x1708] sm:$0xff] %v3571_v33  ;;  %v3573_v34 = vld [vmem:[%s17904_s26 + $0x2e20] sm:$0xff]  ;;  %v3575_v35 = vld [vmem:[%s17904_s26 + $0x2e30] sm:$0xff] }
 0x181   : > { %v3577_v36 = vld [vmem:[%s17904_s26 + $0x2e40] sm:$0xff]  ;;  %3574 = vst [vmem:[%s17912_s27 + $0x1710] sm:$0xff] %v3573_v34  ;;  %3576 = vst [vmem:[%s17912_s27 + $0x1718] sm:$0xff] %v3575_v35  ;;  %v3579_v37 = vld [vmem:[%s17904_s26 + $0x2e50] sm:$0xff] }
 0x182   : > { %3578 = vst [vmem:[%s17912_s27 + $0x1720] sm:$0xff] %v3577_v36  ;;  %v3581_v38 = vld [vmem:[%s17904_s26 + $0x2e60] sm:$0xff]  ;;  %v3583_v39 = vld [vmem:[%s17904_s26 + $0x2e70] sm:$0xff]  ;;  %3580 = vst [vmem:[%s17912_s27 + $0x1728] sm:$0xff] %v3579_v37 }
 0x183   : > { %3582 = vst [vmem:[%s17912_s27 + $0x1730] sm:$0xff] %v3581_v38  ;;  %3584 = vst [vmem:[%s17912_s27 + $0x1738] sm:$0xff] %v3583_v39  ;;  %v3585_v40 = vld [vmem:[%s17904_s26 + $0x2e80] sm:$0xff]  ;;  %v3587_v41 = vld [vmem:[%s17904_s26 + $0x2e90] sm:$0xff] }
 0x184   : > { %v3589_v42 = vld [vmem:[%s17904_s26 + $0x2ea0] sm:$0xff]  ;;  %3586 = vst [vmem:[%s17912_s27 + $0x1740] sm:$0xff] %v3585_v40  ;;  %3588 = vst [vmem:[%s17912_s27 + $0x1748] sm:$0xff] %v3587_v41  ;;  %v3591_v43 = vld [vmem:[%s17904_s26 + $0x2eb0] sm:$0xff] }
 0x185   : > { %3590 = vst [vmem:[%s17912_s27 + $0x1750] sm:$0xff] %v3589_v42  ;;  %v3593_v44 = vld [vmem:[%s17904_s26 + $0x2ec0] sm:$0xff]  ;;  %v3595_v45 = vld [vmem:[%s17904_s26 + $0x2ed0] sm:$0xff]  ;;  %3592 = vst [vmem:[%s17912_s27 + $0x1758] sm:$0xff] %v3591_v43 }
 0x186   : > { %3594 = vst [vmem:[%s17912_s27 + $0x1760] sm:$0xff] %v3593_v44  ;;  %3596 = vst [vmem:[%s17912_s27 + $0x1768] sm:$0xff] %v3595_v45  ;;  %v3597_v46 = vld [vmem:[%s17904_s26 + $0x2ee0] sm:$0xff]  ;;  %v3599_v47 = vld [vmem:[%s17904_s26 + $0x2ef0] sm:$0xff] }
 0x187   : > { %v3601_v48 = vld [vmem:[%s17904_s26 + $0x2f00] sm:$0xff]  ;;  %3598 = vst [vmem:[%s17912_s27 + $0x1770] sm:$0xff] %v3597_v46  ;;  %3600 = vst [vmem:[%s17912_s27 + $0x1778] sm:$0xff] %v3599_v47  ;;  %v3603_v49 = vld [vmem:[%s17904_s26 + $0x2f10] sm:$0xff] }
 0x188   : > { %3602 = vst [vmem:[%s17912_s27 + $0x1780] sm:$0xff] %v3601_v48  ;;  %v3605_v50 = vld [vmem:[%s17904_s26 + $0x2f20] sm:$0xff]  ;;  %v3607_v51 = vld [vmem:[%s17904_s26 + $0x2f30] sm:$0xff]  ;;  %3604 = vst [vmem:[%s17912_s27 + $0x1788] sm:$0xff] %v3603_v49 }
 0x189   : > { %3606 = vst [vmem:[%s17912_s27 + $0x1790] sm:$0xff] %v3605_v50  ;;  %3608 = vst [vmem:[%s17912_s27 + $0x1798] sm:$0xff] %v3607_v51  ;;  %v3609_v52 = vld [vmem:[%s17904_s26 + $0x2f40] sm:$0xff]  ;;  %v3611_v53 = vld [vmem:[%s17904_s26 + $0x2f50] sm:$0xff] }
 0x18a   : > { %v3613_v54 = vld [vmem:[%s17904_s26 + $0x2f60] sm:$0xff]  ;;  %3610 = vst [vmem:[%s17912_s27 + $0x17a0] sm:$0xff] %v3609_v52  ;;  %3612 = vst [vmem:[%s17912_s27 + $0x17a8] sm:$0xff] %v3611_v53  ;;  %v3615_v55 = vld [vmem:[%s17904_s26 + $0x2f70] sm:$0xff] }
 0x18b   : > { %3614 = vst [vmem:[%s17912_s27 + $0x17b0] sm:$0xff] %v3613_v54  ;;  %v3617_v56 = vld [vmem:[%s17904_s26 + $0x2f80] sm:$0xff]  ;;  %v3619_v57 = vld [vmem:[%s17904_s26 + $0x2f90] sm:$0xff]  ;;  %3616 = vst [vmem:[%s17912_s27 + $0x17b8] sm:$0xff] %v3615_v55 }
 0x18c   : > { %3618 = vst [vmem:[%s17912_s27 + $0x17c0] sm:$0xff] %v3617_v56  ;;  %3620 = vst [vmem:[%s17912_s27 + $0x17c8] sm:$0xff] %v3619_v57  ;;  %v3621_v58 = vld [vmem:[%s17904_s26 + $0x2fa0] sm:$0xff]  ;;  %v3623_v59 = vld [vmem:[%s17904_s26 + $0x2fb0] sm:$0xff] }
 0x18d   : > { %v3625_v60 = vld [vmem:[%s17904_s26 + $0x2fc0] sm:$0xff]  ;;  %3622 = vst [vmem:[%s17912_s27 + $0x17d0] sm:$0xff] %v3621_v58  ;;  %3624 = vst [vmem:[%s17912_s27 + $0x17d8] sm:$0xff] %v3623_v59  ;;  %v3627_v61 = vld [vmem:[%s17904_s26 + $0x2fd0] sm:$0xff] }
 0x18e   : > { %3626 = vst [vmem:[%s17912_s27 + $0x17e0] sm:$0xff] %v3625_v60  ;;  %v3629_v62 = vld [vmem:[%s17904_s26 + $0x2fe0] sm:$0xff]  ;;  %v3631_v63 = vld [vmem:[%s17904_s26 + $0x2ff0] sm:$0xff]  ;;  %3628 = vst [vmem:[%s17912_s27 + $0x17e8] sm:$0xff] %v3627_v61 }
 0x18f   : > { %3630 = vst [vmem:[%s17912_s27 + $0x17f0] sm:$0xff] %v3629_v62  ;;  %3632 = vst [vmem:[%s17912_s27 + $0x17f8] sm:$0xff] %v3631_v63  ;;  %v3633_v0 = vld [vmem:[%s17904_s26 + $0x3000] sm:$0xff]  ;;  %v3635_v1 = vld [vmem:[%s17904_s26 + $0x3010] sm:$0xff] }
 0x190   : > { %v3637_v2 = vld [vmem:[%s17904_s26 + $0x3020] sm:$0xff]  ;;  %3634 = vst [vmem:[%s17912_s27 + $0x1800] sm:$0xff] %v3633_v0  ;;  %3636 = vst [vmem:[%s17912_s27 + $0x1808] sm:$0xff] %v3635_v1  ;;  %v3639_v3 = vld [vmem:[%s17904_s26 + $0x3030] sm:$0xff] }
 0x191   : > { %3638 = vst [vmem:[%s17912_s27 + $0x1810] sm:$0xff] %v3637_v2  ;;  %v3641_v4 = vld [vmem:[%s17904_s26 + $0x3040] sm:$0xff]  ;;  %v3643_v5 = vld [vmem:[%s17904_s26 + $0x3050] sm:$0xff]  ;;  %3640 = vst [vmem:[%s17912_s27 + $0x1818] sm:$0xff] %v3639_v3 }
 0x192   : > { %3642 = vst [vmem:[%s17912_s27 + $0x1820] sm:$0xff] %v3641_v4  ;;  %3644 = vst [vmem:[%s17912_s27 + $0x1828] sm:$0xff] %v3643_v5  ;;  %v3645_v6 = vld [vmem:[%s17904_s26 + $0x3060] sm:$0xff]  ;;  %v3647_v7 = vld [vmem:[%s17904_s26 + $0x3070] sm:$0xff] }
 0x193   : > { %v3649_v8 = vld [vmem:[%s17904_s26 + $0x3080] sm:$0xff]  ;;  %3646 = vst [vmem:[%s17912_s27 + $0x1830] sm:$0xff] %v3645_v6  ;;  %3648 = vst [vmem:[%s17912_s27 + $0x1838] sm:$0xff] %v3647_v7  ;;  %v3651_v9 = vld [vmem:[%s17904_s26 + $0x3090] sm:$0xff] }
 0x194   : > { %3650 = vst [vmem:[%s17912_s27 + $0x1840] sm:$0xff] %v3649_v8  ;;  %v3653_v10 = vld [vmem:[%s17904_s26 + $0x30a0] sm:$0xff]  ;;  %v3655_v11 = vld [vmem:[%s17904_s26 + $0x30b0] sm:$0xff]  ;;  %3652 = vst [vmem:[%s17912_s27 + $0x1848] sm:$0xff] %v3651_v9 }
 0x195   : > { %3654 = vst [vmem:[%s17912_s27 + $0x1850] sm:$0xff] %v3653_v10  ;;  %3656 = vst [vmem:[%s17912_s27 + $0x1858] sm:$0xff] %v3655_v11  ;;  %v3657_v12 = vld [vmem:[%s17904_s26 + $0x30c0] sm:$0xff]  ;;  %v3659_v13 = vld [vmem:[%s17904_s26 + $0x30d0] sm:$0xff] }
 0x196   : > { %v3661_v14 = vld [vmem:[%s17904_s26 + $0x30e0] sm:$0xff]  ;;  %3658 = vst [vmem:[%s17912_s27 + $0x1860] sm:$0xff] %v3657_v12  ;;  %3660 = vst [vmem:[%s17912_s27 + $0x1868] sm:$0xff] %v3659_v13  ;;  %v3663_v15 = vld [vmem:[%s17904_s26 + $0x30f0] sm:$0xff] }
 0x197   : > { %3662 = vst [vmem:[%s17912_s27 + $0x1870] sm:$0xff] %v3661_v14  ;;  %v3665_v16 = vld [vmem:[%s17904_s26 + $0x3100] sm:$0xff]  ;;  %v3667_v17 = vld [vmem:[%s17904_s26 + $0x3110] sm:$0xff]  ;;  %3664 = vst [vmem:[%s17912_s27 + $0x1878] sm:$0xff] %v3663_v15 }
 0x198   : > { %3666 = vst [vmem:[%s17912_s27 + $0x1880] sm:$0xff] %v3665_v16  ;;  %3668 = vst [vmem:[%s17912_s27 + $0x1888] sm:$0xff] %v3667_v17  ;;  %v3669_v18 = vld [vmem:[%s17904_s26 + $0x3120] sm:$0xff]  ;;  %v3671_v19 = vld [vmem:[%s17904_s26 + $0x3130] sm:$0xff] }
 0x199   : > { %v3673_v20 = vld [vmem:[%s17904_s26 + $0x3140] sm:$0xff]  ;;  %3670 = vst [vmem:[%s17912_s27 + $0x1890] sm:$0xff] %v3669_v18  ;;  %3672 = vst [vmem:[%s17912_s27 + $0x1898] sm:$0xff] %v3671_v19  ;;  %v3675_v21 = vld [vmem:[%s17904_s26 + $0x3150] sm:$0xff] }
 0x19a   : > { %3674 = vst [vmem:[%s17912_s27 + $0x18a0] sm:$0xff] %v3673_v20  ;;  %v3677_v22 = vld [vmem:[%s17904_s26 + $0x3160] sm:$0xff]  ;;  %v3679_v23 = vld [vmem:[%s17904_s26 + $0x3170] sm:$0xff]  ;;  %3676 = vst [vmem:[%s17912_s27 + $0x18a8] sm:$0xff] %v3675_v21 }
 0x19b   : > { %3678 = vst [vmem:[%s17912_s27 + $0x18b0] sm:$0xff] %v3677_v22  ;;  %3680 = vst [vmem:[%s17912_s27 + $0x18b8] sm:$0xff] %v3679_v23  ;;  %v3681_v24 = vld [vmem:[%s17904_s26 + $0x3180] sm:$0xff]  ;;  %v3683_v25 = vld [vmem:[%s17904_s26 + $0x3190] sm:$0xff] }
 0x19c   : > { %v3685_v26 = vld [vmem:[%s17904_s26 + $0x31a0] sm:$0xff]  ;;  %3682 = vst [vmem:[%s17912_s27 + $0x18c0] sm:$0xff] %v3681_v24  ;;  %3684 = vst [vmem:[%s17912_s27 + $0x18c8] sm:$0xff] %v3683_v25  ;;  %v3687_v27 = vld [vmem:[%s17904_s26 + $0x31b0] sm:$0xff] }
 0x19d   : > { %3686 = vst [vmem:[%s17912_s27 + $0x18d0] sm:$0xff] %v3685_v26  ;;  %v3689_v28 = vld [vmem:[%s17904_s26 + $0x31c0] sm:$0xff]  ;;  %v3691_v29 = vld [vmem:[%s17904_s26 + $0x31d0] sm:$0xff]  ;;  %3688 = vst [vmem:[%s17912_s27 + $0x18d8] sm:$0xff] %v3687_v27 }
 0x19e   : > { %3690 = vst [vmem:[%s17912_s27 + $0x18e0] sm:$0xff] %v3689_v28  ;;  %3692 = vst [vmem:[%s17912_s27 + $0x18e8] sm:$0xff] %v3691_v29  ;;  %v3693_v30 = vld [vmem:[%s17904_s26 + $0x31e0] sm:$0xff]  ;;  %v3695_v31 = vld [vmem:[%s17904_s26 + $0x31f0] sm:$0xff] }
 0x19f   : > { %v3697_v32 = vld [vmem:[%s17904_s26 + $0x3200] sm:$0xff]  ;;  %3694 = vst [vmem:[%s17912_s27 + $0x18f0] sm:$0xff] %v3693_v30  ;;  %3696 = vst [vmem:[%s17912_s27 + $0x18f8] sm:$0xff] %v3695_v31  ;;  %v3699_v33 = vld [vmem:[%s17904_s26 + $0x3210] sm:$0xff] }
 0x1a0   : > { %3698 = vst [vmem:[%s17912_s27 + $0x1900] sm:$0xff] %v3697_v32  ;;  %v3701_v34 = vld [vmem:[%s17904_s26 + $0x3220] sm:$0xff]  ;;  %v3703_v35 = vld [vmem:[%s17904_s26 + $0x3230] sm:$0xff]  ;;  %3700 = vst [vmem:[%s17912_s27 + $0x1908] sm:$0xff] %v3699_v33 }
 0x1a1   : > { %3702 = vst [vmem:[%s17912_s27 + $0x1910] sm:$0xff] %v3701_v34  ;;  %3704 = vst [vmem:[%s17912_s27 + $0x1918] sm:$0xff] %v3703_v35  ;;  %v3705_v36 = vld [vmem:[%s17904_s26 + $0x3240] sm:$0xff]  ;;  %v3707_v37 = vld [vmem:[%s17904_s26 + $0x3250] sm:$0xff] }
 0x1a2   : > { %v3709_v38 = vld [vmem:[%s17904_s26 + $0x3260] sm:$0xff]  ;;  %3706 = vst [vmem:[%s17912_s27 + $0x1920] sm:$0xff] %v3705_v36  ;;  %3708 = vst [vmem:[%s17912_s27 + $0x1928] sm:$0xff] %v3707_v37  ;;  %v3711_v39 = vld [vmem:[%s17904_s26 + $0x3270] sm:$0xff] }
 0x1a3   : > { %3710 = vst [vmem:[%s17912_s27 + $0x1930] sm:$0xff] %v3709_v38  ;;  %v3713_v40 = vld [vmem:[%s17904_s26 + $0x3280] sm:$0xff]  ;;  %v3715_v41 = vld [vmem:[%s17904_s26 + $0x3290] sm:$0xff]  ;;  %3712 = vst [vmem:[%s17912_s27 + $0x1938] sm:$0xff] %v3711_v39 }
 0x1a4   : > { %3714 = vst [vmem:[%s17912_s27 + $0x1940] sm:$0xff] %v3713_v40  ;;  %3716 = vst [vmem:[%s17912_s27 + $0x1948] sm:$0xff] %v3715_v41  ;;  %v3717_v42 = vld [vmem:[%s17904_s26 + $0x32a0] sm:$0xff]  ;;  %v3719_v43 = vld [vmem:[%s17904_s26 + $0x32b0] sm:$0xff] }
 0x1a5   : > { %v3721_v44 = vld [vmem:[%s17904_s26 + $0x32c0] sm:$0xff]  ;;  %3718 = vst [vmem:[%s17912_s27 + $0x1950] sm:$0xff] %v3717_v42  ;;  %3720 = vst [vmem:[%s17912_s27 + $0x1958] sm:$0xff] %v3719_v43  ;;  %v3723_v45 = vld [vmem:[%s17904_s26 + $0x32d0] sm:$0xff] }
 0x1a6   : > { %3722 = vst [vmem:[%s17912_s27 + $0x1960] sm:$0xff] %v3721_v44  ;;  %v3725_v46 = vld [vmem:[%s17904_s26 + $0x32e0] sm:$0xff]  ;;  %v3727_v47 = vld [vmem:[%s17904_s26 + $0x32f0] sm:$0xff]  ;;  %3724 = vst [vmem:[%s17912_s27 + $0x1968] sm:$0xff] %v3723_v45 }
 0x1a7   : > { %3726 = vst [vmem:[%s17912_s27 + $0x1970] sm:$0xff] %v3725_v46  ;;  %3728 = vst [vmem:[%s17912_s27 + $0x1978] sm:$0xff] %v3727_v47  ;;  %v3729_v48 = vld [vmem:[%s17904_s26 + $0x3300] sm:$0xff]  ;;  %v3731_v49 = vld [vmem:[%s17904_s26 + $0x3310] sm:$0xff] }
 0x1a8   : > { %v3733_v50 = vld [vmem:[%s17904_s26 + $0x3320] sm:$0xff]  ;;  %3730 = vst [vmem:[%s17912_s27 + $0x1980] sm:$0xff] %v3729_v48  ;;  %3732 = vst [vmem:[%s17912_s27 + $0x1988] sm:$0xff] %v3731_v49  ;;  %v3735_v51 = vld [vmem:[%s17904_s26 + $0x3330] sm:$0xff] }
 0x1a9   : > { %3734 = vst [vmem:[%s17912_s27 + $0x1990] sm:$0xff] %v3733_v50  ;;  %v3737_v52 = vld [vmem:[%s17904_s26 + $0x3340] sm:$0xff]  ;;  %v3739_v53 = vld [vmem:[%s17904_s26 + $0x3350] sm:$0xff]  ;;  %3736 = vst [vmem:[%s17912_s27 + $0x1998] sm:$0xff] %v3735_v51 }
 0x1aa   : > { %3738 = vst [vmem:[%s17912_s27 + $0x19a0] sm:$0xff] %v3737_v52  ;;  %3740 = vst [vmem:[%s17912_s27 + $0x19a8] sm:$0xff] %v3739_v53  ;;  %v3741_v54 = vld [vmem:[%s17904_s26 + $0x3360] sm:$0xff]  ;;  %v3743_v55 = vld [vmem:[%s17904_s26 + $0x3370] sm:$0xff] }
 0x1ab   : > { %v3745_v56 = vld [vmem:[%s17904_s26 + $0x3380] sm:$0xff]  ;;  %3742 = vst [vmem:[%s17912_s27 + $0x19b0] sm:$0xff] %v3741_v54  ;;  %3744 = vst [vmem:[%s17912_s27 + $0x19b8] sm:$0xff] %v3743_v55  ;;  %v3747_v57 = vld [vmem:[%s17904_s26 + $0x3390] sm:$0xff] }
 0x1ac   : > { %3746 = vst [vmem:[%s17912_s27 + $0x19c0] sm:$0xff] %v3745_v56  ;;  %v3749_v58 = vld [vmem:[%s17904_s26 + $0x33a0] sm:$0xff]  ;;  %v3751_v59 = vld [vmem:[%s17904_s26 + $0x33b0] sm:$0xff]  ;;  %3748 = vst [vmem:[%s17912_s27 + $0x19c8] sm:$0xff] %v3747_v57 }
 0x1ad   : > { %3750 = vst [vmem:[%s17912_s27 + $0x19d0] sm:$0xff] %v3749_v58  ;;  %3752 = vst [vmem:[%s17912_s27 + $0x19d8] sm:$0xff] %v3751_v59  ;;  %v3753_v60 = vld [vmem:[%s17904_s26 + $0x33c0] sm:$0xff]  ;;  %v3755_v61 = vld [vmem:[%s17904_s26 + $0x33d0] sm:$0xff] }
 0x1ae   : > { %v3757_v62 = vld [vmem:[%s17904_s26 + $0x33e0] sm:$0xff]  ;;  %3754 = vst [vmem:[%s17912_s27 + $0x19e0] sm:$0xff] %v3753_v60  ;;  %3756 = vst [vmem:[%s17912_s27 + $0x19e8] sm:$0xff] %v3755_v61  ;;  %v3759_v63 = vld [vmem:[%s17904_s26 + $0x33f0] sm:$0xff] }
 0x1af   : > { %3758 = vst [vmem:[%s17912_s27 + $0x19f0] sm:$0xff] %v3757_v62  ;;  %v3761_v0 = vld [vmem:[%s17904_s26 + $0x3400] sm:$0xff]  ;;  %v3763_v1 = vld [vmem:[%s17904_s26 + $0x3410] sm:$0xff]  ;;  %3760 = vst [vmem:[%s17912_s27 + $0x19f8] sm:$0xff] %v3759_v63 }
 0x1b0   : > { %3762 = vst [vmem:[%s17912_s27 + $0x1a00] sm:$0xff] %v3761_v0  ;;  %3764 = vst [vmem:[%s17912_s27 + $0x1a08] sm:$0xff] %v3763_v1  ;;  %v3765_v2 = vld [vmem:[%s17904_s26 + $0x3420] sm:$0xff]  ;;  %v3767_v3 = vld [vmem:[%s17904_s26 + $0x3430] sm:$0xff] }
 0x1b1   : > { %v3769_v4 = vld [vmem:[%s17904_s26 + $0x3440] sm:$0xff]  ;;  %3766 = vst [vmem:[%s17912_s27 + $0x1a10] sm:$0xff] %v3765_v2  ;;  %3768 = vst [vmem:[%s17912_s27 + $0x1a18] sm:$0xff] %v3767_v3  ;;  %v3771_v5 = vld [vmem:[%s17904_s26 + $0x3450] sm:$0xff] }
 0x1b2   : > { %3770 = vst [vmem:[%s17912_s27 + $0x1a20] sm:$0xff] %v3769_v4  ;;  %v3773_v6 = vld [vmem:[%s17904_s26 + $0x3460] sm:$0xff]  ;;  %v3775_v7 = vld [vmem:[%s17904_s26 + $0x3470] sm:$0xff]  ;;  %3772 = vst [vmem:[%s17912_s27 + $0x1a28] sm:$0xff] %v3771_v5 }
 0x1b3   : > { %3774 = vst [vmem:[%s17912_s27 + $0x1a30] sm:$0xff] %v3773_v6  ;;  %3776 = vst [vmem:[%s17912_s27 + $0x1a38] sm:$0xff] %v3775_v7  ;;  %v3777_v8 = vld [vmem:[%s17904_s26 + $0x3480] sm:$0xff]  ;;  %v3779_v9 = vld [vmem:[%s17904_s26 + $0x3490] sm:$0xff] }
 0x1b4   : > { %v3781_v10 = vld [vmem:[%s17904_s26 + $0x34a0] sm:$0xff]  ;;  %3778 = vst [vmem:[%s17912_s27 + $0x1a40] sm:$0xff] %v3777_v8  ;;  %3780 = vst [vmem:[%s17912_s27 + $0x1a48] sm:$0xff] %v3779_v9  ;;  %v3783_v11 = vld [vmem:[%s17904_s26 + $0x34b0] sm:$0xff] }
 0x1b5   : > { %3782 = vst [vmem:[%s17912_s27 + $0x1a50] sm:$0xff] %v3781_v10  ;;  %v3785_v12 = vld [vmem:[%s17904_s26 + $0x34c0] sm:$0xff]  ;;  %v3787_v13 = vld [vmem:[%s17904_s26 + $0x34d0] sm:$0xff]  ;;  %3784 = vst [vmem:[%s17912_s27 + $0x1a58] sm:$0xff] %v3783_v11 }
 0x1b6   : > { %3786 = vst [vmem:[%s17912_s27 + $0x1a60] sm:$0xff] %v3785_v12  ;;  %3788 = vst [vmem:[%s17912_s27 + $0x1a68] sm:$0xff] %v3787_v13  ;;  %v3789_v14 = vld [vmem:[%s17904_s26 + $0x34e0] sm:$0xff]  ;;  %v3791_v15 = vld [vmem:[%s17904_s26 + $0x34f0] sm:$0xff] }
 0x1b7   : > { %v3793_v16 = vld [vmem:[%s17904_s26 + $0x3500] sm:$0xff]  ;;  %3790 = vst [vmem:[%s17912_s27 + $0x1a70] sm:$0xff] %v3789_v14  ;;  %3792 = vst [vmem:[%s17912_s27 + $0x1a78] sm:$0xff] %v3791_v15  ;;  %v3795_v17 = vld [vmem:[%s17904_s26 + $0x3510] sm:$0xff] }
 0x1b8   : > { %3794 = vst [vmem:[%s17912_s27 + $0x1a80] sm:$0xff] %v3793_v16  ;;  %v3797_v18 = vld [vmem:[%s17904_s26 + $0x3520] sm:$0xff]  ;;  %v3799_v19 = vld [vmem:[%s17904_s26 + $0x3530] sm:$0xff]  ;;  %3796 = vst [vmem:[%s17912_s27 + $0x1a88] sm:$0xff] %v3795_v17 }
 0x1b9   : > { %3798 = vst [vmem:[%s17912_s27 + $0x1a90] sm:$0xff] %v3797_v18  ;;  %3800 = vst [vmem:[%s17912_s27 + $0x1a98] sm:$0xff] %v3799_v19  ;;  %v3801_v20 = vld [vmem:[%s17904_s26 + $0x3540] sm:$0xff]  ;;  %v3803_v21 = vld [vmem:[%s17904_s26 + $0x3550] sm:$0xff] }
 0x1ba   : > { %v3805_v22 = vld [vmem:[%s17904_s26 + $0x3560] sm:$0xff]  ;;  %3802 = vst [vmem:[%s17912_s27 + $0x1aa0] sm:$0xff] %v3801_v20  ;;  %3804 = vst [vmem:[%s17912_s27 + $0x1aa8] sm:$0xff] %v3803_v21  ;;  %v3807_v23 = vld [vmem:[%s17904_s26 + $0x3570] sm:$0xff] }
 0x1bb   : > { %3806 = vst [vmem:[%s17912_s27 + $0x1ab0] sm:$0xff] %v3805_v22  ;;  %v3809_v24 = vld [vmem:[%s17904_s26 + $0x3580] sm:$0xff]  ;;  %v3811_v25 = vld [vmem:[%s17904_s26 + $0x3590] sm:$0xff]  ;;  %3808 = vst [vmem:[%s17912_s27 + $0x1ab8] sm:$0xff] %v3807_v23 }
 0x1bc   : > { %3810 = vst [vmem:[%s17912_s27 + $0x1ac0] sm:$0xff] %v3809_v24  ;;  %3812 = vst [vmem:[%s17912_s27 + $0x1ac8] sm:$0xff] %v3811_v25  ;;  %v3813_v26 = vld [vmem:[%s17904_s26 + $0x35a0] sm:$0xff]  ;;  %v3815_v27 = vld [vmem:[%s17904_s26 + $0x35b0] sm:$0xff] }
 0x1bd   : > { %v3817_v28 = vld [vmem:[%s17904_s26 + $0x35c0] sm:$0xff]  ;;  %3814 = vst [vmem:[%s17912_s27 + $0x1ad0] sm:$0xff] %v3813_v26  ;;  %3816 = vst [vmem:[%s17912_s27 + $0x1ad8] sm:$0xff] %v3815_v27  ;;  %v3819_v29 = vld [vmem:[%s17904_s26 + $0x35d0] sm:$0xff] }
 0x1be   : > { %3818 = vst [vmem:[%s17912_s27 + $0x1ae0] sm:$0xff] %v3817_v28  ;;  %v3821_v30 = vld [vmem:[%s17904_s26 + $0x35e0] sm:$0xff]  ;;  %v3823_v31 = vld [vmem:[%s17904_s26 + $0x35f0] sm:$0xff]  ;;  %3820 = vst [vmem:[%s17912_s27 + $0x1ae8] sm:$0xff] %v3819_v29 }
 0x1bf   : > { %3822 = vst [vmem:[%s17912_s27 + $0x1af0] sm:$0xff] %v3821_v30  ;;  %3824 = vst [vmem:[%s17912_s27 + $0x1af8] sm:$0xff] %v3823_v31  ;;  %v3825_v32 = vld [vmem:[%s17904_s26 + $0x3600] sm:$0xff]  ;;  %v3827_v33 = vld [vmem:[%s17904_s26 + $0x3610] sm:$0xff] }
 0x1c0   : > { %v3829_v34 = vld [vmem:[%s17904_s26 + $0x3620] sm:$0xff]  ;;  %3826 = vst [vmem:[%s17912_s27 + $0x1b00] sm:$0xff] %v3825_v32  ;;  %3828 = vst [vmem:[%s17912_s27 + $0x1b08] sm:$0xff] %v3827_v33  ;;  %v3831_v35 = vld [vmem:[%s17904_s26 + $0x3630] sm:$0xff] }
 0x1c1   : > { %3830 = vst [vmem:[%s17912_s27 + $0x1b10] sm:$0xff] %v3829_v34  ;;  %v3833_v36 = vld [vmem:[%s17904_s26 + $0x3640] sm:$0xff]  ;;  %v3835_v37 = vld [vmem:[%s17904_s26 + $0x3650] sm:$0xff]  ;;  %3832 = vst [vmem:[%s17912_s27 + $0x1b18] sm:$0xff] %v3831_v35 }
 0x1c2   : > { %3834 = vst [vmem:[%s17912_s27 + $0x1b20] sm:$0xff] %v3833_v36  ;;  %3836 = vst [vmem:[%s17912_s27 + $0x1b28] sm:$0xff] %v3835_v37  ;;  %v3837_v38 = vld [vmem:[%s17904_s26 + $0x3660] sm:$0xff]  ;;  %v3839_v39 = vld [vmem:[%s17904_s26 + $0x3670] sm:$0xff] }
 0x1c3   : > { %v3841_v40 = vld [vmem:[%s17904_s26 + $0x3680] sm:$0xff]  ;;  %3838 = vst [vmem:[%s17912_s27 + $0x1b30] sm:$0xff] %v3837_v38  ;;  %3840 = vst [vmem:[%s17912_s27 + $0x1b38] sm:$0xff] %v3839_v39  ;;  %v3843_v41 = vld [vmem:[%s17904_s26 + $0x3690] sm:$0xff] }
 0x1c4   : > { %3842 = vst [vmem:[%s17912_s27 + $0x1b40] sm:$0xff] %v3841_v40  ;;  %v3845_v42 = vld [vmem:[%s17904_s26 + $0x36a0] sm:$0xff]  ;;  %v3847_v43 = vld [vmem:[%s17904_s26 + $0x36b0] sm:$0xff]  ;;  %3844 = vst [vmem:[%s17912_s27 + $0x1b48] sm:$0xff] %v3843_v41 }
 0x1c5   : > { %3846 = vst [vmem:[%s17912_s27 + $0x1b50] sm:$0xff] %v3845_v42  ;;  %3848 = vst [vmem:[%s17912_s27 + $0x1b58] sm:$0xff] %v3847_v43  ;;  %v3849_v44 = vld [vmem:[%s17904_s26 + $0x36c0] sm:$0xff]  ;;  %v3851_v45 = vld [vmem:[%s17904_s26 + $0x36d0] sm:$0xff] }
 0x1c6   : > { %v3853_v46 = vld [vmem:[%s17904_s26 + $0x36e0] sm:$0xff]  ;;  %3850 = vst [vmem:[%s17912_s27 + $0x1b60] sm:$0xff] %v3849_v44  ;;  %3852 = vst [vmem:[%s17912_s27 + $0x1b68] sm:$0xff] %v3851_v45  ;;  %v3855_v47 = vld [vmem:[%s17904_s26 + $0x36f0] sm:$0xff] }
 0x1c7   : > { %3854 = vst [vmem:[%s17912_s27 + $0x1b70] sm:$0xff] %v3853_v46  ;;  %v3857_v48 = vld [vmem:[%s17904_s26 + $0x3700] sm:$0xff]  ;;  %v3859_v49 = vld [vmem:[%s17904_s26 + $0x3710] sm:$0xff]  ;;  %3856 = vst [vmem:[%s17912_s27 + $0x1b78] sm:$0xff] %v3855_v47 }
 0x1c8   : > { %3858 = vst [vmem:[%s17912_s27 + $0x1b80] sm:$0xff] %v3857_v48  ;;  %3860 = vst [vmem:[%s17912_s27 + $0x1b88] sm:$0xff] %v3859_v49  ;;  %v3861_v50 = vld [vmem:[%s17904_s26 + $0x3720] sm:$0xff]  ;;  %v3863_v51 = vld [vmem:[%s17904_s26 + $0x3730] sm:$0xff] }
 0x1c9   : > { %v3865_v52 = vld [vmem:[%s17904_s26 + $0x3740] sm:$0xff]  ;;  %3862 = vst [vmem:[%s17912_s27 + $0x1b90] sm:$0xff] %v3861_v50  ;;  %3864 = vst [vmem:[%s17912_s27 + $0x1b98] sm:$0xff] %v3863_v51  ;;  %v3867_v53 = vld [vmem:[%s17904_s26 + $0x3750] sm:$0xff] }
 0x1ca   : > { %3866 = vst [vmem:[%s17912_s27 + $0x1ba0] sm:$0xff] %v3865_v52  ;;  %v3869_v54 = vld [vmem:[%s17904_s26 + $0x3760] sm:$0xff]  ;;  %v3871_v55 = vld [vmem:[%s17904_s26 + $0x3770] sm:$0xff]  ;;  %3868 = vst [vmem:[%s17912_s27 + $0x1ba8] sm:$0xff] %v3867_v53 }
 0x1cb   : > { %3870 = vst [vmem:[%s17912_s27 + $0x1bb0] sm:$0xff] %v3869_v54  ;;  %3872 = vst [vmem:[%s17912_s27 + $0x1bb8] sm:$0xff] %v3871_v55  ;;  %v3873_v56 = vld [vmem:[%s17904_s26 + $0x3780] sm:$0xff]  ;;  %v3875_v57 = vld [vmem:[%s17904_s26 + $0x3790] sm:$0xff] }
 0x1cc   : > { %v3877_v58 = vld [vmem:[%s17904_s26 + $0x37a0] sm:$0xff]  ;;  %3874 = vst [vmem:[%s17912_s27 + $0x1bc0] sm:$0xff] %v3873_v56  ;;  %3876 = vst [vmem:[%s17912_s27 + $0x1bc8] sm:$0xff] %v3875_v57  ;;  %v3879_v59 = vld [vmem:[%s17904_s26 + $0x37b0] sm:$0xff] }
 0x1cd   : > { %3878 = vst [vmem:[%s17912_s27 + $0x1bd0] sm:$0xff] %v3877_v58  ;;  %v3881_v60 = vld [vmem:[%s17904_s26 + $0x37c0] sm:$0xff]  ;;  %v3883_v61 = vld [vmem:[%s17904_s26 + $0x37d0] sm:$0xff]  ;;  %3880 = vst [vmem:[%s17912_s27 + $0x1bd8] sm:$0xff] %v3879_v59 }
 0x1ce   : > { %3882 = vst [vmem:[%s17912_s27 + $0x1be0] sm:$0xff] %v3881_v60  ;;  %3884 = vst [vmem:[%s17912_s27 + $0x1be8] sm:$0xff] %v3883_v61  ;;  %v3885_v62 = vld [vmem:[%s17904_s26 + $0x37e0] sm:$0xff]  ;;  %v3887_v63 = vld [vmem:[%s17904_s26 + $0x37f0] sm:$0xff] }
 0x1cf   : > { %v3889_v0 = vld [vmem:[%s17904_s26 + $0x3800] sm:$0xff]  ;;  %3886 = vst [vmem:[%s17912_s27 + $0x1bf0] sm:$0xff] %v3885_v62  ;;  %3888 = vst [vmem:[%s17912_s27 + $0x1bf8] sm:$0xff] %v3887_v63  ;;  %v3891_v1 = vld [vmem:[%s17904_s26 + $0x3810] sm:$0xff] }
 0x1d0   : > { %3890 = vst [vmem:[%s17912_s27 + $0x1c00] sm:$0xff] %v3889_v0  ;;  %v3893_v2 = vld [vmem:[%s17904_s26 + $0x3820] sm:$0xff]  ;;  %v3895_v3 = vld [vmem:[%s17904_s26 + $0x3830] sm:$0xff]  ;;  %3892 = vst [vmem:[%s17912_s27 + $0x1c08] sm:$0xff] %v3891_v1 }
 0x1d1   : > { %3894 = vst [vmem:[%s17912_s27 + $0x1c10] sm:$0xff] %v3893_v2  ;;  %3896 = vst [vmem:[%s17912_s27 + $0x1c18] sm:$0xff] %v3895_v3  ;;  %v3897_v4 = vld [vmem:[%s17904_s26 + $0x3840] sm:$0xff]  ;;  %v3899_v5 = vld [vmem:[%s17904_s26 + $0x3850] sm:$0xff] }
 0x1d2   : > { %v3901_v6 = vld [vmem:[%s17904_s26 + $0x3860] sm:$0xff]  ;;  %3898 = vst [vmem:[%s17912_s27 + $0x1c20] sm:$0xff] %v3897_v4  ;;  %3900 = vst [vmem:[%s17912_s27 + $0x1c28] sm:$0xff] %v3899_v5  ;;  %v3903_v7 = vld [vmem:[%s17904_s26 + $0x3870] sm:$0xff] }
 0x1d3   : > { %3902 = vst [vmem:[%s17912_s27 + $0x1c30] sm:$0xff] %v3901_v6  ;;  %v3905_v8 = vld [vmem:[%s17904_s26 + $0x3880] sm:$0xff]  ;;  %v3907_v9 = vld [vmem:[%s17904_s26 + $0x3890] sm:$0xff]  ;;  %3904 = vst [vmem:[%s17912_s27 + $0x1c38] sm:$0xff] %v3903_v7 }
 0x1d4   : > { %3906 = vst [vmem:[%s17912_s27 + $0x1c40] sm:$0xff] %v3905_v8  ;;  %3908 = vst [vmem:[%s17912_s27 + $0x1c48] sm:$0xff] %v3907_v9  ;;  %v3909_v10 = vld [vmem:[%s17904_s26 + $0x38a0] sm:$0xff]  ;;  %v3911_v11 = vld [vmem:[%s17904_s26 + $0x38b0] sm:$0xff] }
 0x1d5   : > { %v3913_v12 = vld [vmem:[%s17904_s26 + $0x38c0] sm:$0xff]  ;;  %3910 = vst [vmem:[%s17912_s27 + $0x1c50] sm:$0xff] %v3909_v10  ;;  %3912 = vst [vmem:[%s17912_s27 + $0x1c58] sm:$0xff] %v3911_v11  ;;  %v3915_v13 = vld [vmem:[%s17904_s26 + $0x38d0] sm:$0xff] }
 0x1d6   : > { %3914 = vst [vmem:[%s17912_s27 + $0x1c60] sm:$0xff] %v3913_v12  ;;  %v3917_v14 = vld [vmem:[%s17904_s26 + $0x38e0] sm:$0xff]  ;;  %v3919_v15 = vld [vmem:[%s17904_s26 + $0x38f0] sm:$0xff]  ;;  %3916 = vst [vmem:[%s17912_s27 + $0x1c68] sm:$0xff] %v3915_v13 }
 0x1d7   : > { %3918 = vst [vmem:[%s17912_s27 + $0x1c70] sm:$0xff] %v3917_v14  ;;  %3920 = vst [vmem:[%s17912_s27 + $0x1c78] sm:$0xff] %v3919_v15  ;;  %v3921_v16 = vld [vmem:[%s17904_s26 + $0x3900] sm:$0xff]  ;;  %v3923_v17 = vld [vmem:[%s17904_s26 + $0x3910] sm:$0xff] }
 0x1d8   : > { %v3925_v18 = vld [vmem:[%s17904_s26 + $0x3920] sm:$0xff]  ;;  %3922 = vst [vmem:[%s17912_s27 + $0x1c80] sm:$0xff] %v3921_v16  ;;  %3924 = vst [vmem:[%s17912_s27 + $0x1c88] sm:$0xff] %v3923_v17  ;;  %v3927_v19 = vld [vmem:[%s17904_s26 + $0x3930] sm:$0xff] }
 0x1d9   : > { %3926 = vst [vmem:[%s17912_s27 + $0x1c90] sm:$0xff] %v3925_v18  ;;  %v3929_v20 = vld [vmem:[%s17904_s26 + $0x3940] sm:$0xff]  ;;  %v3931_v21 = vld [vmem:[%s17904_s26 + $0x3950] sm:$0xff]  ;;  %3928 = vst [vmem:[%s17912_s27 + $0x1c98] sm:$0xff] %v3927_v19 }
 0x1da   : > { %3930 = vst [vmem:[%s17912_s27 + $0x1ca0] sm:$0xff] %v3929_v20  ;;  %3932 = vst [vmem:[%s17912_s27 + $0x1ca8] sm:$0xff] %v3931_v21  ;;  %v3933_v22 = vld [vmem:[%s17904_s26 + $0x3960] sm:$0xff]  ;;  %v3935_v23 = vld [vmem:[%s17904_s26 + $0x3970] sm:$0xff] }
 0x1db   : > { %v3937_v24 = vld [vmem:[%s17904_s26 + $0x3980] sm:$0xff]  ;;  %3934 = vst [vmem:[%s17912_s27 + $0x1cb0] sm:$0xff] %v3933_v22  ;;  %3936 = vst [vmem:[%s17912_s27 + $0x1cb8] sm:$0xff] %v3935_v23  ;;  %v3939_v25 = vld [vmem:[%s17904_s26 + $0x3990] sm:$0xff] }
 0x1dc   : > { %3938 = vst [vmem:[%s17912_s27 + $0x1cc0] sm:$0xff] %v3937_v24  ;;  %v3941_v26 = vld [vmem:[%s17904_s26 + $0x39a0] sm:$0xff]  ;;  %v3943_v27 = vld [vmem:[%s17904_s26 + $0x39b0] sm:$0xff]  ;;  %3940 = vst [vmem:[%s17912_s27 + $0x1cc8] sm:$0xff] %v3939_v25 }
 0x1dd   : > { %3942 = vst [vmem:[%s17912_s27 + $0x1cd0] sm:$0xff] %v3941_v26  ;;  %3944 = vst [vmem:[%s17912_s27 + $0x1cd8] sm:$0xff] %v3943_v27  ;;  %v3945_v28 = vld [vmem:[%s17904_s26 + $0x39c0] sm:$0xff]  ;;  %v3947_v29 = vld [vmem:[%s17904_s26 + $0x39d0] sm:$0xff] }
 0x1de   : > { %v3949_v30 = vld [vmem:[%s17904_s26 + $0x39e0] sm:$0xff]  ;;  %3946 = vst [vmem:[%s17912_s27 + $0x1ce0] sm:$0xff] %v3945_v28  ;;  %3948 = vst [vmem:[%s17912_s27 + $0x1ce8] sm:$0xff] %v3947_v29  ;;  %v3951_v31 = vld [vmem:[%s17904_s26 + $0x39f0] sm:$0xff] }
 0x1df   : > { %3950 = vst [vmem:[%s17912_s27 + $0x1cf0] sm:$0xff] %v3949_v30  ;;  %v3953_v32 = vld [vmem:[%s17904_s26 + $0x3a00] sm:$0xff]  ;;  %v3955_v33 = vld [vmem:[%s17904_s26 + $0x3a10] sm:$0xff]  ;;  %3952 = vst [vmem:[%s17912_s27 + $0x1cf8] sm:$0xff] %v3951_v31 }
 0x1e0   : > { %3954 = vst [vmem:[%s17912_s27 + $0x1d00] sm:$0xff] %v3953_v32  ;;  %3956 = vst [vmem:[%s17912_s27 + $0x1d08] sm:$0xff] %v3955_v33  ;;  %v3957_v34 = vld [vmem:[%s17904_s26 + $0x3a20] sm:$0xff]  ;;  %v3959_v35 = vld [vmem:[%s17904_s26 + $0x3a30] sm:$0xff] }
 0x1e1   : > { %v3961_v36 = vld [vmem:[%s17904_s26 + $0x3a40] sm:$0xff]  ;;  %3958 = vst [vmem:[%s17912_s27 + $0x1d10] sm:$0xff] %v3957_v34  ;;  %3960 = vst [vmem:[%s17912_s27 + $0x1d18] sm:$0xff] %v3959_v35  ;;  %v3963_v37 = vld [vmem:[%s17904_s26 + $0x3a50] sm:$0xff] }
 0x1e2   : > { %3962 = vst [vmem:[%s17912_s27 + $0x1d20] sm:$0xff] %v3961_v36  ;;  %v3965_v38 = vld [vmem:[%s17904_s26 + $0x3a60] sm:$0xff]  ;;  %v3967_v39 = vld [vmem:[%s17904_s26 + $0x3a70] sm:$0xff]  ;;  %3964 = vst [vmem:[%s17912_s27 + $0x1d28] sm:$0xff] %v3963_v37 }
 0x1e3   : > { %3966 = vst [vmem:[%s17912_s27 + $0x1d30] sm:$0xff] %v3965_v38  ;;  %3968 = vst [vmem:[%s17912_s27 + $0x1d38] sm:$0xff] %v3967_v39  ;;  %v3969_v40 = vld [vmem:[%s17904_s26 + $0x3a80] sm:$0xff]  ;;  %v3971_v41 = vld [vmem:[%s17904_s26 + $0x3a90] sm:$0xff] }
 0x1e4   : > { %v3973_v42 = vld [vmem:[%s17904_s26 + $0x3aa0] sm:$0xff]  ;;  %3970 = vst [vmem:[%s17912_s27 + $0x1d40] sm:$0xff] %v3969_v40  ;;  %3972 = vst [vmem:[%s17912_s27 + $0x1d48] sm:$0xff] %v3971_v41  ;;  %v3975_v43 = vld [vmem:[%s17904_s26 + $0x3ab0] sm:$0xff] }
 0x1e5   : > { %3974 = vst [vmem:[%s17912_s27 + $0x1d50] sm:$0xff] %v3973_v42  ;;  %v3977_v44 = vld [vmem:[%s17904_s26 + $0x3ac0] sm:$0xff]  ;;  %v3979_v45 = vld [vmem:[%s17904_s26 + $0x3ad0] sm:$0xff]  ;;  %3976 = vst [vmem:[%s17912_s27 + $0x1d58] sm:$0xff] %v3975_v43 }
 0x1e6   : > { %3978 = vst [vmem:[%s17912_s27 + $0x1d60] sm:$0xff] %v3977_v44  ;;  %3980 = vst [vmem:[%s17912_s27 + $0x1d68] sm:$0xff] %v3979_v45  ;;  %v3981_v46 = vld [vmem:[%s17904_s26 + $0x3ae0] sm:$0xff]  ;;  %v3983_v47 = vld [vmem:[%s17904_s26 + $0x3af0] sm:$0xff] }
 0x1e7   : > { %v3985_v48 = vld [vmem:[%s17904_s26 + $0x3b00] sm:$0xff]  ;;  %3982 = vst [vmem:[%s17912_s27 + $0x1d70] sm:$0xff] %v3981_v46  ;;  %3984 = vst [vmem:[%s17912_s27 + $0x1d78] sm:$0xff] %v3983_v47  ;;  %v3987_v49 = vld [vmem:[%s17904_s26 + $0x3b10] sm:$0xff] }
 0x1e8   : > { %3986 = vst [vmem:[%s17912_s27 + $0x1d80] sm:$0xff] %v3985_v48  ;;  %v3989_v50 = vld [vmem:[%s17904_s26 + $0x3b20] sm:$0xff]  ;;  %v3991_v51 = vld [vmem:[%s17904_s26 + $0x3b30] sm:$0xff]  ;;  %3988 = vst [vmem:[%s17912_s27 + $0x1d88] sm:$0xff] %v3987_v49 }
 0x1e9   : > { %3990 = vst [vmem:[%s17912_s27 + $0x1d90] sm:$0xff] %v3989_v50  ;;  %3992 = vst [vmem:[%s17912_s27 + $0x1d98] sm:$0xff] %v3991_v51  ;;  %v3993_v52 = vld [vmem:[%s17904_s26 + $0x3b40] sm:$0xff]  ;;  %v3995_v53 = vld [vmem:[%s17904_s26 + $0x3b50] sm:$0xff] }
 0x1ea   : > { %v3997_v54 = vld [vmem:[%s17904_s26 + $0x3b60] sm:$0xff]  ;;  %3994 = vst [vmem:[%s17912_s27 + $0x1da0] sm:$0xff] %v3993_v52  ;;  %3996 = vst [vmem:[%s17912_s27 + $0x1da8] sm:$0xff] %v3995_v53  ;;  %v3999_v55 = vld [vmem:[%s17904_s26 + $0x3b70] sm:$0xff] }
 0x1eb   : > { %3998 = vst [vmem:[%s17912_s27 + $0x1db0] sm:$0xff] %v3997_v54  ;;  %4000 = vst [vmem:[%s17912_s27 + $0x1db8] sm:$0xff] %v3999_v55 }
 0x1ec PF: > { %p15251_p6 = scmp.ge.s32.totalorder %s17839_s16, 1  ;;  %p7858_p7 = scmp.lt.s32.totalorder %s17839_s16, 3 }
 0x1ee   : > { %p7859_p8 = pnand %p15251_p6, %p7858_p7 }
 0x1ef   : > { %s7865_s28 = sand.u32 (!%p7859_p8), 1, %s17823_s12   ;;  %s15252_s26 = sshll.u32 (!%p7859_p8), %s17831_s14, 1 }
 0x1f0   : > { %7862 = sbr.rel (%p7859_p8) target bundleno = 1664 (0x680), region = 80  ;;  %p7908_p9 = scmp.lt.s32.totalorder (!%p7859_p8), %s15252_s26, 3 }
 0x1f1   : > { %s16272_s6 = smul.u32 (!%p7859_p8), 7616, %s7865_s28 }
 0x1f3   : > { %s19829_s7 = scalar_lea.vmem (!%p7859_p8), [#allocation2], %s16272_s6 }
 0x1f5   : > { %v19818_v56 = vld [vmem:[%s21131_s0] sm:$0xff]  ;;  %v19823_v57 = vld [vmem:[%s21131_s0 + $0x8] sm:$0xff]  ;;  %v16313_v60 = vld [vmem:[%s19829_s7 + $0x74] ss:$8 sps:$4 sm:$0xff]   ;;  %s21142_s26 = smov (!%p7908_p9, %s15252_s26), 3  ;;  %vm13886_vm0 = vcmask 523264  }
 0x1f6   : > { %v15256_v58 = vcombine.high %v19818_v56, %v19818_v56  ;;  %v15258_v59 = vcombine.high %v19823_v57, %v19823_v57  ;;  %v16315_v61 = vld [vmem:[%s19829_s7 + $0x70] ss:$8 sps:$4 sm:$0xff]   ;;  %13890 = vmatprep.subr.bf16.mxu0 %v16313_v60  ;;  %v16316_v62 = vld [vmem:[%s19829_s7 + $0x174] ss:$8 sps:$4 sm:$0xff]   ;;  %v16319_v0 = vld [vmem:[%s19829_s7 + $0x64] ss:$8 sps:$4 sm:$0xff]   ;;  %s7910_s28 = scalar_lea.vmem %s21133_s2, %s21142_s26 }
 0x1f7   : > { %v16318_v63 = vld [vmem:[%s19829_s7 + $0x170] ss:$8 sps:$4 sm:$0xff]   ;;  %13891 = vmatpush1.bf16.msra.mxu0 %v16315_v61  ;;  %v16321_v1 = vld [vmem:[%s19829_s7 + $0x60] ss:$8 sps:$4 sm:$0xff]   ;;  %13931 = vmatprep.subr.bf16.mxu1 %v16316_v62  ;;  %v16322_v2 = vld [vmem:[%s19829_s7 + $0x164] ss:$8 sps:$4 sm:$0xff]  }
 0x1f8   : > { %13922 = vmatprep.mubr.bf16.mxu0 %v15256_v58  ;;  %13963 = vmatprep.mubr.bf16.mxu1 %v15258_v59  ;;  %v16324_v3 = vld [vmem:[%s19829_s7 + $0x160] ss:$8 sps:$4 sm:$0xff]   ;;  %v16325_v4 = vld [vmem:[%s19829_s7 + $0x54] ss:$8 sps:$4 sm:$0xff]   ;;  %v16327_v5 = vld [vmem:[%s19829_s7 + $0x50] ss:$8 sps:$4 sm:$0xff]  }
 0x1f9   : > { %13932 = vmatpush1.bf16.msra.mxu1 %v16318_v63  ;;  %13892 = vmatprep.subr.bf16.mxu0 %v16319_v0  ;;  %v16328_v6 = vld [vmem:[%s19829_s7 + $0x154] ss:$8 sps:$4 sm:$0xff]   ;;  %v16331_v7 = vld [vmem:[%s19829_s7 + $0x44] ss:$8 sps:$4 sm:$0xff]   ;;  %v16330_v8 = vld [vmem:[%s19829_s7 + $0x150] ss:$8 sps:$4 sm:$0xff]   ;;  %v15255_v0 = vcombine.low %v19818_v56, %v19818_v56 }
 0x1fa   : > { %13933 = vmatprep.subr.bf16.mxu1 %v16322_v2  ;;  %v16334_v9 = vld [vmem:[%s19829_s7 + $0x144] ss:$8 sps:$4 sm:$0xff]   ;;  %v16333_v10 = vld [vmem:[%s19829_s7 + $0x40] ss:$8 sps:$4 sm:$0xff]   ;;  %v16337_v11 = vld [vmem:[%s19829_s7 + $0x34] ss:$8 sps:$4 sm:$0xff]  }
 0x1fb   : > { %13893 = vmatpush1.bf16.msra.mxu0 %v16321_v1  ;;  %v16336_v12 = vld [vmem:[%s19829_s7 + $0x140] ss:$8 sps:$4 sm:$0xff]   ;;  %v16340_v13 = vld [vmem:[%s19829_s7 + $0x134] ss:$8 sps:$4 sm:$0xff]   ;;  %v16339_v14 = vld [vmem:[%s19829_s7 + $0x30] ss:$8 sps:$4 sm:$0xff]  }
 0x1fc   : > { %13894 = vmatprep.subr.bf16.mxu0 %v16325_v4  ;;  %v16343_v15 = vld [vmem:[%s19829_s7 + $0x24] ss:$8 sps:$4 sm:$0xff]   ;;  %v16342_v16 = vld [vmem:[%s19829_s7 + $0x130] ss:$8 sps:$4 sm:$0xff]   ;;  %v16345_v18 = vld [vmem:[%s19829_s7 + $0x20] ss:$8 sps:$4 sm:$0xff]   ;;  %v15257_v4 = vcombine.low %v19823_v57, %v19823_v57 }
 0x1fd   : > { %13934 = vmatpush1.bf16.msra.mxu1 %v16324_v3  ;;  %v16346_v17 = vld [vmem:[%s19829_s7 + $0x124] ss:$8 sps:$4 sm:$0xff]   ;;  %v16349_v19 = vld [vmem:[%s19829_s7 + $0x14] ss:$8 sps:$4 sm:$0xff]   ;;  %v16348_v20 = vld [vmem:[%s19829_s7 + $0x120] ss:$8 sps:$4 sm:$0xff]  }
 0x1fe   : > { %13935 = vmatprep.subr.bf16.mxu1 %v16328_v6  ;;  %v16352_v21 = vld [vmem:[%s19829_s7 + $0x114] ss:$8 sps:$4 sm:$0xff]   ;;  %v16351_v22 = vld [vmem:[%s19829_s7 + $0x10] ss:$8 sps:$4 sm:$0xff]   ;;  %v16355_v23 = vld [vmem:[%s19829_s7 + $0x4] ss:$8 sps:$4 sm:$0xff]  }
 0x1ff   : > { %13895 = vmatpush1.bf16.msra.mxu0 %v16327_v5  ;;  %v16354_v24 = vld [vmem:[%s19829_s7 + $0x110] ss:$8 sps:$4 sm:$0xff]   ;;  %v16358_v25 = vld [vmem:[%s19829_s7 + $0x104] ss:$8 sps:$4 sm:$0xff]   ;;  %v16357_v26 = vld [vmem:[%s19829_s7] ss:$8 sps:$4 sm:$0xff]  }
 0x200   : > { %13896 = vmatprep.subr.bf16.mxu0 %v16331_v7  ;;  %v16361_v27 = vld [vmem:[%s19829_s7 + $0xf4] ss:$8 sps:$4 sm:$0xff]   ;;  %v16360_v28 = vld [vmem:[%s19829_s7 + $0x100] ss:$8 sps:$4 sm:$0xff]   ;;  %v16363_v30 = vld [vmem:[%s19829_s7 + $0xf0] ss:$8 sps:$4 sm:$0xff]  }
 0x201   : > { %13936 = vmatpush1.bf16.msra.mxu1 %v16330_v8  ;;  %v16364_v29 = vld [vmem:[%s19829_s7 + $0x1f4] ss:$8 sps:$4 sm:$0xff]   ;;  %v16367_v31 = vld [vmem:[%s19829_s7 + $0xe4] ss:$8 sps:$4 sm:$0xff]   ;;  %v16366_v32 = vld [vmem:[%s19829_s7 + $0x1f0] ss:$8 sps:$4 sm:$0xff]  }
 0x202   : > { %13937 = vmatprep.subr.bf16.mxu1 %v16334_v9  ;;  %v16370_v33 = vld [vmem:[%s19829_s7 + $0x1e4] ss:$8 sps:$4 sm:$0xff]   ;;  %v16369_v34 = vld [vmem:[%s19829_s7 + $0xe0] ss:$8 sps:$4 sm:$0xff]   ;;  %v16373_v35 = vld [vmem:[%s19829_s7 + $0xd4] ss:$8 sps:$4 sm:$0xff]  }
 0x203   : > { %13897 = vmatpush1.bf16.msra.mxu0 %v16333_v10  ;;  %v16372_v36 = vld [vmem:[%s19829_s7 + $0x1e0] ss:$8 sps:$4 sm:$0xff]   ;;  %v16376_v37 = vld [vmem:[%s19829_s7 + $0x1d4] ss:$8 sps:$4 sm:$0xff]   ;;  %v16375_v38 = vld [vmem:[%s19829_s7 + $0xd0] ss:$8 sps:$4 sm:$0xff]  }
 0x204   : > { %13898 = vmatprep.subr.bf16.mxu0 %v16337_v11  ;;  %v16379_v39 = vld [vmem:[%s19829_s7 + $0xc4] ss:$8 sps:$4 sm:$0xff]   ;;  %v16378_v40 = vld [vmem:[%s19829_s7 + $0x1d0] ss:$8 sps:$4 sm:$0xff]   ;;  %v16381_v42 = vld [vmem:[%s19829_s7 + $0xc0] ss:$8 sps:$4 sm:$0xff]  }
 0x205   : > { %13938 = vmatpush1.bf16.msra.mxu1 %v16336_v12  ;;  %v16382_v41 = vld [vmem:[%s19829_s7 + $0x1c4] ss:$8 sps:$4 sm:$0xff]   ;;  %v16385_v43 = vld [vmem:[%s19829_s7 + $0xb4] ss:$8 sps:$4 sm:$0xff]   ;;  %v16384_v44 = vld [vmem:[%s19829_s7 + $0x1c0] ss:$8 sps:$4 sm:$0xff]  }
 0x206   : > { %13939 = vmatprep.subr.bf16.mxu1 %v16340_v13  ;;  %v16388_v45 = vld [vmem:[%s19829_s7 + $0x1b4] ss:$8 sps:$4 sm:$0xff]   ;;  %v16387_v46 = vld [vmem:[%s19829_s7 + $0xb0] ss:$8 sps:$4 sm:$0xff]   ;;  %v16391_v47 = vld [vmem:[%s19829_s7 + $0xa4] ss:$8 sps:$4 sm:$0xff]  }
 0x207   : > { %13899 = vmatpush1.bf16.msra.mxu0 %v16339_v14  ;;  %v16390_v48 = vld [vmem:[%s19829_s7 + $0x1b0] ss:$8 sps:$4 sm:$0xff]   ;;  %v16394_v49 = vld [vmem:[%s19829_s7 + $0x1a4] ss:$8 sps:$4 sm:$0xff]   ;;  %v16393_v50 = vld [vmem:[%s19829_s7 + $0xa0] ss:$8 sps:$4 sm:$0xff]  }
 0x208   : > { %13900 = vmatprep.subr.bf16.mxu0 %v16343_v15  ;;  %v16397_v51 = vld [vmem:[%s19829_s7 + $0x94] ss:$8 sps:$4 sm:$0xff]   ;;  %v16396_v52 = vld [vmem:[%s19829_s7 + $0x1a0] ss:$8 sps:$4 sm:$0xff]   ;;  %v16399_v54 = vld [vmem:[%s19829_s7 + $0x90] ss:$8 sps:$4 sm:$0xff]  }
 0x209   : > { %13940 = vmatpush1.bf16.msra.mxu1 %v16342_v16  ;;  %v16400_v53 = vld [vmem:[%s19829_s7 + $0x194] ss:$8 sps:$4 sm:$0xff]   ;;  %v16403_v55 = vld [vmem:[%s19829_s7 + $0x84] ss:$8 sps:$4 sm:$0xff]   ;;  %v16402_v58 = vld [vmem:[%s19829_s7 + $0x190] ss:$8 sps:$4 sm:$0xff]  }
 0x20a   : > { %13941 = vmatprep.subr.bf16.mxu1 %v16346_v17  ;;  %v16406_v59 = vld [vmem:[%s19829_s7 + $0x184] ss:$8 sps:$4 sm:$0xff]   ;;  %v16405_v60 = vld [vmem:[%s19829_s7 + $0x80] ss:$8 sps:$4 sm:$0xff]   ;;  %v19897_v61 = vld [vmem:[%s21131_s0 + $0x10] sm:$0xff] }
 0x20b   : > { %13901 = vmatpush1.bf16.msra.mxu0 %v16345_v18  ;;  %v16413_v62 = vld [vmem:[%s19829_s7 + $0x274] ss:$8 sps:$4 sm:$0xff]   ;;  %v16410_v63 = vld [vmem:[%s19829_s7 + $0x180] ss:$8 sps:$4 sm:$0xff]   ;;  %v16411_v2 = vld [vmem:[%s19829_s7 + $0x270] ss:$8 sps:$4 sm:$0xff]   ;;  %v15260_v3 = vcombine.high %v19897_v61, %v19897_v61 }
 0x20c   : > { %13902 = vmatprep.subr.bf16.mxu0 %v16349_v19  ;;  %v16418_v1 = vld [vmem:[%s19829_s7 + $0x374] ss:$8 sps:$4 sm:$0xff]   ;;  %v16421_v5 = vld [vmem:[%s19829_s7 + $0x264] ss:$8 sps:$4 sm:$0xff]   ;;  %v16416_v6 = vld [vmem:[%s19829_s7 + $0x370] ss:$8 sps:$4 sm:$0xff]  }
 0x20d   : > { %13942 = vmatpush1.bf16.msra.mxu1 %v16348_v20  ;;  %v16424_v56 = vld [vmem:[%s19829_s7 + $0x364] ss:$8 sps:$4 sm:$0xff]   ;;  %v16419_v7 = vld [vmem:[%s19829_s7 + $0x260] ss:$8 sps:$4 sm:$0xff]   ;;  %v16427_v8 = vld [vmem:[%s19829_s7 + $0x254] ss:$8 sps:$4 sm:$0xff]  }
 0x20e   : > { %13943 = vmatprep.subr.bf16.mxu1 %v16352_v21  ;;  %v16422_v57 = vld [vmem:[%s19829_s7 + $0x360] ss:$8 sps:$4 sm:$0xff]   ;;  %v16430_v9 = vld [vmem:[%s19829_s7 + $0x354] ss:$8 sps:$4 sm:$0xff]   ;;  %v16425_v10 = vld [vmem:[%s19829_s7 + $0x250] ss:$8 sps:$4 sm:$0xff]  }
 0x20f   : > { %13903 = vmatpush1.bf16.msra.mxu0 %v16351_v22  ;;  %v16433_v11 = vld [vmem:[%s19829_s7 + $0x244] ss:$8 sps:$4 sm:$0xff]   ;;  %v16428_v12 = vld [vmem:[%s19829_s7 + $0x350] ss:$8 sps:$4 sm:$0xff]   ;;  %v16431_v14 = vld [vmem:[%s19829_s7 + $0x240] ss:$8 sps:$4 sm:$0xff]  }
 0x210   : > { %13904 = vmatprep.subr.bf16.mxu0 %v16355_v23  ;;  %v16436_v13 = vld [vmem:[%s19829_s7 + $0x344] ss:$8 sps:$4 sm:$0xff]   ;;  %v16439_v15 = vld [vmem:[%s19829_s7 + $0x234] ss:$8 sps:$4 sm:$0xff]   ;;  %v16434_v16 = vld [vmem:[%s19829_s7 + $0x340] ss:$8 sps:$4 sm:$0xff]  }
 0x211   : > { %13944 = vmatpush1.bf16.msra.mxu1 %v16354_v24  ;;  %v16442_v17 = vld [vmem:[%s19829_s7 + $0x334] ss:$8 sps:$4 sm:$0xff]   ;;  %v16437_v18 = vld [vmem:[%s19829_s7 + $0x230] ss:$8 sps:$4 sm:$0xff]   ;;  %v16445_v19 = vld [vmem:[%s19829_s7 + $0x224] ss:$8 sps:$4 sm:$0xff]  }
 0x212   : > { %13945 = vmatprep.subr.bf16.mxu1 %v16358_v25  ;;  %v16440_v20 = vld [vmem:[%s19829_s7 + $0x330] ss:$8 sps:$4 sm:$0xff]   ;;  %v16448_v21 = vld [vmem:[%s19829_s7 + $0x324] ss:$8 sps:$4 sm:$0xff]   ;;  %v16443_v22 = vld [vmem:[%s19829_s7 + $0x220] ss:$8 sps:$4 sm:$0xff]  }
 0x213   : > { %13905 = vmatpush1.bf16.msra.mxu0 %v16357_v26  ;;  %v16451_v23 = vld [vmem:[%s19829_s7 + $0x214] ss:$8 sps:$4 sm:$0xff]   ;;  %v16446_v24 = vld [vmem:[%s19829_s7 + $0x320] ss:$8 sps:$4 sm:$0xff]  }
 0x214   : > { %13906 = vmatprep.subr.bf16.mxu0 %v16361_v27  ;;  %v16454_v25 = vld [vmem:[%s19829_s7 + $0x314] ss:$8 sps:$4 sm:$0xff]   ;;  %v16449_v27 = vld [vmem:[%s19829_s7 + $0x210] ss:$8 sps:$4 sm:$0xff]  }
 0x215   : > { %13946 = vmatpush1.bf16.msra.mxu1 %v16360_v28  ;;  %v19935_v26 = vld [vmem:[%s21131_s0 + $0x18] sm:$0xff] }
 0x216   : > { %13947 = vmatprep.subr.bf16.mxu1 %v16364_v29  ;;  %v15262_v28 = vcombine.high %v19935_v26, %v19935_v26  ;;  %v16457_v29 = vld [vmem:[%s19829_s7 + $0x204] ss:$8 sps:$4 sm:$0xff]  }
 0x217   : > { %13907 = vmatpush2.bf16.msra.mxu0 %v16363_v30  ;;  %v16452_v30 = vld [vmem:[%s19829_s7 + $0x310] ss:$8 sps:$4 sm:$0xff]  }
 0x218   : > { %13908 = vmatprep.subr.bf16.mxu0 %v16367_v31  ;;  %v16460_v31 = vld [vmem:[%s19829_s7 + $0x304] ss:$8 sps:$4 sm:$0xff]  }
 0x219   : > { %13948 = vmatpush2.bf16.msra.mxu1 %v16366_v32  ;;  %v16455_v32 = vld [vmem:[%s19829_s7 + $0x200] ss:$8 sps:$4 sm:$0xff]  }
 0x21a   : > { %13949 = vmatprep.subr.bf16.mxu1 %v16370_v33  ;;  %v16463_v33 = vld [vmem:[%s19829_s7 + $0x2f4] ss:$8 sps:$4 sm:$0xff]  }
 0x21b   : > { %13909 = vmatpush2.bf16.msra.mxu0 %v16369_v34  ;;  %v16458_v34 = vld [vmem:[%s19829_s7 + $0x300] ss:$8 sps:$4 sm:$0xff]  }
 0x21c   : > { %13910 = vmatprep.subr.bf16.mxu0 %v16373_v35  ;;  %v16466_v35 = vld [vmem:[%s19829_s7 + $0x3f4] ss:$8 sps:$4 sm:$0xff]  }
 0x21d   : > { %13950 = vmatpush2.bf16.msra.mxu1 %v16372_v36  ;;  %v16461_v36 = vld [vmem:[%s19829_s7 + $0x2f0] ss:$8 sps:$4 sm:$0xff]  }
 0x21e   : > { %13951 = vmatprep.subr.bf16.mxu1 %v16376_v37  ;;  %v16469_v37 = vld [vmem:[%s19829_s7 + $0x2e4] ss:$8 sps:$4 sm:$0xff]  }
 0x21f   : > { %13911 = vmatpush2.bf16.msra.mxu0 %v16375_v38  ;;  %v16464_v38 = vld [vmem:[%s19829_s7 + $0x3f0] ss:$8 sps:$4 sm:$0xff]  }
 0x220   : > { %13912 = vmatprep.subr.bf16.mxu0 %v16379_v39  ;;  %v16472_v39 = vld [vmem:[%s19829_s7 + $0x3e4] ss:$8 sps:$4 sm:$0xff]  }
 0x221   : > { %13952 = vmatpush2.bf16.msra.mxu1 %v16378_v40  ;;  %v16467_v40 = vld [vmem:[%s19829_s7 + $0x2e0] ss:$8 sps:$4 sm:$0xff]  }
 0x222   : > { %13953 = vmatprep.subr.bf16.mxu1 %v16382_v41  ;;  %v16475_v41 = vld [vmem:[%s19829_s7 + $0x2d4] ss:$8 sps:$4 sm:$0xff]  }
 0x223   : > { %13913 = vmatpush2.bf16.msra.mxu0 %v16381_v42  ;;  %v16470_v42 = vld [vmem:[%s19829_s7 + $0x3e0] ss:$8 sps:$4 sm:$0xff]  }
 0x224   : > { %13914 = vmatprep.subr.bf16.mxu0 %v16385_v43  ;;  %v16478_v43 = vld [vmem:[%s19829_s7 + $0x3d4] ss:$8 sps:$4 sm:$0xff]  }
 0x225   : > { %13954 = vmatpush2.bf16.msra.mxu1 %v16384_v44  ;;  %v16473_v44 = vld [vmem:[%s19829_s7 + $0x2d0] ss:$8 sps:$4 sm:$0xff]  }
 0x226   : > { %13955 = vmatprep.subr.bf16.mxu1 %v16388_v45  ;;  %v16481_v45 = vld [vmem:[%s19829_s7 + $0x2c4] ss:$8 sps:$4 sm:$0xff]  }
 0x227   : > { %13915 = vmatpush2.bf16.msra.mxu0 %v16387_v46  ;;  %v16476_v46 = vld [vmem:[%s19829_s7 + $0x3d0] ss:$8 sps:$4 sm:$0xff]  }
 0x228   : > { %13916 = vmatprep.subr.bf16.mxu0 %v16391_v47  ;;  %v16484_v47 = vld [vmem:[%s19829_s7 + $0x3c4] ss:$8 sps:$4 sm:$0xff]  }
 0x229   : > { %13956 = vmatpush2.bf16.msra.mxu1 %v16390_v48  ;;  %v16479_v48 = vld [vmem:[%s19829_s7 + $0x2c0] ss:$8 sps:$4 sm:$0xff]  }
 0x22a   : > { %13957 = vmatprep.subr.bf16.mxu1 %v16394_v49  ;;  %v16487_v49 = vld [vmem:[%s19829_s7 + $0x2b4] ss:$8 sps:$4 sm:$0xff]  }
 0x22b   : > { %13917 = vmatpush2.bf16.msra.mxu0 %v16393_v50  ;;  %v16482_v50 = vld [vmem:[%s19829_s7 + $0x3c0] ss:$8 sps:$4 sm:$0xff]  }
 0x22c   : > { %13918 = vmatprep.subr.bf16.mxu0 %v16397_v51  ;;  %v16490_v51 = vld [vmem:[%s19829_s7 + $0x3b4] ss:$8 sps:$4 sm:$0xff]  }
 0x22d   : > { %13958 = vmatpush2.bf16.msra.mxu1 %v16396_v52  ;;  %v16485_v52 = vld [vmem:[%s19829_s7 + $0x2b0] ss:$8 sps:$4 sm:$0xff]  }
 0x22e   : > { %13959 = vmatprep.subr.bf16.mxu1 %v16400_v53  ;;  %v16493_v53 = vld [vmem:[%s19829_s7 + $0x2a4] ss:$8 sps:$4 sm:$0xff]  }
 0x22f   : > { %13919 = vmatpush2.bf16.msra.mxu0 %v16399_v54  ;;  %v16488_v54 = vld [vmem:[%s19829_s7 + $0x3b0] ss:$8 sps:$4 sm:$0xff]  }
 0x230   : > { %13920 = vmatprep.subr.bf16.mxu0 %v16403_v55  ;;  %v16496_v55 = vld [vmem:[%s19829_s7 + $0x3a4] ss:$8 sps:$4 sm:$0xff]  }
 0x231   : > { %13960 = vmatpush2.bf16.msra.mxu1 %v16402_v58  ;;  %v16491_v58 = vld [vmem:[%s19829_s7 + $0x2a0] ss:$8 sps:$4 sm:$0xff]  }
 0x232   : > { %13961 = vmatprep.subr.bf16.mxu1 %v16406_v59  ;;  %v16499_v59 = vld [vmem:[%s19829_s7 + $0x294] ss:$8 sps:$4 sm:$0xff]  }
 0x233   : > { %13921 = vmatpush2.bf16.msra.mxu0 %v16405_v60  ;;  %v16494_v60 = vld [vmem:[%s19829_s7 + $0x3a0] ss:$8 sps:$4 sm:$0xff]  }
 0x234   : > { %13972 = vmatprep.subr.bf16.mxu0 %v16413_v62  ;;  %v16502_v62 = vld [vmem:[%s19829_s7 + $0x394] ss:$8 sps:$4 sm:$0xff]  }
 0x235   : > { %13962 = vmatpush2.bf16.msra.mxu1 %v16410_v63  ;;  %v16497_v63 = vld [vmem:[%s19829_s7 + $0x290] ss:$8 sps:$4 sm:$0xff]  }
 0x236   : > { %13923 = vmatmul.mubr.bf16.vlgmr.msra.gmra.mxu0 %v15255_v0  ;;  %14013 = vmatprep.subr.bf16.mxu1 %v16418_v1  ;;  %v16505_v0 = vld [vmem:[%s19829_s7 + $0x284] ss:$8 sps:$4 sm:$0xff]   ;;  %v16500_v1 = vld [vmem:[%s19829_s7 + $0x390] ss:$8 sps:$4 sm:$0xff]  }
 0x237   : > { %13973 = vmatpush1.bf16.msra.mxu0 %v16411_v2  ;;  %14004 = vmatprep.mubr.bf16.mxu0 %v15260_v3  ;;  %v16508_v2 = vld [vmem:[%s19829_s7 + $0x384] ss:$8 sps:$4 sm:$0xff]   ;;  %v16503_v3 = vld [vmem:[%s19829_s7 + $0x280] ss:$8 sps:$4 sm:$0xff]  }
 0x238   : > { %13964 = vmatmul.mubr.bf16.vlgmr.msra.gmra.mxu1 %v15257_v4  ;;  %13974 = vmatprep.subr.bf16.mxu0 %v16421_v5  ;;  %v16513_v4 = vld [vmem:[%s19829_s7 + $0x474] ss:$8 sps:$4 sm:$0xff]   ;;  %v16506_v5 = vld [vmem:[%s19829_s7 + $0x380] ss:$8 sps:$4 sm:$0xff]  }
 0x239   : > { %14014 = vmatpush1.bf16.msra.mxu1 %v16416_v6  ;;  %14045 = vmatprep.mubr.bf16.mxu1 %v15262_v28  ;;  %v15259_v6 = vcombine.low %v19897_v61, %v19897_v61  ;;  %v16540_v28 = vld [vmem:[%s19829_s7 + $0x530] ss:$8 sps:$4 sm:$0xff]  }
 0x23a   : > { %14015 = vmatprep.subr.bf16.mxu1 %v16424_v56  ;;  %v16518_v56 = vld [vmem:[%s19829_s7 + $0x574] ss:$8 sps:$4 sm:$0xff]  }
 0x23b   : > { %13975 = vmatpush1.bf16.msra.mxu0 %v16419_v7  ;;  %v16511_v7 = vld [vmem:[%s19829_s7 + $0x470] ss:$8 sps:$4 sm:$0xff]  }
 0x23c   : > { %13976 = vmatprep.subr.bf16.mxu0 %v16427_v8  ;;  %v15261_v8 = vcombine.low %v19935_v26, %v19935_v26  ;;  %v16537_v26 = vld [vmem:[%s19829_s7 + $0x430] ss:$8 sps:$4 sm:$0xff]  }
 0x23d   : > { %14016 = vmatpush1.bf16.msra.mxu1 %v16422_v57  ;;  %v16521_v57 = vld [vmem:[%s19829_s7 + $0x464] ss:$8 sps:$4 sm:$0xff]  }
 0x23e   : > { %14017 = vmatprep.subr.bf16.mxu1 %v16430_v9  ;;  %v19988_v9 = vld [vmem:[%s21131_s0 + $0x20] sm:$0xff] }
 0x23f   : > { %13977 = vmatpush1.bf16.msra.mxu0 %v16425_v10  ;;  %v16516_v10 = vld [vmem:[%s19829_s7 + $0x570] ss:$8 sps:$4 sm:$0xff]   ;;  %v15264_v61 = vcombine.high %v19988_v9, %v19988_v9 }
 0x240   : > { %13978 = vmatprep.subr.bf16.mxu0 %v16433_v11  ;;  %v16524_v11 = vld [vmem:[%s19829_s7 + $0x564] ss:$8 sps:$4 sm:$0xff]  }
 0x241   : > { %14018 = vmatpush1.bf16.msra.mxu1 %v16428_v12  ;;  %v19997_v12 = vld [vmem:[%s21131_s0 + $0x28] sm:$0xff] }
 0x242   : > { %14019 = vmatprep.subr.bf16.mxu1 %v16436_v13  ;;  %v16519_v13 = vld [vmem:[%s19829_s7 + $0x460] ss:$8 sps:$4 sm:$0xff]  }
 0x243   : > { %13979 = vmatpush1.bf16.msra.mxu0 %v16431_v14  ;;  %v15266_v14 = vcombine.high %v19997_v12, %v19997_v12 }
 0x244   : > { %13980 = vmatprep.subr.bf16.mxu0 %v16439_v15  ;;  %v16527_v15 = vld [vmem:[%s19829_s7 + $0x454] ss:$8 sps:$4 sm:$0xff]  }
 0x245   : > { %14020 = vmatpush1.bf16.msra.mxu1 %v16434_v16  ;;  %v16522_v16 = vld [vmem:[%s19829_s7 + $0x560] ss:$8 sps:$4 sm:$0xff]  }
 0x246   : > { %14021 = vmatprep.subr.bf16.mxu1 %v16442_v17  ;;  %v16530_v17 = vld [vmem:[%s19829_s7 + $0x554] ss:$8 sps:$4 sm:$0xff]  }
 0x247   : > { %13981 = vmatpush1.bf16.msra.mxu0 %v16437_v18  ;;  %v16525_v18 = vld [vmem:[%s19829_s7 + $0x450] ss:$8 sps:$4 sm:$0xff]  }
 0x248   : > { %13982 = vmatprep.subr.bf16.mxu0 %v16445_v19  ;;  %v16533_v19 = vld [vmem:[%s19829_s7 + $0x444] ss:$8 sps:$4 sm:$0xff]  }
 0x249   : > { %14022 = vmatpush1.bf16.msra.mxu1 %v16440_v20  ;;  %v16528_v20 = vld [vmem:[%s19829_s7 + $0x550] ss:$8 sps:$4 sm:$0xff]  }
 0x24a   : > { %14023 = vmatprep.subr.bf16.mxu1 %v16448_v21  ;;  %v16536_v21 = vld [vmem:[%s19829_s7 + $0x544] ss:$8 sps:$4 sm:$0xff]  }
 0x24b   : > { %13983 = vmatpush1.bf16.msra.mxu0 %v16443_v22  ;;  %v16531_v22 = vld [vmem:[%s19829_s7 + $0x440] ss:$8 sps:$4 sm:$0xff]  }
 0x24c   : > { %13984 = vmatprep.subr.bf16.mxu0 %v16451_v23  ;;  %v16539_v23 = vld [vmem:[%s19829_s7 + $0x434] ss:$8 sps:$4 sm:$0xff]  }
 0x24d   : > { %14024 = vmatpush1.bf16.msra.mxu1 %v16446_v24  ;;  %v16534_v24 = vld [vmem:[%s19829_s7 + $0x540] ss:$8 sps:$4 sm:$0xff]  }
 0x24e   : > { %14025 = vmatprep.subr.bf16.mxu1 %v16454_v25  ;;  %v16542_v25 = vld [vmem:[%s19829_s7 + $0x534] ss:$8 sps:$4 sm:$0xff]  }
 0x24f   : > { %13985 = vmatpush1.bf16.msra.mxu0 %v16449_v27  ;;  %v16545_v27 = vld [vmem:[%s19829_s7 + $0x424] ss:$8 sps:$4 sm:$0xff]  }
 0x250   : > { %13986 = vmatprep.subr.bf16.mxu0 %v16457_v29  ;;  %v16548_v29 = vld [vmem:[%s19829_s7 + $0x524] ss:$8 sps:$4 sm:$0xff]  }
 0x251   : > { %14026 = vmatpush1.bf16.msra.mxu1 %v16452_v30  ;;  %v16543_v30 = vld [vmem:[%s19829_s7 + $0x420] ss:$8 sps:$4 sm:$0xff]  }
 0x252   : > { %14027 = vmatprep.subr.bf16.mxu1 %v16460_v31  ;;  %v16551_v31 = vld [vmem:[%s19829_s7 + $0x414] ss:$8 sps:$4 sm:$0xff]  }
 0x253   : > { %13987 = vmatpush1.bf16.msra.mxu0 %v16455_v32  ;;  %v16546_v32 = vld [vmem:[%s19829_s7 + $0x520] ss:$8 sps:$4 sm:$0xff]  }
 0x254   : > { %13988 = vmatprep.subr.bf16.mxu0 %v16463_v33  ;;  %v16554_v33 = vld [vmem:[%s19829_s7 + $0x514] ss:$8 sps:$4 sm:$0xff]  }
 0x255   : > { %14028 = vmatpush1.bf16.msra.mxu1 %v16458_v34  ;;  %v16549_v34 = vld [vmem:[%s19829_s7 + $0x410] ss:$8 sps:$4 sm:$0xff]  }
 0x256   : > { %14029 = vmatprep.subr.bf16.mxu1 %v16466_v35  ;;  %v16557_v35 = vld [vmem:[%s19829_s7 + $0x404] ss:$8 sps:$4 sm:$0xff]  }
 0x257   : > { %13989 = vmatpush2.bf16.msra.mxu0 %v16461_v36  ;;  %v16552_v36 = vld [vmem:[%s19829_s7 + $0x510] ss:$8 sps:$4 sm:$0xff]  }
 0x258   : > { %13990 = vmatprep.subr.bf16.mxu0 %v16469_v37  ;;  %v16560_v37 = vld [vmem:[%s19829_s7 + $0x504] ss:$8 sps:$4 sm:$0xff]  }
 0x259   : > { %14030 = vmatpush2.bf16.msra.mxu1 %v16464_v38  ;;  %v16555_v38 = vld [vmem:[%s19829_s7 + $0x400] ss:$8 sps:$4 sm:$0xff]  }
 0x25a   : > { %14031 = vmatprep.subr.bf16.mxu1 %v16472_v39  ;;  %v16563_v39 = vld [vmem:[%s19829_s7 + $0x4f4] ss:$8 sps:$4 sm:$0xff]  }
 0x25b   : > { %13991 = vmatpush2.bf16.msra.mxu0 %v16467_v40  ;;  %v16558_v40 = vld [vmem:[%s19829_s7 + $0x500] ss:$8 sps:$4 sm:$0xff]  }
 0x25c   : > { %13992 = vmatprep.subr.bf16.mxu0 %v16475_v41  ;;  %v16566_v41 = vld [vmem:[%s19829_s7 + $0x5f4] ss:$8 sps:$4 sm:$0xff]  }
 0x25d   : > { %14032 = vmatpush2.bf16.msra.mxu1 %v16470_v42  ;;  %v16561_v42 = vld [vmem:[%s19829_s7 + $0x4f0] ss:$8 sps:$4 sm:$0xff]  }
 0x25e   : > { %14033 = vmatprep.subr.bf16.mxu1 %v16478_v43  ;;  %v16569_v43 = vld [vmem:[%s19829_s7 + $0x4e4] ss:$8 sps:$4 sm:$0xff]  }
 0x25f   : > { %13993 = vmatpush2.bf16.msra.mxu0 %v16473_v44  ;;  %v16564_v44 = vld [vmem:[%s19829_s7 + $0x5f0] ss:$8 sps:$4 sm:$0xff]  }
 0x260   : > { %13994 = vmatprep.subr.bf16.mxu0 %v16481_v45  ;;  %v16572_v45 = vld [vmem:[%s19829_s7 + $0x5e4] ss:$8 sps:$4 sm:$0xff]  }
 0x261   : > { %14034 = vmatpush2.bf16.msra.mxu1 %v16476_v46  ;;  %v16567_v46 = vld [vmem:[%s19829_s7 + $0x4e0] ss:$8 sps:$4 sm:$0xff]  }
 0x262   : > { %14035 = vmatprep.subr.bf16.mxu1 %v16484_v47  ;;  %v16575_v47 = vld [vmem:[%s19829_s7 + $0x4d4] ss:$8 sps:$4 sm:$0xff]  }
 0x263   : > { %13995 = vmatpush2.bf16.msra.mxu0 %v16479_v48  ;;  %v16570_v48 = vld [vmem:[%s19829_s7 + $0x5e0] ss:$8 sps:$4 sm:$0xff]  }
 0x264   : > { %13996 = vmatprep.subr.bf16.mxu0 %v16487_v49  ;;  %v16578_v49 = vld [vmem:[%s19829_s7 + $0x5d4] ss:$8 sps:$4 sm:$0xff]  }
 0x265   : > { %14036 = vmatpush2.bf16.msra.mxu1 %v16482_v50  ;;  %v16573_v50 = vld [vmem:[%s19829_s7 + $0x4d0] ss:$8 sps:$4 sm:$0xff]  }
 0x266   : > { %14037 = vmatprep.subr.bf16.mxu1 %v16490_v51  ;;  %v16581_v51 = vld [vmem:[%s19829_s7 + $0x4c4] ss:$8 sps:$4 sm:$0xff]  }
 0x267   : > { %13997 = vmatpush2.bf16.msra.mxu0 %v16485_v52  ;;  %v16576_v52 = vld [vmem:[%s19829_s7 + $0x5d0] ss:$8 sps:$4 sm:$0xff]  }
 0x268   : > { %13998 = vmatprep.subr.bf16.mxu0 %v16493_v53  ;;  %v16584_v53 = vld [vmem:[%s19829_s7 + $0x5c4] ss:$8 sps:$4 sm:$0xff]  }
 0x269   : > { %14038 = vmatpush2.bf16.msra.mxu1 %v16488_v54  ;;  %v16579_v54 = vld [vmem:[%s19829_s7 + $0x4c0] ss:$8 sps:$4 sm:$0xff]  }
 0x26a   : > { %14039 = vmatprep.subr.bf16.mxu1 %v16496_v55  ;;  %v16587_v55 = vld [vmem:[%s19829_s7 + $0x4b4] ss:$8 sps:$4 sm:$0xff]  }
 0x26b   : > { %13999 = vmatpush2.bf16.msra.mxu0 %v16491_v58  ;;  %v16582_v58 = vld [vmem:[%s19829_s7 + $0x5c0] ss:$8 sps:$4 sm:$0xff]  }
 0x26c   : > { %14000 = vmatprep.subr.bf16.mxu0 %v16499_v59  ;;  %v16590_v59 = vld [vmem:[%s19829_s7 + $0x5b4] ss:$8 sps:$4 sm:$0xff]  }
 0x26d   : > { %14040 = vmatpush2.bf16.msra.mxu1 %v16494_v60  ;;  %v16585_v60 = vld [vmem:[%s19829_s7 + $0x4b0] ss:$8 sps:$4 sm:$0xff]  }
 0x26e   : > { %14041 = vmatprep.subr.bf16.mxu1 %v16502_v62  ;;  %v16593_v62 = vld [vmem:[%s19829_s7 + $0x4a4] ss:$8 sps:$4 sm:$0xff]  }
 0x26f   : > { %14001 = vmatpush2.bf16.msra.mxu0 %v16497_v63  ;;  %v16588_v63 = vld [vmem:[%s19829_s7 + $0x5b0] ss:$8 sps:$4 sm:$0xff]  }
 0x270   : > { %14002 = vmatprep.subr.bf16.mxu0 %v16505_v0  ;;  %v16596_v0 = vld [vmem:[%s19829_s7 + $0x5a4] ss:$8 sps:$4 sm:$0xff]  }
 0x271   : > { %14042 = vmatpush2.bf16.msra.mxu1 %v16500_v1  ;;  %v16591_v1 = vld [vmem:[%s19829_s7 + $0x4a0] ss:$8 sps:$4 sm:$0xff]  }
 0x272   : > { %14043 = vmatprep.subr.bf16.mxu1 %v16508_v2  ;;  %v16599_v2 = vld [vmem:[%s19829_s7 + $0x494] ss:$8 sps:$4 sm:$0xff]  }
 0x273   : > { %14003 = vmatpush2.bf16.msra.mxu0 %v16503_v3  ;;  %v16594_v3 = vld [vmem:[%s19829_s7 + $0x5a0] ss:$8 sps:$4 sm:$0xff]  }
 0x274   : > { %14054 = vmatprep.subr.bf16.mxu0 %v16513_v4  ;;  %v16602_v4 = vld [vmem:[%s19829_s7 + $0x594] ss:$8 sps:$4 sm:$0xff]  }
 0x275   : > { %14044 = vmatpush2.bf16.msra.mxu1 %v16506_v5  ;;  %v16597_v5 = vld [vmem:[%s19829_s7 + $0x490] ss:$8 sps:$4 sm:$0xff]  }
 0x276   : > { %14005 = vmatmul.mubr.bf16.vlgmr.msra.gmra.mxu0 %v15259_v6  ;;  %14095 = vmatprep.subr.bf16.mxu1 %v16518_v56  ;;  %v16605_v6 = vld [vmem:[%s19829_s7 + $0x484] ss:$8 sps:$4 sm:$0xff]   ;;  %v16600_v56 = vld [vmem:[%s19829_s7 + $0x590] ss:$8 sps:$4 sm:$0xff]  }
 0x277   : > { %14055 = vmatpush1.bf16.msra.mxu0 %v16511_v7  ;;  %14086 = vmatprep.mubr.bf16.mxu0 %v15264_v61  ;;  %v16608_v7 = vld [vmem:[%s19829_s7 + $0x584] ss:$8 sps:$4 sm:$0xff]   ;;  %v16618_v61 = vld [vmem:[%s19829_s7 + $0x774] ss:$8 sps:$4 sm:$0xff]  }
 0x278   : > { %14046 = vmatmul.mubr.bf16.vlgmr.msra.gmra.mxu1 %v15261_v8  ;;  %14056 = vmatprep.subr.bf16.mxu0 %v16521_v57  ;;  %v16603_v8 = vld [vmem:[%s19829_s7 + $0x480] ss:$8 sps:$4 sm:$0xff]   ;;  %v16613_v57 = vld [vmem:[%s19829_s7 + $0x674] ss:$8 sps:$4 sm:$0xff]  }
 0x279   : > { %14096 = vmatpush1.bf16.msra.mxu1 %v16516_v10  ;;  %14127 = vmatprep.mubr.bf16.mxu1 %v15266_v14  ;;  %v20062_v10 = vld [vmem:[%s21131_s0 + $0x30] sm:$0xff]  ;;  %v20071_v14 = vld [vmem:[%s21131_s0 + $0x38] sm:$0xff] }
 0x27a   : > { %14097 = vmatprep.subr.bf16.mxu1 %v16524_v11  ;;  %v16606_v11 = vld [vmem:[%s19829_s7 + $0x580] ss:$8 sps:$4 sm:$0xff]  }
 0x27b   : > { %14057 = vmatpush1.bf16.msra.mxu0 %v16519_v13  ;;  %v15263_v13 = vcombine.low %v19988_v9, %v19988_v9  ;;  %v16616_v9 = vld [vmem:[%s19829_s7 + $0x770] ss:$8 sps:$4 sm:$0xff]  }
 0x27c   : > { %14058 = vmatprep.subr.bf16.mxu0 %v16527_v15  ;;  %v16611_v15 = vld [vmem:[%s19829_s7 + $0x670] ss:$8 sps:$4 sm:$0xff]  }
 0x27d   : > { %14098 = vmatpush1.bf16.msra.mxu1 %v16522_v16  ;;  %v15268_v16 = vcombine.high %v20062_v10, %v20062_v10 }
 0x27e   : > { %14099 = vmatprep.subr.bf16.mxu1 %v16530_v17  ;;  %v15265_v17 = vcombine.low %v19997_v12, %v19997_v12  ;;  %v16627_v12 = vld [vmem:[%s19829_s7 + $0x654] ss:$8 sps:$4 sm:$0xff]  }
 0x27f   : > { %14059 = vmatpush1.bf16.msra.mxu0 %v16525_v18  ;;  %v16621_v18 = vld [vmem:[%s19829_s7 + $0x664] ss:$8 sps:$4 sm:$0xff]  }
 0x280   : > { %14060 = vmatprep.subr.bf16.mxu0 %v16533_v19  ;;  %v15270_v19 = vcombine.high %v20071_v14, %v20071_v14 }
 0x281   : > { %14100 = vmatpush1.bf16.msra.mxu1 %v16528_v20  ;;  %v16624_v20 = vld [vmem:[%s19829_s7 + $0x764] ss:$8 sps:$4 sm:$0xff]  }
 0x282   : > { %14101 = vmatprep.subr.bf16.mxu1 %v16536_v21  ;;  %v16619_v21 = vld [vmem:[%s19829_s7 + $0x660] ss:$8 sps:$4 sm:$0xff]  }
 0x283   : > { %14061 = vmatpush1.bf16.msra.mxu0 %v16531_v22  ;;  %v16622_v22 = vld [vmem:[%s19829_s7 + $0x760] ss:$8 sps:$4 sm:$0xff]  }
 0x284   : > { %14062 = vmatprep.subr.bf16.mxu0 %v16539_v23  ;;  %v16630_v23 = vld [vmem:[%s19829_s7 + $0x754] ss:$8 sps:$4 sm:$0xff]  }
 0x285   : > { %14102 = vmatpush1.bf16.msra.mxu1 %v16534_v24  ;;  %v16625_v24 = vld [vmem:[%s19829_s7 + $0x650] ss:$8 sps:$4 sm:$0xff]  }
 0x286   : > { %14103 = vmatprep.subr.bf16.mxu1 %v16542_v25  ;;  %v16633_v25 = vld [vmem:[%s19829_s7 + $0x644] ss:$8 sps:$4 sm:$0xff]  }
 0x287   : > { %14063 = vmatpush1.bf16.msra.mxu0 %v16537_v26  ;;  %v16628_v26 = vld [vmem:[%s19829_s7 + $0x750] ss:$8 sps:$4 sm:$0xff]  }
 0x288   : > { %14064 = vmatprep.subr.bf16.mxu0 %v16545_v27  ;;  %v16636_v27 = vld [vmem:[%s19829_s7 + $0x744] ss:$8 sps:$4 sm:$0xff]  }
 0x289   : > { %14104 = vmatpush1.bf16.msra.mxu1 %v16540_v28  ;;  %v16631_v28 = vld [vmem:[%s19829_s7 + $0x640] ss:$8 sps:$4 sm:$0xff]  }
 0x28a   : > { %14105 = vmatprep.subr.bf16.mxu1 %v16548_v29  ;;  %v16639_v29 = vld [vmem:[%s19829_s7 + $0x634] ss:$8 sps:$4 sm:$0xff]  }
 0x28b   : > { %14065 = vmatpush1.bf16.msra.mxu0 %v16543_v30  ;;  %v16634_v30 = vld [vmem:[%s19829_s7 + $0x740] ss:$8 sps:$4 sm:$0xff]  }
 0x28c   : > { %14066 = vmatprep.subr.bf16.mxu0 %v16551_v31  ;;  %v16642_v31 = vld [vmem:[%s19829_s7 + $0x734] ss:$8 sps:$4 sm:$0xff]  }
 0x28d   : > { %14106 = vmatpush1.bf16.msra.mxu1 %v16546_v32  ;;  %v16637_v32 = vld [vmem:[%s19829_s7 + $0x630] ss:$8 sps:$4 sm:$0xff]  }
 0x28e   : > { %14107 = vmatprep.subr.bf16.mxu1 %v16554_v33  ;;  %v16645_v33 = vld [vmem:[%s19829_s7 + $0x624] ss:$8 sps:$4 sm:$0xff]  }
 0x28f   : > { %14067 = vmatpush1.bf16.msra.mxu0 %v16549_v34  ;;  %v16640_v34 = vld [vmem:[%s19829_s7 + $0x730] ss:$8 sps:$4 sm:$0xff]  }
 0x290   : > { %14068 = vmatprep.subr.bf16.mxu0 %v16557_v35  ;;  %v16648_v35 = vld [vmem:[%s19829_s7 + $0x724] ss:$8 sps:$4 sm:$0xff]  }
 0x291   : > { %14108 = vmatpush1.bf16.msra.mxu1 %v16552_v36  ;;  %v16643_v36 = vld [vmem:[%s19829_s7 + $0x620] ss:$8 sps:$4 sm:$0xff]  }
 0x292   : > { %14109 = vmatprep.subr.bf16.mxu1 %v16560_v37  ;;  %v16651_v37 = vld [vmem:[%s19829_s7 + $0x614] ss:$8 sps:$4 sm:$0xff]  }
 0x293   : > { %14069 = vmatpush1.bf16.msra.mxu0 %v16555_v38  ;;  %v16646_v38 = vld [vmem:[%s19829_s7 + $0x720] ss:$8 sps:$4 sm:$0xff]  }
 0x294   : > { %14070 = vmatprep.subr.bf16.mxu0 %v16563_v39  ;;  %v16654_v39 = vld [vmem:[%s19829_s7 + $0x714] ss:$8 sps:$4 sm:$0xff]  }
 0x295   : > { %14110 = vmatpush1.bf16.msra.mxu1 %v16558_v40  ;;  %v16649_v40 = vld [vmem:[%s19829_s7 + $0x610] ss:$8 sps:$4 sm:$0xff]  }
 0x296   : > { %14111 = vmatprep.subr.bf16.mxu1 %v16566_v41  ;;  %v16657_v41 = vld [vmem:[%s19829_s7 + $0x604] ss:$8 sps:$4 sm:$0xff]  }
 0x297   : > { %14071 = vmatpush2.bf16.msra.mxu0 %v16561_v42  ;;  %v16652_v42 = vld [vmem:[%s19829_s7 + $0x710] ss:$8 sps:$4 sm:$0xff]  }
 0x298   : > { %14072 = vmatprep.subr.bf16.mxu0 %v16569_v43  ;;  %v16660_v43 = vld [vmem:[%s19829_s7 + $0x704] ss:$8 sps:$4 sm:$0xff]  }
 0x299   : > { %14112 = vmatpush2.bf16.msra.mxu1 %v16564_v44  ;;  %v16655_v44 = vld [vmem:[%s19829_s7 + $0x600] ss:$8 sps:$4 sm:$0xff]  }
 0x29a   : > { %14113 = vmatprep.subr.bf16.mxu1 %v16572_v45  ;;  %v16663_v45 = vld [vmem:[%s19829_s7 + $0x6f4] ss:$8 sps:$4 sm:$0xff]  }
 0x29b   : > { %14073 = vmatpush2.bf16.msra.mxu0 %v16567_v46  ;;  %v16658_v46 = vld [vmem:[%s19829_s7 + $0x700] ss:$8 sps:$4 sm:$0xff]  }
 0x29c   : > { %14074 = vmatprep.subr.bf16.mxu0 %v16575_v47  ;;  %v16666_v47 = vld [vmem:[%s19829_s7 + $0x7f4] ss:$8 sps:$4 sm:$0xff]  }
 0x29d   : > { %14114 = vmatpush2.bf16.msra.mxu1 %v16570_v48  ;;  %v16661_v48 = vld [vmem:[%s19829_s7 + $0x6f0] ss:$8 sps:$4 sm:$0xff]  }
 0x29e   : > { %14115 = vmatprep.subr.bf16.mxu1 %v16578_v49  ;;  %v16669_v49 = vld [vmem:[%s19829_s7 + $0x6e4] ss:$8 sps:$4 sm:$0xff]  }
 0x29f   : > { %14075 = vmatpush2.bf16.msra.mxu0 %v16573_v50  ;;  %v16664_v50 = vld [vmem:[%s19829_s7 + $0x7f0] ss:$8 sps:$4 sm:$0xff]  }
 0x2a0   : > { %14076 = vmatprep.subr.bf16.mxu0 %v16581_v51  ;;  %v16672_v51 = vld [vmem:[%s19829_s7 + $0x7e4] ss:$8 sps:$4 sm:$0xff]  }
 0x2a1   : > { %14116 = vmatpush2.bf16.msra.mxu1 %v16576_v52  ;;  %v16667_v52 = vld [vmem:[%s19829_s7 + $0x6e0] ss:$8 sps:$4 sm:$0xff]  }
 0x2a2   : > { %14117 = vmatprep.subr.bf16.mxu1 %v16584_v53  ;;  %v16675_v53 = vld [vmem:[%s19829_s7 + $0x6d4] ss:$8 sps:$4 sm:$0xff]  }
 0x2a3   : > { %14077 = vmatpush2.bf16.msra.mxu0 %v16579_v54  ;;  %v16670_v54 = vld [vmem:[%s19829_s7 + $0x7e0] ss:$8 sps:$4 sm:$0xff]  }
 0x2a4   : > { %14078 = vmatprep.subr.bf16.mxu0 %v16587_v55  ;;  %v16678_v55 = vld [vmem:[%s19829_s7 + $0x7d4] ss:$8 sps:$4 sm:$0xff]  }
 0x2a5   : > { %14118 = vmatpush2.bf16.msra.mxu1 %v16582_v58  ;;  %v16673_v58 = vld [vmem:[%s19829_s7 + $0x6d0] ss:$8 sps:$4 sm:$0xff]  }
 0x2a6   : > { %14119 = vmatprep.subr.bf16.mxu1 %v16590_v59  ;;  %v16681_v59 = vld [vmem:[%s19829_s7 + $0x6c4] ss:$8 sps:$4 sm:$0xff]  }
 0x2a7   : > { %14079 = vmatpush2.bf16.msra.mxu0 %v16585_v60  ;;  %v16676_v60 = vld [vmem:[%s19829_s7 + $0x7d0] ss:$8 sps:$4 sm:$0xff]  }
 0x2a8   : > { %14080 = vmatprep.subr.bf16.mxu0 %v16593_v62  ;;  %v16684_v62 = vld [vmem:[%s19829_s7 + $0x7c4] ss:$8 sps:$4 sm:$0xff]  }
 0x2a9   : > { %14120 = vmatpush2.bf16.msra.mxu1 %v16588_v63  ;;  %v16679_v63 = vld [vmem:[%s19829_s7 + $0x6c0] ss:$8 sps:$4 sm:$0xff]  }
 0x2aa   : > { %14121 = vmatprep.subr.bf16.mxu1 %v16596_v0  ;;  %v16687_v0 = vld [vmem:[%s19829_s7 + $0x6b4] ss:$8 sps:$4 sm:$0xff]  }
 0x2ab   : > { %14081 = vmatpush2.bf16.msra.mxu0 %v16591_v1  ;;  %v16682_v1 = vld [vmem:[%s19829_s7 + $0x7c0] ss:$8 sps:$4 sm:$0xff]  }
 0x2ac   : > { %14082 = vmatprep.subr.bf16.mxu0 %v16599_v2  ;;  %v16690_v2 = vld [vmem:[%s19829_s7 + $0x7b4] ss:$8 sps:$4 sm:$0xff]  }
 0x2ad   : > { %14122 = vmatpush2.bf16.msra.mxu1 %v16594_v3  ;;  %v16685_v3 = vld [vmem:[%s19829_s7 + $0x6b0] ss:$8 sps:$4 sm:$0xff]  }
 0x2ae   : > { %14123 = vmatprep.subr.bf16.mxu1 %v16602_v4  ;;  %v16693_v4 = vld [vmem:[%s19829_s7 + $0x6a4] ss:$8 sps:$4 sm:$0xff]  }
 0x2af   : > { %14083 = vmatpush2.bf16.msra.mxu0 %v16597_v5  ;;  %v16688_v5 = vld [vmem:[%s19829_s7 + $0x7b0] ss:$8 sps:$4 sm:$0xff]  }
 0x2b0   : > { %14084 = vmatprep.subr.bf16.mxu0 %v16605_v6  ;;  %v16696_v6 = vld [vmem:[%s19829_s7 + $0x7a4] ss:$8 sps:$4 sm:$0xff]  }
 0x2b1   : > { %14124 = vmatpush2.bf16.msra.mxu1 %v16600_v56  ;;  %v16691_v56 = vld [vmem:[%s19829_s7 + $0x6a0] ss:$8 sps:$4 sm:$0xff]  }
 0x2b2   : > { %14125 = vmatprep.subr.bf16.mxu1 %v16608_v7  ;;  %v8907_v7 = vlaneseq }
 0x2b3   : > { %14085 = vmatpush2.bf16.msra.mxu0 %v16603_v8  ;;  %v16699_v8 = vld [vmem:[%s19829_s7 + $0x694] ss:$8 sps:$4 sm:$0xff]  }
 0x2b4   : > { %14136 = vmatprep.subr.bf16.mxu0 %v16613_v57  ;;  %v16694_v57 = vld [vmem:[%s19829_s7 + $0x7a0] ss:$8 sps:$4 sm:$0xff]  }
 0x2b5   : > { %14126 = vmatpush2.bf16.msra.mxu1 %v16606_v11  ;;  %v16702_v11 = vld [vmem:[%s19829_s7 + $0x794] ss:$8 sps:$4 sm:$0xff]  }
 0x2b6   : > { %14087 = vmatmul.mubr.bf16.vlgmr.msra.gmra.mxu0 %v15263_v13  ;;  %14177 = vmatprep.subr.bf16.mxu1 %v16618_v61  ;;  %v16697_v61 = vld [vmem:[%s19829_s7 + $0x690] ss:$8 sps:$4 sm:$0xff]   ;;  %v8908_v13 = vshrl.u32 %v8907_v7, 7  ;;  %v16760_v7 = vld [vmem:[%s19829_s7 + $0x904] ss:$8 sps:$4 sm:$0xff]  }
 0x2b7   : > { %14137 = vmatpush1.bf16.msra.mxu0 %v16611_v15  ;;  %14168 = vmatprep.mubr.bf16.mxu0 %v15268_v16  ;;  %v16705_v15 = vld [vmem:[%s19829_s7 + $0x684] ss:$8 sps:$4 sm:$0xff]   ;;  %v16700_v16 = vld [vmem:[%s19829_s7 + $0x790] ss:$8 sps:$4 sm:$0xff]  }
 0x2b8   : > { %14128 = vmatmul.mubr.bf16.vlgmr.msra.gmra.mxu1 %v15265_v17  ;;  %14138 = vmatprep.subr.bf16.mxu0 %v16621_v18  ;;  %v16703_v17 = vld [vmem:[%s19829_s7 + $0x680] ss:$8 sps:$4 sm:$0xff]   ;;  %v16708_v18 = vld [vmem:[%s19829_s7 + $0x784] ss:$8 sps:$4 sm:$0xff]  }
 0x2b9   : > { %14178 = vmatpush1.bf16.msra.mxu1 %v16616_v9  ;;  %14209 = vmatprep.mubr.bf16.mxu1 %v15270_v19  ;;  %v8905_v9 = vld [vmem:[%s7910_s28] sm:$0x3]  ;;  %v8909_v19 = vsub.s32 0, %v8908_v13 }
 0x2ba   : > { %14179 = vmatprep.subr.bf16.mxu1 %v16624_v20  ;;  %v16713_v20 = vld [vmem:[%s19829_s7 + $0x874] ss:$8 sps:$4 sm:$0xff]  }
 0x2bb   : > { %14139 = vmatpush1.bf16.msra.mxu0 %v16619_v21  ;;  %v20151_v21 = vld [vmem:[%s21131_s0 + $0x40] sm:$0xff] }
 0x2bc   : > { %14140 = vmatprep.subr.bf16.mxu0 %v16627_v12  ;;  %v16706_v12 = vld [vmem:[%s19829_s7 + $0x780] ss:$8 sps:$4 sm:$0xff]  }
 0x2bd   : > { %14180 = vmatpush1.bf16.msra.mxu1 %v16622_v22  ;;  %v8913_v22 = vsub.s32 1, %v8908_v13  ;;  %v16764_v13 = vld [vmem:[%s19829_s7 + $0x9f0] ss:$8 sps:$4 sm:$0xff]  }
 0x2be   : > { %14181 = vmatprep.subr.bf16.mxu1 %v16630_v23  ;;  %v15267_v23 = vcombine.low %v20062_v10, %v20062_v10 }
 0x2bf   : > { %14141 = vmatpush1.bf16.msra.mxu0 %v16625_v24  ;;  %v16718_v24 = vld [vmem:[%s19829_s7 + $0x974] ss:$8 sps:$4 sm:$0xff]   ;;  %v8914_v10 = vrot.slane %v8905_v9, %v8913_v22  ;;  %v16781_v22 = vld [vmem:[%s19829_s7 + $0x8c4] ss:$8 sps:$4 sm:$0xff]  }
 0x2c0   : > { %14142 = vmatprep.subr.bf16.mxu0 %v16633_v25  ;;  %v20160_v25 = vld [vmem:[%s21131_s0 + $0x48] sm:$0xff] }
 0x2c1   : > { %14182 = vmatpush1.bf16.msra.mxu1 %v16628_v26  ;;  %v8910_v26 = vrot.slane %v8905_v9, %v8909_v19  ;;  %v16775_v9 = vld [vmem:[%s19829_s7 + $0x8d4] ss:$8 sps:$4 sm:$0xff]   ;;  %v16773_v19 = vld [vmem:[%s19829_s7 + $0x8d0] ss:$8 sps:$4 sm:$0xff]  }
 0x2c2   : > { %14183 = vmatprep.subr.bf16.mxu1 %v16636_v27  ;;  %v16711_v27 = vld [vmem:[%s19829_s7 + $0x870] ss:$8 sps:$4 sm:$0xff]  }
 0x2c3   : > { %14143 = vmatpush1.bf16.msra.mxu0 %v16631_v28  ;;  %v15272_v28 = vcombine.high %v20151_v21, %v20151_v21 }
 0x2c4   : > { %14144 = vmatprep.subr.bf16.mxu0 %v16639_v29  ;;  %v15269_v29 = vcombine.low %v20071_v14, %v20071_v14 }
 0x2c5   : > { %14184 = vmatpush1.bf16.msra.mxu1 %v16634_v30  ;;  %v16721_v30 = vld [vmem:[%s19829_s7 + $0x864] ss:$8 sps:$4 sm:$0xff]  }
 0x2c6   : > { %14185 = vmatprep.subr.bf16.mxu1 %v16642_v31  ;;  %v16716_v31 = vld [vmem:[%s19829_s7 + $0x970] ss:$8 sps:$4 sm:$0xff]  }
 0x2c7   : > { %14145 = vmatpush1.bf16.msra.mxu0 %v16637_v32  ;;  %v15274_v32 = vcombine.high %v20160_v25, %v20160_v25 }
 0x2c8   : > { %14146 = vmatprep.subr.bf16.mxu0 %v16645_v33 }
 0x2c9   : > { %14186 = vmatpush1.bf16.msra.mxu1 %v16640_v34  ;;  %v16724_v34 = vld [vmem:[%s19829_s7 + $0x964] ss:$8 sps:$4 sm:$0xff]  }
 0x2ca   : > { %14187 = vmatprep.subr.bf16.mxu1 %v16648_v35 }
 0x2cb   : > { %14147 = vmatpush1.bf16.msra.mxu0 %v16643_v36  ;;  %v16719_v36 = vld [vmem:[%s19829_s7 + $0x860] ss:$8 sps:$4 sm:$0xff]  }
 0x2cc   : > { %14148 = vmatprep.subr.bf16.mxu0 %v16651_v37 }
 0x2cd   : > { %14188 = vmatpush1.bf16.msra.mxu1 %v16646_v38  ;;  %v16727_v38 = vld [vmem:[%s19829_s7 + $0x854] ss:$8 sps:$4 sm:$0xff]  }
 0x2ce   : > { %14189 = vmatprep.subr.bf16.mxu1 %v16654_v39 }
 0x2cf   : > { %14149 = vmatpush1.bf16.msra.mxu0 %v16649_v40 }
 0x2d0   : > { %14150 = vmatprep.subr.bf16.mxu0 %v16657_v41  ;;  %v16722_v41 = vld [vmem:[%s19829_s7 + $0x960] ss:$8 sps:$4 sm:$0xff]  }
 0x2d1   : > { %14190 = vmatpush1.bf16.msra.mxu1 %v16652_v42 }
 0x2d2   : > { %14191 = vmatprep.subr.bf16.mxu1 %v16660_v43 }
 0x2d3   : > { %14151 = vmatpush1.bf16.msra.mxu0 %v16655_v44  ;;  %v16730_v44 = vld [vmem:[%s19829_s7 + $0x954] ss:$8 sps:$4 sm:$0xff]  }
 0x2d4   : > { %14152 = vmatprep.subr.bf16.mxu0 %v16663_v45 }
 0x2d5   : > { %14192 = vmatpush1.bf16.msra.mxu1 %v16658_v46  ;;  %v16725_v46 = vld [vmem:[%s19829_s7 + $0x850] ss:$8 sps:$4 sm:$0xff]  }
 0x2d6   : > { %14193 = vmatprep.subr.bf16.mxu1 %v16666_v47 }
 0x2d7   : > { %14153 = vmatpush2.bf16.msra.mxu0 %v16661_v48  ;;  %v16733_v48 = vld [vmem:[%s19829_s7 + $0x844] ss:$8 sps:$4 sm:$0xff]  }
 0x2d8   : > { %14154 = vmatprep.subr.bf16.mxu0 %v16669_v49 }
 0x2d9   : > { %14194 = vmatpush2.bf16.msra.mxu1 %v16664_v50  ;;  %v16728_v50 = vld [vmem:[%s19829_s7 + $0x950] ss:$8 sps:$4 sm:$0xff]  }
 0x2da   : > { %14195 = vmatprep.subr.bf16.mxu1 %v16672_v51  ;;  %v16731_v51 = vld [vmem:[%s19829_s7 + $0x840] ss:$8 sps:$4 sm:$0xff]  }
 0x2db   : > { %14155 = vmatpush2.bf16.msra.mxu0 %v16667_v52  ;;  %v16736_v52 = vld [vmem:[%s19829_s7 + $0x944] ss:$8 sps:$4 sm:$0xff]  }
 0x2dc   : > { %14156 = vmatprep.subr.bf16.mxu0 %v16675_v53 }
 0x2dd   : > { %14196 = vmatpush2.bf16.msra.mxu1 %v16670_v54  ;;  %v16734_v54 = vld [vmem:[%s19829_s7 + $0x940] ss:$8 sps:$4 sm:$0xff]  }
 0x2de   : > { %14197 = vmatprep.subr.bf16.mxu1 %v16678_v55  ;;  %v16739_v55 = vld [vmem:[%s19829_s7 + $0x834] ss:$8 sps:$4 sm:$0xff]  }
 0x2df   : > { %14157 = vmatpush2.bf16.msra.mxu0 %v16673_v58  ;;  %v16737_v58 = vld [vmem:[%s19829_s7 + $0x830] ss:$8 sps:$4 sm:$0xff]  }
 0x2e0   : > { %14158 = vmatprep.subr.bf16.mxu0 %v16681_v59  ;;  %v16742_v59 = vld [vmem:[%s19829_s7 + $0x934] ss:$8 sps:$4 sm:$0xff]  }
 0x2e1   : > { %14198 = vmatpush2.bf16.msra.mxu1 %v16676_v60  ;;  %v16740_v60 = vld [vmem:[%s19829_s7 + $0x930] ss:$8 sps:$4 sm:$0xff]  }
 0x2e2   : > { %14199 = vmatprep.subr.bf16.mxu1 %v16684_v62  ;;  %v16745_v62 = vld [vmem:[%s19829_s7 + $0x824] ss:$8 sps:$4 sm:$0xff]  }
 0x2e3   : > { %14159 = vmatpush2.bf16.msra.mxu0 %v16679_v63  ;;  %v16743_v63 = vld [vmem:[%s19829_s7 + $0x820] ss:$8 sps:$4 sm:$0xff]  }
 0x2e4   : > { %14160 = vmatprep.subr.bf16.mxu0 %v16687_v0  ;;  %v16748_v0 = vld [vmem:[%s19829_s7 + $0x924] ss:$8 sps:$4 sm:$0xff]  }
 0x2e5   : > { %14200 = vmatpush2.bf16.msra.mxu1 %v16682_v1  ;;  %v16746_v1 = vld [vmem:[%s19829_s7 + $0x920] ss:$8 sps:$4 sm:$0xff]  }
 0x2e6   : > { %14201 = vmatprep.subr.bf16.mxu1 %v16690_v2  ;;  %v16751_v2 = vld [vmem:[%s19829_s7 + $0x814] ss:$8 sps:$4 sm:$0xff]  }
 0x2e7   : > { %14161 = vmatpush2.bf16.msra.mxu0 %v16685_v3  ;;  %v16749_v3 = vld [vmem:[%s19829_s7 + $0x810] ss:$8 sps:$4 sm:$0xff]  }
 0x2e8   : > { %14162 = vmatprep.subr.bf16.mxu0 %v16693_v4  ;;  %v16754_v4 = vld [vmem:[%s19829_s7 + $0x914] ss:$8 sps:$4 sm:$0xff]  }
 0x2e9   : > { %14202 = vmatpush2.bf16.msra.mxu1 %v16688_v5  ;;  %v16752_v5 = vld [vmem:[%s19829_s7 + $0x910] ss:$8 sps:$4 sm:$0xff]  }
 0x2ea   : > { %14203 = vmatprep.subr.bf16.mxu1 %v16696_v6  ;;  %v16757_v6 = vld [vmem:[%s19829_s7 + $0x804] ss:$8 sps:$4 sm:$0xff]  }
 0x2eb   : > { %14163 = vmatpush2.bf16.msra.mxu0 %v16691_v56  ;;  %v16755_v56 = vld [vmem:[%s19829_s7 + $0x800] ss:$8 sps:$4 sm:$0xff]  }
 0x2ec   : > { %14164 = vmatprep.subr.bf16.mxu0 %v16699_v8  ;;  %v16758_v8 = vld [vmem:[%s19829_s7 + $0x900] ss:$8 sps:$4 sm:$0xff]  }
 0x2ed   : > { %14204 = vmatpush2.bf16.msra.mxu1 %v16694_v57  ;;  %v16763_v57 = vld [vmem:[%s19829_s7 + $0x8f4] ss:$8 sps:$4 sm:$0xff]  }
 0x2ee   : > { %14205 = vmatprep.subr.bf16.mxu1 %v16702_v11  ;;  %v16761_v11 = vld [vmem:[%s19829_s7 + $0x8f0] ss:$8 sps:$4 sm:$0xff]  }
 0x2ef   : > { %14165 = vmatpush2.bf16.msra.mxu0 %v16697_v61  ;;  %v16766_v61 = vld [vmem:[%s19829_s7 + $0x9f4] ss:$8 sps:$4 sm:$0xff]  }
 0x2f0   : > { %14166 = vmatprep.subr.bf16.mxu0 %v16705_v15  ;;  %v16769_v15 = vld [vmem:[%s19829_s7 + $0x8e4] ss:$8 sps:$4 sm:$0xff]  }
 0x2f1   : > { %14206 = vmatpush2.bf16.msra.mxu1 %v16700_v16  ;;  %v16767_v16 = vld [vmem:[%s19829_s7 + $0x8e0] ss:$8 sps:$4 sm:$0xff]  }
 0x2f2   : > { %14207 = vmatprep.subr.bf16.mxu1 %v16708_v18  ;;  %v16770_v18 = vld [vmem:[%s19829_s7 + $0x9e0] ss:$8 sps:$4 sm:$0xff]  }
 0x2f3   : > { %14167 = vmatpush2.bf16.msra.mxu0 %v16703_v17  ;;  %v16772_v17 = vld [vmem:[%s19829_s7 + $0x9e4] ss:$8 sps:$4 sm:$0xff]  }
 0x2f4   : > { %14218 = vmatprep.subr.bf16.mxu0 %v16713_v20  ;;  %v16778_v20 = vld [vmem:[%s19829_s7 + $0x9d4] ss:$8 sps:$4 sm:$0xff]  }
 0x2f5   : > { %14208 = vmatpush2.bf16.msra.mxu1 %v16706_v12  ;;  %v16776_v12 = vld [vmem:[%s19829_s7 + $0x9d0] ss:$8 sps:$4 sm:$0xff]  }
 0x2f6   : > { %v13924_v33 = vpop.f32.mrf.mxu0  ;;  %14169 = vmatmul.mubr.bf16.vlgmr.msra.gmra.mxu0 %v15267_v23  ;;  %14259 = vmatprep.subr.bf16.mxu1 %v16718_v24  ;;  %v16779_v23 = vld [vmem:[%s19829_s7 + $0x8c0] ss:$8 sps:$4 sm:$0xff]   ;;  %v16784_v24 = vld [vmem:[%s19829_s7 + $0x9c4] ss:$8 sps:$4 sm:$0xff]  }
 0x2f7   : > { %v13925_v35 = vadd.f32 %v13924_v33, %v8910_v26  ;;  %14219 = vmatpush1.bf16.msra.mxu0 %v16711_v27  ;;  %14250 = vmatprep.mubr.bf16.mxu0 %v15272_v28  ;;  %v16782_v26 = vld [vmem:[%s19829_s7 + $0x9c0] ss:$8 sps:$4 sm:$0xff]   ;;  %v16787_v27 = vld [vmem:[%s19829_s7 + $0x8b4] ss:$8 sps:$4 sm:$0xff]   ;;  %v16785_v28 = vld [vmem:[%s19829_s7 + $0x8b0] ss:$8 sps:$4 sm:$0xff]  }
 0x2f8   : > { %v13926_v37 = vpop.f32.mrf.mxu0  ;;  %v13965_v14 = vpop.f32.mrf.mxu1  ;;  %14210 = vmatmul.mubr.bf16.vlgmr.msra.gmra.mxu1 %v15269_v29  ;;  %14220 = vmatprep.subr.bf16.mxu0 %v16721_v30  ;;  %v16790_v29 = vld [vmem:[%s19829_s7 + $0x9b4] ss:$8 sps:$4 sm:$0xff]   ;;  %v16788_v30 = vld [vmem:[%s19829_s7 + $0x9b0] ss:$8 sps:$4 sm:$0xff]   ;;  %v16794_v33 = vld [vmem:[%s19829_s7 + $0x9a0] ss:$8 sps:$4 sm:$0xff]  }
 0x2f9   : > { %v13927_v39 = vadd.f32 %v13926_v37, %v8914_v10  ;;  %v20174_v40 = vadd.f32 %v13965_v14, %v13925_v35  ;;  %14260 = vmatpush1.bf16.msra.mxu1 %v16716_v31  ;;  %14291 = vmatprep.mubr.bf16.mxu1 %v15274_v32  ;;  %v16793_v10 = vld [vmem:[%s19829_s7 + $0x8a4] ss:$8 sps:$4 sm:$0xff]   ;;  %v16791_v31 = vld [vmem:[%s19829_s7 + $0x8a0] ss:$8 sps:$4 sm:$0xff]   ;;  %v16797_v35 = vld [vmem:[%s19829_s7 + $0x890] ss:$8 sps:$4 sm:$0xff]  }
 0x2fa   : > { %v13928_v42 = vpop.f32.mrf.mxu0  ;;  %v13967_v43 = vpop.f32.mrf.mxu1  ;;  %14261 = vmatprep.subr.bf16.mxu1 %v16724_v34  ;;  %v16796_v32 = vld [vmem:[%s19829_s7 + $0x9a4] ss:$8 sps:$4 sm:$0xff]   ;;  %v16799_v34 = vld [vmem:[%s19829_s7 + $0x894] ss:$8 sps:$4 sm:$0xff]   ;;  %v16800_v37 = vld [vmem:[%s19829_s7 + $0x990] ss:$8 sps:$4 sm:$0xff]  }
 0x2fb   : > { %v20178_v45 = vadd.f32 %v13967_v43, %v13927_v39  ;;  %14221 = vmatpush1.bf16.msra.mxu0 %v16719_v36  ;;  %v16802_v36 = vld [vmem:[%s19829_s7 + $0x994] ss:$8 sps:$4 sm:$0xff]   ;;  %v16805_v14 = vld [vmem:[%s19829_s7 + $0x884] ss:$8 sps:$4 sm:$0xff]   ;;  %v16806_v43 = vld [vmem:[%s19829_s7 + $0x980] ss:$8 sps:$4 sm:$0xff]  }
 0x2fc   : > { %v13929_v47 = vpop.f32.mrf.mxu0  ;;  %14222 = vmatprep.subr.bf16.mxu0 %v16727_v38  ;;  %v13969_v49 = vpop.f32.mrf.mxu1  ;;  %v16803_v38 = vld [vmem:[%s19829_s7 + $0x880] ss:$8 sps:$4 sm:$0xff]   ;;  %v16808_v39 = vld [vmem:[%s19829_s7 + $0x984] ss:$8 sps:$4 sm:$0xff]   ;;  %v20237_v42 = vld [vmem:[%s21131_s0 + $0x50] sm:$0xff] }
 0x2fd   : > { %14262 = vmatpush1.bf16.msra.mxu1 %v16722_v41  ;;  %v16813_v41 = vld [vmem:[%s19829_s7 + $0xa74] ss:$8 sps:$4 sm:$0xff]   ;;  %v15276_v49 = vcombine.high %v20237_v42, %v20237_v42 }
 0x2fe   : > { %14263 = vmatprep.subr.bf16.mxu1 %v16730_v44  ;;  %v13970_v53 = vpop.f32.mrf.mxu1  ;;  %v15271_v44 = vcombine.low %v20151_v21, %v20151_v21  ;;  %v20246_v47 = vld [vmem:[%s21131_s0 + $0x58] sm:$0xff]  ;;  %v16819_v21 = vld [vmem:[%s19829_s7 + $0xa60] ss:$8 sps:$4 sm:$0xff]  }
 0x2ff   : > { %14223 = vmatpush1.bf16.msra.mxu0 %v16725_v46  ;;  %v16818_v46 = vld [vmem:[%s19829_s7 + $0xb74] ss:$8 sps:$4 sm:$0xff]   ;;  %v15278_v53 = vcombine.high %v20246_v47, %v20246_v47 }
 0x300   : > { %14224 = vmatprep.subr.bf16.mxu0 %v16733_v48  ;;  %v16811_v48 = vld [vmem:[%s19829_s7 + $0xa70] ss:$8 sps:$4 sm:$0xff]  }
 0x301   : > { %14264 = vmatpush1.bf16.msra.mxu1 %v16728_v50  ;;  %v15273_v50 = vcombine.low %v20160_v25, %v20160_v25 }
 0x302   : > { %14265 = vmatprep.subr.bf16.mxu1 %v16736_v52  ;;  %v16821_v52 = vld [vmem:[%s19829_s7 + $0xa64] ss:$8 sps:$4 sm:$0xff]  }
 0x303   : > { %14225 = vmatpush1.bf16.msra.mxu0 %v16731_v51  ;;  %v16816_v51 = vld [vmem:[%s19829_s7 + $0xb70] ss:$8 sps:$4 sm:$0xff]  }
 0x304   : > { %14226 = vmatprep.subr.bf16.mxu0 %v16739_v55  ;;  %v16824_v55 = vld [vmem:[%s19829_s7 + $0xb64] ss:$8 sps:$4 sm:$0xff]  }
 0x305   : > { %14266 = vmatpush1.bf16.msra.mxu1 %v16734_v54 }
 0x306   : > { %14267 = vmatprep.subr.bf16.mxu1 %v16742_v59  ;;  %v16822_v59 = vld [vmem:[%s19829_s7 + $0xb60] ss:$8 sps:$4 sm:$0xff]  }
 0x307   : > { %14227 = vmatpush1.bf16.msra.mxu0 %v16737_v58 }
 0x308   : > { %14228 = vmatprep.subr.bf16.mxu0 %v16745_v62  ;;  %v16827_v62 = vld [vmem:[%s19829_s7 + $0xa54] ss:$8 sps:$4 sm:$0xff]  }
 0x309   : > { %14268 = vmatpush1.bf16.msra.mxu1 %v16740_v60 }
 0x30a   : > { %14269 = vmatprep.subr.bf16.mxu1 %v16748_v0 }
 0x30b   : > { %14229 = vmatpush1.bf16.msra.mxu0 %v16743_v63 }
 0x30c   : > { %14230 = vmatprep.subr.bf16.mxu0 %v16751_v2 }
 0x30d   : > { %14270 = vmatpush1.bf16.msra.mxu1 %v16746_v1  ;;  %v16825_v1 = vld [vmem:[%s19829_s7 + $0xa50] ss:$8 sps:$4 sm:$0xff]  }
 0x30e   : > { %14271 = vmatprep.subr.bf16.mxu1 %v16754_v4 }
 0x30f   : > { %14231 = vmatpush1.bf16.msra.mxu0 %v16749_v3  ;;  %v16830_v3 = vld [vmem:[%s19829_s7 + $0xb54] ss:$8 sps:$4 sm:$0xff]  }
 0x310   : > { %14232 = vmatprep.subr.bf16.mxu0 %v16757_v6 }
 0x311   : > { %14272 = vmatpush1.bf16.msra.mxu1 %v16752_v5  ;;  %v16828_v5 = vld [vmem:[%s19829_s7 + $0xb50] ss:$8 sps:$4 sm:$0xff]  }
 0x312   : > { %14273 = vmatprep.subr.bf16.mxu1 %v16760_v7  ;;  %v16831_v7 = vld [vmem:[%s19829_s7 + $0xa40] ss:$8 sps:$4 sm:$0xff]  }
 0x313   : > { %14233 = vmatpush1.bf16.msra.mxu0 %v16755_v56 }
 0x314   : > { %14234 = vmatprep.subr.bf16.mxu0 %v16763_v57 }
 0x315   : > { %14274 = vmatpush1.bf16.msra.mxu1 %v16758_v8  ;;  %v16836_v8 = vld [vmem:[%s19829_s7 + $0xb44] ss:$8 sps:$4 sm:$0xff]  }
 0x316   : > { %14275 = vmatprep.subr.bf16.mxu1 %v16766_v61  ;;  %v16839_v61 = vld [vmem:[%s19829_s7 + $0xa34] ss:$8 sps:$4 sm:$0xff]  }
 0x317   : > { %14235 = vmatpush2.bf16.msra.mxu0 %v16761_v11  ;;  %v16834_v11 = vld [vmem:[%s19829_s7 + $0xb40] ss:$8 sps:$4 sm:$0xff]  }
 0x318   : > { %14236 = vmatprep.subr.bf16.mxu0 %v16769_v15  ;;  %v16842_v15 = vld [vmem:[%s19829_s7 + $0xb34] ss:$8 sps:$4 sm:$0xff]  }
 0x319   : > { %14276 = vmatpush2.bf16.msra.mxu1 %v16764_v13  ;;  %v16837_v13 = vld [vmem:[%s19829_s7 + $0xa30] ss:$8 sps:$4 sm:$0xff]  }
 0x31a   : > { %14277 = vmatprep.subr.bf16.mxu1 %v16772_v17  ;;  %v16845_v17 = vld [vmem:[%s19829_s7 + $0xa24] ss:$8 sps:$4 sm:$0xff]  }
 0x31b   : > { %14237 = vmatpush2.bf16.msra.mxu0 %v16767_v16  ;;  %v16840_v16 = vld [vmem:[%s19829_s7 + $0xb30] ss:$8 sps:$4 sm:$0xff]  }
 0x31c   : > { %14238 = vmatprep.subr.bf16.mxu0 %v16775_v9  ;;  %v16848_v9 = vld [vmem:[%s19829_s7 + $0xb24] ss:$8 sps:$4 sm:$0xff]  }
 0x31d   : > { %14278 = vmatpush2.bf16.msra.mxu1 %v16770_v18  ;;  %v16843_v18 = vld [vmem:[%s19829_s7 + $0xa20] ss:$8 sps:$4 sm:$0xff]  }
 0x31e   : > { %14279 = vmatprep.subr.bf16.mxu1 %v16778_v20  ;;  %v16851_v20 = vld [vmem:[%s19829_s7 + $0xa14] ss:$8 sps:$4 sm:$0xff]  }
 0x31f   : > { %14239 = vmatpush2.bf16.msra.mxu0 %v16773_v19  ;;  %v16846_v19 = vld [vmem:[%s19829_s7 + $0xb20] ss:$8 sps:$4 sm:$0xff]  }
 0x320   : > { %14240 = vmatprep.subr.bf16.mxu0 %v16781_v22  ;;  %v16854_v22 = vld [vmem:[%s19829_s7 + $0xb14] ss:$8 sps:$4 sm:$0xff]  }
 0x321   : > { %14280 = vmatpush2.bf16.msra.mxu1 %v16776_v12  ;;  %v16849_v12 = vld [vmem:[%s19829_s7 + $0xa10] ss:$8 sps:$4 sm:$0xff]  }
 0x322   : > { %14281 = vmatprep.subr.bf16.mxu1 %v16784_v24  ;;  %v16857_v24 = vld [vmem:[%s19829_s7 + $0xa04] ss:$8 sps:$4 sm:$0xff]  }
 0x323   : > { %14241 = vmatpush2.bf16.msra.mxu0 %v16779_v23  ;;  %v16852_v23 = vld [vmem:[%s19829_s7 + $0xb10] ss:$8 sps:$4 sm:$0xff]  }
 0x324   : > { %14242 = vmatprep.subr.bf16.mxu0 %v16787_v27  ;;  %v16860_v27 = vld [vmem:[%s19829_s7 + $0xb04] ss:$8 sps:$4 sm:$0xff]  }
 0x325   : > { %14282 = vmatpush2.bf16.msra.mxu1 %v16782_v26  ;;  %v16855_v26 = vld [vmem:[%s19829_s7 + $0xa00] ss:$8 sps:$4 sm:$0xff]  }
 0x326   : > { %14283 = vmatprep.subr.bf16.mxu1 %v16790_v29  ;;  %v16863_v29 = vld [vmem:[%s19829_s7 + $0xaf4] ss:$8 sps:$4 sm:$0xff]  }
 0x327   : > { %14243 = vmatpush2.bf16.msra.mxu0 %v16785_v28  ;;  %v16858_v28 = vld [vmem:[%s19829_s7 + $0xb00] ss:$8 sps:$4 sm:$0xff]  }
 0x328   : > { %14244 = vmatprep.subr.bf16.mxu0 %v16793_v10  ;;  %v16866_v10 = vld [vmem:[%s19829_s7 + $0xbf4] ss:$8 sps:$4 sm:$0xff]  }
 0x329   : > { %14284 = vmatpush2.bf16.msra.mxu1 %v16788_v30  ;;  %v16861_v30 = vld [vmem:[%s19829_s7 + $0xaf0] ss:$8 sps:$4 sm:$0xff]  }
 0x32a   : > { %14285 = vmatprep.subr.bf16.mxu1 %v16796_v32  ;;  %v16869_v32 = vld [vmem:[%s19829_s7 + $0xae4] ss:$8 sps:$4 sm:$0xff]  }
 0x32b   : > { %14245 = vmatpush2.bf16.msra.mxu0 %v16791_v31  ;;  %v16864_v31 = vld [vmem:[%s19829_s7 + $0xbf0] ss:$8 sps:$4 sm:$0xff]  }
 0x32c   : > { %14246 = vmatprep.subr.bf16.mxu0 %v16799_v34  ;;  %v16872_v34 = vld [vmem:[%s19829_s7 + $0xbe4] ss:$8 sps:$4 sm:$0xff]  }
 0x32d   : > { %14286 = vmatpush2.bf16.msra.mxu1 %v16794_v33  ;;  %v16867_v33 = vld [vmem:[%s19829_s7 + $0xae0] ss:$8 sps:$4 sm:$0xff]  }
 0x32e   : > { %14287 = vmatprep.subr.bf16.mxu1 %v16802_v36  ;;  %v16875_v36 = vld [vmem:[%s19829_s7 + $0xad4] ss:$8 sps:$4 sm:$0xff]  }
 0x32f   : > { %14247 = vmatpush2.bf16.msra.mxu0 %v16797_v35  ;;  %v16870_v35 = vld [vmem:[%s19829_s7 + $0xbe0] ss:$8 sps:$4 sm:$0xff]  }
 0x330   : > { %14248 = vmatprep.subr.bf16.mxu0 %v16805_v14  ;;  %v16878_v14 = vld [vmem:[%s19829_s7 + $0xbd4] ss:$8 sps:$4 sm:$0xff]  }
 0x331   : > { %14288 = vmatpush2.bf16.msra.mxu1 %v16800_v37  ;;  %v16873_v37 = vld [vmem:[%s19829_s7 + $0xad0] ss:$8 sps:$4 sm:$0xff]  }
 0x332   : > { %14289 = vmatprep.subr.bf16.mxu1 %v16808_v39  ;;  %v16881_v39 = vld [vmem:[%s19829_s7 + $0xac4] ss:$8 sps:$4 sm:$0xff]  }
 0x333   : > { %14249 = vmatpush2.bf16.msra.mxu0 %v16803_v38  ;;  %v16876_v38 = vld [vmem:[%s19829_s7 + $0xbd0] ss:$8 sps:$4 sm:$0xff]  }
 0x334   : > { %14300 = vmatprep.subr.bf16.mxu0 %v16813_v41  ;;  %v16879_v41 = vld [vmem:[%s19829_s7 + $0xac0] ss:$8 sps:$4 sm:$0xff]  }
 0x335   : > { %14290 = vmatpush2.bf16.msra.mxu1 %v16806_v43  ;;  %v16884_v43 = vld [vmem:[%s19829_s7 + $0xbc4] ss:$8 sps:$4 sm:$0xff]  }
 0x336   : > { %v14006_v54 = vpop.f32.mrf.mxu0  ;;  %14251 = vmatmul.mubr.bf16.vlgmr.msra.gmra.mxu0 %v15271_v44  ;;  %14341 = vmatprep.subr.bf16.mxu1 %v16818_v46  ;;  %v16882_v44 = vld [vmem:[%s19829_s7 + $0xbc0] ss:$8 sps:$4 sm:$0xff]   ;;  %v16887_v46 = vld [vmem:[%s19829_s7 + $0xab4] ss:$8 sps:$4 sm:$0xff]  }
 0x337   : > { %v14007_v58 = vadd.f32 %v14006_v54, %v20174_v40  ;;  %14301 = vmatpush1.bf16.msra.mxu0 %v16811_v48  ;;  %14332 = vmatprep.mubr.bf16.mxu0 %v15276_v49  ;;  %v16885_v48 = vld [vmem:[%s19829_s7 + $0xab0] ss:$8 sps:$4 sm:$0xff]   ;;  %v16890_v49 = vld [vmem:[%s19829_s7 + $0xbb4] ss:$8 sps:$4 sm:$0xff]  }
 0x338   : > { %v14008_v25 = vpop.f32.mrf.mxu0  ;;  %v14047_v60 = vpop.f32.mrf.mxu1  ;;  %14292 = vmatmul.mubr.bf16.vlgmr.msra.gmra.mxu1 %v15273_v50  ;;  %14302 = vmatprep.subr.bf16.mxu0 %v16821_v52  ;;  %v16888_v50 = vld [vmem:[%s19829_s7 + $0xbb0] ss:$8 sps:$4 sm:$0xff]   ;;  %v16891_v52 = vld [vmem:[%s19829_s7 + $0xaa0] ss:$8 sps:$4 sm:$0xff]   ;;  %v16899_v54 = vld [vmem:[%s19829_s7 + $0xa94] ss:$8 sps:$4 sm:$0xff]  }
 0x339   : > { %v14009_v63 = vadd.f32 %v14008_v25, %v20178_v45  ;;  %v20263_v0 = vadd.f32 %v14047_v60, %v14007_v58  ;;  %14342 = vmatpush1.bf16.msra.mxu1 %v16816_v51  ;;  %14373 = vmatprep.mubr.bf16.mxu1 %v15278_v53  ;;  %v16833_v45 = vld [vmem:[%s19829_s7 + $0xa44] ss:$8 sps:$4 sm:$0xff]   ;;  %v16894_v53 = vld [vmem:[%s19829_s7 + $0xba0] ss:$8 sps:$4 sm:$0xff]   ;;  %v16902_v58 = vld [vmem:[%s19829_s7 + $0xb94] ss:$8 sps:$4 sm:$0xff]  }
 0x33a   : > { %v14010_v40 = vpop.f32.mrf.mxu0  ;;  %v14049_v2 = vpop.f32.mrf.mxu1  ;;  %14343 = vmatprep.subr.bf16.mxu1 %v16824_v55  ;;  %v16893_v51 = vld [vmem:[%s19829_s7 + $0xaa4] ss:$8 sps:$4 sm:$0xff]   ;;  %v16897_v55 = vld [vmem:[%s19829_s7 + $0xa90] ss:$8 sps:$4 sm:$0xff]   ;;  %v16903_v60 = vld [vmem:[%s19829_s7 + $0xa80] ss:$8 sps:$4 sm:$0xff]  }
 0x33b   : > { %v20267_v4 = vadd.f32 %v14049_v2, %v14009_v63  ;;  %14303 = vmatpush1.bf16.msra.mxu0 %v16819_v21  ;;  %v16896_v21 = vld [vmem:[%s19829_s7 + $0xba4] ss:$8 sps:$4 sm:$0xff]   ;;  %v16913_v63 = vld [vmem:[%s19829_s7 + $0xc74] ss:$8 sps:$4 sm:$0xff]   ;;  %v16906_v40 = vld [vmem:[%s19829_s7 + $0xb80] ss:$8 sps:$4 sm:$0xff]   ;;  %v15275_v2 = vcombine.low %v20237_v42, %v20237_v42 }
 0x33c   : > { %v14011_v6 = vpop.f32.mrf.mxu0  ;;  %14304 = vmatprep.subr.bf16.mxu0 %v16827_v62  ;;  %v14051_v56 = vpop.f32.mrf.mxu1  ;;  %v16905_v25 = vld [vmem:[%s19829_s7 + $0xa84] ss:$8 sps:$4 sm:$0xff]   ;;  %v16919_v42 = vld [vmem:[%s19829_s7 + $0xc60] ss:$8 sps:$4 sm:$0xff]  }
 0x33d   : > { %14344 = vmatpush1.bf16.msra.mxu1 %v16822_v59  ;;  %v16900_v59 = vld [vmem:[%s19829_s7 + $0xb90] ss:$8 sps:$4 sm:$0xff]   ;;  %v16908_v62 = vld [vmem:[%s19829_s7 + $0xb84] ss:$8 sps:$4 sm:$0xff]   ;;  %v15277_v56 = vcombine.low %v20246_v47, %v20246_v47 }
 0x33e   : > { %14345 = vmatprep.subr.bf16.mxu1 %v16830_v3  ;;  %v14052_v57 = vpop.f32.mrf.mxu1  ;;  %v16918_v3 = vld [vmem:[%s19829_s7 + $0xd74] ss:$8 sps:$4 sm:$0xff]   ;;  %v16911_v6 = vld [vmem:[%s19829_s7 + $0xc70] ss:$8 sps:$4 sm:$0xff]  }
 0x33f   : > { %14305 = vmatpush1.bf16.msra.mxu0 %v16825_v1  ;;  %v20325_v1 = vld [vmem:[%s21131_s0 + $0x60] sm:$0xff] }
 0x340   : > { %14306 = vmatprep.subr.bf16.mxu0 %v16833_v45  ;;  %v15280_v45 = vcombine.high %v20325_v1, %v20325_v1 }
 0x341   : > { %14346 = vmatpush1.bf16.msra.mxu1 %v16828_v5  ;;  %v20334_v5 = vld [vmem:[%s21131_s0 + $0x68] sm:$0xff] }
 0x342   : > { %14347 = vmatprep.subr.bf16.mxu1 %v16836_v8  ;;  %v16921_v8 = vld [vmem:[%s19829_s7 + $0xc64] ss:$8 sps:$4 sm:$0xff]   ;;  %v15282_v57 = vcombine.high %v20334_v5, %v20334_v5 }
 0x343   : > { %14307 = vmatpush1.bf16.msra.mxu0 %v16831_v7  ;;  %v16916_v7 = vld [vmem:[%s19829_s7 + $0xd70] ss:$8 sps:$4 sm:$0xff]  }
 0x344   : > { %14308 = vmatprep.subr.bf16.mxu0 %v16839_v61  ;;  %v16924_v61 = vld [vmem:[%s19829_s7 + $0xd64] ss:$8 sps:$4 sm:$0xff]  }
 0x345   : > { %14348 = vmatpush1.bf16.msra.mxu1 %v16834_v11 }
 0x346   : > { %14349 = vmatprep.subr.bf16.mxu1 %v16842_v15  ;;  %v16922_v15 = vld [vmem:[%s19829_s7 + $0xd60] ss:$8 sps:$4 sm:$0xff]  }
 0x347   : > { %14309 = vmatpush1.bf16.msra.mxu0 %v16837_v13 }
 0x348   : > { %14310 = vmatprep.subr.bf16.mxu0 %v16845_v17  ;;  %v16927_v17 = vld [vmem:[%s19829_s7 + $0xc54] ss:$8 sps:$4 sm:$0xff]  }
 0x349   : > { %14350 = vmatpush1.bf16.msra.mxu1 %v16840_v16 }
 0x34a   : > { %14351 = vmatprep.subr.bf16.mxu1 %v16848_v9 }
 0x34b   : > { %14311 = vmatpush1.bf16.msra.mxu0 %v16843_v18 }
 0x34c   : > { %14312 = vmatprep.subr.bf16.mxu0 %v16851_v20 }
 0x34d   : > { %14352 = vmatpush1.bf16.msra.mxu1 %v16846_v19  ;;  %v16925_v19 = vld [vmem:[%s19829_s7 + $0xc50] ss:$8 sps:$4 sm:$0xff]  }
 0x34e   : > { %14353 = vmatprep.subr.bf16.mxu1 %v16854_v22 }
 0x34f   : > { %14313 = vmatpush1.bf16.msra.mxu0 %v16849_v12  ;;  %v16930_v12 = vld [vmem:[%s19829_s7 + $0xd54] ss:$8 sps:$4 sm:$0xff]  }
 0x350   : > { %14314 = vmatprep.subr.bf16.mxu0 %v16857_v24 }
 0x351   : > { %14354 = vmatpush1.bf16.msra.mxu1 %v16852_v23  ;;  %v16928_v23 = vld [vmem:[%s19829_s7 + $0xd50] ss:$8 sps:$4 sm:$0xff]  }
 0x352   : > { %14355 = vmatprep.subr.bf16.mxu1 %v16860_v27  ;;  %v16931_v27 = vld [vmem:[%s19829_s7 + $0xc40] ss:$8 sps:$4 sm:$0xff]  }
 0x353   : > { %14315 = vmatpush1.bf16.msra.mxu0 %v16855_v26 }
 0x354   : > { %14316 = vmatprep.subr.bf16.mxu0 %v16863_v29 }
 0x355   : > { %14356 = vmatpush1.bf16.msra.mxu1 %v16858_v28  ;;  %v16936_v28 = vld [vmem:[%s19829_s7 + $0xd44] ss:$8 sps:$4 sm:$0xff]  }
 0x356   : > { %14357 = vmatprep.subr.bf16.mxu1 %v16866_v10  ;;  %v16939_v10 = vld [vmem:[%s19829_s7 + $0xc34] ss:$8 sps:$4 sm:$0xff]  }
 0x357   : > { %14317 = vmatpush2.bf16.msra.mxu0 %v16861_v30  ;;  %v16934_v30 = vld [vmem:[%s19829_s7 + $0xd40] ss:$8 sps:$4 sm:$0xff]  }
 0x358   : > { %14318 = vmatprep.subr.bf16.mxu0 %v16869_v32  ;;  %v16942_v32 = vld [vmem:[%s19829_s7 + $0xd34] ss:$8 sps:$4 sm:$0xff]  }
 0x359   : > { %14358 = vmatpush2.bf16.msra.mxu1 %v16864_v31  ;;  %v16937_v31 = vld [vmem:[%s19829_s7 + $0xc30] ss:$8 sps:$4 sm:$0xff]  }
 0x35a   : > { %14359 = vmatprep.subr.bf16.mxu1 %v16872_v34  ;;  %v16945_v34 = vld [vmem:[%s19829_s7 + $0xc24] ss:$8 sps:$4 sm:$0xff]  }
 0x35b   : > { %14319 = vmatpush2.bf16.msra.mxu0 %v16867_v33  ;;  %v16940_v33 = vld [vmem:[%s19829_s7 + $0xd30] ss:$8 sps:$4 sm:$0xff]  }
 0x35c   : > { %14320 = vmatprep.subr.bf16.mxu0 %v16875_v36  ;;  %v16948_v36 = vld [vmem:[%s19829_s7 + $0xd24] ss:$8 sps:$4 sm:$0xff]  }
 0x35d   : > { %14360 = vmatpush2.bf16.msra.mxu1 %v16870_v35  ;;  %v16943_v35 = vld [vmem:[%s19829_s7 + $0xc20] ss:$8 sps:$4 sm:$0xff]  }
 0x35e   : > { %14361 = vmatprep.subr.bf16.mxu1 %v16878_v14  ;;  %v16951_v14 = vld [vmem:[%s19829_s7 + $0xc14] ss:$8 sps:$4 sm:$0xff]  }
 0x35f   : > { %14321 = vmatpush2.bf16.msra.mxu0 %v16873_v37  ;;  %v16946_v37 = vld [vmem:[%s19829_s7 + $0xd20] ss:$8 sps:$4 sm:$0xff]  }
 0x360   : > { %14322 = vmatprep.subr.bf16.mxu0 %v16881_v39  ;;  %v16954_v39 = vld [vmem:[%s19829_s7 + $0xd14] ss:$8 sps:$4 sm:$0xff]  }
 0x361   : > { %14362 = vmatpush2.bf16.msra.mxu1 %v16876_v38  ;;  %v16949_v38 = vld [vmem:[%s19829_s7 + $0xc10] ss:$8 sps:$4 sm:$0xff]  }
 0x362   : > { %14363 = vmatprep.subr.bf16.mxu1 %v16884_v43  ;;  %v16957_v43 = vld [vmem:[%s19829_s7 + $0xc04] ss:$8 sps:$4 sm:$0xff]  }
 0x363   : > { %14323 = vmatpush2.bf16.msra.mxu0 %v16879_v41  ;;  %v16952_v41 = vld [vmem:[%s19829_s7 + $0xd10] ss:$8 sps:$4 sm:$0xff]  }
 0x364   : > { %14324 = vmatprep.subr.bf16.mxu0 %v16887_v46  ;;  %v16960_v46 = vld [vmem:[%s19829_s7 + $0xd04] ss:$8 sps:$4 sm:$0xff]  }
 0x365   : > { %14364 = vmatpush2.bf16.msra.mxu1 %v16882_v44  ;;  %v16955_v44 = vld [vmem:[%s19829_s7 + $0xc00] ss:$8 sps:$4 sm:$0xff]  }
 0x366   : > { %14365 = vmatprep.subr.bf16.mxu1 %v16890_v49  ;;  %v16963_v49 = vld [vmem:[%s19829_s7 + $0xcf4] ss:$8 sps:$4 sm:$0xff]  }
 0x367   : > { %14325 = vmatpush2.bf16.msra.mxu0 %v16885_v48  ;;  %v16958_v48 = vld [vmem:[%s19829_s7 + $0xd00] ss:$8 sps:$4 sm:$0xff]  }
 0x368   : > { %14326 = vmatprep.subr.bf16.mxu0 %v16893_v51  ;;  %v16966_v51 = vld [vmem:[%s19829_s7 + $0xdf4] ss:$8 sps:$4 sm:$0xff]  }
 0x369   : > { %14366 = vmatpush2.bf16.msra.mxu1 %v16888_v50  ;;  %v16961_v50 = vld [vmem:[%s19829_s7 + $0xcf0] ss:$8 sps:$4 sm:$0xff]  }
 0x36a   : > { %14367 = vmatprep.subr.bf16.mxu1 %v16896_v21  ;;  %v16969_v21 = vld [vmem:[%s19829_s7 + $0xce4] ss:$8 sps:$4 sm:$0xff]  }
 0x36b   : > { %14327 = vmatpush2.bf16.msra.mxu0 %v16891_v52  ;;  %v16964_v52 = vld [vmem:[%s19829_s7 + $0xdf0] ss:$8 sps:$4 sm:$0xff]  }
 0x36c   : > { %14328 = vmatprep.subr.bf16.mxu0 %v16899_v54  ;;  %v16972_v54 = vld [vmem:[%s19829_s7 + $0xde4] ss:$8 sps:$4 sm:$0xff]  }
 0x36d   : > { %14368 = vmatpush2.bf16.msra.mxu1 %v16894_v53  ;;  %v16967_v53 = vld [vmem:[%s19829_s7 + $0xce0] ss:$8 sps:$4 sm:$0xff]  }
 0x36e   : > { %14369 = vmatprep.subr.bf16.mxu1 %v16902_v58  ;;  %v16975_v58 = vld [vmem:[%s19829_s7 + $0xcd4] ss:$8 sps:$4 sm:$0xff]  }
 0x36f   : > { %14329 = vmatpush2.bf16.msra.mxu0 %v16897_v55  ;;  %v16970_v55 = vld [vmem:[%s19829_s7 + $0xde0] ss:$8 sps:$4 sm:$0xff]  }
 0x370   : > { %14330 = vmatprep.subr.bf16.mxu0 %v16905_v25  ;;  %v16978_v25 = vld [vmem:[%s19829_s7 + $0xdd4] ss:$8 sps:$4 sm:$0xff]  }
 0x371   : > { %14370 = vmatpush2.bf16.msra.mxu1 %v16900_v59  ;;  %v16973_v59 = vld [vmem:[%s19829_s7 + $0xcd0] ss:$8 sps:$4 sm:$0xff]  }
 0x372   : > { %14371 = vmatprep.subr.bf16.mxu1 %v16908_v62  ;;  %v16981_v62 = vld [vmem:[%s19829_s7 + $0xcc4] ss:$8 sps:$4 sm:$0xff]  }
 0x373   : > { %14331 = vmatpush2.bf16.msra.mxu0 %v16903_v60  ;;  %v16976_v60 = vld [vmem:[%s19829_s7 + $0xdd0] ss:$8 sps:$4 sm:$0xff]  }
 0x374   : > { %14382 = vmatprep.subr.bf16.mxu0 %v16913_v63  ;;  %v16979_v63 = vld [vmem:[%s19829_s7 + $0xcc0] ss:$8 sps:$4 sm:$0xff]  }
 0x375   : > { %14372 = vmatpush2.bf16.msra.mxu1 %v16906_v40  ;;  %v16984_v40 = vld [vmem:[%s19829_s7 + $0xdc4] ss:$8 sps:$4 sm:$0xff]  }
 0x376   : > { %v14088_v11 = vpop.f32.mrf.mxu0  ;;  %14333 = vmatmul.mubr.bf16.vlgmr.msra.gmra.mxu0 %v15275_v2  ;;  %14423 = vmatprep.subr.bf16.mxu1 %v16918_v3  ;;  %v16982_v2 = vld [vmem:[%s19829_s7 + $0xdc0] ss:$8 sps:$4 sm:$0xff]   ;;  %v16987_v3 = vld [vmem:[%s19829_s7 + $0xcb4] ss:$8 sps:$4 sm:$0xff]  }
 0x377   : > { %v14089_v13 = vadd.f32 %v14088_v11, %v20263_v0  ;;  %14383 = vmatpush1.bf16.msra.mxu0 %v16911_v6  ;;  %14414 = vmatprep.mubr.bf16.mxu0 %v15280_v45  ;;  %v16985_v6 = vld [vmem:[%s19829_s7 + $0xcb0] ss:$8 sps:$4 sm:$0xff]   ;;  %v16990_v45 = vld [vmem:[%s19829_s7 + $0xdb4] ss:$8 sps:$4 sm:$0xff]  }
 0x378   : > { %v14090_v47 = vpop.f32.mrf.mxu0  ;;  %v14129_v16 = vpop.f32.mrf.mxu1  ;;  %14374 = vmatmul.mubr.bf16.vlgmr.msra.gmra.mxu1 %v15277_v56  ;;  %14384 = vmatprep.subr.bf16.mxu0 %v16921_v8  ;;  %v16988_v56 = vld [vmem:[%s19829_s7 + $0xdb0] ss:$8 sps:$4 sm:$0xff]   ;;  %v16991_v8 = vld [vmem:[%s19829_s7 + $0xca0] ss:$8 sps:$4 sm:$0xff]   ;;  %v16999_v11 = vld [vmem:[%s19829_s7 + $0xc94] ss:$8 sps:$4 sm:$0xff]  }
 0x379   : > { %v14091_v18 = vadd.f32 %v14090_v47, %v20267_v4  ;;  %v20351_v9 = vadd.f32 %v14129_v16, %v14089_v13  ;;  %14424 = vmatpush1.bf16.msra.mxu1 %v16916_v7  ;;  %14455 = vmatprep.mubr.bf16.mxu1 %v15282_v57  ;;  %v16933_v4 = vld [vmem:[%s19829_s7 + $0xc44] ss:$8 sps:$4 sm:$0xff]   ;;  %v16994_v57 = vld [vmem:[%s19829_s7 + $0xda0] ss:$8 sps:$4 sm:$0xff]   ;;  %v17002_v13 = vld [vmem:[%s19829_s7 + $0xd94] ss:$8 sps:$4 sm:$0xff]  }
 0x37a   : > { %v14092_v0 = vpop.f32.mrf.mxu0  ;;  %v14131_v20 = vpop.f32.mrf.mxu1  ;;  %14425 = vmatprep.subr.bf16.mxu1 %v16924_v61  ;;  %v16993_v7 = vld [vmem:[%s19829_s7 + $0xca4] ss:$8 sps:$4 sm:$0xff]   ;;  %v16997_v61 = vld [vmem:[%s19829_s7 + $0xc90] ss:$8 sps:$4 sm:$0xff]   ;;  %v17003_v16 = vld [vmem:[%s19829_s7 + $0xc80] ss:$8 sps:$4 sm:$0xff]  }
 0x37b   : > { %v20355_v22 = vadd.f32 %v14131_v20, %v14091_v18  ;;  %14385 = vmatpush1.bf16.msra.mxu0 %v16919_v42  ;;  %v16996_v42 = vld [vmem:[%s19829_s7 + $0xda4] ss:$8 sps:$4 sm:$0xff]   ;;  %v17013_v18 = vld [vmem:[%s19829_s7 + $0xe74] ss:$8 sps:$4 sm:$0xff]   ;;  %v17006_v0 = vld [vmem:[%s19829_s7 + $0xd80] ss:$8 sps:$4 sm:$0xff]   ;;  %v15279_v20 = vcombine.low %v20325_v1, %v20325_v1 }
 0x37c   : > { %v14093_v24 = vpop.f32.mrf.mxu0  ;;  %14386 = vmatprep.subr.bf16.mxu0 %v16927_v17  ;;  %v14133_v26 = vpop.f32.mrf.mxu1  ;;  %v17005_v47 = vld [vmem:[%s19829_s7 + $0xc84] ss:$8 sps:$4 sm:$0xff]   ;;  %v17019_v1 = vld [vmem:[%s19829_s7 + $0xe60] ss:$8 sps:$4 sm:$0xff]  }
 0x37d   : > { %14426 = vmatpush1.bf16.msra.mxu1 %v16922_v15  ;;  %v17000_v15 = vld [vmem:[%s19829_s7 + $0xd90] ss:$8 sps:$4 sm:$0xff]   ;;  %v17008_v17 = vld [vmem:[%s19829_s7 + $0xd84] ss:$8 sps:$4 sm:$0xff]   ;;  %v15281_v26 = vcombine.low %v20334_v5, %v20334_v5 }
 0x37e   : > { %14427 = vmatprep.subr.bf16.mxu1 %v16930_v12  ;;  %v14134_v29 = vpop.f32.mrf.mxu1  ;;  %v17018_v12 = vld [vmem:[%s19829_s7 + $0xf74] ss:$8 sps:$4 sm:$0xff]   ;;  %v17011_v24 = vld [vmem:[%s19829_s7 + $0xe70] ss:$8 sps:$4 sm:$0xff]  }
 0x37f   : > { %14387 = vmatpush1.bf16.msra.mxu0 %v16925_v19  ;;  %v20413_v19 = vld [vmem:[%s21131_s0 + $0x70] sm:$0xff] }
 0x380   : > { %14388 = vmatprep.subr.bf16.mxu0 %v16933_v4  ;;  %v15284_v4 = vcombine.high %v20413_v19, %v20413_v19 }
 0x381   : > { %14428 = vmatpush1.bf16.msra.mxu1 %v16928_v23  ;;  %v20422_v23 = vld [vmem:[%s21131_s0 + $0x78] sm:$0xff] }
 0x382   : > { %14429 = vmatprep.subr.bf16.mxu1 %v16936_v28  ;;  %v17021_v28 = vld [vmem:[%s19829_s7 + $0xe64] ss:$8 sps:$4 sm:$0xff]   ;;  %v15286_v29 = vcombine.high %v20422_v23, %v20422_v23 }
 0x383   : > { %14389 = vmatpush1.bf16.msra.mxu0 %v16931_v27  ;;  %v17016_v27 = vld [vmem:[%s19829_s7 + $0xf70] ss:$8 sps:$4 sm:$0xff]  }
 0x384   : > { %14390 = vmatprep.subr.bf16.mxu0 %v16939_v10  ;;  %v17024_v10 = vld [vmem:[%s19829_s7 + $0xf64] ss:$8 sps:$4 sm:$0xff]  }
 0x385   : > { %14430 = vmatpush1.bf16.msra.mxu1 %v16934_v30 }
 0x386   : > { %14431 = vmatprep.subr.bf16.mxu1 %v16942_v32  ;;  %v17022_v32 = vld [vmem:[%s19829_s7 + $0xf60] ss:$8 sps:$4 sm:$0xff]  }
 0x387   : > { %14391 = vmatpush1.bf16.msra.mxu0 %v16937_v31 }
 0x388   : > { %14392 = vmatprep.subr.bf16.mxu0 %v16945_v34  ;;  %v17027_v34 = vld [vmem:[%s19829_s7 + $0xe54] ss:$8 sps:$4 sm:$0xff]  }
 0x389   : > { %14432 = vmatpush1.bf16.msra.mxu1 %v16940_v33 }
 0x38a   : > { %14433 = vmatprep.subr.bf16.mxu1 %v16948_v36 }
 0x38b   : > { %14393 = vmatpush1.bf16.msra.mxu0 %v16943_v35 }
 0x38c   : > { %14394 = vmatprep.subr.bf16.mxu0 %v16951_v14 }
 0x38d   : > { %14434 = vmatpush1.bf16.msra.mxu1 %v16946_v37  ;;  %v17025_v37 = vld [vmem:[%s19829_s7 + $0xe50] ss:$8 sps:$4 sm:$0xff]  }
 0x38e   : > { %14435 = vmatprep.subr.bf16.mxu1 %v16954_v39 }
 0x38f   : > { %14395 = vmatpush1.bf16.msra.mxu0 %v16949_v38  ;;  %v17030_v38 = vld [vmem:[%s19829_s7 + $0xf54] ss:$8 sps:$4 sm:$0xff]  }
 0x390   : > { %14396 = vmatprep.subr.bf16.mxu0 %v16957_v43 }
 0x391   : > { %14436 = vmatpush1.bf16.msra.mxu1 %v16952_v41  ;;  %v17028_v41 = vld [vmem:[%s19829_s7 + $0xf50] ss:$8 sps:$4 sm:$0xff]  }
 0x392   : > { %14437 = vmatprep.subr.bf16.mxu1 %v16960_v46  ;;  %v17031_v46 = vld [vmem:[%s19829_s7 + $0xe40] ss:$8 sps:$4 sm:$0xff]  }
 0x393   : > { %14397 = vmatpush1.bf16.msra.mxu0 %v16955_v44 }
 0x394   : > { %14398 = vmatprep.subr.bf16.mxu0 %v16963_v49 }
 0x395   : > { %14438 = vmatpush1.bf16.msra.mxu1 %v16958_v48  ;;  %v17036_v48 = vld [vmem:[%s19829_s7 + $0xf44] ss:$8 sps:$4 sm:$0xff]  }
 0x396   : > { %14439 = vmatprep.subr.bf16.mxu1 %v16966_v51  ;;  %v17039_v51 = vld [vmem:[%s19829_s7 + $0xe34] ss:$8 sps:$4 sm:$0xff]  }
 0x397   : > { %14399 = vmatpush2.bf16.msra.mxu0 %v16961_v50  ;;  %v17034_v50 = vld [vmem:[%s19829_s7 + $0xf40] ss:$8 sps:$4 sm:$0xff]  }
 0x398   : > { %14400 = vmatprep.subr.bf16.mxu0 %v16969_v21  ;;  %v17042_v21 = vld [vmem:[%s19829_s7 + $0xf34] ss:$8 sps:$4 sm:$0xff]  }
 0x399   : > { %14440 = vmatpush2.bf16.msra.mxu1 %v16964_v52  ;;  %v17037_v52 = vld [vmem:[%s19829_s7 + $0xe30] ss:$8 sps:$4 sm:$0xff]  }
 0x39a   : > { %14441 = vmatprep.subr.bf16.mxu1 %v16972_v54  ;;  %v17045_v54 = vld [vmem:[%s19829_s7 + $0xe24] ss:$8 sps:$4 sm:$0xff]  }
 0x39b   : > { %14401 = vmatpush2.bf16.msra.mxu0 %v16967_v53  ;;  %v17040_v53 = vld [vmem:[%s19829_s7 + $0xf30] ss:$8 sps:$4 sm:$0xff]  }
 0x39c   : > { %14402 = vmatprep.subr.bf16.mxu0 %v16975_v58  ;;  %v17048_v58 = vld [vmem:[%s19829_s7 + $0xf24] ss:$8 sps:$4 sm:$0xff]  }
 0x39d   : > { %14442 = vmatpush2.bf16.msra.mxu1 %v16970_v55  ;;  %v17043_v55 = vld [vmem:[%s19829_s7 + $0xe20] ss:$8 sps:$4 sm:$0xff]  }
 0x39e   : > { %14443 = vmatprep.subr.bf16.mxu1 %v16978_v25  ;;  %v17051_v25 = vld [vmem:[%s19829_s7 + $0xe14] ss:$8 sps:$4 sm:$0xff]  }
 0x39f   : > { %14403 = vmatpush2.bf16.msra.mxu0 %v16973_v59  ;;  %v17046_v59 = vld [vmem:[%s19829_s7 + $0xf20] ss:$8 sps:$4 sm:$0xff]  }
 0x3a0   : > { %14404 = vmatprep.subr.bf16.mxu0 %v16981_v62  ;;  %v17054_v62 = vld [vmem:[%s19829_s7 + $0xf14] ss:$8 sps:$4 sm:$0xff]  }
 0x3a1   : > { %14444 = vmatpush2.bf16.msra.mxu1 %v16976_v60  ;;  %v17049_v60 = vld [vmem:[%s19829_s7 + $0xe10] ss:$8 sps:$4 sm:$0xff]  }
 0x3a2   : > { %14445 = vmatprep.subr.bf16.mxu1 %v16984_v40  ;;  %v17057_v40 = vld [vmem:[%s19829_s7 + $0xe04] ss:$8 sps:$4 sm:$0xff]  }
 0x3a3   : > { %14405 = vmatpush2.bf16.msra.mxu0 %v16979_v63  ;;  %v17052_v63 = vld [vmem:[%s19829_s7 + $0xf10] ss:$8 sps:$4 sm:$0xff]  }
 0x3a4   : > { %14406 = vmatprep.subr.bf16.mxu0 %v16987_v3  ;;  %v17060_v3 = vld [vmem:[%s19829_s7 + $0xf04] ss:$8 sps:$4 sm:$0xff]  }
 0x3a5   : > { %14446 = vmatpush2.bf16.msra.mxu1 %v16982_v2  ;;  %v17055_v2 = vld [vmem:[%s19829_s7 + $0xe00] ss:$8 sps:$4 sm:$0xff]  }
 0x3a6   : > { %14447 = vmatprep.subr.bf16.mxu1 %v16990_v45  ;;  %v17063_v45 = vld [vmem:[%s19829_s7 + $0xef4] ss:$8 sps:$4 sm:$0xff]  }
 0x3a7   : > { %14407 = vmatpush2.bf16.msra.mxu0 %v16985_v6  ;;  %v17058_v6 = vld [vmem:[%s19829_s7 + $0xf00] ss:$8 sps:$4 sm:$0xff]  }
 0x3a8   : > { %14408 = vmatprep.subr.bf16.mxu0 %v16993_v7  ;;  %v17066_v7 = vld [vmem:[%s19829_s7 + $0xff4] ss:$8 sps:$4 sm:$0xff]  }
 0x3a9   : > { %14448 = vmatpush2.bf16.msra.mxu1 %v16988_v56  ;;  %v17061_v56 = vld [vmem:[%s19829_s7 + $0xef0] ss:$8 sps:$4 sm:$0xff]  }
 0x3aa   : > { %14449 = vmatprep.subr.bf16.mxu1 %v16996_v42  ;;  %v17069_v42 = vld [vmem:[%s19829_s7 + $0xee4] ss:$8 sps:$4 sm:$0xff]  }
 0x3ab   : > { %14409 = vmatpush2.bf16.msra.mxu0 %v16991_v8  ;;  %v17064_v8 = vld [vmem:[%s19829_s7 + $0xff0] ss:$8 sps:$4 sm:$0xff]  }
 0x3ac   : > { %14410 = vmatprep.subr.bf16.mxu0 %v16999_v11  ;;  %v17072_v11 = vld [vmem:[%s19829_s7 + $0xfe4] ss:$8 sps:$4 sm:$0xff]  }
 0x3ad   : > { %14450 = vmatpush2.bf16.msra.mxu1 %v16994_v57  ;;  %v17067_v57 = vld [vmem:[%s19829_s7 + $0xee0] ss:$8 sps:$4 sm:$0xff]  }
 0x3ae   : > { %14451 = vmatprep.subr.bf16.mxu1 %v17002_v13  ;;  %v17075_v13 = vld [vmem:[%s19829_s7 + $0xed4] ss:$8 sps:$4 sm:$0xff]  }
 0x3af   : > { %14411 = vmatpush2.bf16.msra.mxu0 %v16997_v61  ;;  %v17070_v61 = vld [vmem:[%s19829_s7 + $0xfe0] ss:$8 sps:$4 sm:$0xff]  }
 0x3b0   : > { %14412 = vmatprep.subr.bf16.mxu0 %v17005_v47  ;;  %v17078_v47 = vld [vmem:[%s19829_s7 + $0xfd4] ss:$8 sps:$4 sm:$0xff]  }
 0x3b1   : > { %14452 = vmatpush2.bf16.msra.mxu1 %v17000_v15  ;;  %v17073_v15 = vld [vmem:[%s19829_s7 + $0xed0] ss:$8 sps:$4 sm:$0xff]  }
 0x3b2   : > { %14453 = vmatprep.subr.bf16.mxu1 %v17008_v17  ;;  %v17081_v17 = vld [vmem:[%s19829_s7 + $0xec4] ss:$8 sps:$4 sm:$0xff]  }
 0x3b3   : > { %14413 = vmatpush2.bf16.msra.mxu0 %v17003_v16  ;;  %v17076_v16 = vld [vmem:[%s19829_s7 + $0xfd0] ss:$8 sps:$4 sm:$0xff]  }
 0x3b4   : > { %14464 = vmatprep.subr.bf16.mxu0 %v17013_v18  ;;  %v17079_v18 = vld [vmem:[%s19829_s7 + $0xec0] ss:$8 sps:$4 sm:$0xff]  }
 0x3b5   : > { %14454 = vmatpush2.bf16.msra.mxu1 %v17006_v0  ;;  %v17084_v0 = vld [vmem:[%s19829_s7 + $0xfc4] ss:$8 sps:$4 sm:$0xff]  }
 0x3b6   : > { %v14170_v30 = vpop.f32.mrf.mxu0  ;;  %14415 = vmatmul.mubr.bf16.vlgmr.msra.gmra.mxu0 %v15279_v20  ;;  %14505 = vmatprep.subr.bf16.mxu1 %v17018_v12  ;;  %v17082_v20 = vld [vmem:[%s19829_s7 + $0xfc0] ss:$8 sps:$4 sm:$0xff]   ;;  %v17087_v12 = vld [vmem:[%s19829_s7 + $0xeb4] ss:$8 sps:$4 sm:$0xff]  }
 0x3b7   : > { %v14171_v31 = vadd.f32 %v14170_v30, %v20351_v9  ;;  %14465 = vmatpush1.bf16.msra.mxu0 %v17011_v24  ;;  %14496 = vmatprep.mubr.bf16.mxu0 %v15284_v4  ;;  %v17085_v24 = vld [vmem:[%s19829_s7 + $0xeb0] ss:$8 sps:$4 sm:$0xff]   ;;  %v17090_v4 = vld [vmem:[%s19829_s7 + $0xfb4] ss:$8 sps:$4 sm:$0xff]  }
 0x3b8   : > { %v14172_v5 = vpop.f32.mrf.mxu0  ;;  %v14211_v33 = vpop.f32.mrf.mxu1  ;;  %14456 = vmatmul.mubr.bf16.vlgmr.msra.gmra.mxu1 %v15281_v26  ;;  %14466 = vmatprep.subr.bf16.mxu0 %v17021_v28  ;;  %v17088_v26 = vld [vmem:[%s19829_s7 + $0xfb0] ss:$8 sps:$4 sm:$0xff]   ;;  %v17091_v28 = vld [vmem:[%s19829_s7 + $0xea0] ss:$8 sps:$4 sm:$0xff]   ;;  %v17099_v30 = vld [vmem:[%s19829_s7 + $0xe94] ss:$8 sps:$4 sm:$0xff]  }
 0x3b9   : > { %v14173_v35 = vadd.f32 %v14172_v5, %v20355_v22  ;;  %v20439_v36 = vadd.f32 %v14211_v33, %v14171_v31  ;;  %14506 = vmatpush1.bf16.msra.mxu1 %v17016_v27  ;;  %14537 = vmatprep.mubr.bf16.mxu1 %v15286_v29  ;;  %v17033_v22 = vld [vmem:[%s19829_s7 + $0xe44] ss:$8 sps:$4 sm:$0xff]   ;;  %v17094_v29 = vld [vmem:[%s19829_s7 + $0xfa0] ss:$8 sps:$4 sm:$0xff]   ;;  %v17102_v31 = vld [vmem:[%s19829_s7 + $0xf94] ss:$8 sps:$4 sm:$0xff]  }
 0x3ba   : > { %v14174_v9 = vpop.f32.mrf.mxu0  ;;  %v14213_v14 = vpop.f32.mrf.mxu1  ;;  %14507 = vmatprep.subr.bf16.mxu1 %v17024_v10  ;;  %v17093_v27 = vld [vmem:[%s19829_s7 + $0xea4] ss:$8 sps:$4 sm:$0xff]   ;;  %v17097_v10 = vld [vmem:[%s19829_s7 + $0xe90] ss:$8 sps:$4 sm:$0xff]   ;;  %v17103_v33 = vld [vmem:[%s19829_s7 + $0xe80] ss:$8 sps:$4 sm:$0xff]  }
 0x3bb   : > { %v20443_v39 = vadd.f32 %v14213_v14, %v14173_v35  ;;  %14467 = vmatpush1.bf16.msra.mxu0 %v17019_v1  ;;  %v17096_v1 = vld [vmem:[%s19829_s7 + $0xfa4] ss:$8 sps:$4 sm:$0xff]   ;;  %v17113_v35 = vld [vmem:[%s19829_s7 + $0x1074] ss:$8 sps:$4 sm:$0xff]   ;;  %v17106_v9 = vld [vmem:[%s19829_s7 + $0xf80] ss:$8 sps:$4 sm:$0xff]   ;;  %v15283_v14 = vcombine.low %v20413_v19, %v20413_v19 }
 0x3bc   : > { %v14175_v43 = vpop.f32.mrf.mxu0  ;;  %14468 = vmatprep.subr.bf16.mxu0 %v17027_v34  ;;  %v14215_v44 = vpop.f32.mrf.mxu1  ;;  %v17105_v5 = vld [vmem:[%s19829_s7 + $0xe84] ss:$8 sps:$4 sm:$0xff]   ;;  %v17116_v19 = vld [vmem:[%s19829_s7 + $0x1170] ss:$8 sps:$4 sm:$0xff]  }
 0x3bd   : > { %14508 = vmatpush1.bf16.msra.mxu1 %v17022_v32  ;;  %v17100_v32 = vld [vmem:[%s19829_s7 + $0xf90] ss:$8 sps:$4 sm:$0xff]   ;;  %v17108_v34 = vld [vmem:[%s19829_s7 + $0xf84] ss:$8 sps:$4 sm:$0xff]   ;;  %v15285_v44 = vcombine.low %v20422_v23, %v20422_v23 }
 0x3be   : > { %14509 = vmatprep.subr.bf16.mxu1 %v17030_v38  ;;  %v14216_v49 = vpop.f32.mrf.mxu1  ;;  %v17118_v38 = vld [vmem:[%s19829_s7 + $0x1174] ss:$8 sps:$4 sm:$0xff]   ;;  %v17111_v43 = vld [vmem:[%s19829_s7 + $0x1070] ss:$8 sps:$4 sm:$0xff]  }
 0x3bf   : > { %14469 = vmatpush1.bf16.msra.mxu0 %v17025_v37  ;;  %v20501_v37 = vld [vmem:[%s21131_s0 + $0x80] sm:$0xff] }
 0x3c0   : > { %14470 = vmatprep.subr.bf16.mxu0 %v17033_v22  ;;  %v15288_v22 = vcombine.high %v20501_v37, %v20501_v37 }
 0x3c1   : > { %14510 = vmatpush1.bf16.msra.mxu1 %v17028_v41  ;;  %v20510_v41 = vld [vmem:[%s21131_s0 + $0x88] sm:$0xff] }
 0x3c2   : > { %14511 = vmatprep.subr.bf16.mxu1 %v17036_v48  ;;  %v15290_v48 = vcombine.high %v20510_v41, %v20510_v41 }
 0x3c3   : > { %14471 = vmatpush1.bf16.msra.mxu0 %v17031_v46  ;;  %v17121_v46 = vld [vmem:[%s19829_s7 + $0x1064] ss:$8 sps:$4 sm:$0xff]  }
 0x3c4   : > { %14472 = vmatprep.subr.bf16.mxu0 %v17039_v51 }
 0x3c5   : > { %14512 = vmatpush1.bf16.msra.mxu1 %v17034_v50  ;;  %v17124_v50 = vld [vmem:[%s19829_s7 + $0x1164] ss:$8 sps:$4 sm:$0xff]  }
 0x3c6   : > { %14513 = vmatprep.subr.bf16.mxu1 %v17042_v21 }
 0x3c7   : > { %14473 = vmatpush1.bf16.msra.mxu0 %v17037_v52  ;;  %v17119_v52 = vld [vmem:[%s19829_s7 + $0x1060] ss:$8 sps:$4 sm:$0xff]  }
 0x3c8   : > { %14474 = vmatprep.subr.bf16.mxu0 %v17045_v54 }
 0x3c9   : > { %14514 = vmatpush1.bf16.msra.mxu1 %v17040_v53  ;;  %v17127_v53 = vld [vmem:[%s19829_s7 + $0x1054] ss:$8 sps:$4 sm:$0xff]  }
 0x3ca   : > { %14515 = vmatprep.subr.bf16.mxu1 %v17048_v58  ;;  %v17122_v58 = vld [vmem:[%s19829_s7 + $0x1160] ss:$8 sps:$4 sm:$0xff]  }
 0x3cb   : > { %14475 = vmatpush1.bf16.msra.mxu0 %v17043_v55 }
 0x3cc   : > { %14476 = vmatprep.subr.bf16.mxu0 %v17051_v25  ;;  %v17130_v25 = vld [vmem:[%s19829_s7 + $0x1154] ss:$8 sps:$4 sm:$0xff]  }
 0x3cd   : > { %14516 = vmatpush1.bf16.msra.mxu1 %v17046_v59 }
 0x3ce   : > { %14517 = vmatprep.subr.bf16.mxu1 %v17054_v62  ;;  %v17125_v62 = vld [vmem:[%s19829_s7 + $0x1050] ss:$8 sps:$4 sm:$0xff]  }
 0x3cf   : > { %14477 = vmatpush1.bf16.msra.mxu0 %v17049_v60 }
 0x3d0   : > { %14478 = vmatprep.subr.bf16.mxu0 %v17057_v40 }
 0x3d1   : > { %14518 = vmatpush1.bf16.msra.mxu1 %v17052_v63 }
 0x3d2   : > { %14519 = vmatprep.subr.bf16.mxu1 %v17060_v3  ;;  %v17136_v3 = vld [vmem:[%s19829_s7 + $0x1144] ss:$8 sps:$4 sm:$0xff]  }
 0x3d3   : > { %14479 = vmatpush1.bf16.msra.mxu0 %v17055_v2  ;;  %v17128_v2 = vld [vmem:[%s19829_s7 + $0x1150] ss:$8 sps:$4 sm:$0xff]  }
 0x3d4   : > { %14480 = vmatprep.subr.bf16.mxu0 %v17063_v45  ;;  %v17131_v45 = vld [vmem:[%s19829_s7 + $0x1040] ss:$8 sps:$4 sm:$0xff]  }
 0x3d5   : > { %14520 = vmatpush1.bf16.msra.mxu1 %v17058_v6 }
 0x3d6   : > { %14521 = vmatprep.subr.bf16.mxu1 %v17066_v7  ;;  %v17134_v7 = vld [vmem:[%s19829_s7 + $0x1140] ss:$8 sps:$4 sm:$0xff]  }
 0x3d7   : > { %14481 = vmatpush2.bf16.msra.mxu0 %v17061_v56  ;;  %v17139_v56 = vld [vmem:[%s19829_s7 + $0x1034] ss:$8 sps:$4 sm:$0xff]  }
 0x3d8   : > { %14482 = vmatprep.subr.bf16.mxu0 %v17069_v42  ;;  %v17137_v42 = vld [vmem:[%s19829_s7 + $0x1030] ss:$8 sps:$4 sm:$0xff]  }
 0x3d9   : > { %14522 = vmatpush2.bf16.msra.mxu1 %v17064_v8  ;;  %v17142_v8 = vld [vmem:[%s19829_s7 + $0x1134] ss:$8 sps:$4 sm:$0xff]  }
 0x3da   : > { %14523 = vmatprep.subr.bf16.mxu1 %v17072_v11  ;;  %v17140_v11 = vld [vmem:[%s19829_s7 + $0x1130] ss:$8 sps:$4 sm:$0xff]  }
 0x3db   : > { %14483 = vmatpush2.bf16.msra.mxu0 %v17067_v57  ;;  %v17145_v57 = vld [vmem:[%s19829_s7 + $0x1024] ss:$8 sps:$4 sm:$0xff]  }
 0x3dc   : > { %14484 = vmatprep.subr.bf16.mxu0 %v17075_v13  ;;  %v17143_v13 = vld [vmem:[%s19829_s7 + $0x1020] ss:$8 sps:$4 sm:$0xff]  }
 0x3dd   : > { %14524 = vmatpush2.bf16.msra.mxu1 %v17070_v61  ;;  %v17148_v61 = vld [vmem:[%s19829_s7 + $0x1124] ss:$8 sps:$4 sm:$0xff]  }
 0x3de   : > { %14525 = vmatprep.subr.bf16.mxu1 %v17078_v47  ;;  %v17146_v47 = vld [vmem:[%s19829_s7 + $0x1120] ss:$8 sps:$4 sm:$0xff]  }
 0x3df   : > { %14485 = vmatpush2.bf16.msra.mxu0 %v17073_v15  ;;  %v17151_v15 = vld [vmem:[%s19829_s7 + $0x1014] ss:$8 sps:$4 sm:$0xff]  }
 0x3e0   : > { %14486 = vmatprep.subr.bf16.mxu0 %v17081_v17  ;;  %v17149_v17 = vld [vmem:[%s19829_s7 + $0x1010] ss:$8 sps:$4 sm:$0xff]  }
 0x3e1   : > { %14526 = vmatpush2.bf16.msra.mxu1 %v17076_v16  ;;  %v17154_v16 = vld [vmem:[%s19829_s7 + $0x1114] ss:$8 sps:$4 sm:$0xff]  }
 0x3e2   : > { %14527 = vmatprep.subr.bf16.mxu1 %v17084_v0  ;;  %v17152_v0 = vld [vmem:[%s19829_s7 + $0x1110] ss:$8 sps:$4 sm:$0xff]  }
 0x3e3   : > { %14487 = vmatpush2.bf16.msra.mxu0 %v17079_v18  ;;  %v17157_v18 = vld [vmem:[%s19829_s7 + $0x1004] ss:$8 sps:$4 sm:$0xff]  }
 0x3e4   : > { %14488 = vmatprep.subr.bf16.mxu0 %v17087_v12  ;;  %v17155_v12 = vld [vmem:[%s19829_s7 + $0x1000] ss:$8 sps:$4 sm:$0xff]  }
 0x3e5   : > { %14528 = vmatpush2.bf16.msra.mxu1 %v17082_v20  ;;  %v17160_v20 = vld [vmem:[%s19829_s7 + $0x1104] ss:$8 sps:$4 sm:$0xff]  }
 0x3e6   : > { %14529 = vmatprep.subr.bf16.mxu1 %v17090_v4  ;;  %v17158_v4 = vld [vmem:[%s19829_s7 + $0x1100] ss:$8 sps:$4 sm:$0xff]  }
 0x3e7   : > { %14489 = vmatpush2.bf16.msra.mxu0 %v17085_v24  ;;  %v17163_v24 = vld [vmem:[%s19829_s7 + $0x10f4] ss:$8 sps:$4 sm:$0xff]  }
 0x3e8   : > { %14490 = vmatprep.subr.bf16.mxu0 %v17093_v27  ;;  %v17161_v27 = vld [vmem:[%s19829_s7 + $0x10f0] ss:$8 sps:$4 sm:$0xff]  }
 0x3e9   : > { %14530 = vmatpush2.bf16.msra.mxu1 %v17088_v26  ;;  %v17166_v26 = vld [vmem:[%s19829_s7 + $0x11f4] ss:$8 sps:$4 sm:$0xff]  }
 0x3ea   : > { %14531 = vmatprep.subr.bf16.mxu1 %v17096_v1  ;;  %v17164_v1 = vld [vmem:[%s19829_s7 + $0x11f0] ss:$8 sps:$4 sm:$0xff]  }
 0x3eb   : > { %14491 = vmatpush2.bf16.msra.mxu0 %v17091_v28  ;;  %v17169_v28 = vld [vmem:[%s19829_s7 + $0x10e4] ss:$8 sps:$4 sm:$0xff]  }
 0x3ec   : > { %14492 = vmatprep.subr.bf16.mxu0 %v17099_v30  ;;  %v17167_v30 = vld [vmem:[%s19829_s7 + $0x10e0] ss:$8 sps:$4 sm:$0xff]  }
 0x3ed   : > { %14532 = vmatpush2.bf16.msra.mxu1 %v17094_v29  ;;  %v17172_v29 = vld [vmem:[%s19829_s7 + $0x11e4] ss:$8 sps:$4 sm:$0xff]  }
 0x3ee   : > { %14533 = vmatprep.subr.bf16.mxu1 %v17102_v31  ;;  %v17170_v31 = vld [vmem:[%s19829_s7 + $0x11e0] ss:$8 sps:$4 sm:$0xff]  }
 0x3ef   : > { %14493 = vmatpush2.bf16.msra.mxu0 %v17097_v10  ;;  %v17175_v10 = vld [vmem:[%s19829_s7 + $0x10d4] ss:$8 sps:$4 sm:$0xff]  }
 0x3f0   : > { %14494 = vmatprep.subr.bf16.mxu0 %v17105_v5  ;;  %v17173_v5 = vld [vmem:[%s19829_s7 + $0x10d0] ss:$8 sps:$4 sm:$0xff]  }
 0x3f1   : > { %14534 = vmatpush2.bf16.msra.mxu1 %v17100_v32  ;;  %v17178_v32 = vld [vmem:[%s19829_s7 + $0x11d4] ss:$8 sps:$4 sm:$0xff]  }
 0x3f2   : > { %14535 = vmatprep.subr.bf16.mxu1 %v17108_v34  ;;  %v17176_v34 = vld [vmem:[%s19829_s7 + $0x11d0] ss:$8 sps:$4 sm:$0xff]  }
 0x3f3   : > { %14495 = vmatpush2.bf16.msra.mxu0 %v17103_v33  ;;  %v17181_v33 = vld [vmem:[%s19829_s7 + $0x10c4] ss:$8 sps:$4 sm:$0xff]  }
 0x3f4   : > { %14546 = vmatprep.subr.bf16.mxu0 %v17113_v35  ;;  %v17184_v35 = vld [vmem:[%s19829_s7 + $0x11c4] ss:$8 sps:$4 sm:$0xff]  }
 0x3f5   : > { %14536 = vmatpush2.bf16.msra.mxu1 %v17106_v9  ;;  %v17179_v9 = vld [vmem:[%s19829_s7 + $0x10c0] ss:$8 sps:$4 sm:$0xff]  }
 0x3f6   : > { %v14252_v49 = vpop.f32.mrf.mxu0  ;;  %14497 = vmatmul.mubr.bf16.vlgmr.msra.gmra.mxu0 %v15283_v14  ;;  %14587 = vmatprep.subr.bf16.mxu1 %v17118_v38  ;;  %v17187_v14 = vld [vmem:[%s19829_s7 + $0x10b4] ss:$8 sps:$4 sm:$0xff]   ;;  %v17182_v38 = vld [vmem:[%s19829_s7 + $0x11c0] ss:$8 sps:$4 sm:$0xff]  }
 0x3f7   : > { %v14253_v51 = vadd.f32 %v14252_v49, %v20439_v36  ;;  %14547 = vmatpush1.bf16.msra.mxu0 %v17111_v43  ;;  %14578 = vmatprep.mubr.bf16.mxu0 %v15288_v22  ;;  %v17190_v43 = vld [vmem:[%s19829_s7 + $0x11b4] ss:$8 sps:$4 sm:$0xff]   ;;  %v17185_v22 = vld [vmem:[%s19829_s7 + $0x10b0] ss:$8 sps:$4 sm:$0xff]  }
 0x3f8   : > { %v14254_v21 = vpop.f32.mrf.mxu0  ;;  %v14293_v23 = vpop.f32.mrf.mxu1  ;;  %14538 = vmatmul.mubr.bf16.vlgmr.msra.gmra.mxu1 %v15285_v44  ;;  %14548 = vmatprep.subr.bf16.mxu0 %v17121_v46  ;;  %v17193_v44 = vld [vmem:[%s19829_s7 + $0x10a4] ss:$8 sps:$4 sm:$0xff]   ;;  %v17188_v46 = vld [vmem:[%s19829_s7 + $0x11b0] ss:$8 sps:$4 sm:$0xff]   ;;  %v17199_v49 = vld [vmem:[%s19829_s7 + $0x1094] ss:$8 sps:$4 sm:$0xff]  }
 0x3f9   : > { %v14255_v54 = vadd.f32 %v14254_v21, %v20443_v39  ;;  %v20526_v55 = vadd.f32 %v14293_v23, %v14253_v51  ;;  %14588 = vmatpush1.bf16.msra.mxu1 %v17116_v19  ;;  %14619 = vmatprep.mubr.bf16.mxu1 %v15290_v48  ;;  %v17133_v39 = vld [vmem:[%s19829_s7 + $0x1044] ss:$8 sps:$4 sm:$0xff]   ;;  %v17191_v48 = vld [vmem:[%s19829_s7 + $0x10a0] ss:$8 sps:$4 sm:$0xff]   ;;  %v17202_v51 = vld [vmem:[%s19829_s7 + $0x1194] ss:$8 sps:$4 sm:$0xff]  }
 0x3fa   : > { %v14256_v36 = vpop.f32.mrf.mxu0  ;;  %v14295_v59 = vpop.f32.mrf.mxu1  ;;  %14589 = vmatprep.subr.bf16.mxu1 %v17124_v50  ;;  %v17196_v19 = vld [vmem:[%s19829_s7 + $0x11a4] ss:$8 sps:$4 sm:$0xff]   ;;  %v17194_v50 = vld [vmem:[%s19829_s7 + $0x11a0] ss:$8 sps:$4 sm:$0xff]   ;;  %v17200_v23 = vld [vmem:[%s19829_s7 + $0x1190] ss:$8 sps:$4 sm:$0xff]  }
 0x3fb   : > { %v20530_v60 = vadd.f32 %v14295_v59, %v14255_v54  ;;  %14549 = vmatpush1.bf16.msra.mxu0 %v17119_v52  ;;  %v17197_v52 = vld [vmem:[%s19829_s7 + $0x1090] ss:$8 sps:$4 sm:$0xff]   ;;  %v17205_v21 = vld [vmem:[%s19829_s7 + $0x1084] ss:$8 sps:$4 sm:$0xff]   ;;  %v17203_v54 = vld [vmem:[%s19829_s7 + $0x1080] ss:$8 sps:$4 sm:$0xff]  }
 0x3fc   : > { %v14257_v63 = vpop.f32.mrf.mxu0  ;;  %14550 = vmatprep.subr.bf16.mxu0 %v17127_v53  ;;  %v14297_v40 = vpop.f32.mrf.mxu1  ;;  %v17208_v53 = vld [vmem:[%s19829_s7 + $0x1184] ss:$8 sps:$4 sm:$0xff]   ;;  %v20589_v36 = vld [vmem:[%s21131_s0 + $0x90] sm:$0xff]  ;;  %v17206_v59 = vld [vmem:[%s19829_s7 + $0x1180] ss:$8 sps:$4 sm:$0xff]  }
 0x3fd   : > { %14590 = vmatpush1.bf16.msra.mxu1 %v17122_v58  ;;  %v17213_v58 = vld [vmem:[%s19829_s7 + $0x1274] ss:$8 sps:$4 sm:$0xff]   ;;  %v15292_v40 = vcombine.high %v20589_v36, %v20589_v36 }
 0x3fe   : > { %14591 = vmatprep.subr.bf16.mxu1 %v17130_v25  ;;  %v14298_v6 = vpop.f32.mrf.mxu1  ;;  %v15287_v25 = vcombine.low %v20501_v37, %v20501_v37  ;;  %v20598_v63 = vld [vmem:[%s21131_s0 + $0x98] sm:$0xff] }
 0x3ff   : > { %14551 = vmatpush1.bf16.msra.mxu0 %v17125_v62  ;;  %v17218_v62 = vld [vmem:[%s19829_s7 + $0x1374] ss:$8 sps:$4 sm:$0xff]   ;;  %v17216_v37 = vld [vmem:[%s19829_s7 + $0x1370] ss:$8 sps:$4 sm:$0xff]   ;;  %v15294_v6 = vcombine.high %v20598_v63, %v20598_v63 }
 0x400   : > { %14552 = vmatprep.subr.bf16.mxu0 %v17133_v39  ;;  %v17211_v39 = vld [vmem:[%s19829_s7 + $0x1270] ss:$8 sps:$4 sm:$0xff]  }
 0x401   : > { %14592 = vmatpush1.bf16.msra.mxu1 %v17128_v2  ;;  %v15289_v2 = vcombine.low %v20510_v41, %v20510_v41 }
 0x402   : > { %14593 = vmatprep.subr.bf16.mxu1 %v17136_v3  ;;  %v17221_v3 = vld [vmem:[%s19829_s7 + $0x1264] ss:$8 sps:$4 sm:$0xff]  }
 0x403   : > { %14553 = vmatpush1.bf16.msra.mxu0 %v17131_v45 }
 0x404   : > { %14554 = vmatprep.subr.bf16.mxu0 %v17139_v56  ;;  %v17224_v56 = vld [vmem:[%s19829_s7 + $0x1364] ss:$8 sps:$4 sm:$0xff]  }
 0x405   : > { %14594 = vmatpush1.bf16.msra.mxu1 %v17134_v7 }
 0x406   : > { %14595 = vmatprep.subr.bf16.mxu1 %v17142_v8  ;;  %v17219_v8 = vld [vmem:[%s19829_s7 + $0x1260] ss:$8 sps:$4 sm:$0xff]  }
 0x407   : > { %14555 = vmatpush1.bf16.msra.mxu0 %v17137_v42 }
 0x408   : > { %14556 = vmatprep.subr.bf16.mxu0 %v17145_v57  ;;  %v17227_v57 = vld [vmem:[%s19829_s7 + $0x1254] ss:$8 sps:$4 sm:$0xff]  }
 0x409   : > { %14596 = vmatpush1.bf16.msra.mxu1 %v17140_v11 }
 0x40a   : > { %14597 = vmatprep.subr.bf16.mxu1 %v17148_v61 }
 0x40b   : > { %14557 = vmatpush1.bf16.msra.mxu0 %v17143_v13  ;;  %v17222_v13 = vld [vmem:[%s19829_s7 + $0x1360] ss:$8 sps:$4 sm:$0xff]  }
 0x40c   : > { %14558 = vmatprep.subr.bf16.mxu0 %v17151_v15 }
 0x40d   : > { %14598 = vmatpush1.bf16.msra.mxu1 %v17146_v47  ;;  %v17230_v47 = vld [vmem:[%s19829_s7 + $0x1354] ss:$8 sps:$4 sm:$0xff]  }
 0x40e   : > { %14599 = vmatprep.subr.bf16.mxu1 %v17154_v16 }
 0x40f   : > { %14559 = vmatpush1.bf16.msra.mxu0 %v17149_v17  ;;  %v17225_v17 = vld [vmem:[%s19829_s7 + $0x1250] ss:$8 sps:$4 sm:$0xff]  }
 0x410   : > { %14560 = vmatprep.subr.bf16.mxu0 %v17157_v18 }
 0x411   : > { %14600 = vmatpush1.bf16.msra.mxu1 %v17152_v0 }
 0x412   : > { %14601 = vmatprep.subr.bf16.mxu1 %v17160_v20  ;;  %v17228_v20 = vld [vmem:[%s19829_s7 + $0x1350] ss:$8 sps:$4 sm:$0xff]  }
 0x413   : > { %14561 = vmatpush1.bf16.msra.mxu0 %v17155_v12  ;;  %v17236_v12 = vld [vmem:[%s19829_s7 + $0x1344] ss:$8 sps:$4 sm:$0xff]  }
 0x414   : > { %14562 = vmatprep.subr.bf16.mxu0 %v17163_v24 }
 0x415   : > { %14602 = vmatpush1.bf16.msra.mxu1 %v17158_v4  ;;  %v17231_v4 = vld [vmem:[%s19829_s7 + $0x1240] ss:$8 sps:$4 sm:$0xff]  }
 0x416   : > { %14603 = vmatprep.subr.bf16.mxu1 %v17166_v26  ;;  %v17239_v26 = vld [vmem:[%s19829_s7 + $0x1234] ss:$8 sps:$4 sm:$0xff]  }
 0x417   : > { %14563 = vmatpush2.bf16.msra.mxu0 %v17161_v27  ;;  %v17234_v27 = vld [vmem:[%s19829_s7 + $0x1340] ss:$8 sps:$4 sm:$0xff]  }
 0x418   : > { %14564 = vmatprep.subr.bf16.mxu0 %v17169_v28  ;;  %v17242_v28 = vld [vmem:[%s19829_s7 + $0x1334] ss:$8 sps:$4 sm:$0xff]  }
 0x419   : > { %14604 = vmatpush2.bf16.msra.mxu1 %v17164_v1  ;;  %v17237_v1 = vld [vmem:[%s19829_s7 + $0x1230] ss:$8 sps:$4 sm:$0xff]  }
 0x41a   : > { %14605 = vmatprep.subr.bf16.mxu1 %v17172_v29  ;;  %v17245_v29 = vld [vmem:[%s19829_s7 + $0x1224] ss:$8 sps:$4 sm:$0xff]  }
 0x41b   : > { %14565 = vmatpush2.bf16.msra.mxu0 %v17167_v30  ;;  %v17240_v30 = vld [vmem:[%s19829_s7 + $0x1330] ss:$8 sps:$4 sm:$0xff]  }
 0x41c   : > { %14566 = vmatprep.subr.bf16.mxu0 %v17175_v10  ;;  %v17248_v10 = vld [vmem:[%s19829_s7 + $0x1324] ss:$8 sps:$4 sm:$0xff]  }
 0x41d   : > { %14606 = vmatpush2.bf16.msra.mxu1 %v17170_v31  ;;  %v17243_v31 = vld [vmem:[%s19829_s7 + $0x1220] ss:$8 sps:$4 sm:$0xff]  }
 0x41e   : > { %14607 = vmatprep.subr.bf16.mxu1 %v17178_v32  ;;  %v17251_v32 = vld [vmem:[%s19829_s7 + $0x1214] ss:$8 sps:$4 sm:$0xff]  }
 0x41f   : > { %14567 = vmatpush2.bf16.msra.mxu0 %v17173_v5  ;;  %v17246_v5 = vld [vmem:[%s19829_s7 + $0x1320] ss:$8 sps:$4 sm:$0xff]  }
 0x420   : > { %14568 = vmatprep.subr.bf16.mxu0 %v17181_v33  ;;  %v17254_v33 = vld [vmem:[%s19829_s7 + $0x1314] ss:$8 sps:$4 sm:$0xff]  }
 0x421   : > { %14608 = vmatpush2.bf16.msra.mxu1 %v17176_v34  ;;  %v17249_v34 = vld [vmem:[%s19829_s7 + $0x1210] ss:$8 sps:$4 sm:$0xff]  }
 0x422   : > { %14609 = vmatprep.subr.bf16.mxu1 %v17184_v35  ;;  %v17257_v35 = vld [vmem:[%s19829_s7 + $0x1204] ss:$8 sps:$4 sm:$0xff]  }
 0x423   : > { %14569 = vmatpush2.bf16.msra.mxu0 %v17179_v9  ;;  %v17252_v9 = vld [vmem:[%s19829_s7 + $0x1310] ss:$8 sps:$4 sm:$0xff]  }
 0x424   : > { %14570 = vmatprep.subr.bf16.mxu0 %v17187_v14  ;;  %v17260_v14 = vld [vmem:[%s19829_s7 + $0x1304] ss:$8 sps:$4 sm:$0xff]  }
 0x425   : > { %14610 = vmatpush2.bf16.msra.mxu1 %v17182_v38  ;;  %v17255_v38 = vld [vmem:[%s19829_s7 + $0x1200] ss:$8 sps:$4 sm:$0xff]  }
 0x426   : > { %14611 = vmatprep.subr.bf16.mxu1 %v17190_v43  ;;  %v17263_v43 = vld [vmem:[%s19829_s7 + $0x12f4] ss:$8 sps:$4 sm:$0xff]  }
 0x427   : > { %14571 = vmatpush2.bf16.msra.mxu0 %v17185_v22  ;;  %v17258_v22 = vld [vmem:[%s19829_s7 + $0x1300] ss:$8 sps:$4 sm:$0xff]  }
 0x428   : > { %14572 = vmatprep.subr.bf16.mxu0 %v17193_v44  ;;  %v17266_v44 = vld [vmem:[%s19829_s7 + $0x13f4] ss:$8 sps:$4 sm:$0xff]  }
 0x429   : > { %14612 = vmatpush2.bf16.msra.mxu1 %v17188_v46  ;;  %v17261_v46 = vld [vmem:[%s19829_s7 + $0x12f0] ss:$8 sps:$4 sm:$0xff]  }
 0x42a   : > { %14613 = vmatprep.subr.bf16.mxu1 %v17196_v19  ;;  %v17269_v19 = vld [vmem:[%s19829_s7 + $0x12e4] ss:$8 sps:$4 sm:$0xff]  }
 0x42b   : > { %14573 = vmatpush2.bf16.msra.mxu0 %v17191_v48  ;;  %v17264_v48 = vld [vmem:[%s19829_s7 + $0x13f0] ss:$8 sps:$4 sm:$0xff]  }
 0x42c   : > { %14574 = vmatprep.subr.bf16.mxu0 %v17199_v49  ;;  %v17272_v49 = vld [vmem:[%s19829_s7 + $0x13e4] ss:$8 sps:$4 sm:$0xff]  }
 0x42d   : > { %14614 = vmatpush2.bf16.msra.mxu1 %v17194_v50  ;;  %v17267_v50 = vld [vmem:[%s19829_s7 + $0x12e0] ss:$8 sps:$4 sm:$0xff]  }
 0x42e   : > { %14615 = vmatprep.subr.bf16.mxu1 %v17202_v51  ;;  %v17275_v51 = vld [vmem:[%s19829_s7 + $0x12d4] ss:$8 sps:$4 sm:$0xff]  }
 0x42f   : > { %14575 = vmatpush2.bf16.msra.mxu0 %v17197_v52  ;;  %v17270_v52 = vld [vmem:[%s19829_s7 + $0x13e0] ss:$8 sps:$4 sm:$0xff]  }
 0x430   : > { %14576 = vmatprep.subr.bf16.mxu0 %v17205_v21  ;;  %v17278_v21 = vld [vmem:[%s19829_s7 + $0x13d4] ss:$8 sps:$4 sm:$0xff]  }
 0x431   : > { %14616 = vmatpush2.bf16.msra.mxu1 %v17200_v23  ;;  %v17273_v23 = vld [vmem:[%s19829_s7 + $0x12d0] ss:$8 sps:$4 sm:$0xff]  }
 0x432   : > { %14617 = vmatprep.subr.bf16.mxu1 %v17208_v53  ;;  %v17281_v53 = vld [vmem:[%s19829_s7 + $0x12c4] ss:$8 sps:$4 sm:$0xff]  }
 0x433   : > { %14577 = vmatpush2.bf16.msra.mxu0 %v17203_v54  ;;  %v17276_v54 = vld [vmem:[%s19829_s7 + $0x13d0] ss:$8 sps:$4 sm:$0xff]  }
 0x434   : > { %14628 = vmatprep.subr.bf16.mxu0 %v17213_v58  ;;  %v17284_v58 = vld [vmem:[%s19829_s7 + $0x13c4] ss:$8 sps:$4 sm:$0xff]  }
 0x435   : > { %14618 = vmatpush2.bf16.msra.mxu1 %v17206_v59  ;;  %v17279_v59 = vld [vmem:[%s19829_s7 + $0x12c0] ss:$8 sps:$4 sm:$0xff]  }
 0x436   : > { %v14334_v45 = vpop.f32.mrf.mxu0  ;;  %14579 = vmatmul.mubr.bf16.vlgmr.msra.gmra.mxu0 %v15287_v25  ;;  %14669 = vmatprep.subr.bf16.mxu1 %v17218_v62  ;;  %v17287_v25 = vld [vmem:[%s19829_s7 + $0x12b4] ss:$8 sps:$4 sm:$0xff]   ;;  %v17282_v62 = vld [vmem:[%s19829_s7 + $0x13c0] ss:$8 sps:$4 sm:$0xff]  }
 0x437   : > { %v14335_v7 = vadd.f32 %v14334_v45, %v20526_v55  ;;  %14629 = vmatpush1.bf16.msra.mxu0 %v17211_v39  ;;  %14660 = vmatprep.mubr.bf16.mxu0 %v15292_v40  ;;  %v17290_v39 = vld [vmem:[%s19829_s7 + $0x13b4] ss:$8 sps:$4 sm:$0xff]   ;;  %v17285_v40 = vld [vmem:[%s19829_s7 + $0x12b0] ss:$8 sps:$4 sm:$0xff]  }
 0x438   : > { %v14336_v42 = vpop.f32.mrf.mxu0  ;;  %v14375_v41 = vpop.f32.mrf.mxu1  ;;  %14620 = vmatmul.mubr.bf16.vlgmr.msra.gmra.mxu1 %v15289_v2  ;;  %14630 = vmatprep.subr.bf16.mxu0 %v17221_v3  ;;  %v17293_v2 = vld [vmem:[%s19829_s7 + $0x12a4] ss:$8 sps:$4 sm:$0xff]   ;;  %v17288_v3 = vld [vmem:[%s19829_s7 + $0x13b0] ss:$8 sps:$4 sm:$0xff]   ;;  %v17299_v45 = vld [vmem:[%s19829_s7 + $0x1294] ss:$8 sps:$4 sm:$0xff]  }
 0x439   : > { %v14337_v11 = vadd.f32 %v14336_v42, %v20530_v60  ;;  %v20614_v61 = vadd.f32 %v14375_v41, %v14335_v7  ;;  %14670 = vmatpush1.bf16.msra.mxu1 %v17216_v37  ;;  %14701 = vmatprep.mubr.bf16.mxu1 %v15294_v6  ;;  %v17233_v60 = vld [vmem:[%s19829_s7 + $0x1244] ss:$8 sps:$4 sm:$0xff]   ;;  %v17291_v6 = vld [vmem:[%s19829_s7 + $0x12a0] ss:$8 sps:$4 sm:$0xff]   ;;  %v17302_v7 = vld [vmem:[%s19829_s7 + $0x1394] ss:$8 sps:$4 sm:$0xff]  }
 0x43a   : > { %v14338_v55 = vpop.f32.mrf.mxu0  ;;  %v14377_v15 = vpop.f32.mrf.mxu1  ;;  %14671 = vmatprep.subr.bf16.mxu1 %v17224_v56  ;;  %v17296_v37 = vld [vmem:[%s19829_s7 + $0x13a4] ss:$8 sps:$4 sm:$0xff]   ;;  %v17294_v56 = vld [vmem:[%s19829_s7 + $0x13a0] ss:$8 sps:$4 sm:$0xff]   ;;  %v17300_v41 = vld [vmem:[%s19829_s7 + $0x1390] ss:$8 sps:$4 sm:$0xff]  }
 0x43b   : > { %v20618_v16 = vadd.f32 %v14377_v15, %v14337_v11  ;;  %14631 = vmatpush1.bf16.msra.mxu0 %v17219_v8  ;;  %v17297_v8 = vld [vmem:[%s19829_s7 + $0x1290] ss:$8 sps:$4 sm:$0xff]   ;;  %v17305_v42 = vld [vmem:[%s19829_s7 + $0x1284] ss:$8 sps:$4 sm:$0xff]   ;;  %v17303_v11 = vld [vmem:[%s19829_s7 + $0x1280] ss:$8 sps:$4 sm:$0xff]  }
 0x43c   : > { %v14339_v18 = vpop.f32.mrf.mxu0  ;;  %14632 = vmatprep.subr.bf16.mxu0 %v17227_v57  ;;  %v14379_v0 = vpop.f32.mrf.mxu1  ;;  %v17308_v57 = vld [vmem:[%s19829_s7 + $0x1384] ss:$8 sps:$4 sm:$0xff]   ;;  %v17306_v15 = vld [vmem:[%s19829_s7 + $0x1380] ss:$8 sps:$4 sm:$0xff]  }
 0x43d   : > { %14672 = vmatpush1.bf16.msra.mxu1 %v17222_v13  ;;  %v17313_v13 = vld [vmem:[%s19829_s7 + $0x1474] ss:$8 sps:$4 sm:$0xff]   ;;  %v20677_v55 = vld [vmem:[%s21131_s0 + $0xa0] sm:$0xff]  ;;  %v20686_v18 = vld [vmem:[%s21131_s0 + $0xa8] sm:$0xff] }
 0x43e   : > { %14673 = vmatprep.subr.bf16.mxu1 %v17230_v47  ;;  %v14380_v24 = vpop.f32.mrf.mxu1  ;;  %v15291_v47 = vcombine.low %v20589_v36, %v20589_v36  ;;  %v15296_v0 = vcombine.high %v20677_v55, %v20677_v55  ;;  %v17316_v36 = vld [vmem:[%s19829_s7 + $0x1570] ss:$8 sps:$4 sm:$0xff]  }
 0x43f   : > { %14633 = vmatpush1.bf16.msra.mxu0 %v17225_v17  ;;  %v17318_v17 = vld [vmem:[%s19829_s7 + $0x1574] ss:$8 sps:$4 sm:$0xff]   ;;  %v15298_v24 = vcombine.high %v20686_v18, %v20686_v18 }
 0x440   : > { %14634 = vmatprep.subr.bf16.mxu0 %v17233_v60  ;;  %v17311_v60 = vld [vmem:[%s19829_s7 + $0x1470] ss:$8 sps:$4 sm:$0xff]  }
 0x441   : > { %14674 = vmatpush1.bf16.msra.mxu1 %v17228_v20  ;;  %v15293_v20 = vcombine.low %v20598_v63, %v20598_v63 }
 0x442   : > { %14675 = vmatprep.subr.bf16.mxu1 %v17236_v12  ;;  %v17321_v12 = vld [vmem:[%s19829_s7 + $0x1464] ss:$8 sps:$4 sm:$0xff]  }
 0x443   : > { %14635 = vmatpush1.bf16.msra.mxu0 %v17231_v4 }
 0x444   : > { %14636 = vmatprep.subr.bf16.mxu0 %v17239_v26  ;;  %v17324_v26 = vld [vmem:[%s19829_s7 + $0x1564] ss:$8 sps:$4 sm:$0xff]  }
 0x445   : > { %14676 = vmatpush1.bf16.msra.mxu1 %v17234_v27 }
 0x446   : > { %14677 = vmatprep.subr.bf16.mxu1 %v17242_v28  ;;  %v17319_v28 = vld [vmem:[%s19829_s7 + $0x1460] ss:$8 sps:$4 sm:$0xff]  }
 0x447   : > { %14637 = vmatpush1.bf16.msra.mxu0 %v17237_v1 }
 0x448   : > { %14638 = vmatprep.subr.bf16.mxu0 %v17245_v29  ;;  %v17327_v29 = vld [vmem:[%s19829_s7 + $0x1454] ss:$8 sps:$4 sm:$0xff]  }
 0x449   : > { %14678 = vmatpush1.bf16.msra.mxu1 %v17240_v30 }
 0x44a   : > { %14679 = vmatprep.subr.bf16.mxu1 %v17248_v10 }
 0x44b   : > { %14639 = vmatpush1.bf16.msra.mxu0 %v17243_v31  ;;  %v17322_v31 = vld [vmem:[%s19829_s7 + $0x1560] ss:$8 sps:$4 sm:$0xff]  }
 0x44c   : > { %14640 = vmatprep.subr.bf16.mxu0 %v17251_v32 }
 0x44d   : > { %14680 = vmatpush1.bf16.msra.mxu1 %v17246_v5  ;;  %v17330_v5 = vld [vmem:[%s19829_s7 + $0x1554] ss:$8 sps:$4 sm:$0xff]  }
 0x44e   : > { %14681 = vmatprep.subr.bf16.mxu1 %v17254_v33 }
 0x44f   : > { %14641 = vmatpush1.bf16.msra.mxu0 %v17249_v34  ;;  %v17325_v34 = vld [vmem:[%s19829_s7 + $0x1450] ss:$8 sps:$4 sm:$0xff]  }
 0x450   : > { %14642 = vmatprep.subr.bf16.mxu0 %v17257_v35 }
 0x451   : > { %14682 = vmatpush1.bf16.msra.mxu1 %v17252_v9 }
 0x452   : > { %14683 = vmatprep.subr.bf16.mxu1 %v17260_v14  ;;  %v17328_v14 = vld [vmem:[%s19829_s7 + $0x1550] ss:$8 sps:$4 sm:$0xff]  }
 0x453   : > { %14643 = vmatpush1.bf16.msra.mxu0 %v17255_v38  ;;  %v17336_v38 = vld [vmem:[%s19829_s7 + $0x1544] ss:$8 sps:$4 sm:$0xff]  }
 0x454   : > { %14644 = vmatprep.subr.bf16.mxu0 %v17263_v43 }
 0x455   : > { %14684 = vmatpush1.bf16.msra.mxu1 %v17258_v22  ;;  %v17331_v22 = vld [vmem:[%s19829_s7 + $0x1440] ss:$8 sps:$4 sm:$0xff]  }
 0x456   : > { %14685 = vmatprep.subr.bf16.mxu1 %v17266_v44  ;;  %v17339_v44 = vld [vmem:[%s19829_s7 + $0x1434] ss:$8 sps:$4 sm:$0xff]  }
 0x457   : > { %14645 = vmatpush2.bf16.msra.mxu0 %v17261_v46  ;;  %v17334_v46 = vld [vmem:[%s19829_s7 + $0x1540] ss:$8 sps:$4 sm:$0xff]  }
 0x458   : > { %14646 = vmatprep.subr.bf16.mxu0 %v17269_v19  ;;  %v17342_v19 = vld [vmem:[%s19829_s7 + $0x1534] ss:$8 sps:$4 sm:$0xff]  }
 0x459   : > { %14686 = vmatpush2.bf16.msra.mxu1 %v17264_v48  ;;  %v17337_v48 = vld [vmem:[%s19829_s7 + $0x1430] ss:$8 sps:$4 sm:$0xff]  }
 0x45a   : > { %14687 = vmatprep.subr.bf16.mxu1 %v17272_v49  ;;  %v17345_v49 = vld [vmem:[%s19829_s7 + $0x1424] ss:$8 sps:$4 sm:$0xff]  }
 0x45b   : > { %14647 = vmatpush2.bf16.msra.mxu0 %v17267_v50  ;;  %v17340_v50 = vld [vmem:[%s19829_s7 + $0x1530] ss:$8 sps:$4 sm:$0xff]  }
 0x45c   : > { %14648 = vmatprep.subr.bf16.mxu0 %v17275_v51  ;;  %v17348_v51 = vld [vmem:[%s19829_s7 + $0x1524] ss:$8 sps:$4 sm:$0xff]  }
 0x45d   : > { %14688 = vmatpush2.bf16.msra.mxu1 %v17270_v52  ;;  %v17343_v52 = vld [vmem:[%s19829_s7 + $0x1420] ss:$8 sps:$4 sm:$0xff]  }
 0x45e   : > { %14689 = vmatprep.subr.bf16.mxu1 %v17278_v21  ;;  %v17351_v21 = vld [vmem:[%s19829_s7 + $0x1414] ss:$8 sps:$4 sm:$0xff]  }
 0x45f   : > { %14649 = vmatpush2.bf16.msra.mxu0 %v17273_v23  ;;  %v17346_v23 = vld [vmem:[%s19829_s7 + $0x1520] ss:$8 sps:$4 sm:$0xff]  }
 0x460   : > { %14650 = vmatprep.subr.bf16.mxu0 %v17281_v53  ;;  %v17354_v53 = vld [vmem:[%s19829_s7 + $0x1514] ss:$8 sps:$4 sm:$0xff]  }
 0x461   : > { %14690 = vmatpush2.bf16.msra.mxu1 %v17276_v54  ;;  %v17349_v54 = vld [vmem:[%s19829_s7 + $0x1410] ss:$8 sps:$4 sm:$0xff]  }
 0x462   : > { %14691 = vmatprep.subr.bf16.mxu1 %v17284_v58  ;;  %v17357_v58 = vld [vmem:[%s19829_s7 + $0x1404] ss:$8 sps:$4 sm:$0xff]  }
 0x463   : > { %14651 = vmatpush2.bf16.msra.mxu0 %v17279_v59  ;;  %v17352_v59 = vld [vmem:[%s19829_s7 + $0x1510] ss:$8 sps:$4 sm:$0xff]  }
 0x464   : > { %14652 = vmatprep.subr.bf16.mxu0 %v17287_v25  ;;  %v17360_v25 = vld [vmem:[%s19829_s7 + $0x1504] ss:$8 sps:$4 sm:$0xff]  }
 0x465   : > { %14692 = vmatpush2.bf16.msra.mxu1 %v17282_v62  ;;  %v17355_v62 = vld [vmem:[%s19829_s7 + $0x1400] ss:$8 sps:$4 sm:$0xff]  }
 0x466   : > { %14693 = vmatprep.subr.bf16.mxu1 %v17290_v39  ;;  %v17363_v39 = vld [vmem:[%s19829_s7 + $0x14f4] ss:$8 sps:$4 sm:$0xff]  }
 0x467   : > { %14653 = vmatpush2.bf16.msra.mxu0 %v17285_v40  ;;  %v17358_v40 = vld [vmem:[%s19829_s7 + $0x1500] ss:$8 sps:$4 sm:$0xff]  }
 0x468   : > { %14654 = vmatprep.subr.bf16.mxu0 %v17293_v2  ;;  %v17366_v2 = vld [vmem:[%s19829_s7 + $0x15f4] ss:$8 sps:$4 sm:$0xff]  }
 0x469   : > { %14694 = vmatpush2.bf16.msra.mxu1 %v17288_v3  ;;  %v17361_v3 = vld [vmem:[%s19829_s7 + $0x14f0] ss:$8 sps:$4 sm:$0xff]  }
 0x46a   : > { %14695 = vmatprep.subr.bf16.mxu1 %v17296_v37  ;;  %v17369_v37 = vld [vmem:[%s19829_s7 + $0x14e4] ss:$8 sps:$4 sm:$0xff]  }
 0x46b   : > { %14655 = vmatpush2.bf16.msra.mxu0 %v17291_v6  ;;  %v17364_v6 = vld [vmem:[%s19829_s7 + $0x15f0] ss:$8 sps:$4 sm:$0xff]  }
 0x46c   : > { %14656 = vmatprep.subr.bf16.mxu0 %v17299_v45  ;;  %v17372_v45 = vld [vmem:[%s19829_s7 + $0x15e4] ss:$8 sps:$4 sm:$0xff]  }
 0x46d   : > { %14696 = vmatpush2.bf16.msra.mxu1 %v17294_v56  ;;  %v17367_v56 = vld [vmem:[%s19829_s7 + $0x14e0] ss:$8 sps:$4 sm:$0xff]  }
 0x46e   : > { %14697 = vmatprep.subr.bf16.mxu1 %v17302_v7  ;;  %v17375_v7 = vld [vmem:[%s19829_s7 + $0x14d4] ss:$8 sps:$4 sm:$0xff]  }
 0x46f   : > { %14657 = vmatpush2.bf16.msra.mxu0 %v17297_v8  ;;  %v17370_v8 = vld [vmem:[%s19829_s7 + $0x15e0] ss:$8 sps:$4 sm:$0xff]  }
 0x470   : > { %14658 = vmatprep.subr.bf16.mxu0 %v17305_v42  ;;  %v17378_v42 = vld [vmem:[%s19829_s7 + $0x15d4] ss:$8 sps:$4 sm:$0xff]  }
 0x471   : > { %14698 = vmatpush2.bf16.msra.mxu1 %v17300_v41  ;;  %v17373_v41 = vld [vmem:[%s19829_s7 + $0x14d0] ss:$8 sps:$4 sm:$0xff]  }
 0x472   : > { %14699 = vmatprep.subr.bf16.mxu1 %v17308_v57  ;;  %v17381_v57 = vld [vmem:[%s19829_s7 + $0x14c4] ss:$8 sps:$4 sm:$0xff]  }
 0x473   : > { %14659 = vmatpush2.bf16.msra.mxu0 %v17303_v11  ;;  %v17376_v11 = vld [vmem:[%s19829_s7 + $0x15d0] ss:$8 sps:$4 sm:$0xff]  }
 0x474   : > { %14710 = vmatprep.subr.bf16.mxu0 %v17313_v13  ;;  %v17384_v13 = vld [vmem:[%s19829_s7 + $0x15c4] ss:$8 sps:$4 sm:$0xff]  }
 0x475   : > { %14700 = vmatpush2.bf16.msra.mxu1 %v17306_v15  ;;  %v17379_v15 = vld [vmem:[%s19829_s7 + $0x14c0] ss:$8 sps:$4 sm:$0xff]  }
 0x476   : > { %v14416_v4 = vpop.f32.mrf.mxu0  ;;  %14661 = vmatmul.mubr.bf16.vlgmr.msra.gmra.mxu0 %v15291_v47  ;;  %14751 = vmatprep.subr.bf16.mxu1 %v17318_v17  ;;  %v17387_v47 = vld [vmem:[%s19829_s7 + $0x14b4] ss:$8 sps:$4 sm:$0xff]   ;;  %v17382_v17 = vld [vmem:[%s19829_s7 + $0x15c0] ss:$8 sps:$4 sm:$0xff]  }
 0x477   : > { %v14417_v27 = vadd.f32 %v14416_v4, %v20614_v61  ;;  %14711 = vmatpush1.bf16.msra.mxu0 %v17311_v60  ;;  %14742 = vmatprep.mubr.bf16.mxu0 %v15296_v0  ;;  %v17390_v60 = vld [vmem:[%s19829_s7 + $0x15b4] ss:$8 sps:$4 sm:$0xff]   ;;  %v17385_v0 = vld [vmem:[%s19829_s7 + $0x14b0] ss:$8 sps:$4 sm:$0xff]  }
 0x478   : > { %v14418_v1 = vpop.f32.mrf.mxu0  ;;  %v14457_v63 = vpop.f32.mrf.mxu1  ;;  %14702 = vmatmul.mubr.bf16.vlgmr.msra.gmra.mxu1 %v15293_v20  ;;  %14712 = vmatprep.subr.bf16.mxu0 %v17321_v12  ;;  %v17393_v20 = vld [vmem:[%s19829_s7 + $0x14a4] ss:$8 sps:$4 sm:$0xff]   ;;  %v17388_v12 = vld [vmem:[%s19829_s7 + $0x15b0] ss:$8 sps:$4 sm:$0xff]   ;;  %v17399_v4 = vld [vmem:[%s19829_s7 + $0x1494] ss:$8 sps:$4 sm:$0xff]  }
 0x479   : > { %v14419_v30 = vadd.f32 %v14418_v1, %v20618_v16  ;;  %v20702_v10 = vadd.f32 %v14457_v63, %v14417_v27  ;;  %14752 = vmatpush1.bf16.msra.mxu1 %v17316_v36  ;;  %14783 = vmatprep.mubr.bf16.mxu1 %v15298_v24  ;;  %v17333_v16 = vld [vmem:[%s19829_s7 + $0x1444] ss:$8 sps:$4 sm:$0xff]   ;;  %v17391_v24 = vld [vmem:[%s19829_s7 + $0x14a0] ss:$8 sps:$4 sm:$0xff]   ;;  %v17402_v27 = vld [vmem:[%s19829_s7 + $0x1594] ss:$8 sps:$4 sm:$0xff]  }
 0x47a   : > { %v14420_v61 = vpop.f32.mrf.mxu0  ;;  %v14459_v32 = vpop.f32.mrf.mxu1  ;;  %14753 = vmatprep.subr.bf16.mxu1 %v17324_v26  ;;  %v17396_v36 = vld [vmem:[%s19829_s7 + $0x15a4] ss:$8 sps:$4 sm:$0xff]   ;;  %v17394_v26 = vld [vmem:[%s19829_s7 + $0x15a0] ss:$8 sps:$4 sm:$0xff]   ;;  %v17400_v63 = vld [vmem:[%s19829_s7 + $0x1590] ss:$8 sps:$4 sm:$0xff]  }
 0x47b   : > { %v20706_v33 = vadd.f32 %v14459_v32, %v14419_v30  ;;  %14713 = vmatpush1.bf16.msra.mxu0 %v17319_v28  ;;  %v17397_v28 = vld [vmem:[%s19829_s7 + $0x1490] ss:$8 sps:$4 sm:$0xff]   ;;  %v17405_v1 = vld [vmem:[%s19829_s7 + $0x1484] ss:$8 sps:$4 sm:$0xff]   ;;  %v17403_v30 = vld [vmem:[%s19829_s7 + $0x1480] ss:$8 sps:$4 sm:$0xff]  }
 0x47c   : > { %v14421_v35 = vpop.f32.mrf.mxu0  ;;  %14714 = vmatprep.subr.bf16.mxu0 %v17327_v29  ;;  %v14461_v9 = vpop.f32.mrf.mxu1  ;;  %v17408_v29 = vld [vmem:[%s19829_s7 + $0x1584] ss:$8 sps:$4 sm:$0xff]   ;;  %v20765_v61 = vld [vmem:[%s21131_s0 + $0xb0] sm:$0xff]  ;;  %v17406_v32 = vld [vmem:[%s19829_s7 + $0x1580] ss:$8 sps:$4 sm:$0xff]  }
 0x47d   : > { %14754 = vmatpush1.bf16.msra.mxu1 %v17322_v31  ;;  %v17413_v31 = vld [vmem:[%s19829_s7 + $0x1674] ss:$8 sps:$4 sm:$0xff]   ;;  %v15300_v9 = vcombine.high %v20765_v61, %v20765_v61 }
 0x47e   : > { %14755 = vmatprep.subr.bf16.mxu1 %v17330_v5  ;;  %v14462_v43 = vpop.f32.mrf.mxu1  ;;  %v15295_v5 = vcombine.low %v20677_v55, %v20677_v55  ;;  %v20774_v35 = vld [vmem:[%s21131_s0 + $0xb8] sm:$0xff] }
 0x47f   : > { %14715 = vmatpush1.bf16.msra.mxu0 %v17325_v34  ;;  %v17418_v34 = vld [vmem:[%s19829_s7 + $0x1774] ss:$8 sps:$4 sm:$0xff]   ;;  %v17416_v55 = vld [vmem:[%s19829_s7 + $0x1770] ss:$8 sps:$4 sm:$0xff]   ;;  %v15302_v43 = vcombine.high %v20774_v35, %v20774_v35 }
 0x480   : > { %14716 = vmatprep.subr.bf16.mxu0 %v17333_v16  ;;  %v17411_v16 = vld [vmem:[%s19829_s7 + $0x1670] ss:$8 sps:$4 sm:$0xff]  }
 0x481   : > { %14756 = vmatpush1.bf16.msra.mxu1 %v17328_v14  ;;  %v15297_v14 = vcombine.low %v20686_v18, %v20686_v18 }
 0x482   : > { %14757 = vmatprep.subr.bf16.mxu1 %v17336_v38  ;;  %v17421_v38 = vld [vmem:[%s19829_s7 + $0x1664] ss:$8 sps:$4 sm:$0xff]  }
 0x483   : > { %14717 = vmatpush1.bf16.msra.mxu0 %v17331_v22 }
 0x484   : > { %14718 = vmatprep.subr.bf16.mxu0 %v17339_v44  ;;  %v17424_v44 = vld [vmem:[%s19829_s7 + $0x1764] ss:$8 sps:$4 sm:$0xff]  }
 0x485   : > { %14758 = vmatpush1.bf16.msra.mxu1 %v17334_v46 }
 0x486   : > { %14759 = vmatprep.subr.bf16.mxu1 %v17342_v19  ;;  %v17419_v19 = vld [vmem:[%s19829_s7 + $0x1660] ss:$8 sps:$4 sm:$0xff]  }
 0x487   : > { %14719 = vmatpush1.bf16.msra.mxu0 %v17337_v48 }
 0x488   : > { %14720 = vmatprep.subr.bf16.mxu0 %v17345_v49  ;;  %v17427_v49 = vld [vmem:[%s19829_s7 + $0x1654] ss:$8 sps:$4 sm:$0xff]  }
 0x489   : > { %14760 = vmatpush1.bf16.msra.mxu1 %v17340_v50 }
 0x48a   : > { %14761 = vmatprep.subr.bf16.mxu1 %v17348_v51 }
 0x48b   : > { %14721 = vmatpush1.bf16.msra.mxu0 %v17343_v52  ;;  %v17422_v52 = vld [vmem:[%s19829_s7 + $0x1760] ss:$8 sps:$4 sm:$0xff]  }
 0x48c   : > { %14722 = vmatprep.subr.bf16.mxu0 %v17351_v21 }
 0x48d   : > { %14762 = vmatpush1.bf16.msra.mxu1 %v17346_v23  ;;  %v17430_v23 = vld [vmem:[%s19829_s7 + $0x1754] ss:$8 sps:$4 sm:$0xff]  }
 0x48e   : > { %14763 = vmatprep.subr.bf16.mxu1 %v17354_v53 }
 0x48f   : > { %14723 = vmatpush1.bf16.msra.mxu0 %v17349_v54  ;;  %v17425_v54 = vld [vmem:[%s19829_s7 + $0x1650] ss:$8 sps:$4 sm:$0xff]  }
 0x490   : > { %14724 = vmatprep.subr.bf16.mxu0 %v17357_v58 }
 0x491   : > { %14764 = vmatpush1.bf16.msra.mxu1 %v17352_v59 }
 0x492   : > { %14765 = vmatprep.subr.bf16.mxu1 %v17360_v25  ;;  %v17428_v25 = vld [vmem:[%s19829_s7 + $0x1750] ss:$8 sps:$4 sm:$0xff]  }
 0x493   : > { %14725 = vmatpush1.bf16.msra.mxu0 %v17355_v62  ;;  %v17436_v62 = vld [vmem:[%s19829_s7 + $0x1744] ss:$8 sps:$4 sm:$0xff]  }
 0x494   : > { %14726 = vmatprep.subr.bf16.mxu0 %v17363_v39 }
 0x495   : > { %14766 = vmatpush1.bf16.msra.mxu1 %v17358_v40  ;;  %v17431_v40 = vld [vmem:[%s19829_s7 + $0x1640] ss:$8 sps:$4 sm:$0xff]  }
 0x496   : > { %14767 = vmatprep.subr.bf16.mxu1 %v17366_v2  ;;  %v17439_v2 = vld [vmem:[%s19829_s7 + $0x1634] ss:$8 sps:$4 sm:$0xff]  }
 0x497   : > { %14727 = vmatpush2.bf16.msra.mxu0 %v17361_v3  ;;  %v17434_v3 = vld [vmem:[%s19829_s7 + $0x1740] ss:$8 sps:$4 sm:$0xff]  }
 0x498   : > { %14728 = vmatprep.subr.bf16.mxu0 %v17369_v37  ;;  %v17442_v37 = vld [vmem:[%s19829_s7 + $0x1734] ss:$8 sps:$4 sm:$0xff]  }
 0x499   : > { %14768 = vmatpush2.bf16.msra.mxu1 %v17364_v6  ;;  %v17437_v6 = vld [vmem:[%s19829_s7 + $0x1630] ss:$8 sps:$4 sm:$0xff]  }
 0x49a   : > { %14769 = vmatprep.subr.bf16.mxu1 %v17372_v45  ;;  %v17445_v45 = vld [vmem:[%s19829_s7 + $0x1624] ss:$8 sps:$4 sm:$0xff]  }
 0x49b   : > { %14729 = vmatpush2.bf16.msra.mxu0 %v17367_v56  ;;  %v17440_v56 = vld [vmem:[%s19829_s7 + $0x1730] ss:$8 sps:$4 sm:$0xff]  }
 0x49c   : > { %14730 = vmatprep.subr.bf16.mxu0 %v17375_v7  ;;  %v17448_v7 = vld [vmem:[%s19829_s7 + $0x1724] ss:$8 sps:$4 sm:$0xff]  }
 0x49d   : > { %14770 = vmatpush2.bf16.msra.mxu1 %v17370_v8  ;;  %v17443_v8 = vld [vmem:[%s19829_s7 + $0x1620] ss:$8 sps:$4 sm:$0xff]  }
 0x49e   : > { %14771 = vmatprep.subr.bf16.mxu1 %v17378_v42  ;;  %v17451_v42 = vld [vmem:[%s19829_s7 + $0x1614] ss:$8 sps:$4 sm:$0xff]  }
 0x49f   : > { %14731 = vmatpush2.bf16.msra.mxu0 %v17373_v41  ;;  %v17446_v41 = vld [vmem:[%s19829_s7 + $0x1720] ss:$8 sps:$4 sm:$0xff]  }
 0x4a0   : > { %14732 = vmatprep.subr.bf16.mxu0 %v17381_v57  ;;  %v17454_v57 = vld [vmem:[%s19829_s7 + $0x1714] ss:$8 sps:$4 sm:$0xff]  }
 0x4a1   : > { %14772 = vmatpush2.bf16.msra.mxu1 %v17376_v11  ;;  %v17449_v11 = vld [vmem:[%s19829_s7 + $0x1610] ss:$8 sps:$4 sm:$0xff]  }
 0x4a2   : > { %14773 = vmatprep.subr.bf16.mxu1 %v17384_v13  ;;  %v17457_v13 = vld [vmem:[%s19829_s7 + $0x1604] ss:$8 sps:$4 sm:$0xff]  }
 0x4a3   : > { %14733 = vmatpush2.bf16.msra.mxu0 %v17379_v15  ;;  %v17452_v15 = vld [vmem:[%s19829_s7 + $0x1710] ss:$8 sps:$4 sm:$0xff]  }
 0x4a4   : > { %14734 = vmatprep.subr.bf16.mxu0 %v17387_v47  ;;  %v17460_v47 = vld [vmem:[%s19829_s7 + $0x1704] ss:$8 sps:$4 sm:$0xff]  }
 0x4a5   : > { %14774 = vmatpush2.bf16.msra.mxu1 %v17382_v17  ;;  %v17455_v17 = vld [vmem:[%s19829_s7 + $0x1600] ss:$8 sps:$4 sm:$0xff]  }
 0x4a6   : > { %14775 = vmatprep.subr.bf16.mxu1 %v17390_v60  ;;  %v17463_v60 = vld [vmem:[%s19829_s7 + $0x16f4] ss:$8 sps:$4 sm:$0xff]  }
 0x4a7   : > { %14735 = vmatpush2.bf16.msra.mxu0 %v17385_v0  ;;  %v17458_v0 = vld [vmem:[%s19829_s7 + $0x1700] ss:$8 sps:$4 sm:$0xff]  }
 0x4a8   : > { %14736 = vmatprep.subr.bf16.mxu0 %v17393_v20  ;;  %v17466_v20 = vld [vmem:[%s19829_s7 + $0x17f4] ss:$8 sps:$4 sm:$0xff]  }
 0x4a9   : > { %14776 = vmatpush2.bf16.msra.mxu1 %v17388_v12  ;;  %v17461_v12 = vld [vmem:[%s19829_s7 + $0x16f0] ss:$8 sps:$4 sm:$0xff]  }
 0x4aa   : > { %14777 = vmatprep.subr.bf16.mxu1 %v17396_v36  ;;  %v17469_v36 = vld [vmem:[%s19829_s7 + $0x16e4] ss:$8 sps:$4 sm:$0xff]  }
 0x4ab   : > { %14737 = vmatpush2.bf16.msra.mxu0 %v17391_v24  ;;  %v17464_v24 = vld [vmem:[%s19829_s7 + $0x17f0] ss:$8 sps:$4 sm:$0xff]  }
 0x4ac   : > { %14738 = vmatprep.subr.bf16.mxu0 %v17399_v4  ;;  %v17472_v4 = vld [vmem:[%s19829_s7 + $0x17e4] ss:$8 sps:$4 sm:$0xff]  }
 0x4ad   : > { %14778 = vmatpush2.bf16.msra.mxu1 %v17394_v26  ;;  %v17467_v26 = vld [vmem:[%s19829_s7 + $0x16e0] ss:$8 sps:$4 sm:$0xff]  }
 0x4ae   : > { %14779 = vmatprep.subr.bf16.mxu1 %v17402_v27  ;;  %v17475_v27 = vld [vmem:[%s19829_s7 + $0x16d4] ss:$8 sps:$4 sm:$0xff]  }
 0x4af   : > { %14739 = vmatpush2.bf16.msra.mxu0 %v17397_v28  ;;  %v17470_v28 = vld [vmem:[%s19829_s7 + $0x17e0] ss:$8 sps:$4 sm:$0xff]  }
 0x4b0   : > { %14740 = vmatprep.subr.bf16.mxu0 %v17405_v1  ;;  %v17478_v1 = vld [vmem:[%s19829_s7 + $0x17d4] ss:$8 sps:$4 sm:$0xff]  }
 0x4b1   : > { %14780 = vmatpush2.bf16.msra.mxu1 %v17400_v63  ;;  %v17473_v63 = vld [vmem:[%s19829_s7 + $0x16d0] ss:$8 sps:$4 sm:$0xff]  }
 0x4b2   : > { %14781 = vmatprep.subr.bf16.mxu1 %v17408_v29  ;;  %v17481_v29 = vld [vmem:[%s19829_s7 + $0x16c4] ss:$8 sps:$4 sm:$0xff]  }
 0x4b3   : > { %14741 = vmatpush2.bf16.msra.mxu0 %v17403_v30  ;;  %v17476_v30 = vld [vmem:[%s19829_s7 + $0x17d0] ss:$8 sps:$4 sm:$0xff]  }
 0x4b4   : > { %14792 = vmatprep.subr.bf16.mxu0 %v17413_v31  ;;  %v17484_v31 = vld [vmem:[%s19829_s7 + $0x17c4] ss:$8 sps:$4 sm:$0xff]  }
 0x4b5   : > { %14782 = vmatpush2.bf16.msra.mxu1 %v17406_v32  ;;  %v17479_v32 = vld [vmem:[%s19829_s7 + $0x16c0] ss:$8 sps:$4 sm:$0xff]  }
 0x4b6   : > { %v14498_v22 = vpop.f32.mrf.mxu0  ;;  %14743 = vmatmul.mubr.bf16.vlgmr.msra.gmra.mxu0 %v15295_v5  ;;  %14833 = vmatprep.subr.bf16.mxu1 %v17418_v34  ;;  %v17487_v5 = vld [vmem:[%s19829_s7 + $0x16b4] ss:$8 sps:$4 sm:$0xff]   ;;  %v17482_v34 = vld [vmem:[%s19829_s7 + $0x17c0] ss:$8 sps:$4 sm:$0xff]  }
 0x4b7   : > { %v14499_v46 = vadd.f32 %v14498_v22, %v20702_v10  ;;  %14793 = vmatpush1.bf16.msra.mxu0 %v17411_v16  ;;  %14824 = vmatprep.mubr.bf16.mxu0 %v15300_v9  ;;  %v17490_v16 = vld [vmem:[%s19829_s7 + $0x17b4] ss:$8 sps:$4 sm:$0xff]   ;;  %v17485_v9 = vld [vmem:[%s19829_s7 + $0x16b0] ss:$8 sps:$4 sm:$0xff]  }
 0x4b8   : > { %v14500_v48 = vpop.f32.mrf.mxu0  ;;  %v14539_v18 = vpop.f32.mrf.mxu1  ;;  %14784 = vmatmul.mubr.bf16.vlgmr.msra.gmra.mxu1 %v15297_v14  ;;  %14794 = vmatprep.subr.bf16.mxu0 %v17421_v38  ;;  %v17493_v14 = vld [vmem:[%s19829_s7 + $0x16a4] ss:$8 sps:$4 sm:$0xff]   ;;  %v17488_v38 = vld [vmem:[%s19829_s7 + $0x17b0] ss:$8 sps:$4 sm:$0xff]   ;;  %v17499_v22 = vld [vmem:[%s19829_s7 + $0x1694] ss:$8 sps:$4 sm:$0xff]  }
 0x4b9   : > { %v14501_v50 = vadd.f32 %v14500_v48, %v20706_v33  ;;  %v20790_v51 = vadd.f32 %v14539_v18, %v14499_v46  ;;  %14834 = vmatpush1.bf16.msra.mxu1 %v17416_v55  ;;  %14865 = vmatprep.mubr.bf16.mxu1 %v15302_v43  ;;  %v17433_v33 = vld [vmem:[%s19829_s7 + $0x1644] ss:$8 sps:$4 sm:$0xff]   ;;  %v17491_v43 = vld [vmem:[%s19829_s7 + $0x16a0] ss:$8 sps:$4 sm:$0xff]   ;;  %v17502_v46 = vld [vmem:[%s19829_s7 + $0x1794] ss:$8 sps:$4 sm:$0xff]  }
 0x4ba   : > { %v14502_v10 = vpop.f32.mrf.mxu0  ;;  %v14541_v21 = vpop.f32.mrf.mxu1  ;;  %14835 = vmatprep.subr.bf16.mxu1 %v17424_v44  ;;  %v17496_v55 = vld [vmem:[%s19829_s7 + $0x17a4] ss:$8 sps:$4 sm:$0xff]   ;;  %v17494_v44 = vld [vmem:[%s19829_s7 + $0x17a0] ss:$8 sps:$4 sm:$0xff]   ;;  %v17500_v18 = vld [vmem:[%s19829_s7 + $0x1790] ss:$8 sps:$4 sm:$0xff]  }
 0x4bb   : > { %v20794_v53 = vadd.f32 %v14541_v21, %v14501_v50  ;;  %14795 = vmatpush1.bf16.msra.mxu0 %v17419_v19  ;;  %v17497_v19 = vld [vmem:[%s19829_s7 + $0x1690] ss:$8 sps:$4 sm:$0xff]   ;;  %v17505_v48 = vld [vmem:[%s19829_s7 + $0x1684] ss:$8 sps:$4 sm:$0xff]   ;;  %v17503_v50 = vld [vmem:[%s19829_s7 + $0x1680] ss:$8 sps:$4 sm:$0xff]  }
 0x4bc   : > { %v14503_v58 = vpop.f32.mrf.mxu0  ;;  %14796 = vmatprep.subr.bf16.mxu0 %v17427_v49  ;;  %v14543_v59 = vpop.f32.mrf.mxu1  ;;  %v17508_v49 = vld [vmem:[%s19829_s7 + $0x1784] ss:$8 sps:$4 sm:$0xff]   ;;  %v17506_v21 = vld [vmem:[%s19829_s7 + $0x1780] ss:$8 sps:$4 sm:$0xff]  }
 0x4bd   : > { %14836 = vmatpush1.bf16.msra.mxu1 %v17422_v52  ;;  %v17513_v52 = vld [vmem:[%s19829_s7 + $0x1874] ss:$8 sps:$4 sm:$0xff]   ;;  %v20853_v10 = vld [vmem:[%s21131_s0 + $0xc0] sm:$0xff]  ;;  %v20862_v58 = vld [vmem:[%s21131_s0 + $0xc8] sm:$0xff] }
 0x4be   : > { %14837 = vmatprep.subr.bf16.mxu1 %v17430_v23  ;;  %v14544_v39 = vpop.f32.mrf.mxu1  ;;  %v15299_v23 = vcombine.low %v20765_v61, %v20765_v61  ;;  %v15304_v59 = vcombine.high %v20853_v10, %v20853_v10  ;;  %v17516_v61 = vld [vmem:[%s19829_s7 + $0x1970] ss:$8 sps:$4 sm:$0xff]  }
 0x4bf   : > { %14797 = vmatpush1.bf16.msra.mxu0 %v17425_v54  ;;  %v17518_v54 = vld [vmem:[%s19829_s7 + $0x1974] ss:$8 sps:$4 sm:$0xff]   ;;  %v15306_v39 = vcombine.high %v20862_v58, %v20862_v58 }
 0x4c0   : > { %14798 = vmatprep.subr.bf16.mxu0 %v17433_v33  ;;  %v17511_v33 = vld [vmem:[%s19829_s7 + $0x1870] ss:$8 sps:$4 sm:$0xff]  }
 0x4c1   : > { %14838 = vmatpush1.bf16.msra.mxu1 %v17428_v25  ;;  %v15301_v25 = vcombine.low %v20774_v35, %v20774_v35 }
 0x4c2   : > { %14839 = vmatprep.subr.bf16.mxu1 %v17436_v62  ;;  %v17521_v62 = vld [vmem:[%s19829_s7 + $0x1864] ss:$8 sps:$4 sm:$0xff]  }
 0x4c3   : > { %14799 = vmatpush1.bf16.msra.mxu0 %v17431_v40 }
 0x4c4   : > { %14800 = vmatprep.subr.bf16.mxu0 %v17439_v2  ;;  %v17524_v2 = vld [vmem:[%s19829_s7 + $0x1964] ss:$8 sps:$4 sm:$0xff]  }
 0x4c5   : > { %14840 = vmatpush1.bf16.msra.mxu1 %v17434_v3 }
 0x4c6   : > { %14841 = vmatprep.subr.bf16.mxu1 %v17442_v37  ;;  %v17519_v37 = vld [vmem:[%s19829_s7 + $0x1860] ss:$8 sps:$4 sm:$0xff]  }
 0x4c7   : > { %14801 = vmatpush1.bf16.msra.mxu0 %v17437_v6 }
 0x4c8   : > { %14802 = vmatprep.subr.bf16.mxu0 %v17445_v45  ;;  %v17527_v45 = vld [vmem:[%s19829_s7 + $0x1854] ss:$8 sps:$4 sm:$0xff]  }
 0x4c9   : > { %14842 = vmatpush1.bf16.msra.mxu1 %v17440_v56 }
 0x4ca   : > { %14843 = vmatprep.subr.bf16.mxu1 %v17448_v7 }
 0x4cb   : > { %14803 = vmatpush1.bf16.msra.mxu0 %v17443_v8  ;;  %v17522_v8 = vld [vmem:[%s19829_s7 + $0x1960] ss:$8 sps:$4 sm:$0xff]  }
 0x4cc   : > { %14804 = vmatprep.subr.bf16.mxu0 %v17451_v42 }
 0x4cd   : > { %14844 = vmatpush1.bf16.msra.mxu1 %v17446_v41  ;;  %v17530_v41 = vld [vmem:[%s19829_s7 + $0x1954] ss:$8 sps:$4 sm:$0xff]  }
 0x4ce   : > { %14845 = vmatprep.subr.bf16.mxu1 %v17454_v57 }
 0x4cf   : > { %14805 = vmatpush1.bf16.msra.mxu0 %v17449_v11  ;;  %v17525_v11 = vld [vmem:[%s19829_s7 + $0x1850] ss:$8 sps:$4 sm:$0xff]  }
 0x4d0   : > { %14806 = vmatprep.subr.bf16.mxu0 %v17457_v13 }
 0x4d1   : > { %14846 = vmatpush1.bf16.msra.mxu1 %v17452_v15 }
 0x4d2   : > { %14847 = vmatprep.subr.bf16.mxu1 %v17460_v47  ;;  %v17528_v47 = vld [vmem:[%s19829_s7 + $0x1950] ss:$8 sps:$4 sm:$0xff]  }
 0x4d3   : > { %14807 = vmatpush1.bf16.msra.mxu0 %v17455_v17  ;;  %v17536_v17 = vld [vmem:[%s19829_s7 + $0x1944] ss:$8 sps:$4 sm:$0xff]  }
 0x4d4   : > { %14808 = vmatprep.subr.bf16.mxu0 %v17463_v60 }
 0x4d5   : > { %14848 = vmatpush1.bf16.msra.mxu1 %v17458_v0  ;;  %v17531_v0 = vld [vmem:[%s19829_s7 + $0x1840] ss:$8 sps:$4 sm:$0xff]  }
 0x4d6   : > { %14849 = vmatprep.subr.bf16.mxu1 %v17466_v20  ;;  %v17539_v20 = vld [vmem:[%s19829_s7 + $0x1834] ss:$8 sps:$4 sm:$0xff]  }
 0x4d7   : > { %14809 = vmatpush2.bf16.msra.mxu0 %v17461_v12  ;;  %v17534_v12 = vld [vmem:[%s19829_s7 + $0x1940] ss:$8 sps:$4 sm:$0xff]  }
 0x4d8   : > { %14810 = vmatprep.subr.bf16.mxu0 %v17469_v36  ;;  %v17542_v36 = vld [vmem:[%s19829_s7 + $0x1934] ss:$8 sps:$4 sm:$0xff]  }
 0x4d9   : > { %14850 = vmatpush2.bf16.msra.mxu1 %v17464_v24  ;;  %v17537_v24 = vld [vmem:[%s19829_s7 + $0x1830] ss:$8 sps:$4 sm:$0xff]  }
 0x4da   : > { %14851 = vmatprep.subr.bf16.mxu1 %v17472_v4  ;;  %v17545_v4 = vld [vmem:[%s19829_s7 + $0x1824] ss:$8 sps:$4 sm:$0xff]  }
 0x4db   : > { %14811 = vmatpush2.bf16.msra.mxu0 %v17467_v26  ;;  %v17540_v26 = vld [vmem:[%s19829_s7 + $0x1930] ss:$8 sps:$4 sm:$0xff]  }
 0x4dc   : > { %14812 = vmatprep.subr.bf16.mxu0 %v17475_v27  ;;  %v17548_v27 = vld [vmem:[%s19829_s7 + $0x1924] ss:$8 sps:$4 sm:$0xff]  }
 0x4dd   : > { %14852 = vmatpush2.bf16.msra.mxu1 %v17470_v28  ;;  %v17543_v28 = vld [vmem:[%s19829_s7 + $0x1820] ss:$8 sps:$4 sm:$0xff]  }
 0x4de   : > { %14853 = vmatprep.subr.bf16.mxu1 %v17478_v1  ;;  %v17551_v1 = vld [vmem:[%s19829_s7 + $0x1814] ss:$8 sps:$4 sm:$0xff]  }
 0x4df   : > { %14813 = vmatpush2.bf16.msra.mxu0 %v17473_v63  ;;  %v17546_v63 = vld [vmem:[%s19829_s7 + $0x1920] ss:$8 sps:$4 sm:$0xff]  }
 0x4e0   : > { %14814 = vmatprep.subr.bf16.mxu0 %v17481_v29  ;;  %v17554_v29 = vld [vmem:[%s19829_s7 + $0x1914] ss:$8 sps:$4 sm:$0xff]  }
 0x4e1   : > { %14854 = vmatpush2.bf16.msra.mxu1 %v17476_v30  ;;  %v17549_v30 = vld [vmem:[%s19829_s7 + $0x1810] ss:$8 sps:$4 sm:$0xff]  }
 0x4e2   : > { %14855 = vmatprep.subr.bf16.mxu1 %v17484_v31  ;;  %v17557_v31 = vld [vmem:[%s19829_s7 + $0x1804] ss:$8 sps:$4 sm:$0xff]  }
 0x4e3   : > { %14815 = vmatpush2.bf16.msra.mxu0 %v17479_v32  ;;  %v17552_v32 = vld [vmem:[%s19829_s7 + $0x1910] ss:$8 sps:$4 sm:$0xff]  }
 0x4e4   : > { %14816 = vmatprep.subr.bf16.mxu0 %v17487_v5  ;;  %v17560_v5 = vld [vmem:[%s19829_s7 + $0x1904] ss:$8 sps:$4 sm:$0xff]  }
 0x4e5   : > { %14856 = vmatpush2.bf16.msra.mxu1 %v17482_v34  ;;  %v17555_v34 = vld [vmem:[%s19829_s7 + $0x1800] ss:$8 sps:$4 sm:$0xff]  }
 0x4e6   : > { %14857 = vmatprep.subr.bf16.mxu1 %v17490_v16  ;;  %v17563_v16 = vld [vmem:[%s19829_s7 + $0x18f4] ss:$8 sps:$4 sm:$0xff]  }
 0x4e7   : > { %14817 = vmatpush2.bf16.msra.mxu0 %v17485_v9  ;;  %v17558_v9 = vld [vmem:[%s19829_s7 + $0x1900] ss:$8 sps:$4 sm:$0xff]  }
 0x4e8   : > { %14818 = vmatprep.subr.bf16.mxu0 %v17493_v14  ;;  %v17566_v14 = vld [vmem:[%s19829_s7 + $0x19f4] ss:$8 sps:$4 sm:$0xff]  }
 0x4e9   : > { %14858 = vmatpush2.bf16.msra.mxu1 %v17488_v38  ;;  %v17561_v38 = vld [vmem:[%s19829_s7 + $0x18f0] ss:$8 sps:$4 sm:$0xff]  }
 0x4ea   : > { %14859 = vmatprep.subr.bf16.mxu1 %v17496_v55  ;;  %v17569_v55 = vld [vmem:[%s19829_s7 + $0x18e4] ss:$8 sps:$4 sm:$0xff]  }
 0x4eb   : > { %14819 = vmatpush2.bf16.msra.mxu0 %v17491_v43  ;;  %v17564_v43 = vld [vmem:[%s19829_s7 + $0x19f0] ss:$8 sps:$4 sm:$0xff]  }
 0x4ec   : > { %14820 = vmatprep.subr.bf16.mxu0 %v17499_v22  ;;  %v17572_v22 = vld [vmem:[%s19829_s7 + $0x19e4] ss:$8 sps:$4 sm:$0xff]  }
 0x4ed   : > { %14860 = vmatpush2.bf16.msra.mxu1 %v17494_v44  ;;  %v17567_v44 = vld [vmem:[%s19829_s7 + $0x18e0] ss:$8 sps:$4 sm:$0xff]  }
 0x4ee   : > { %14861 = vmatprep.subr.bf16.mxu1 %v17502_v46  ;;  %v17575_v46 = vld [vmem:[%s19829_s7 + $0x18d4] ss:$8 sps:$4 sm:$0xff]  }
 0x4ef   : > { %14821 = vmatpush2.bf16.msra.mxu0 %v17497_v19  ;;  %v17570_v19 = vld [vmem:[%s19829_s7 + $0x19e0] ss:$8 sps:$4 sm:$0xff]  }
 0x4f0   : > { %14822 = vmatprep.subr.bf16.mxu0 %v17505_v48  ;;  %v17578_v48 = vld [vmem:[%s19829_s7 + $0x19d4] ss:$8 sps:$4 sm:$0xff]  }
 0x4f1   : > { %14862 = vmatpush2.bf16.msra.mxu1 %v17500_v18  ;;  %v17573_v18 = vld [vmem:[%s19829_s7 + $0x18d0] ss:$8 sps:$4 sm:$0xff]  }
 0x4f2   : > { %14863 = vmatprep.subr.bf16.mxu1 %v17508_v49  ;;  %v17581_v49 = vld [vmem:[%s19829_s7 + $0x18c4] ss:$8 sps:$4 sm:$0xff]  }
 0x4f3   : > { %14823 = vmatpush2.bf16.msra.mxu0 %v17503_v50  ;;  %v17576_v50 = vld [vmem:[%s19829_s7 + $0x19d0] ss:$8 sps:$4 sm:$0xff]  }
 0x4f4   : > { %14874 = vmatprep.subr.bf16.mxu0 %v17513_v52  ;;  %v17584_v52 = vld [vmem:[%s19829_s7 + $0x19c4] ss:$8 sps:$4 sm:$0xff]  }
 0x4f5   : > { %14864 = vmatpush2.bf16.msra.mxu1 %v17506_v21  ;;  %v17579_v21 = vld [vmem:[%s19829_s7 + $0x18c0] ss:$8 sps:$4 sm:$0xff]  }
 0x4f6   : > { %v14580_v40 = vpop.f32.mrf.mxu0  ;;  %14825 = vmatmul.mubr.bf16.vlgmr.msra.gmra.mxu0 %v15299_v23  ;;  %14915 = vmatprep.subr.bf16.mxu1 %v17518_v54  ;;  %v17587_v23 = vld [vmem:[%s19829_s7 + $0x18b4] ss:$8 sps:$4 sm:$0xff]   ;;  %v17582_v54 = vld [vmem:[%s19829_s7 + $0x19c0] ss:$8 sps:$4 sm:$0xff]  }
 0x4f7   : > { %v14581_v3 = vadd.f32 %v14580_v40, %v20790_v51  ;;  %14875 = vmatpush1.bf16.msra.mxu0 %v17511_v33  ;;  %14906 = vmatprep.mubr.bf16.mxu0 %v15304_v59  ;;  %v17590_v33 = vld [vmem:[%s19829_s7 + $0x19b4] ss:$8 sps:$4 sm:$0xff]   ;;  %v17585_v59 = vld [vmem:[%s19829_s7 + $0x18b0] ss:$8 sps:$4 sm:$0xff]  }
 0x4f8   : > { %v14582_v6 = vpop.f32.mrf.mxu0  ;;  %v14621_v35 = vpop.f32.mrf.mxu1  ;;  %14866 = vmatmul.mubr.bf16.vlgmr.msra.gmra.mxu1 %v15301_v25  ;;  %14876 = vmatprep.subr.bf16.mxu0 %v17521_v62  ;;  %v17593_v25 = vld [vmem:[%s19829_s7 + $0x18a4] ss:$8 sps:$4 sm:$0xff]   ;;  %v17588_v62 = vld [vmem:[%s19829_s7 + $0x19b0] ss:$8 sps:$4 sm:$0xff]   ;;  %v17599_v40 = vld [vmem:[%s19829_s7 + $0x1894] ss:$8 sps:$4 sm:$0xff]  }
 0x4f9   : > { %v14583_v56 = vadd.f32 %v14582_v6, %v20794_v53  ;;  %v20878_v7 = vadd.f32 %v14621_v35, %v14581_v3  ;;  %14916 = vmatpush1.bf16.msra.mxu1 %v17516_v61  ;;  %14947 = vmatprep.mubr.bf16.mxu1 %v15306_v39  ;;  %v17533_v53 = vld [vmem:[%s19829_s7 + $0x1844] ss:$8 sps:$4 sm:$0xff]   ;;  %v17591_v39 = vld [vmem:[%s19829_s7 + $0x18a0] ss:$8 sps:$4 sm:$0xff]   ;;  %v17602_v3 = vld [vmem:[%s19829_s7 + $0x1994] ss:$8 sps:$4 sm:$0xff]  }
 0x4fa   : > { %v14584_v51 = vpop.f32.mrf.mxu0  ;;  %v14623_v42 = vpop.f32.mrf.mxu1  ;;  %14917 = vmatprep.subr.bf16.mxu1 %v17524_v2  ;;  %v17596_v61 = vld [vmem:[%s19829_s7 + $0x19a4] ss:$8 sps:$4 sm:$0xff]   ;;  %v17594_v2 = vld [vmem:[%s19829_s7 + $0x19a0] ss:$8 sps:$4 sm:$0xff]   ;;  %v17600_v35 = vld [vmem:[%s19829_s7 + $0x1990] ss:$8 sps:$4 sm:$0xff]  }
 0x4fb   : > { %v20882_v57 = vadd.f32 %v14623_v42, %v14583_v56  ;;  %14877 = vmatpush1.bf16.msra.mxu0 %v17519_v37  ;;  %v17597_v37 = vld [vmem:[%s19829_s7 + $0x1890] ss:$8 sps:$4 sm:$0xff]   ;;  %v17605_v6 = vld [vmem:[%s19829_s7 + $0x1884] ss:$8 sps:$4 sm:$0xff]   ;;  %v17603_v56 = vld [vmem:[%s19829_s7 + $0x1880] ss:$8 sps:$4 sm:$0xff]  }
 0x4fc   : > { %v14585_v13 = vpop.f32.mrf.mxu0  ;;  %14878 = vmatprep.subr.bf16.mxu0 %v17527_v45  ;;  %v14625_v15 = vpop.f32.mrf.mxu1  ;;  %v17608_v45 = vld [vmem:[%s19829_s7 + $0x1984] ss:$8 sps:$4 sm:$0xff]   ;;  %v20941_v51 = vld [vmem:[%s21131_s0 + $0xd0] sm:$0xff]  ;;  %v17606_v42 = vld [vmem:[%s19829_s7 + $0x1980] ss:$8 sps:$4 sm:$0xff]  }
 0x4fd   : > { %14918 = vmatpush1.bf16.msra.mxu1 %v17522_v8  ;;  %v17613_v8 = vld [vmem:[%s19829_s7 + $0x1a74] ss:$8 sps:$4 sm:$0xff]   ;;  %v15308_v15 = vcombine.high %v20941_v51, %v20941_v51 }
 0x4fe   : > { %14919 = vmatprep.subr.bf16.mxu1 %v17530_v41  ;;  %v14626_v60 = vpop.f32.mrf.mxu1  ;;  %v15303_v41 = vcombine.low %v20853_v10, %v20853_v10  ;;  %v20950_v13 = vld [vmem:[%s21131_s0 + $0xd8] sm:$0xff] }
 0x4ff   : > { %14879 = vmatpush1.bf16.msra.mxu0 %v17525_v11  ;;  %v17618_v11 = vld [vmem:[%s19829_s7 + $0x1b74] ss:$8 sps:$4 sm:$0xff]   ;;  %v17616_v10 = vld [vmem:[%s19829_s7 + $0x1b70] ss:$8 sps:$4 sm:$0xff]   ;;  %v15310_v60 = vcombine.high %v20950_v13, %v20950_v13 }
 0x500   : > { %14880 = vmatprep.subr.bf16.mxu0 %v17533_v53  ;;  %v17611_v53 = vld [vmem:[%s19829_s7 + $0x1a70] ss:$8 sps:$4 sm:$0xff]  }
 0x501   : > { %14920 = vmatpush1.bf16.msra.mxu1 %v17528_v47  ;;  %v15305_v47 = vcombine.low %v20862_v58, %v20862_v58 }
 0x502   : > { %14921 = vmatprep.subr.bf16.mxu1 %v17536_v17  ;;  %v17621_v17 = vld [vmem:[%s19829_s7 + $0x1a64] ss:$8 sps:$4 sm:$0xff]  }
 0x503   : > { %14881 = vmatpush1.bf16.msra.mxu0 %v17531_v0 }
 0x504   : > { %14882 = vmatprep.subr.bf16.mxu0 %v17539_v20  ;;  %v17624_v20 = vld [vmem:[%s19829_s7 + $0x1b64] ss:$8 sps:$4 sm:$0xff]  }
 0x505   : > { %14922 = vmatpush1.bf16.msra.mxu1 %v17534_v12 }
 0x506   : > { %14923 = vmatprep.subr.bf16.mxu1 %v17542_v36  ;;  %v17619_v36 = vld [vmem:[%s19829_s7 + $0x1a60] ss:$8 sps:$4 sm:$0xff]  }
 0x507   : > { %14883 = vmatpush1.bf16.msra.mxu0 %v17537_v24 }
 0x508   : > { %14884 = vmatprep.subr.bf16.mxu0 %v17545_v4  ;;  %v17627_v4 = vld [vmem:[%s19829_s7 + $0x1a54] ss:$8 sps:$4 sm:$0xff]  }
 0x509   : > { %14924 = vmatpush1.bf16.msra.mxu1 %v17540_v26 }
 0x50a   : > { %14925 = vmatprep.subr.bf16.mxu1 %v17548_v27 }
 0x50b   : > { %14885 = vmatpush1.bf16.msra.mxu0 %v17543_v28  ;;  %v17622_v28 = vld [vmem:[%s19829_s7 + $0x1b60] ss:$8 sps:$4 sm:$0xff]  }
 0x50c   : > { %14886 = vmatprep.subr.bf16.mxu0 %v17551_v1 }
 0x50d   : > { %14926 = vmatpush1.bf16.msra.mxu1 %v17546_v63  ;;  %v17630_v63 = vld [vmem:[%s19829_s7 + $0x1b54] ss:$8 sps:$4 sm:$0xff]  }
 0x50e   : > { %14927 = vmatprep.subr.bf16.mxu1 %v17554_v29 }
 0x50f   : > { %14887 = vmatpush1.bf16.msra.mxu0 %v17549_v30  ;;  %v17625_v30 = vld [vmem:[%s19829_s7 + $0x1a50] ss:$8 sps:$4 sm:$0xff]  }
 0x510   : > { %14888 = vmatprep.subr.bf16.mxu0 %v17557_v31 }
 0x511   : > { %14928 = vmatpush1.bf16.msra.mxu1 %v17552_v32 }
 0x512   : > { %14929 = vmatprep.subr.bf16.mxu1 %v17560_v5  ;;  %v17628_v5 = vld [vmem:[%s19829_s7 + $0x1b50] ss:$8 sps:$4 sm:$0xff]  }
 0x513   : > { %14889 = vmatpush1.bf16.msra.mxu0 %v17555_v34  ;;  %v17636_v34 = vld [vmem:[%s19829_s7 + $0x1b44] ss:$8 sps:$4 sm:$0xff]  }
 0x514   : > { %14890 = vmatprep.subr.bf16.mxu0 %v17563_v16 }
 0x515   : > { %14930 = vmatpush1.bf16.msra.mxu1 %v17558_v9  ;;  %v17631_v9 = vld [vmem:[%s19829_s7 + $0x1a40] ss:$8 sps:$4 sm:$0xff]  }
 0x516   : > { %14931 = vmatprep.subr.bf16.mxu1 %v17566_v14  ;;  %v17639_v14 = vld [vmem:[%s19829_s7 + $0x1a34] ss:$8 sps:$4 sm:$0xff]  }
 0x517   : > { %14891 = vmatpush2.bf16.msra.mxu0 %v17561_v38  ;;  %v17634_v38 = vld [vmem:[%s19829_s7 + $0x1b40] ss:$8 sps:$4 sm:$0xff]  }
 0x518   : > { %14892 = vmatprep.subr.bf16.mxu0 %v17569_v55  ;;  %v17642_v55 = vld [vmem:[%s19829_s7 + $0x1b34] ss:$8 sps:$4 sm:$0xff]  }
 0x519   : > { %14932 = vmatpush2.bf16.msra.mxu1 %v17564_v43  ;;  %v17637_v43 = vld [vmem:[%s19829_s7 + $0x1a30] ss:$8 sps:$4 sm:$0xff]  }
 0x51a   : > { %14933 = vmatprep.subr.bf16.mxu1 %v17572_v22  ;;  %v17645_v22 = vld [vmem:[%s19829_s7 + $0x1a24] ss:$8 sps:$4 sm:$0xff]  }
 0x51b   : > { %14893 = vmatpush2.bf16.msra.mxu0 %v17567_v44  ;;  %v17640_v44 = vld [vmem:[%s19829_s7 + $0x1b30] ss:$8 sps:$4 sm:$0xff]  }
 0x51c   : > { %14894 = vmatprep.subr.bf16.mxu0 %v17575_v46  ;;  %v17648_v46 = vld [vmem:[%s19829_s7 + $0x1b24] ss:$8 sps:$4 sm:$0xff]  }
 0x51d   : > { %14934 = vmatpush2.bf16.msra.mxu1 %v17570_v19  ;;  %v17643_v19 = vld [vmem:[%s19829_s7 + $0x1a20] ss:$8 sps:$4 sm:$0xff]  }
 0x51e   : > { %14935 = vmatprep.subr.bf16.mxu1 %v17578_v48  ;;  %v17651_v48 = vld [vmem:[%s19829_s7 + $0x1a14] ss:$8 sps:$4 sm:$0xff]  }
 0x51f   : > { %14895 = vmatpush2.bf16.msra.mxu0 %v17573_v18  ;;  %v17646_v18 = vld [vmem:[%s19829_s7 + $0x1b20] ss:$8 sps:$4 sm:$0xff]  }
 0x520   : > { %14896 = vmatprep.subr.bf16.mxu0 %v17581_v49  ;;  %v17654_v49 = vld [vmem:[%s19829_s7 + $0x1b14] ss:$8 sps:$4 sm:$0xff]  }
 0x521   : > { %14936 = vmatpush2.bf16.msra.mxu1 %v17576_v50  ;;  %v17649_v50 = vld [vmem:[%s19829_s7 + $0x1a10] ss:$8 sps:$4 sm:$0xff]  }
 0x522   : > { %14937 = vmatprep.subr.bf16.mxu1 %v17584_v52  ;;  %v17657_v52 = vld [vmem:[%s19829_s7 + $0x1a04] ss:$8 sps:$4 sm:$0xff]  }
 0x523   : > { %14897 = vmatpush2.bf16.msra.mxu0 %v17579_v21  ;;  %v17652_v21 = vld [vmem:[%s19829_s7 + $0x1b10] ss:$8 sps:$4 sm:$0xff]  }
 0x524   : > { %14898 = vmatprep.subr.bf16.mxu0 %v17587_v23  ;;  %v17660_v23 = vld [vmem:[%s19829_s7 + $0x1b04] ss:$8 sps:$4 sm:$0xff]  }
 0x525   : > { %14938 = vmatpush2.bf16.msra.mxu1 %v17582_v54  ;;  %v17655_v54 = vld [vmem:[%s19829_s7 + $0x1a00] ss:$8 sps:$4 sm:$0xff]  }
 0x526   : > { %14939 = vmatprep.subr.bf16.mxu1 %v17590_v33  ;;  %v17663_v33 = vld [vmem:[%s19829_s7 + $0x1af4] ss:$8 sps:$4 sm:$0xff]  }
 0x527   : > { %14899 = vmatpush2.bf16.msra.mxu0 %v17585_v59  ;;  %v17658_v59 = vld [vmem:[%s19829_s7 + $0x1b00] ss:$8 sps:$4 sm:$0xff]  }
 0x528   : > { %14900 = vmatprep.subr.bf16.mxu0 %v17593_v25  ;;  %v17666_v25 = vld [vmem:[%s19829_s7 + $0x1bf4] ss:$8 sps:$4 sm:$0xff]  }
 0x529   : > { %14940 = vmatpush2.bf16.msra.mxu1 %v17588_v62  ;;  %v17661_v62 = vld [vmem:[%s19829_s7 + $0x1af0] ss:$8 sps:$4 sm:$0xff]  }
 0x52a   : > { %14941 = vmatprep.subr.bf16.mxu1 %v17596_v61  ;;  %v17669_v61 = vld [vmem:[%s19829_s7 + $0x1ae4] ss:$8 sps:$4 sm:$0xff]  }
 0x52b   : > { %14901 = vmatpush2.bf16.msra.mxu0 %v17591_v39  ;;  %v17664_v39 = vld [vmem:[%s19829_s7 + $0x1bf0] ss:$8 sps:$4 sm:$0xff]  }
 0x52c   : > { %14902 = vmatprep.subr.bf16.mxu0 %v17599_v40  ;;  %v17672_v40 = vld [vmem:[%s19829_s7 + $0x1be4] ss:$8 sps:$4 sm:$0xff]  }
 0x52d   : > { %14942 = vmatpush2.bf16.msra.mxu1 %v17594_v2  ;;  %v17667_v2 = vld [vmem:[%s19829_s7 + $0x1ae0] ss:$8 sps:$4 sm:$0xff]  }
 0x52e   : > { %14943 = vmatprep.subr.bf16.mxu1 %v17602_v3  ;;  %v17675_v3 = vld [vmem:[%s19829_s7 + $0x1ad4] ss:$8 sps:$4 sm:$0xff]  }
 0x52f   : > { %14903 = vmatpush2.bf16.msra.mxu0 %v17597_v37  ;;  %v17670_v37 = vld [vmem:[%s19829_s7 + $0x1be0] ss:$8 sps:$4 sm:$0xff]  }
 0x530   : > { %14904 = vmatprep.subr.bf16.mxu0 %v17605_v6  ;;  %v17678_v6 = vld [vmem:[%s19829_s7 + $0x1bd4] ss:$8 sps:$4 sm:$0xff]  }
 0x531   : > { %14944 = vmatpush2.bf16.msra.mxu1 %v17600_v35  ;;  %v17673_v35 = vld [vmem:[%s19829_s7 + $0x1ad0] ss:$8 sps:$4 sm:$0xff]  }
 0x532   : > { %14945 = vmatprep.subr.bf16.mxu1 %v17608_v45  ;;  %v17681_v45 = vld [vmem:[%s19829_s7 + $0x1ac4] ss:$8 sps:$4 sm:$0xff]  }
 0x533   : > { %14905 = vmatpush2.bf16.msra.mxu0 %v17603_v56  ;;  %v17676_v56 = vld [vmem:[%s19829_s7 + $0x1bd0] ss:$8 sps:$4 sm:$0xff]  }
 0x534   : > { %14956 = vmatprep.subr.bf16.mxu0 %v17613_v8  ;;  %v17684_v8 = vld [vmem:[%s19829_s7 + $0x1bc4] ss:$8 sps:$4 sm:$0xff]  }
 0x535   : > { %14946 = vmatpush2.bf16.msra.mxu1 %v17606_v42  ;;  %v17679_v42 = vld [vmem:[%s19829_s7 + $0x1ac0] ss:$8 sps:$4 sm:$0xff]  }
 0x536   : > { %v14662_v0 = vpop.f32.mrf.mxu0  ;;  %14907 = vmatmul.mubr.bf16.vlgmr.msra.gmra.mxu0 %v15303_v41  ;;  %14997 = vmatprep.subr.bf16.mxu1 %v17618_v11  ;;  %v17687_v41 = vld [vmem:[%s19829_s7 + $0x1ab4] ss:$8 sps:$4 sm:$0xff]   ;;  %v17682_v11 = vld [vmem:[%s19829_s7 + $0x1bc0] ss:$8 sps:$4 sm:$0xff]  }
 0x537   : > { %v14663_v12 = vadd.f32 %v14662_v0, %v20878_v7  ;;  %14957 = vmatpush1.bf16.msra.mxu0 %v17611_v53  ;;  %14988 = vmatprep.mubr.bf16.mxu0 %v15308_v15  ;;  %v17690_v53 = vld [vmem:[%s19829_s7 + $0x1bb4] ss:$8 sps:$4 sm:$0xff]   ;;  %v17685_v15 = vld [vmem:[%s19829_s7 + $0x1ab0] ss:$8 sps:$4 sm:$0xff]  }
 0x538   : > { %v14664_v24 = vpop.f32.mrf.mxu0  ;;  %v14703_v58 = vpop.f32.mrf.mxu1  ;;  %14948 = vmatmul.mubr.bf16.vlgmr.msra.gmra.mxu1 %v15305_v47  ;;  %14958 = vmatprep.subr.bf16.mxu0 %v17621_v17  ;;  %v17693_v47 = vld [vmem:[%s19829_s7 + $0x1aa4] ss:$8 sps:$4 sm:$0xff]   ;;  %v17688_v17 = vld [vmem:[%s19829_s7 + $0x1bb0] ss:$8 sps:$4 sm:$0xff]   ;;  %v17699_v0 = vld [vmem:[%s19829_s7 + $0x1a94] ss:$8 sps:$4 sm:$0xff]  }
 0x539   : > { %v14665_v26 = vadd.f32 %v14664_v24, %v20882_v57  ;;  %v20966_v27 = vadd.f32 %v14703_v58, %v14663_v12  ;;  %14998 = vmatpush1.bf16.msra.mxu1 %v17616_v10  ;;  %15029 = vmatprep.mubr.bf16.mxu1 %v15310_v60  ;;  %v17633_v57 = vld [vmem:[%s19829_s7 + $0x1a44] ss:$8 sps:$4 sm:$0xff]   ;;  %v17691_v60 = vld [vmem:[%s19829_s7 + $0x1aa0] ss:$8 sps:$4 sm:$0xff]   ;;  %v17702_v12 = vld [vmem:[%s19829_s7 + $0x1b94] ss:$8 sps:$4 sm:$0xff]  }
 0x53a   : > { %v14666_v7 = vpop.f32.mrf.mxu0  ;;  %v14705_v1 = vpop.f32.mrf.mxu1  ;;  %14999 = vmatprep.subr.bf16.mxu1 %v17624_v20  ;;  %v17696_v10 = vld [vmem:[%s19829_s7 + $0x1ba4] ss:$8 sps:$4 sm:$0xff]   ;;  %v17694_v20 = vld [vmem:[%s19829_s7 + $0x1ba0] ss:$8 sps:$4 sm:$0xff]   ;;  %v17700_v58 = vld [vmem:[%s19829_s7 + $0x1b90] ss:$8 sps:$4 sm:$0xff]  }
 0x53b   : > { %v20970_v29 = vadd.f32 %v14705_v1, %v14665_v26  ;;  %14959 = vmatpush1.bf16.msra.mxu0 %v17619_v36  ;;  %v17697_v36 = vld [vmem:[%s19829_s7 + $0x1a90] ss:$8 sps:$4 sm:$0xff]   ;;  %v17705_v24 = vld [vmem:[%s19829_s7 + $0x1a84] ss:$8 sps:$4 sm:$0xff]   ;;  %v17703_v26 = vld [vmem:[%s19829_s7 + $0x1a80] ss:$8 sps:$4 sm:$0xff]  }
 0x53c   : > { %v14667_v31 = vpop.f32.mrf.mxu0  ;;  %14960 = vmatprep.subr.bf16.mxu0 %v17627_v4  ;;  %v14707_v32 = vpop.f32.mrf.mxu1  ;;  %v17708_v4 = vld [vmem:[%s19829_s7 + $0x1b84] ss:$8 sps:$4 sm:$0xff]   ;;  %v17706_v1 = vld [vmem:[%s19829_s7 + $0x1b80] ss:$8 sps:$4 sm:$0xff]  }
 0x53d   : > { %15000 = vmatpush1.bf16.msra.mxu1 %v17622_v28  ;;  %v17713_v28 = vld [vmem:[%s19829_s7 + $0x1c74] ss:$8 sps:$4 sm:$0xff]   ;;  %v21029_v7 = vld [vmem:[%s21131_s0 + $0xe0] sm:$0xff]  ;;  %v21038_v31 = vld [vmem:[%s21131_s0 + $0xe8] sm:$0xff] }
 0x53e   : > { %15001 = vmatprep.subr.bf16.mxu1 %v17630_v63  ;;  %v14708_v16 = vpop.f32.mrf.mxu1  ;;  %v15307_v63 = vcombine.low %v20941_v51, %v20941_v51  ;;  %v15312_v32 = vcombine.high %v21029_v7, %v21029_v7  ;;  %v17725_v51 = vld [vmem:[%s19829_s7 + $0x1d70] ss:$8 sps:$4 sm:$0xff]  }
 0x53f   : > { %14961 = vmatpush1.bf16.msra.mxu0 %v17625_v30  ;;  %v17727_v30 = vld [vmem:[%s19829_s7 + $0x1d74] ss:$8 sps:$4 sm:$0xff]   ;;  %v15314_v16 = vcombine.high %v21038_v31, %v21038_v31 }
 0x540   : > { %14962 = vmatprep.subr.bf16.mxu0 %v17633_v57  ;;  %v17711_v57 = vld [vmem:[%s19829_s7 + $0x1c70] ss:$8 sps:$4 sm:$0xff]  }
 0x541   : > { %15002 = vmatpush1.bf16.msra.mxu1 %v17628_v5  ;;  %v15309_v5 = vcombine.low %v20950_v13, %v20950_v13 }
 0x542   : > { %15003 = vmatprep.subr.bf16.mxu1 %v17636_v34  ;;  %v17718_v34 = vld [vmem:[%s19829_s7 + $0x1c64] ss:$8 sps:$4 sm:$0xff]  }
 0x543   : > { %14963 = vmatpush1.bf16.msra.mxu0 %v17631_v9 }
 0x544   : > { %14964 = vmatprep.subr.bf16.mxu0 %v17639_v14  ;;  %v17733_v14 = vld [vmem:[%s19829_s7 + $0x1d64] ss:$8 sps:$4 sm:$0xff]  }
 0x545   : > { %15004 = vmatpush1.bf16.msra.mxu1 %v17634_v38 }
 0x546   : > { %15005 = vmatprep.subr.bf16.mxu1 %v17642_v55  ;;  %v17716_v55 = vld [vmem:[%s19829_s7 + $0x1c60] ss:$8 sps:$4 sm:$0xff]  }
 0x547   : > { %14965 = vmatpush1.bf16.msra.mxu0 %v17637_v43 }
 0x548   : > { %14966 = vmatprep.subr.bf16.mxu0 %v17645_v22  ;;  %v17721_v22 = vld [vmem:[%s19829_s7 + $0x1c54] ss:$8 sps:$4 sm:$0xff]  }
 0x549   : > { %15006 = vmatpush1.bf16.msra.mxu1 %v17640_v44 }
 0x54a   : > { %15007 = vmatprep.subr.bf16.mxu1 %v17648_v46 }
 0x54b   : > { %14967 = vmatpush1.bf16.msra.mxu0 %v17643_v19  ;;  %v17731_v19 = vld [vmem:[%s19829_s7 + $0x1d60] ss:$8 sps:$4 sm:$0xff]  }
 0x54c   : > { %14968 = vmatprep.subr.bf16.mxu0 %v17651_v48 }
 0x54d   : > { %15008 = vmatpush1.bf16.msra.mxu1 %v17646_v18  ;;  %v17739_v18 = vld [vmem:[%s19829_s7 + $0x1d54] ss:$8 sps:$4 sm:$0xff]  }
 0x54e   : > { %15009 = vmatprep.subr.bf16.mxu1 %v17654_v49 }
 0x54f   : > { %14969 = vmatpush1.bf16.msra.mxu0 %v17649_v50  ;;  %v17719_v50 = vld [vmem:[%s19829_s7 + $0x1c50] ss:$8 sps:$4 sm:$0xff]  }
 0x550   : > { %14970 = vmatprep.subr.bf16.mxu0 %v17657_v52 }
 0x551   : > { %15010 = vmatpush1.bf16.msra.mxu1 %v17652_v21 }
 0x552   : > { %15011 = vmatprep.subr.bf16.mxu1 %v17660_v23  ;;  %v17737_v23 = vld [vmem:[%s19829_s7 + $0x1d50] ss:$8 sps:$4 sm:$0xff]  }
 0x553   : > { %14971 = vmatpush1.bf16.msra.mxu0 %v17655_v54 }
 0x554   : > { %14972 = vmatprep.subr.bf16.mxu0 %v17663_v33  ;;  %v17745_v33 = vld [vmem:[%s19829_s7 + $0x1d44] ss:$8 sps:$4 sm:$0xff]  }
 0x555   : > { %15012 = vmatpush1.bf16.msra.mxu1 %v17658_v59  ;;  %v17722_v59 = vld [vmem:[%s19829_s7 + $0x1c40] ss:$8 sps:$4 sm:$0xff]  }
 0x556   : > { %15013 = vmatprep.subr.bf16.mxu1 %v17666_v25  ;;  %v17730_v25 = vld [vmem:[%s19829_s7 + $0x1c34] ss:$8 sps:$4 sm:$0xff]  }
 0x557   : > { %14973 = vmatpush2.bf16.msra.mxu0 %v17661_v62  ;;  %v17743_v62 = vld [vmem:[%s19829_s7 + $0x1d40] ss:$8 sps:$4 sm:$0xff]  }
 0x558   : > { %14974 = vmatprep.subr.bf16.mxu0 %v17669_v61  ;;  %v17751_v61 = vld [vmem:[%s19829_s7 + $0x1d34] ss:$8 sps:$4 sm:$0xff]  }
 0x559   : > { %15014 = vmatpush2.bf16.msra.mxu1 %v17664_v39  ;;  %v17728_v39 = vld [vmem:[%s19829_s7 + $0x1c30] ss:$8 sps:$4 sm:$0xff]  }
 0x55a   : > { %15015 = vmatprep.subr.bf16.mxu1 %v17672_v40  ;;  %v17736_v40 = vld [vmem:[%s19829_s7 + $0x1c24] ss:$8 sps:$4 sm:$0xff]  }
 0x55b   : > { %14975 = vmatpush2.bf16.msra.mxu0 %v17667_v2  ;;  %v17749_v2 = vld [vmem:[%s19829_s7 + $0x1d30] ss:$8 sps:$4 sm:$0xff]  }
 0x55c   : > { %14976 = vmatprep.subr.bf16.mxu0 %v17675_v3  ;;  %v17757_v3 = vld [vmem:[%s19829_s7 + $0x1d24] ss:$8 sps:$4 sm:$0xff]  }
 0x55d   : > { %15016 = vmatpush2.bf16.msra.mxu1 %v17670_v37  ;;  %v17734_v37 = vld [vmem:[%s19829_s7 + $0x1c20] ss:$8 sps:$4 sm:$0xff]  }
 0x55e   : > { %15017 = vmatprep.subr.bf16.mxu1 %v17678_v6  ;;  %v17742_v6 = vld [vmem:[%s19829_s7 + $0x1c14] ss:$8 sps:$4 sm:$0xff]  }
 0x55f   : > { %14977 = vmatpush2.bf16.msra.mxu0 %v17673_v35  ;;  %v17755_v35 = vld [vmem:[%s19829_s7 + $0x1d20] ss:$8 sps:$4 sm:$0xff]  }
 0x560   : > { %14978 = vmatprep.subr.bf16.mxu0 %v17681_v45  ;;  %v17763_v45 = vld [vmem:[%s19829_s7 + $0x1d14] ss:$8 sps:$4 sm:$0xff]  }
 0x561   : > { %15018 = vmatpush2.bf16.msra.mxu1 %v17676_v56  ;;  %v17740_v56 = vld [vmem:[%s19829_s7 + $0x1c10] ss:$8 sps:$4 sm:$0xff]  }
 0x562   : > { %15019 = vmatprep.subr.bf16.mxu1 %v17684_v8  ;;  %v17748_v8 = vld [vmem:[%s19829_s7 + $0x1c04] ss:$8 sps:$4 sm:$0xff]  }
 0x563   : > { %14979 = vmatpush2.bf16.msra.mxu0 %v17679_v42  ;;  %v17761_v42 = vld [vmem:[%s19829_s7 + $0x1d10] ss:$8 sps:$4 sm:$0xff]  }
 0x564   : > { %14980 = vmatprep.subr.bf16.mxu0 %v17687_v41  ;;  %v17769_v41 = vld [vmem:[%s19829_s7 + $0x1d04] ss:$8 sps:$4 sm:$0xff]  }
 0x565   : > { %15020 = vmatpush2.bf16.msra.mxu1 %v17682_v11  ;;  %v17746_v11 = vld [vmem:[%s19829_s7 + $0x1c00] ss:$8 sps:$4 sm:$0xff]  }
 0x566   : > { %15021 = vmatprep.subr.bf16.mxu1 %v17690_v53  ;;  %v17754_v53 = vld [vmem:[%s19829_s7 + $0x1cf4] ss:$8 sps:$4 sm:$0xff]  }
 0x567   : > { %14981 = vmatpush2.bf16.msra.mxu0 %v17685_v15  ;;  %v17767_v15 = vld [vmem:[%s19829_s7 + $0x1d00] ss:$8 sps:$4 sm:$0xff]  }
 0x568   : > { %14982 = vmatprep.subr.bf16.mxu0 %v17693_v47  ;;  %v17775_v47 = vld [vmem:[%s19829_s7 + $0x1db4] ss:$8 sps:$4 sm:$0xff]  }
 0x569   : > { %15022 = vmatpush2.bf16.msra.mxu1 %v17688_v17  ;;  %v17752_v17 = vld [vmem:[%s19829_s7 + $0x1cf0] ss:$8 sps:$4 sm:$0xff]  }
 0x56a   : > { %15023 = vmatprep.subr.bf16.mxu1 %v17696_v10  ;;  %v17760_v10 = vld [vmem:[%s19829_s7 + $0x1ce4] ss:$8 sps:$4 sm:$0xff]  }
 0x56b   : > { %14983 = vmatpush2.bf16.msra.mxu0 %v17691_v60  ;;  %v17773_v60 = vld [vmem:[%s19829_s7 + $0x1db0] ss:$8 sps:$4 sm:$0xff]  }
 0x56c   : > { %14984 = vmatprep.subr.bf16.mxu0 %v17699_v0  ;;  %v17781_v0 = vld [vmem:[%s19829_s7 + $0x1da4] ss:$8 sps:$4 sm:$0xff]  }
 0x56d   : > { %15024 = vmatpush2.bf16.msra.mxu1 %v17694_v20  ;;  %v17758_v20 = vld [vmem:[%s19829_s7 + $0x1ce0] ss:$8 sps:$4 sm:$0xff]  }
 0x56e   : > { %15025 = vmatprep.subr.bf16.mxu1 %v17702_v12  ;;  %v17766_v12 = vld [vmem:[%s19829_s7 + $0x1cd4] ss:$8 sps:$4 sm:$0xff]  }
 0x56f   : > { %14985 = vmatpush2.bf16.msra.mxu0 %v17697_v36  ;;  %v17779_v36 = vld [vmem:[%s19829_s7 + $0x1da0] ss:$8 sps:$4 sm:$0xff]  }
 0x570   : > { %14986 = vmatprep.subr.bf16.mxu0 %v17705_v24  ;;  %v17787_v24 = vld [vmem:[%s19829_s7 + $0x1d94] ss:$8 sps:$4 sm:$0xff]  }
 0x571   : > { %15026 = vmatpush2.bf16.msra.mxu1 %v17700_v58  ;;  %v17764_v58 = vld [vmem:[%s19829_s7 + $0x1cd0] ss:$8 sps:$4 sm:$0xff]  }
 0x572   : > { %15027 = vmatprep.subr.bf16.mxu1 %v17708_v4  ;;  %v17772_v4 = vld [vmem:[%s19829_s7 + $0x1cc4] ss:$8 sps:$4 sm:$0xff]  }
 0x573   : > { %14987 = vmatpush2.bf16.msra.mxu0 %v17703_v26  ;;  %v17785_v26 = vld [vmem:[%s19829_s7 + $0x1d90] ss:$8 sps:$4 sm:$0xff]  }
 0x574   : > { %15038 = vmatprep.subr.bf16.mxu0 %v17713_v28  ;;  %v17793_v28 = vld [vmem:[%s19829_s7 + $0x1d84] ss:$8 sps:$4 sm:$0xff]  }
 0x575   : > { %15028 = vmatpush2.bf16.msra.mxu1 %v17706_v1  ;;  %v17770_v1 = vld [vmem:[%s19829_s7 + $0x1cc0] ss:$8 sps:$4 sm:$0xff]  }
 0x576   : > { %v14744_v9 = vpop.f32.mrf.mxu0  ;;  %14989 = vmatmul.mubr.bf16.vlgmr.msra.gmra.mxu0 %v15307_v63  ;;  %15079 = vmatprep.subr.bf16.mxu1 %v17727_v30  ;;  %v17778_v63 = vld [vmem:[%s19829_s7 + $0x1cb4] ss:$8 sps:$4 sm:$0xff]   ;;  %v17791_v30 = vld [vmem:[%s19829_s7 + $0x1d80] ss:$8 sps:$4 sm:$0xff]  }
 0x577   : > { %v14745_v38 = vadd.f32 %v14744_v9, %v20966_v27  ;;  %15039 = vmatpush1.bf16.msra.mxu0 %v17711_v57  ;;  %15070 = vmatprep.mubr.bf16.mxu0 %v15312_v32  ;;  %v17776_v57 = vld [vmem:[%s19829_s7 + $0x1cb0] ss:$8 sps:$4 sm:$0xff]   ;;  %v17784_v32 = vld [vmem:[%s19829_s7 + $0x1ca4] ss:$8 sps:$4 sm:$0xff]  }
 0x578   : > { %v14746_v13 = vpop.f32.mrf.mxu0  ;;  %v14785_v43 = vpop.f32.mrf.mxu1  ;;  %15030 = vmatmul.mubr.bf16.vlgmr.msra.gmra.mxu1 %v15309_v5  ;;  %15040 = vmatprep.subr.bf16.mxu0 %v17718_v34  ;;  %v15313_v5 = vcombine.low %v21038_v31, %v21038_v31  ;;  %v17782_v34 = vld [vmem:[%s19829_s7 + $0x1ca0] ss:$8 sps:$4 sm:$0xff]   ;;  %v17797_v9 = vld [vmem:[%s19829_s7 + $0x1c84] ss:$8 sps:$4 sm:$0xff]  }
 0x579   : > { %v14747_v44 = vadd.f32 %v14746_v13, %v20970_v29  ;;  %v21054_v46 = vadd.f32 %v14785_v43, %v14745_v38  ;;  %15080 = vmatpush1.bf16.msra.mxu1 %v17725_v51  ;;  %16267 = vmatprep.mubr.msk.bf16.mxu1 %vm13886_vm0, %v15314_v16  ;;  %v17724_v29 = vld [vmem:[%s19829_s7 + $0x1c44] ss:$8 sps:$4 sm:$0xff]   ;;  %v17790_v51 = vld [vmem:[%s19829_s7 + $0x1c94] ss:$8 sps:$4 sm:$0xff]   ;;  %v17788_v16 = vld [vmem:[%s19829_s7 + $0x1c90] ss:$8 sps:$4 sm:$0xff]   ;;  %v15311_v38 = vcombine.low %v21029_v7, %v21029_v7 }
 0x57a   : > { %v14748_v27 = vpop.f32.mrf.mxu0  ;;  %v14787_v48 = vpop.f32.mrf.mxu1  ;;  %15081 = vmatprep.subr.bf16.mxu1 %v17733_v14  ;;  %v17795_v14 = vld [vmem:[%s19829_s7 + $0x1c80] ss:$8 sps:$4 sm:$0xff]   ;;  %s15254_s7 = sshll.u32 %s21142_s26, 3 }
 0x57b   : > { %v21058_v49 = vadd.f32 %v14787_v48, %v14747_v44  ;;  %15041 = vmatpush1.bf16.msra.mxu0 %v17716_v55  ;;  %s7920_s9 = scalar_lea.vmem %s21134_s3, %s15254_s7 }
 0x57c   : > { %v14749_v52 = vpop.f32.mrf.mxu0  ;;  %15042 = vmatprep.subr.bf16.mxu0 %v17721_v22  ;;  %v14789_v21 = vpop.f32.mrf.mxu1 }
 0x57d   : > { %15082 = vmatpush1.bf16.msra.mxu1 %v17731_v19 }
 0x57e   : > { %v14790_v54 = vpop.f32.mrf.mxu1  ;;  %15083 = vmatprep.subr.bf16.mxu1 %v17739_v18 }
 0x57f   : > { %15043 = vmatpush1.bf16.msra.mxu0 %v17719_v50 }
 0x580   : > { %15044 = vmatprep.subr.bf16.mxu0 %v17724_v29 }
 0x581   : > { %15084 = vmatpush1.bf16.msra.mxu1 %v17737_v23 }
 0x582   : > { %15085 = vmatprep.subr.bf16.mxu1 %v17745_v33 }
 0x583   : > { %15045 = vmatpush1.bf16.msra.mxu0 %v17722_v59 }
 0x584   : > { %15046 = vmatprep.subr.bf16.mxu0 %v17730_v25 }
 0x585   : > { %15086 = vmatpush1.bf16.msra.mxu1 %v17743_v62 }
 0x586   : > { %15087 = vmatprep.subr.bf16.mxu1 %v17751_v61 }
 0x587   : > { %15047 = vmatpush1.bf16.msra.mxu0 %v17728_v39 }
 0x588   : > { %15048 = vmatprep.subr.bf16.mxu0 %v17736_v40 }
 0x589   : > { %15088 = vmatpush1.bf16.msra.mxu1 %v17749_v2 }
 0x58a   : > { %15089 = vmatprep.subr.bf16.mxu1 %v17757_v3 }
 0x58b   : > { %15049 = vmatpush1.bf16.msra.mxu0 %v17734_v37 }
 0x58c   : > { %15050 = vmatprep.subr.bf16.mxu0 %v17742_v6 }
 0x58d   : > { %15090 = vmatpush1.bf16.msra.mxu1 %v17755_v35 }
 0x58e   : > { %15091 = vmatprep.subr.bf16.mxu1 %v17763_v45 }
 0x58f   : > { %15051 = vmatpush1.bf16.msra.mxu0 %v17740_v56 }
 0x590   : > { %15052 = vmatprep.subr.bf16.mxu0 %v17748_v8 }
 0x591   : > { %15092 = vmatpush1.bf16.msra.mxu1 %v17761_v42 }
 0x592   : > { %15093 = vmatprep.subr.bf16.mxu1 %v17769_v41 }
 0x593   : > { %15053 = vmatpush1.bf16.msra.mxu0 %v17746_v11 }
 0x594   : > { %15054 = vmatprep.subr.bf16.mxu0 %v17754_v53 }
 0x595   : > { %15094 = vmatpush1.bf16.msra.mxu1 %v17767_v15 }
 0x596   : > { %15103 = vmatprep.subr.bf16.mxu1 %v17775_v47 }
 0x597   : > { %15055 = vmatpush2.bf16.msra.mxu0 %v17752_v17 }
 0x598   : > { %15056 = vmatprep.subr.bf16.mxu0 %v17760_v10 }
 0x599   : > { %15104 = vmatpush2.bf16.msra.mxu1 %v17773_v60 }
 0x59a   : > { %15105 = vmatprep.subr.bf16.mxu1 %v17781_v0 }
 0x59b   : > { %15057 = vmatpush2.bf16.msra.mxu0 %v17758_v20 }
 0x59c   : > { %15058 = vmatprep.subr.bf16.mxu0 %v17766_v12 }
 0x59d   : > { %15106 = vmatpush2.bf16.msra.mxu1 %v17779_v36 }
 0x59e   : > { %15107 = vmatprep.subr.bf16.mxu1 %v17787_v24 }
 0x59f   : > { %15059 = vmatpush2.bf16.msra.mxu0 %v17764_v58 }
 0x5a0   : > { %15060 = vmatprep.subr.bf16.mxu0 %v17772_v4 }
 0x5a1   : > { %15108 = vmatpush2.bf16.msra.mxu1 %v17785_v26 }
 0x5a2   : > { %15109 = vmatprep.subr.bf16.mxu1 %v17793_v28 }
 0x5a3   : > { %15061 = vmatpush2.bf16.msra.mxu0 %v17770_v1 }
 0x5a4   : > { %15062 = vmatprep.subr.bf16.mxu0 %v17778_v63 }
 0x5a5   : > { %15110 = vmatpush2.bf16.msra.mxu1 %v17791_v30 }
 0x5a7   : > { %15063 = vmatpush2.bf16.msra.mxu0 %v17776_v57 }
 0x5a8   : > { %15064 = vmatprep.subr.bf16.mxu0 %v17784_v32  ;;  %15112 = vmatmul.mubr.bf16.vlgmr.msra.gmra.mxu1 %v15313_v5 }
 0x5ab   : > { %15065 = vmatpush2.bf16.msra.mxu0 %v17782_v34 }
 0x5ac   : > { %15066 = vmatprep.subr.bf16.mxu0 %v17790_v51 }
 0x5af   : > { %15067 = vmatpush2.bf16.msra.mxu0 %v17788_v16 }
 0x5b0   : > { %15068 = vmatprep.subr.bf16.mxu0 %v17797_v9 }
 0x5b3   : > { %15069 = vmatpush2.bf16.msra.mxu0 %v17795_v14 }
 0x5b6   : > { %v14826_v55 = vpop.f32.mrf.mxu0  ;;  %15071 = vmatmul.mubr.bf16.vlgmr.msra.gmra.mxu0 %v15311_v38 }
 0x5b7   : > { %v14827_v31 = vadd.f32 %v14826_v55, %v21054_v46 }
 0x5b8   : > { %v14828_v13 = vpop.f32.mrf.mxu0  ;;  %v14867_v43 = vpop.f32.mrf.mxu1 }
 0x5b9   : > { %v14829_v22 = vadd.f32 %v14828_v13, %v21058_v49  ;;  %v14868_v44 = vadd.f32 %v14867_v43, %v14827_v31 }
 0x5ba   : > { %v14830_v19 = vpop.f32.mrf.mxu0  ;;  %v14869_v27 = vpop.f32.mrf.mxu1 }
 0x5bb   : > { %v14870_v48 = vadd.f32 %v14869_v27, %v14829_v22 }
 0x5bc   : > { %v14831_v18 = vpop.f32.mrf.mxu0  ;;  %v14871_v50 = vpop.f32.mrf.mxu1 }
 0x5be   : > { %v14872_v52 = vpop.f32.mrf.mxu1 }
 0x5f6   : > { %v14908_v29 = vpop.f32.mrf.mxu0 }
 0x5f7   : > { %v14909_v21 = vadd.f32 %v14908_v29, %v14868_v44 }
 0x5f8   : > { %v14910_v23 = vpop.f32.mrf.mxu0  ;;  %v14949_v7 = vpop.f32.mrf.mxu1 }
 0x5f9   : > { %v14911_v54 = vadd.f32 %v14910_v23, %v14870_v48  ;;  %v14950_v33 = vadd.f32 %v14949_v7, %v14909_v21 }
 0x5fa   : > { %v14912_v59 = vpop.f32.mrf.mxu0  ;;  %v14951_v25 = vpop.f32.mrf.mxu1 }
 0x5fb   : > { %v14952_v46 = vadd.f32 %v14951_v25, %v14911_v54 }
 0x5fc   : > { %v14913_v62 = vpop.f32.mrf.mxu0  ;;  %v14953_v61 = vpop.f32.mrf.mxu1 }
 0x5fe   : > { %v14954_v39 = vpop.f32.mrf.mxu1 }
 0x636   : > { %v14990_v49 = vpop.f32.mrf.mxu0 }
 0x637   : > { %v14991_v11 = vadd.f32 %v14990_v49, %v14950_v33 }
 0x638   : > { %v14992_v40 = vpop.f32.mrf.mxu0  ;;  %v15031_v2 = vpop.f32.mrf.mxu1 }
 0x639   : > { %v14993_v53 = vadd.f32 %v14992_v40, %v14952_v46  ;;  %v15032_v15 = vadd.f32 %v15031_v2, %v14991_v11 }
 0x63a   : > { %v14994_v3 = vpop.f32.mrf.mxu0  ;;  %v15033_v37 = vpop.f32.mrf.mxu1 }
 0x63b   : > { %v15034_v17 = vadd.f32 %v15033_v37, %v14993_v53 }
 0x63c   : > { %v14995_v6 = vpop.f32.mrf.mxu0  ;;  %v15035_v35 = vpop.f32.mrf.mxu1 }
 0x63e   : > { %v15036_v45 = vpop.f32.mrf.mxu1 }
 0x668   : > { %v15113_v56 = vpop.f32.mrf.mxu1 }
 0x66a   : > { %v15115_v8 = vpop.f32.mrf.mxu1 }
 0x66c   : > { %v15117_v42 = vpop.f32.mrf.mxu1 }
 0x66e   : > { %v15118_v41 = vpop.f32.mrf.mxu1 }
 0x676   : > { %v15072_v47 = vpop.f32.mrf.mxu0 }
 0x677   : > { %v15073_v10 = vadd.f32 %v15072_v47, %v15032_v15 }
 0x678   : > { %v15074_v60 = vpop.f32.mrf.mxu0 }
 0x679   : > { %v15114_v0 = vadd.f32 %v15113_v56, %v15073_v10  ;;  %v15075_v20 = vadd.f32 %v15074_v60, %v15034_v17 }
 0x67a   : > { %v15076_v12 = vpop.f32.mrf.mxu0 }
 0x67b   : > { %v15120_v36 = vmax.f32 %v15114_v0, 0.0  ;;  %v15116_v24 = vadd.f32 %v15115_v8, %v15075_v20 }
 0x67c   : > { %v15077_v58 = vpop.f32.mrf.mxu0 }
 0x67d   : > { %15122 = vst [vmem:[%s7920_s9] sm:$0xff] %v15120_v36  ;;  %v15121_v4 = vmax.f32 %v15116_v24, 0.0 }
 0x67f   : > { %15123 = vst [vmem:[%s7920_s9 + $0x8] sm:$0xff] %v15121_v4 }
 0x680 PF: > { %s13_s16 = sadd.s32 1, %s17839_s16   ;;  %s21135_s12 = smov %s17827_s13 }
 0x681   : > { %p10_p10 = scmp.ge.s32.totalorder %s13_s16, 4   ;;  %s21136_s13 = smov %s17896_s20 }
 0x682   : > { %s21137_s14 = smov %s17835_s15  ;;  %s21138_s15 = smov %s21140_s17 }
 0x683   :  { %12 = sbr.rel (!%p10_p10) target bundleno = 3 (0x3), region = 131 }

</bundles_post_ra>
